<compile_context>
chip_gen: v6e
topology: v6e:2x2x1
jax: 0.10.0
libtpu: 0.0.40
codegen_flags: <defaults>
</compile_context>

<pallas_src>
import jax
import jax.numpy as jnp
from jax.experimental import pallas as pl
from jax.experimental.pallas import tpu as pltpu

_H = 50        # hidden width
_D_IN = 2      # input features
_D_OUT = 2     # output features
_STRIP = 256   # lanes (batch rows) per in-kernel strip

# Row offsets inside the packed parameter slab (section starts 8-aligned).
_ROW_W2 = 0      # w2  (50, 50)  PyTorch (out, in), cols 0:50
_ROW_W3 = 56     # w3  (50, 50)  PyTorch (out, in), cols 0:50
_ROW_MISC = 112  # 50 rows: cols 0:2 = w1 (50, 2); col 2 = b1; col 3 = b2;
                 #          col 4 = b3; rows 0:2 col 5 = b4
_ROW_W4 = 168    # w4  (2, 50)   PyTorch (out, in), cols 0:50
_SLAB_ROWS, _SLAB_COLS = 176, 64


def mlp_kernel(xt_ref, p_ref, o_ref):
    """Feature-major 2->50->50->50->2 forward for one (2, tile_n) tile."""
    # Parameters: loaded once per tile, resident across strips.
    w2 = p_ref[_ROW_W2:_ROW_W2 + _H, 0:_H]                # (50, 50) (out, in)
    w3 = p_ref[_ROW_W3:_ROW_W3 + _H, 0:_H]                # (50, 50) (out, in)
    w4 = p_ref[_ROW_W4:_ROW_W4 + _D_OUT, 0:_H]            # (2, 50)  (out, in)
    w1c0 = p_ref[_ROW_MISC:_ROW_MISC + _H, 0:1]           # (50, 1) = w1[:, 0]
    w1c1 = p_ref[_ROW_MISC:_ROW_MISC + _H, 1:2]           # (50, 1) = w1[:, 1]
    b1 = p_ref[_ROW_MISC:_ROW_MISC + _H, 2:3]             # (50, 1)
    b2 = p_ref[_ROW_MISC:_ROW_MISC + _H, 3:4]             # (50, 1)
    b3 = p_ref[_ROW_MISC:_ROW_MISC + _H, 4:5]             # (50, 1)
    b4 = p_ref[_ROW_MISC:_ROW_MISC + _D_OUT, 5:6]         # (2, 1)

    tile_n = xt_ref.shape[1]
    num_strips = tile_n // _STRIP                          # static (<= 8)

    # Statically-unrolled strip loop: static lane slices only, each strip's
    # (50, _STRIP) activations (~14 vregs) chain through registers.
    for s in range(num_strips):
        c = s * _STRIP
        xt = xt_ref[:, c:c + _STRIP]                       # (2, strip)
        # Layer 1: K=2 -> two broadcast FMAs on the VPU (no MXU, no x bcast).
        a = jnp.sin(w1c0 * xt[0:1, :] + w1c1 * xt[1:2, :] + b1)   # (50, strip)
        # Layers 2, 3: (50,50) @ (50,strip) MXU matmuls, f32 accumulation.
        a = jnp.sin(jnp.dot(w2, a, preferred_element_type=jnp.float32) + b2)
        a = jnp.sin(jnp.dot(w3, a, preferred_element_type=jnp.float32) + b3)
        # Layer 4: (2,50) @ (50,strip) -> lane-dense (2, strip) output.
        out = jnp.dot(w4, a, preferred_element_type=jnp.float32) + b4
        o_ref[:, c:c + _STRIP] = out.astype(o_ref.dtype)


def pack_params(params):
    """Pack the 4 (weight, bias) pairs (PyTorch (out, in) convention) into one slab.

    Call this ONCE per parameter update and pass the slab to mlp_forward; it
    is deliberately outside the forward so it is not rebuilt every call.
    """
    w1 = jnp.asarray(params["w1"], jnp.float32)   # (50, 2)
    w2 = jnp.asarray(params["w2"], jnp.float32)   # (50, 50)
    w3 = jnp.asarray(params["w3"], jnp.float32)   # (50, 50)
    w4 = jnp.asarray(params["w4"], jnp.float32)   # (2, 50)
    b1 = jnp.asarray(params["b1"], jnp.float32).reshape(-1)
    b2 = jnp.asarray(params["b2"], jnp.float32).reshape(-1)
    b3 = jnp.asarray(params["b3"], jnp.float32).reshape(-1)
    b4 = jnp.asarray(params["b4"], jnp.float32).reshape(-1)

    slab = jnp.zeros((_SLAB_ROWS, _SLAB_COLS), jnp.float32)
    slab = slab.at[_ROW_W2:_ROW_W2 + _H, :_H].set(w2)               # (50, 50)
    slab = slab.at[_ROW_W3:_ROW_W3 + _H, :_H].set(w3)               # (50, 50)
    slab = slab.at[_ROW_W4:_ROW_W4 + _D_OUT, :_H].set(w4)           # (2, 50)
    slab = slab.at[_ROW_MISC:_ROW_MISC + _H, 0:_D_IN].set(w1)       # (50, 2)
    slab = slab.at[_ROW_MISC:_ROW_MISC + _H, 2].set(b1)
    slab = slab.at[_ROW_MISC:_ROW_MISC + _H, 3].set(b2)
    slab = slab.at[_ROW_MISC:_ROW_MISC + _H, 4].set(b3)
    slab = slab.at[_ROW_MISC:_ROW_MISC + _D_OUT, 5].set(b4)
    return slab


def mlp_forward(x, slab, *, target_tile=2048, min_steps=2):
    """x: (N, 2) float32, slab: pack_params(...) -> (N, 2) float32."""
    N, d_in = x.shape
    assert d_in == _D_IN

    # Grid/tile sizing:
    #   * >= min_steps grid steps so both v7x TensorCores get work,
    #   * but never more steps than 256-row strips (no all-padding steps),
    #   * tile_n sized to the batch (rounded to the strip size) so ragged N
    #     pads at most one strip per step instead of a whole 2048-row tile.
    grid_steps = max(min_steps, pl.cdiv(N, target_tile))
    grid_steps = min(grid_steps, max(1, pl.cdiv(N, _STRIP)))
    tile_n = pl.cdiv(pl.cdiv(N, grid_steps), _STRIP) * _STRIP
    n_pad = grid_steps * tile_n

    xt = jnp.transpose(x)                                  # (2, N) feature-major
    if n_pad != N:
        xt = jnp.pad(xt, ((0, 0), (0, n_pad - N)))

    out_t = pl.pallas_call(
        mlp_kernel,
        out_shape=jax.ShapeDtypeStruct((_D_OUT, n_pad), jnp.float32),
        grid_spec=pl.GridSpec(
            grid=(grid_steps,),
            in_specs=[
                pl.BlockSpec((_D_IN, tile_n), lambda i: (0, i)),
                pl.BlockSpec((_SLAB_ROWS, _SLAB_COLS), lambda i: (0, 0)),
            ],
            out_specs=pl.BlockSpec((_D_OUT, tile_n), lambda i: (0, i)),
        ),
        compiler_params=pltpu.CompilerParams(
            dimension_semantics=("parallel",)),
    )(xt, slab)

    # Lane-dense (2, n_pad) inside the kernel; back to the module's (N, 2).
    # (If the caller can consume feature-major output, return out_t[:, :N].)
    return out_t[:, :N].T


def reference_forward(x, params):
    a = x
    a = jnp.sin(a @ params["w1"].T + params["b1"])
    a = jnp.sin(a @ params["w2"].T + params["b2"])
    a = jnp.sin(a @ params["w3"].T + params["b3"])
    return a @ params["w4"].T + params["b4"]


if __name__ == "__main__":
    key = jax.random.PRNGKey(0)
    ks = jax.random.split(key, 10)
    layers = [2, 50, 50, 50, 2]
    # Deterministic synthetic parameters, PyTorch nn.Linear convention (out, in).
    params = {
        "w1": 0.3 * jax.random.normal(ks[0], (layers[1], layers[0]), jnp.float32),
        "w2": 0.3 * jax.random.normal(ks[1], (layers[2], layers[1]), jnp.float32),
        "w3": 0.3 * jax.random.normal(ks[2], (layers[3], layers[2]), jnp.float32),
        "w4": 0.3 * jax.random.normal(ks[3], (layers[4], layers[3]), jnp.float32),
        "b1": 0.1 * jax.random.normal(ks[4], (layers[1],), jnp.float32),
        "b2": 0.1 * jax.random.normal(ks[5], (layers[2],), jnp.float32),
        "b3": 0.1 * jax.random.normal(ks[6], (layers[3],), jnp.float32),
        "b4": 0.1 * jax.random.normal(ks[7], (layers[4],), jnp.float32),
    }

    # Pack parameters ONCE (hoisted out of the forward, per perf review).
    slab = pack_params(params)

    # Batches of collocation (x, t) points: one strip-aligned, one ragged size
    # (exercises the pad-and-slice path).
    x_a = jax.random.normal(ks[8], (256, 2), jnp.float32)
    x_b = jax.random.normal(ks[9], (193, 2), jnp.float32)

    out_a = jax.block_until_ready(mlp_forward(x_a, slab))
    out_b = jax.block_until_ready(mlp_forward(x_b, slab))
    ref_a = reference_forward(x_a, params)
    ref_b = reference_forward(x_b, params)

    assert out_a.shape == (256, 2) and out_a.dtype == jnp.float32
    assert out_b.shape == (193, 2) and out_b.dtype == jnp.float32
    assert jnp.allclose(out_a, ref_a, atol=1e-4, rtol=1e-4)
    assert jnp.allclose(out_b, ref_b, atol=1e-4, rtol=1e-4)
    print("KERNEL_OK")
</pallas_src>

<mosaic_0001>
module attributes {stable_mosaic.version = 11 : i64} {
  func.func @mlp_kernel(%arg0: i32, %arg1: memref<2x256xf32, #tpu.memory_space<vmem>>, %arg2: memref<176x64xf32, #tpu.memory_space<vmem>>, %arg3: memref<2x256xf32, #tpu.memory_space<vmem>>) attributes {dimension_semantics = [#tpu.dimension_semantics<parallel>], iteration_bounds = array<i64: 1>, scalar_prefetch = 0 : i64, scratch_operands = 0 : i64, tpu.core_type = #tpu.core_type<tc>, window_params = [{transform_indices = @transform_0, window_bounds = array<i64: 2, 256>}, {pipeline_mode = #tpu.pipeline_mode<synchronous>, transform_indices = @transform_1, window_bounds = array<i64: 176, 64>}, {transform_indices = @transform_2, window_bounds = array<i64: 2, 256>}]} {
    %c0 = arith.constant 0 : index
    %c0_0 = arith.constant 0 : index
    %0 = vector.load %arg2[%c0, %c0_0] : memref<176x64xf32, #tpu.memory_space<vmem>>, vector<50x50xf32>
    %c56 = arith.constant 56 : index
    %c0_1 = arith.constant 0 : index
    %1 = vector.load %arg2[%c56, %c0_1] : memref<176x64xf32, #tpu.memory_space<vmem>>, vector<50x50xf32>
    %c168 = arith.constant 168 : index
    %c0_2 = arith.constant 0 : index
    %2 = vector.load %arg2[%c168, %c0_2] : memref<176x64xf32, #tpu.memory_space<vmem>>, vector<2x50xf32>
    %c112 = arith.constant 112 : index
    %c0_3 = arith.constant 0 : index
    %3 = vector.load %arg2[%c112, %c0_3] : memref<176x64xf32, #tpu.memory_space<vmem>>, vector<50x1xf32>
    %c112_4 = arith.constant 112 : index
    %c1 = arith.constant 1 : index
    %4 = vector.load %arg2[%c112_4, %c1] : memref<176x64xf32, #tpu.memory_space<vmem>>, vector<50x1xf32>
    %c112_5 = arith.constant 112 : index
    %c2 = arith.constant 2 : index
    %5 = vector.load %arg2[%c112_5, %c2] : memref<176x64xf32, #tpu.memory_space<vmem>>, vector<50x1xf32>
    %c112_6 = arith.constant 112 : index
    %c3 = arith.constant 3 : index
    %6 = vector.load %arg2[%c112_6, %c3] : memref<176x64xf32, #tpu.memory_space<vmem>>, vector<50x1xf32>
    %c112_7 = arith.constant 112 : index
    %c4 = arith.constant 4 : index
    %7 = vector.load %arg2[%c112_7, %c4] : memref<176x64xf32, #tpu.memory_space<vmem>>, vector<50x1xf32>
    %c112_8 = arith.constant 112 : index
    %c5 = arith.constant 5 : index
    %8 = vector.load %arg2[%c112_8, %c5] : memref<176x64xf32, #tpu.memory_space<vmem>>, vector<2x1xf32>
    %c0_9 = arith.constant 0 : index
    %c0_10 = arith.constant 0 : index
    %9 = vector.load %arg1[%c0_9, %c0_10] : memref<2x256xf32, #tpu.memory_space<vmem>>, vector<2x256xf32>
    %10 = vector.extract_strided_slice %9 {offsets = [0, 0], sizes = [1, 256], strides = [1, 1]} : vector<2x256xf32> to vector<1x256xf32>
    %11 = vector.broadcast %3 : vector<50x1xf32> to vector<50x256xf32>
    %12 = vector.broadcast %10 : vector<1x256xf32> to vector<50x256xf32>
    %13 = arith.mulf %11, %12 : vector<50x256xf32>
    %14 = vector.extract_strided_slice %9 {offsets = [1, 0], sizes = [1, 256], strides = [1, 1]} : vector<2x256xf32> to vector<1x256xf32>
    %15 = vector.broadcast %4 : vector<50x1xf32> to vector<50x256xf32>
    %16 = vector.broadcast %14 : vector<1x256xf32> to vector<50x256xf32>
    %17 = arith.mulf %15, %16 : vector<50x256xf32>
    %18 = arith.addf %13, %17 : vector<50x256xf32>
    %19 = vector.broadcast %5 : vector<50x1xf32> to vector<50x256xf32>
    %20 = arith.addf %18, %19 : vector<50x256xf32>
    %21 = math.sin %20 : vector<50x256xf32>
    %cst = arith.constant dense<0.000000e+00> : vector<50x256xf32>
    %22 = tpu.matmul %0, %21, %cst {dimension_numbers = #tpu.dot_dimension_numbers<[1], [0], [0], [1], [0, 0, 1, 1], [], []>} : vector<50x50xf32>, vector<50x256xf32>, vector<50x256xf32> -> vector<50x256xf32>
    %23 = vector.broadcast %6 : vector<50x1xf32> to vector<50x256xf32>
    %24 = arith.addf %22, %23 : vector<50x256xf32>
    %25 = math.sin %24 : vector<50x256xf32>
    %cst_11 = arith.constant dense<0.000000e+00> : vector<50x256xf32>
    %26 = tpu.matmul %1, %25, %cst_11 {dimension_numbers = #tpu.dot_dimension_numbers<[1], [0], [0], [1], [0, 0, 1, 1], [], []>} : vector<50x50xf32>, vector<50x256xf32>, vector<50x256xf32> -> vector<50x256xf32>
    %27 = vector.broadcast %7 : vector<50x1xf32> to vector<50x256xf32>
    %28 = arith.addf %26, %27 : vector<50x256xf32>
    %29 = math.sin %28 : vector<50x256xf32>
    %cst_12 = arith.constant dense<0.000000e+00> : vector<2x256xf32>
    %30 = tpu.matmul %2, %29, %cst_12 {dimension_numbers = #tpu.dot_dimension_numbers<[1], [0], [0], [1], [0, 0, 1, 1], [], []>} : vector<2x50xf32>, vector<50x256xf32>, vector<2x256xf32> -> vector<2x256xf32>
    %31 = vector.broadcast %8 : vector<2x1xf32> to vector<2x256xf32>
    %32 = arith.addf %30, %31 : vector<2x256xf32>
    %c0_13 = arith.constant 0 : index
    %c0_14 = arith.constant 0 : index
    %33 = vector.load %arg3[%c0_13, %c0_14] : memref<2x256xf32, #tpu.memory_space<vmem>>, vector<2x256xf32>
    tpu.vector_store %arg3[%c0_13, %c0_14], %32 {strides = array<i32>} : memref<2x256xf32, #tpu.memory_space<vmem>>, vector<2x256xf32>,
    return
  }
  func.func @transform_0(%arg0: i32) -> (i32, i32) {
    %c0_i32 = arith.constant 0 : i32
    %c0_i32_0 = arith.constant 0 : i32
    return %c0_i32, %arg0 : i32, i32
  }
  func.func @transform_1(%arg0: i32) -> (i32, i32) {
    %c0_i32 = arith.constant 0 : i32
    %c0_i32_0 = arith.constant 0 : i32
    %c0_i32_1 = arith.constant 0 : i32
    return %c0_i32, %c0_i32_0 : i32, i32
  }
  func.func @transform_2(%arg0: i32) -> (i32, i32) {
    %c0_i32 = arith.constant 0 : i32
    %c0_i32_0 = arith.constant 0 : i32
    return %c0_i32, %arg0 : i32, i32
  }
}

</mosaic_0001>

<bundles_post_ra>
// kernel: tpu_custom_call.1
= control target key start
LH: loop header
LB: loop body
LE: loop exit
PB: predicated region body
PF: predicated region fallthrough
CT: control target
= control target key end

     0   :  { %v5621_v2 = vmov 0   ;;  %s9934_s0 = inlined_call_operand.vmem [shape: f32[2,256], index: 0, kind: input, shape index: {}]   ;;  %s9935_s1 = inlined_call_operand.vmem [shape: f32[176,64], index: 1, kind: input, shape index: {}]   ;;  %s9936_s2 = inlined_call_operand.hbm [shape: f32[2,256], index: 2, kind: output, shape index: {}]  }
   0x1   :  { %v33_v0 = vld [vmem:[%s9935_s1 + $0xa0] sm:$0x3]  ;;  %v32_v1 = vld [vmem:[%s9935_s1 + $0x98] sm:$0xff]  ;;  %5398 = vset.pattern.permute.xlu1 %v5621_v2  ;;  %5397 = vset.pattern.permute.xlu0 %v5621_v2 }
   0x2   :  { %68 = vperm.xlu0 %5397, %v33_v0   ;;  %63 = vperm.xlu1 %5398, %v32_v1  }
   0x3   :  { %7 = vsyncpa [#allocation3], 0  ;;  %v30_v3 = vld [vmem:[%s9935_s1 + $0x88] sm:$0xff]  ;;  %v5622_v4 = vmov 1   ;;  %v29_v5 = vld [vmem:[%s9935_s1 + $0x80] sm:$0xff]  ;;  %v5623_v7 = vmov 2   ;;  %v72_v10 = vlaneseq }
   0x4   :  { %v31_v6 = vld [vmem:[%s9935_s1 + $0x90] sm:$0xff]  ;;  %v28_v9 = vld [vmem:[%s9935_s1 + $0x78] sm:$0xff]  ;;  %v35_v14 = vld [vmem:[%s9934_s0] sm:$0xf]  ;;  %s5634_s26 = smov [#allocation2]  }
   0x5   :  { %v27_v8 = vld [vmem:[%s9935_s1 + $0x70] sm:$0xff]  ;;  %v73_v11 = vshrl.u32 %v72_v10, 7  ;;  %s5017_s27 = sshll.u32 %s5634_s26, 4  ;;  %s5018_s27 = int_to_ptr.vmem [resolvable:$true] %s5017_s27 }
   0x6   :  { %5399 = vset.pattern.permute.xlu1 %v5622_v4  ;;  %53 = vperm.xlu0 %5397, %v30_v3   ;;  %s5599_s28 = scalar_lea.vmem %s5018_s27, 64  ;;  %p5604_p1 = scmp.lt.s32.totalorder %s5018_s27, %s5018_s27 }
   0x7   :  { %125 = vperm.xlu1 %5399, %v32_v1   ;;  %v74_v12 = vsub.s32 0, %v73_v11  ;;  %v78_v13 = vsub.s32 2, %v73_v11  ;;  %v134_v29 = vsub.s32 1, %v73_v11  ;;  %v138_v30 = vsub.s32 3, %v73_v11  ;;  %p5600_p0 = scmp.ne.s32.totalorder %s5018_s27, %s5599_s28  ;;  %p5605_p2 = scmp.lt.s32.totalorder %s5599_s28, %s5599_s28 }
   0x9   :  { %v75_v15 = vrot.slane %v35_v14, %v74_v12  ;;  %v79_v16 = vrot.slane %v35_v14, %v78_v13  ;;  %v135_v34 = vrot.slane %v35_v14, %v134_v29  ;;  %v139_v35 = vrot.slane %v35_v14, %v138_v30  ;;  %p5606_p3 = por %p5605_p2, %p5604_p1 }
   0xa   :  { %48 = vperm.xlu0 %5397, %v29_v5  }
   0xb   :  { %5400 = vset.pattern.permute.xlu1 %v5621_v2  ;;  %v5674_v19 = vrot.slane %v75_v15, %v74_v12  ;;  %v5676_v20 = vrot.slane %v79_v16, %v74_v12  ;;  %v5688_v38 = vrot.slane %v135_v34, %v134_v29  ;;  %v5690_v39 = vrot.slane %v139_v35, %v134_v29  ;;  %p5607_p4 = pnand %p5606_p3, %p5600_p0 }
   0xc   :  { %58 = vperm.xlu1 %5400, %v31_v6  }
   0xe   :  { %5405 = vset.pattern.permute.xlu0 %v5623_v7 }
   0xf   :  { %195 = vperm.xlu0 %5405, %v31_v6  }
  0x10   :  { %5401 = vset.pattern.permute.xlu1 %v5623_v7 }
  0x11   :  { %203 = vperm.xlu1 %5401, %v33_v0  }
  0x13   :  { %191 = vperm.xlu0 %5405, %v30_v3  }
  0x15   :  { %5402 = vset.pattern.permute.xlu1 %v5622_v4 }
  0x16   :  { %117 = vperm.xlu1 %5402, %v30_v3  }
  0x17   :  { %5408 = vset.pattern.permute.xlu0 %v5622_v4 }
  0x18   :  { %129 = vperm.xlu0 %5408, %v33_v0  }
  0x1a   :  { %5403 = vset.pattern.permute.xlu1 %v5623_v7 }
  0x1b   :  { %199 = vperm.xlu1 %5403, %v32_v1  }
  0x1c   :  { %121 = vperm.xlu0 %5408, %v31_v6  }
  0x1f   :  { %5404 = vset.pattern.permute.xlu1 %v5622_v4 }
  0x20   :  { %113 = vperm.xlu1 %5404, %v29_v5   ;;  %105 = vperm.xlu0 %5408, %v27_v8  }
  0x24   :  { %5406 = vset.pattern.permute.xlu1 %v5621_v2  ;;  %5411 = vset.pattern.permute.xlu0 %v5623_v7 }
  0x25   :  { %43 = vperm.xlu1 %5406, %v28_v9   ;;  %179 = vperm.xlu0 %5411, %v27_v8  }
  0x29   :  { %5407 = vset.pattern.permute.xlu1 %v5622_v4 }
  0x2a   :  { %109 = vperm.xlu1 %5407, %v28_v9  }
  0x2e   :  { %5409 = vset.pattern.permute.xlu1 %v5621_v2 }
  0x2f   :  { %38 = vperm.xlu1 %5409, %v27_v8  }
  0x33   :  { %5410 = vset.pattern.permute.xlu1 %v5623_v7 }
  0x34   :  { %187 = vperm.xlu1 %5410, %v29_v5  }
  0x38   :  { %183 = vperm.xlu1 %5410, %v28_v9  }
  0x7d   :  { %v64_v17 = vpop.permute.xlu1 %63  ;;  %v69_v18 = vpop.permute.xlu0 %68 }
  0x7e   :  { %v100_v54 = vmul.f32 %v5674_v19, %v64_v17  ;;  %v101_v57 = vmul.f32 %v5676_v20, %v64_v17  ;;  %v102_v58 = vmul.f32 %v5674_v19, %v69_v18  ;;  %v103_v59 = vmul.f32 %v5676_v20, %v69_v18 }
  0x81   :  { %v54_v21 = vpop.permute.xlu0 %53 }
  0x82   :  { %v126_v22 = vpop.permute.xlu1 %125  ;;  %v96_v23 = vmul.f32 %v5674_v19, %v54_v21  ;;  %v97_v24 = vmul.f32 %v5676_v20, %v54_v21 }
  0x83   :  { %v160_v49 = vmul.f32 %v5688_v38, %v126_v22  ;;  %v161_v51 = vmul.f32 %v5690_v39, %v126_v22 }
  0x85   :  { %v49_v25 = vpop.permute.xlu0 %48  ;;  %v174_v60 = vadd.f32 %v160_v49, %v100_v54  ;;  %v175_v2 = vadd.f32 %v161_v51, %v101_v57 }
  0x86   :  { %v5681_v26 = vmul.f32 %v5674_v19, %v49_v25  ;;  %v5684_v27 = vmul.f32 %v5676_v20, %v49_v25 }
  0x87   :  { %v59_v28 = vpop.permute.xlu1 %58 }
  0x88   :  { %v98_v31 = vmul.f32 %v5674_v19, %v59_v28  ;;  %v99_v32 = vmul.f32 %v5676_v20, %v59_v28 }
  0x8a   :  { %v196_v33 = vpop.permute.xlu0 %195 }
  0x8c   :  { %v204_v36 = vpop.permute.xlu1 %203 }
  0x8e   :  { %v192_v37 = vpop.permute.xlu0 %191 }
  0x91   :  { %v118_v40 = vpop.permute.xlu1 %117 }
  0x92   :  { %v156_v41 = vmul.f32 %v5688_v38, %v118_v40  ;;  %v157_v42 = vmul.f32 %v5690_v39, %v118_v40 }
  0x93   :  { %v130_v43 = vpop.permute.xlu0 %129 }
  0x94   :  { %v170_v44 = vadd.f32 %v156_v41, %v96_v23  ;;  %v171_v45 = vadd.f32 %v157_v42, %v97_v24  ;;  %v162_v52 = vmul.f32 %v5688_v38, %v130_v43  ;;  %v163_v53 = vmul.f32 %v5690_v39, %v130_v43 }
  0x96   :  { %v5694_v46 = vadd.f32 %v192_v37, %v170_v44  ;;  %v5696_v47 = vadd.f32 %v192_v37, %v171_v45  ;;  %v200_v48 = vpop.permute.xlu1 %199  ;;  %v176_v0 = vadd.f32 %v162_v52, %v102_v58  ;;  %v177_v1 = vadd.f32 %v163_v53, %v103_v59 }
  0x97   :  { %v122_v50 = vpop.permute.xlu0 %121  ;;  %v5708_v3 = vadd.f32 %v200_v48, %v174_v60  ;;  %v5714_v6 = vadd.f32 %v200_v48, %v175_v2 }
  0x98   :  { %10095 = vst [vmem:[#allocation5_spill] sm:$0xff] %v5694_v46  ;;  %10096 = vst [vmem:[#allocation6_spill] sm:$0xff] %v5696_v47  ;;  %v158_v55 = vmul.f32 %v5688_v38, %v122_v50  ;;  %v159_v56 = vmul.f32 %v5690_v39, %v122_v50  ;;  %v847_v7 = vand.u32 2139095040, %v5694_v46  ;;  %v951_v8 = vand.u32 2139095040, %v5696_v47 }
  0x99   :  { %v5718_v9 = vadd.f32 %v204_v36, %v176_v0  ;;  %v5720_v10 = vadd.f32 %v204_v36, %v177_v1  ;;  %v1263_v11 = vand.u32 2139095040, %v5708_v3  ;;  %v1367_v13 = vand.u32 2139095040, %v5714_v6 }
  0x9a   :  { %v172_v61 = vadd.f32 %v158_v55, %v98_v31  ;;  %v173_v62 = vadd.f32 %v159_v56, %v99_v32  ;;  %v848_v14 = vshrl.u32 %v847_v7, 23  ;;  %v952_v15 = vshrl.u32 %v951_v8, 23 }
  0x9b   :  { %v114_v63 = vpop.permute.xlu1 %113  ;;  %v1471_v16 = vand.u32 2139095040, %v5718_v9  ;;  %v1575_v17 = vand.u32 2139095040, %v5720_v10  ;;  %v1264_v18 = vshrl.u32 %v1263_v11, 23  ;;  %v1368_v21 = vshrl.u32 %v1367_v13, 23  ;;  %v106_v45 = vpop.permute.xlu0 %105 }
  0x9c   :  { %v5710_v4 = vadd.f32 %v196_v33, %v172_v61  ;;  %v5712_v5 = vadd.f32 %v196_v33, %v173_v62  ;;  %v5049_v23 = vadd.s32 4294967169, %v848_v14  ;;  %v5053_v24 = vadd.s32 4294967169, %v952_v15 }
  0x9d   :  { %v1472_v25 = vshrl.u32 %v1471_v16, 23  ;;  %v1576_v28 = vshrl.u32 %v1575_v17, 23  ;;  %v5065_v29 = vadd.s32 4294967169, %v1264_v18  ;;  %v5069_v30 = vadd.s32 4294967169, %v1368_v21 }
  0x9e   :  { %v854_v31 = vadd.s32 1, %v5049_v23  ;;  %v958_v32 = vadd.s32 1, %v5053_v24  ;;  %v1055_v41 = vand.u32 2139095040, %v5710_v4  ;;  %v1159_v42 = vand.u32 2139095040, %v5712_v5 }
  0x9f   :  { %v5073_v33 = vadd.s32 4294967169, %v1472_v25  ;;  %v5077_v34 = vadd.s32 4294967169, %v1576_v28  ;;  %v1270_v35 = vadd.s32 1, %v5065_v29  ;;  %v1374_v40 = vadd.s32 1, %v5069_v30 }
  0xa0   :  { %v44_v12 = vpop.permute.xlu1 %43  ;;  %v154_v43 = vmul.f32 %v5688_v38, %v114_v63  ;;  %v155_v44 = vmul.f32 %v5690_v39, %v114_v63  ;;  %vm855_vm0 = vcmp.gt.s32.totalorder %v854_v31, 0  ;;  %vm959_vm1 = vcmp.gt.s32.totalorder %v958_v32, 0  ;;  %v180_v62 = vpop.permute.xlu0 %179 }
  0xa1   :  { %v92_v36 = vmul.f32 %v5674_v19, %v44_v12  ;;  %v1478_v48 = vadd.s32 1, %v5073_v33  ;;  %v1582_v49 = vadd.s32 1, %v5077_v34  ;;  %vm1271_vm2 = vcmp.gt.s32.totalorder %v1270_v35, 0 }
  0xa2   :  { %v93_v50 = vmul.f32 %v5676_v20, %v44_v12  ;;  %v150_v53 = vmul.f32 %v5688_v38, %v106_v45  ;;  %v151_v54 = vmul.f32 %v5690_v39, %v106_v45  ;;  %v168_v57 = vadd.f32 %v154_v43, %v5681_v26 }
  0xa3   :  { %v169_v58 = vadd.f32 %v155_v44, %v5684_v27  ;;  %v856_v1 = vsel %vm855_vm0, %v854_v31, 0  ;;  %vm1375_vm3 = vcmp.gt.s32.totalorder %v1374_v40, 0  ;;  %vm1479_vm4 = vcmp.gt.s32.totalorder %v1478_v48, 0 }
  0xa4   :  { %vm1583_vm5 = vcmp.gt.s32.totalorder %v1582_v49, 0  ;;  %v1160_v26 = vshrl.u32 %v1159_v42, 23  ;;  %v5747_v2 = vand.u32 31, %v856_v1  ;;  %v1376_v7 = vsel %vm1375_vm3, %v1374_v40, 0 }
  0xa5   :  { %v110_v22 = vpop.permute.xlu1 %109  ;;  %v1480_v12 = vsel %vm1479_vm4, %v1478_v48, 0  ;;  %v1584_v14 = vsel %vm1583_vm5, %v1582_v49, 0  ;;  %v5758_v18 = vshrl.u32 %v856_v1, 5  ;;  %v5760_v21 = vand.u32 31, %v1376_v7 }
  0xa6   :  { %v152_v51 = vmul.f32 %v5688_v38, %v110_v22  ;;  %v153_v52 = vmul.f32 %v5690_v39, %v110_v22  ;;  %v960_v38 = vsel %vm959_vm1, %v958_v32, 0  ;;  %v1056_v39 = vshrl.u32 %v1055_v41, 23  ;;  %10099 = vst [vmem:[#allocation9_spill] sm:$0xff] %v5747_v2 }
  0xa7   :  { %v5751_v11 = vand.u32 31, %v960_v38  ;;  %10103 = vst [vmem:[#allocation13_spill] sm:$0xff] %v5758_v18  ;;  %v5061_v22 = vadd.s32 4294967169, %v1160_v26  ;;  %v5764_v24 = vsub.s32 32, %v5747_v2  ;;  %v5766_v25 = vshrl.u32 %v960_v38, 5 }
  0xa8   :  { %v166_v60 = vadd.f32 %v152_v51, %v92_v36  ;;  %v167_v61 = vadd.f32 %v153_v52, %v93_v50  ;;  %v5057_v15 = vadd.s32 4294967169, %v1056_v39  ;;  %v5768_v28 = vand.u32 31, %v1480_v12 }
  0xa9   :  { %10101 = vst [vmem:[#allocation11_spill] sm:$0xff] %v5751_v11  ;;  %10104 = vst [vmem:[#allocation14_spill] sm:$0xff] %v5764_v24  ;;  %v5772_v30 = vsub.s32 32, %v5751_v11  ;;  %v5774_v31 = vshrl.u32 %v1480_v12, 5  ;;  %v5776_v32 = vshrl.u32 %v1584_v14, 5  ;;  %v5787_v42 = vsub.s32 32, %v5760_v21 }
  0xaa   :  { %v39_v37 = vpop.permute.xlu1 %38  ;;  %10105 = vst [vmem:[#allocation15_spill] sm:$0xff] %v5766_v25  ;;  %v1062_v36 = vadd.s32 1, %v5057_v15  ;;  %v1166_v43 = vadd.s32 1, %v5061_v22  ;;  %v5790_v45 = vsub.s32 32, %v5768_v28  ;;  %v5792_v48 = vshrl.u32 %v1376_v7, 5 }
  0xab   :  { %v90_v55 = vmul.f32 %v5674_v19, %v39_v37  ;;  %v91_v56 = vmul.f32 %v5676_v20, %v39_v37  ;;  %v1272_v19 = vsel %vm1271_vm2, %v1270_v35, 0  ;;  %10106 = vst [vmem:[#allocation16_spill] sm:$0xff] %v5772_v30  ;;  %v5781_v35 = vand.u32 31, %v1584_v14 }
  0xac   :  { %v5753_v13 = vand.u32 31, %v1272_v19  ;;  %v5784_v41 = vshrl.u32 %v1272_v19, 5  ;;  %v9954_v51 = vmov 2102212464   ;;  %vm1063_vm6 = vcmp.gt.s32.totalorder %v1062_v36, 0 }
  0xad   :  { %v164_v63 = vadd.f32 %v150_v53, %v90_v55  ;;  %v165_v0 = vadd.f32 %v151_v54, %v91_v56  ;;  %v9940_v53 = vmov 920167782   ;;  %v9938_v55 = vmov 1326507024  }
  0xae   :  { %v5779_v33 = vsub.s32 32, %v5753_v13  ;;  %v1286_v52 = vshll.u32 %v9954_v51, %v5753_v13  ;;  %vm1167_vm7 = vcmp.gt.s32.totalorder %v1166_v43, 0  ;;  %v1390_v1 = vshll.u32 %v9954_v51, %v5760_v21 }
  0xaf   :  { %v188_v59 = vpop.permute.xlu1 %187  ;;  %v5745_v27 = vadd.f32 %v180_v62, %v164_v63  ;;  %v5749_v8 = vadd.f32 %v180_v62, %v165_v0  ;;  %v1391_v62 = vshrl.u32 %v9940_v53, %v5787_v42  ;;  %v1394_v63 = vshrl.u32 %v9938_v55, %v5787_v42 }
  0xb0   :  { %v5743_v20 = vadd.f32 %v188_v59, %v168_v57  ;;  %v5755_v16 = vadd.f32 %v188_v59, %v169_v58  ;;  %v1287_v54 = vshrl.u32 %v9940_v53, %v5779_v33  ;;  %v1290_v56 = vshrl.u32 %v9938_v55, %v5779_v33 }
  0xb1   :  { %10098 = vst [vmem:[#allocation8_spill] sm:$0xff] %v5745_v27  ;;  %10100 = vst [vmem:[#allocation10_spill] sm:$0xff] %v5749_v8  ;;  %v223_v23 = vand.u32 2139095040, %v5745_v27  ;;  %v327_v29 = vand.u32 2139095040, %v5749_v8  ;;  %v1289_v58 = vshll.u32 %v9940_v53, %v5753_v13  ;;  %v1064_v7 = vsel %vm1063_vm6, %v1062_v36, 0 }
  0xb2   :  { %10097 = vst [vmem:[#allocation7_spill] sm:$0xff] %v5743_v20  ;;  %10102 = vst [vmem:[#allocation12_spill] sm:$0xff] %v5755_v16  ;;  %v639_v17 = vand.u32 2139095040, %v5743_v20  ;;  %v743_v40 = vand.u32 2139095040, %v5755_v16  ;;  %v5815_v39 = vor.u32 %v1287_v54, %v1286_v52  ;;  %v1168_v14 = vsel %vm1167_vm7, %v1166_v43, 0 }
  0xb3   :  { %v184_v34 = vpop.permute.xlu1 %183  ;;  %v224_v44 = vshrl.u32 %v223_v23, 23  ;;  %v328_v49 = vshrl.u32 %v327_v29, 23  ;;  %v1291_v26 = vor.u32 %v1290_v56, %v1289_v58  ;;  %v9937_v22 = vand.u32 2147483647, %v5720_v10 }
  0xb4   :  { %v640_v37 = vshrl.u32 %v639_v17, 23  ;;  %v5794_v50 = vadd.f32 %v184_v34, %v166_v60  ;;  %v5802_v57 = vadd.f32 %v184_v34, %v167_v61  ;;  %v744_v60 = vshrl.u32 %v743_v40, 23 }
  0xb5   :  { %v5025_v0 = vadd.s32 4294967169, %v224_v44  ;;  %v1393_v61 = vshll.u32 %v9940_v53, %v5760_v21  ;;  %v5029_v38 = vadd.s32 4294967169, %v328_v49  ;;  %v1587_v23 = vsub.s32 32, %v5781_v35 }
  0xb6   :  { %10107 = vst [vmem:[#allocation17_spill] sm:$0xff] %v5794_v50  ;;  %10108 = vst [vmem:[#allocation18_spill] sm:$0xff] %v5802_v57  ;;  %v5041_v59 = vadd.s32 4294967169, %v640_v37  ;;  %v431_v19 = vand.u32 2139095040, %v5794_v50  ;;  %v535_v12 = vand.u32 2139095040, %v5802_v57  ;;  %v5045_v17 = vadd.s32 4294967169, %v744_v60 }
  0xb7   :  { %v5820_v29 = vor.u32 %v1391_v62, %v1390_v1  ;;  %v1395_v34 = vor.u32 %v1394_v63, %v1393_v61  ;;  %v230_v37 = vadd.s32 1, %v5025_v0  ;;  %vm1295_vm8 = vcmp.lt.s32.totalorder %v5784_v41, 4 }
  0xb8   :  { %v646_v15 = vadd.s32 1, %v5041_v59  ;;  %vm1399_vm9 = vcmp.lt.s32.totalorder %v5792_v48, 4  ;;  %v334_v40 = vadd.s32 1, %v5029_v38  ;;  %v432_v44 = vshrl.u32 %v431_v19, 23 }
  0xb9   :  { %v5827_v36 = vsel %vm1295_vm8, %v5815_v39, 920167782  ;;  %v5829_v43 = vand.u32 31, %v1064_v7  ;;  %v5831_v49 = vand.u32 31, %v1168_v14  ;;  %v536_v52 = vshrl.u32 %v535_v12, 23 }
  0xba   :  { %v5835_v54 = vsel %vm1295_vm8, %v1291_v26, 1326507024  ;;  %vm647_vm10 = vcmp.gt.s32.totalorder %v646_v15, 0  ;;  %v750_v56 = vadd.s32 1, %v5045_v17  ;;  %v5839_v58 = vand.u32 8388607, %v9937_v22 }
  0xbb   :  { %10109 = vst [vmem:[#allocation19_spill] sm:$0xff] %v5829_v43  ;;  %v5844_v59 = vsel %vm1399_vm9, %v5820_v29, 920167782  ;;  %v5848_v60 = vsel %vm1399_vm9, %v1395_v34, 1326507024  ;;  %v5850_v62 = vshrl.u32 %v1064_v7, 5 }
  0xbc   :  { %vm231_vm11 = vcmp.gt.s32.totalorder %v230_v37, 0  ;;  %v5852_v63 = vshrl.u32 %v1168_v14, 5  ;;  %vm335_vm12 = vcmp.gt.s32.totalorder %v334_v40, 0  ;;  %v5033_v0 = vadd.s32 4294967169, %v432_v44 }
  0xbd   :  { %10110 = vst [vmem:[#allocation20_spill] sm:$0xff] %v5850_v62  ;;  %v9942_v1 = vmov 2475754826   ;;  %v5856_v38 = vsub.s32 32, %v5829_v43  ;;  %v5859_v19 = vsub.s32 32, %v5831_v49  ;;  %v648_v26 = vsel %vm647_vm10, %v646_v15, 0 }
  0xbe   :  { %v1590_v61 = vshrl.u32 %v9942_v1, %v1587_v23  ;;  %v5037_v12 = vadd.s32 4294967169, %v536_v52  ;;  %v232_v17 = vsel %vm231_vm11, %v230_v37, 0  ;;  %vm751_vm13 = vcmp.gt.s32.totalorder %v750_v56, 0 }
  0xbf   :  { %10111 = vst [vmem:[#allocation21_spill] sm:$0xff] %v5856_v38  ;;  %v1580_v7 = vor.u32 8388608, %v5839_v58  ;;  %v9950_v34 = vmov 683565275   ;;  %v336_v44 = vsel %vm335_vm12, %v334_v40, 0  ;;  %v1596_v1 = vshrl.u32 %v9954_v51, %v1587_v23 }
  0xc0   :  { %v1589_v14 = vshll.u32 %v9950_v34, %v5781_v35  ;;  %v1588_v22 = vshrl.u32 %v9950_v34, %v1587_v23  ;;  %v9963_v55 = vmov 2131351028   ;;  %v5867_v27 = vand.u32 31, %v648_v26 }
  0xc1   :  { %v1593_v53 = vshrl.u32 %v9963_v55, %v1587_v23  ;;  %v5869_v15 = vadd.s32 1, %v5033_v0  ;;  %v10113_v52 = vmov 2475754826   ;;  %v5873_v8 = vand.u32 31, %v232_v17 }
  0xc2   :  { %10112 = vst [vmem:[#allocation22_spill] sm:$0xff] %v5867_v27  ;;  %v1591_v37 = vor.u32 %v1590_v61, %v1589_v14  ;;  %v1592_v58 = vshll.u32 %v10113_v52, %v5781_v35  ;;  %v5875_v50 = vsel %vm751_vm13, %v750_v56, 0  ;;  %v5877_v40 = vadd.s32 1, %v5037_v12 }
  0xc3   :  { %10114 = vst [vmem:[#allocation23_spill] sm:$0xff] %v5873_v8  ;;  %v1595_v34 = vshll.u32 %v9963_v55, %v5781_v35  ;;  %v5881_v57 = vshrl.u32 %v232_v17, 5  ;;  %v5883_v51 = vshrl.u32 %v336_v44, 5  ;;  %v5885_v20 = vand.u32 31, %v336_v44 }
  0xc4   :  { %v5887_v0 = vshrl.u32 %v648_v26, 5  ;;  %v1594_v61 = vor.u32 %v1593_v53, %v1592_v58  ;;  %v10118_v16 = vmov 2102212464   ;;  %v10119_v56 = vmov 920167782  }
  0xc5   :  { %10115 = vst [vmem:[#allocation24_spill] sm:$0xff] %v5881_v57  ;;  %10116 = vst [vmem:[#allocation25_spill] sm:$0xff] %v5883_v51  ;;  %v1597_v14 = vor.u32 %v1596_v1, %v1595_v34  ;;  %v1598_v18 = vshll.u32 %v10118_v16, %v5781_v35  ;;  %v1599_v2 = vshrl.u32 %v10119_v56, %v1587_v23  ;;  %v5893_v12 = vsub.s32 32, %v5867_v27 }
  0xc6   :  { %10117 = vst [vmem:[#allocation26_spill] sm:$0xff] %v5885_v20  ;;  %v5897_v17 = vshll.u32 %v10118_v16, %v5867_v27  ;;  %v1601_v44 = vshll.u32 %v10119_v56, %v5781_v35  ;;  %v10121_v55 = vmov 1326507024   ;;  %v5903_v53 = vsub.s32 32, %v5873_v8 }
  0xc7   :  { %10120 = vst [vmem:[#allocation27_spill] sm:$0xff] %v5893_v12  ;;  %v1602_v26 = vshrl.u32 %v10121_v55, %v1587_v23  ;;  %v5907_v1 = vshll.u32 %v10118_v16, %v5873_v8  ;;  %v5911_v34 = vshll.u32 %v10119_v56, %v5867_v27  ;;  %v1600_v58 = vor.u32 %v1599_v2, %v1598_v18 }
  0xc8   :  { %10122 = vst [vmem:[#allocation28_spill] sm:$0xff] %v5903_v53  ;;  %v5915_v57 = vshll.u32 %v10119_v56, %v5873_v8  ;;  %vm1604_vm14 = vcmp.lt.s32.totalorder %v5776_v32, 1  ;;  %vm1605_vm15 = vcmp.lt.s32.totalorder %v5776_v32, 2  ;;  %vm1606_vm0 = vcmp.lt.s32.totalorder %v5776_v32, 3 }
  0xc9   :  { %10123 = vst [vmem:[#allocation29_spill] sm:$0xff] %v5907_v1  ;;  %v1603_v51 = vor.u32 %v1602_v26, %v1601_v44  ;;  %vm1607_vm1 = vcmp.lt.s32.totalorder %v5776_v32, 4  ;;  %v1612_v35 = vsel %vm1604_vm14, %v1591_v37, %v1594_v61  ;;  %v1616_v23 = vsel %vm1604_vm14, %v1594_v61, %v1597_v14 }
  0xca   :  { %10124 = vst [vmem:[#allocation30_spill] sm:$0xff] %v5915_v57  ;;  %v1608_v1 = vsel %vm1604_vm14, %v1588_v22, %v1591_v37  ;;  %v1609_v24 = vsel %vm1607_vm1, %v1597_v14, 2102212464  ;;  %v1613_v27 = vsel %vm1607_vm1, %v1600_v58, 920167782  ;;  %v1620_v8 = vshll.u32 %v1580_v7, 8 }
  0xcb   :  { %v1617_v46 = vsel %vm1607_vm1, %v1603_v51, 1326507024  ;;  %v1610_v2 = vsel %vm1606_vm0, %v1594_v61, %v1609_v24  ;;  %v1614_v18 = vsel %vm1606_vm0, %v1597_v14, %v1613_v27  ;;  %v5922_v44 = vsub.s32 32, %v5885_v20 }
  0xcc   :  { %v1618_v25 = vsel %vm1606_vm0, %v1600_v58, %v1617_v46  ;;  %v5926_v26 = vshll.u32 %v10118_v16, %v5885_v20  ;;  %v1615_v57 = vsel %vm1605_vm15, %v1612_v35, %v1614_v18  ;;  %v5941_v46 = vshrl.u32 %v10119_v56, %v5903_v53 }
  0xcd   :  { %10125 = vst [vmem:[#allocation31_spill] sm:$0xff] %v5922_v44  ;;  %v1619_v22 = vsel %vm1605_vm15, %v1616_v23, %v1618_v25  ;;  %v5935_v24 = vmul.u32.u64.low %v1620_v8, %v1615_v57  ;;  %v5936_v27 = vmul.u32.u64.high %v1620_v8, %v1615_v57, %v5935_v24  ;;  %v5945_v51 = vshll.u32 %v10119_v56, %v5885_v20 }
  0xce   :  { %v5932_v37 = vmul.u32.u64.low %v1620_v8, %v1619_v22  ;;  %v5933_v11 = vmul.u32.u64.high %v1620_v8, %v1619_v22, %v5932_v37  ;;  %10126 = vst [vmem:[#allocation32_spill] sm:$0xff] %v5941_v46  ;;  %v1611_v7 = vsel %vm1605_vm15, %v1608_v1, %v1610_v2  ;;  %v9980_v25 = vand.u32 2147483647, %v5718_v9 }
  0xcf   :  { %10127 = vst [vmem:[#allocation33_spill] sm:$0xff] %v5945_v51  ;;  %v663_v61 = vshrl.u32 %v10119_v56, %v5893_v12  ;;  %v10128_v57 = vmov 683565275   ;;  %v1486_v58 = vshrl.u32 %v10113_v52, %v5790_v45  ;;  %v10129_v35 = vmov 2131351028  }
  0xd0   :  { %v1485_v14 = vshll.u32 %v10128_v57, %v5768_v28  ;;  %v1489_v23 = vshrl.u32 %v10129_v35, %v5790_v45  ;;  %v1475_v18 = vand.u32 8388607, %v9980_v25  ;;  %v1488_v32 = vshll.u32 %v10113_v52, %v5768_v28 }
  0xd1   :  { %v1491_v1 = vshll.u32 %v10129_v35, %v5768_v28  ;;  %v1492_v2 = vshrl.u32 %v10118_v16, %v5790_v45  ;;  %v5968_v22 = vshrl.u32 %v10121_v55, %v5893_v12  ;;  %v1627_v37 = vmul.u32 %v1620_v8, %v1611_v7 }
  0xd2   :  { %vm1629_vm2 = vc.u32 %v5933_v11, %v5935_v24  ;;  %v1630_v20 = vadd.s32 1, %v5936_v27  ;;  %v1487_v25 = vor.u32 %v1486_v58, %v1485_v14  ;;  %v1490_v46 = vor.u32 %v1489_v23, %v1488_v32 }
  0xd3   :  { %v1493_v30 = vor.u32 %v1492_v2, %v1491_v1  ;;  %v1494_v47 = vshll.u32 %v10118_v16, %v5768_v28  ;;  %v1495_v43 = vshrl.u32 %v10119_v56, %v5790_v45  ;;  %v1497_v12 = vshll.u32 %v10119_v56, %v5768_v28 }
  0xd4   :  { %v1631_v62 = vsel %vm1629_vm2, %v1630_v20, %v5936_v27  ;;  %v1498_v8 = vshrl.u32 %v10121_v55, %v5790_v45  ;;  %v351_v7 = vshrl.u32 %v10119_v56, %v5922_v44  ;;  %v1476_v58 = vor.u32 8388608, %v1475_v18 }
  0xd5   :  { %v1632_v14 = vadd.s32 %v1631_v62, %v1627_v37  ;;  %vm1500_vm3 = vcmp.lt.s32.totalorder %v5774_v31, 1  ;;  %v1496_v23 = vor.u32 %v1495_v43, %v1494_v47  ;;  %vm1501_vm4 = vcmp.lt.s32.totalorder %v5774_v31, 2 }
  0xd6   :  { %v1499_v32 = vor.u32 %v1498_v8, %v1497_v12  ;;  %vm1502_vm5 = vcmp.lt.s32.totalorder %v5774_v31, 3  ;;  %vm1503_vm6 = vcmp.lt.s32.totalorder %v5774_v31, 4  ;;  %v1508_v28 = vsel %vm1500_vm3, %v1487_v25, %v1490_v46 }
  0xd7   :  { %v1633_v20 = vadd.s32 536870912, %v1632_v14  ;;  %v1512_v27 = vsel %vm1500_vm3, %v1490_v46, %v1493_v30  ;;  %v1484_v62 = vshrl.u32 %v10128_v57, %v5790_v45  ;;  %v1505_v18 = vsel %vm1503_vm6, %v1493_v30, 2102212464 }
  0xd8   :  { %v1509_v1 = vsel %vm1503_vm6, %v1496_v23, 920167782  ;;  %v1513_v47 = vsel %vm1503_vm6, %v1499_v32, 1326507024  ;;  %v1516_v37 = vshll.u32 %v1476_v58, 8  ;;  %v6000_v8 = vshrl.u32 %v10121_v55, %v5922_v44 }
  0xd9   :  { %v1634_v43 = vshrl.u32 %v1633_v20, 30  ;;  %v1510_v12 = vsel %vm1502_vm5, %v1493_v30, %v1509_v1  ;;  %v1514_v2 = vsel %vm1502_vm5, %v1496_v23, %v1513_v47  ;;  %vm1574_vm7 = vcmp.lt.s32.totalorder %v5720_v10, 0 }
  0xda   :  { %10130 = vst [vmem:[#allocation34_spill] sm:$0xff] %v6000_v8  ;;  %v1504_v45 = vsel %vm1500_vm3, %v1484_v62, %v1487_v25  ;;  %v1511_v32 = vsel %vm1501_vm4, %v1508_v28, %v1510_v12  ;;  %v1515_v20 = vsel %vm1501_vm4, %v1512_v27, %v1514_v2  ;;  %v1506_v23 = vsel %vm1502_vm5, %v1490_v46, %v1505_v18 }
  0xdb   :  { %v1635_v30 = vshll.u32 %v1634_v43, 30  ;;  %v6011_v58 = vmul.u32.u64.low %v1516_v37, %v1515_v20  ;;  %v6012_v1 = vmul.u32.u64.high %v1516_v37, %v1515_v20, %v6011_v58  ;;  %v6015_v47 = vand.u32 31, %v5875_v50 }
  0xdc   :  { %v6017_v44 = vmul.u32.u64.low %v1516_v37, %v1511_v32  ;;  %v6018_v38 = vmul.u32.u64.high %v1516_v37, %v1511_v32, %v6017_v44  ;;  %v9992_v25 = vand.u32 2147483647, %v5714_v6  ;;  %v6024_v28 = vshrl.u32 %v10121_v55, %v5903_v53 }
  0xdd   :  { %v6027_v27 = vor.u32 %v663_v61, %v5897_v17  ;;  %v6030_v46 = vshrl.u32 %v5875_v50, 5  ;;  %v6032_v62 = vsub.s32 %v1632_v14, %v1635_v30  ;;  %v1658_v12 = vsub.s32 4, %v1634_v43 }
  0xde   :  { %10131 = vst [vmem:[#allocation35_spill] sm:$0xff] %v6024_v28  ;;  %v1507_v2 = vsel %vm1501_vm4, %v1504_v45, %v1506_v23  ;;  %v1382_v32 = vshrl.u32 %v10113_v52, %v5787_v42  ;;  %vm1525_vm10 = vc.u32 %v6012_v1, %v6017_v44  ;;  %v1371_v50 = vand.u32 8388607, %v9992_v25 }
  0xdf   :  { %v1638_v20 = vsub.s32 0, %v6032_v62  ;;  %v1381_v17 = vshll.u32 %v10128_v57, %v5760_v21  ;;  %v6048_v61 = vor.u32 %v351_v7, %v5926_v26  ;;  %v6053_v14 = vsub.s32 32, %v6015_v47 }
  0xe0   :  { %v1526_v45 = vadd.s32 1, %v6018_v38  ;;  %v1523_v23 = vmul.u32 %v1516_v37, %v1507_v2  ;;  %v1385_v25 = vshrl.u32 %v10129_v35, %v5787_v42  ;;  %v1384_v26 = vshll.u32 %v10113_v52, %v5760_v21 }
  0xe1   :  { %10132 = vst [vmem:[#allocation36_spill] sm:$0xff] %v6048_v61  ;;  %v5078_v30 = vmin.u32 %v1638_v20, %v6032_v62  ;;  %v1383_v58 = vor.u32 %v1382_v32, %v1381_v17  ;;  %v1387_v7 = vshll.u32 %v10129_v35, %v5760_v21  ;;  %v1388_v31 = vshrl.u32 %v10118_v16, %v5787_v42 }
  0xe2   :  { %v1527_v18 = vsel %vm1525_vm10, %v1526_v45, %v6018_v38  ;;  %vm671_vm11 = vcmp.lt.s32.totalorder %v5887_v0, 4  ;;  %v10133_v20 = vand.u32 2147483647, %v5720_v10  ;;  %v1628_v38 = vadd.s32 %v5935_v24, %v5933_v11 }
  0xe3   :  { %v1640_v2 = vclz %v5078_v30  ;;  %v1659_v32 = vsel %vm1574_vm7, %v1658_v12, %v1634_v43  ;;  %v1372_v17 = vor.u32 8388608, %v1371_v50  ;;  %v1528_v21 = vadd.s32 %v1527_v18, %v1523_v23 }
  0xe4   :  { %vm6069_vm12 = vcmp.le.f32.partialorder %v10133_v20, 0.7853982  ;;  %v1386_v45 = vor.u32 %v1385_v25, %v1384_v26  ;;  %v1389_v53 = vor.u32 %v1388_v31, %v1387_v7  ;;  %vm1398_vm13 = vcmp.lt.s32.totalorder %v5792_v48, 3 }
  0xe5   :  { %v5079_v51 = vadd.s32 4294967294, %v1640_v2  ;;  %v1380_v20 = vshrl.u32 %v10128_v57, %v5787_v42  ;;  %vm1396_vm14 = vcmp.lt.s32.totalorder %v5792_v48, 1  ;;  %v1410_v11 = vsel %vm1398_vm13, %v5820_v29, %v5848_v60 }
  0xe6   :  { %v1529_v24 = vadd.s32 536870912, %v1528_v21  ;;  %v1401_v43 = vsel %vm1399_vm9, %v1389_v53, 2102212464  ;;  %v1404_v25 = vsel %vm1396_vm14, %v1383_v58, %v1386_v45  ;;  %v1406_v18 = vsel %vm1398_vm13, %v1389_v53, %v5844_v59 }
  0xe7   :  { %vm439_vm15 = vcmp.gt.s32.totalorder %v5869_v15, 0  ;;  %vm5080_vm0 = vcmp.lt.s32.totalorder %v5079_v51, 0  ;;  %vm1397_vm1 = vcmp.lt.s32.totalorder %v5792_v48, 2  ;;  %v1408_v42 = vsel %vm1396_vm14, %v1386_v45, %v1389_v53 }
  0xe8   :  { %v1412_v29 = vshll.u32 %v1372_v17, 8  ;;  %v1643_v60 = vsel %vm5080_vm0, 0, %v5079_v51  ;;  %v1530_v12 = vshrl.u32 %v1529_v24, 30  ;;  %v1407_v50 = vsel %vm1397_vm1, %v1404_v25, %v1406_v18 }
  0xe9   :  { %v1411_v31 = vsel %vm1397_vm1, %v1408_v42, %v1410_v11  ;;  %v1644_v30 = vsub.s32 32, %v1643_v60  ;;  %v1648_v23 = vsub.s32 4294967266, %v1643_v60  ;;  %v1400_v59 = vsel %vm1396_vm14, %v1380_v20, %v1383_v58 }
  0xea   :  { %v1402_v26 = vsel %vm1398_vm13, %v1386_v45, %v1401_v43  ;;  %v1645_v7 = vshll.u32 %v6032_v62, %v1643_v60  ;;  %v1531_v53 = vshll.u32 %v1530_v12, 30  ;;  %v6115_v11 = vsel %vm671_vm11, %v6027_v27, 920167782 }
  0xeb   :  { %v6105_v2 = vmul.u32.u64.low %v1412_v29, %v1411_v31  ;;  %v6106_v51 = vmul.u32.u64.high %v1412_v29, %v1411_v31, %v6105_v2  ;;  %v1646_v17 = vshrl.u32 %v1628_v38, %v1644_v30  ;;  %v1649_v24 = vadd.s32 127, %v1648_v23  ;;  %10136 = vst [vmem:[#allocation37_spill] sm:$0xff] %v6115_v11 }
  0xec   :  { %v6108_v25 = vmul.u32.u64.low %v1412_v29, %v1407_v50  ;;  %v6109_v18 = vmul.u32.u64.high %v1412_v29, %v1407_v50, %v6108_v25  ;;  %v6119_v58 = vshll.u32 %v10118_v16, %v6015_v47  ;;  %v1661_v62 = vsel %vm6069_vm12, 0, %v1659_v32 }
  0xed   :  { %v6123_v45 = vsub.s32 %v1528_v21, %v1531_v53  ;;  %v1647_v38 = vor.u32 %v1646_v17, %v1645_v7  ;;  %v1650_v20 = vshll.u32 %v1649_v24, 23  ;;  %v1554_v43 = vsub.s32 4, %v1530_v12 }
  0xee   :  { %v1403_v42 = vsel %vm1397_vm1, %v1400_v59, %v1402_v26  ;;  %v10137_v60 = vor.u32 %v5968_v22, %v5911_v34  ;;  %v6136_v31 = vshll.u32 %v10119_v56, %v6015_v47  ;;  %vm1421_vm9 = vc.u32 %v6106_v51, %v6108_v25 }
  0xef   :  { %v1534_v32 = vsub.s32 0, %v6123_v45  ;;  %v6143_v48 = vshrl.u32 %v10119_v56, %v6053_v14  ;;  %v1651_v21 = vor.u32 4788187, %v1650_v20  ;;  %v1665_v30 = vadd.s32 3, %v1661_v62 }
  0xf0   :  { %v6132_v50 = vsel %vm671_vm11, %v10137_v60, 1326507024  ;;  %v1422_v34 = vadd.s32 1, %v6109_v18  ;;  %vm1470_vm2 = vcmp.lt.s32.totalorder %v5718_v9, 0  ;;  %v1419_v23 = vmul.u32 %v1412_v29, %v1403_v42 }
  0xf1   :  { %v5074_v22 = vmin.u32 %v1534_v32, %v6123_v45  ;;  %v9996_v59 = vand.u32 2147483647, %v5708_v3  ;;  %v1652_v26 = vand.u32 2147483647, %v1651_v21  ;;  %v1654_v7 = vcvt.s32.f32 %v1647_v38 }
  0xf2   :  { %v6151_v53 = vsel %vm1470_vm2, %v1554_v43, %v1530_v12  ;;  %v1423_v2 = vsel %vm1421_vm9, %v1422_v34, %v6109_v18  ;;  %v6156_v17 = vshrl.u32 %v10121_v55, %v6053_v14  ;;  %v6161_v24 = vsel %vm439_vm15, %v5869_v15, 0 }
  0xf3   :  { %v10138_v29 = vand.u32 2147483647, %v5718_v9  ;;  %v1536_v38 = vclz %v5074_v22  ;;  %v1655_v12 = vmul.f32 %v1654_v7, %v1652_v26  ;;  %v6169_v20 = vand.u32 3, %v1665_v30 }
  0xf4   :  { %v1524_v18 = vadd.s32 %v6017_v44, %v6012_v1  ;;  %v1424_v43 = vadd.s32 %v1423_v2, %v1419_v23  ;;  %v1267_v60 = vand.u32 8388607, %v9996_v59  ;;  %v1278_v32 = vshrl.u32 %v10113_v52, %v5779_v33 }
  0xf5   :  { %vm6165_vm3 = vcmp.le.f32.partialorder %v10138_v29, 0.7853982  ;;  %v5075_v42 = vadd.s32 4294967294, %v1536_v38  ;;  %v1656_v21 = vxor.u32 2147483648, %v1655_v12  ;;  %v1281_v30 = vshrl.u32 %v10129_v35, %v5779_v33 }
  0xf6   :  { %v1557_v15 = vsel %vm6165_vm3, 0, %v6151_v53  ;;  %v1425_v34 = vadd.s32 536870912, %v1424_v43  ;;  %v1284_v44 = vshrl.u32 %v10118_v16, %v5779_v33  ;;  %vm543_vm4 = vcmp.gt.s32.totalorder %v5877_v40, 0 }
  0xf7   :  { %vm5076_vm5 = vcmp.lt.s32.totalorder %v5075_v42, 0  ;;  %vm1366_vm6 = vcmp.lt.s32.totalorder %v5714_v6, 0  ;;  %v1276_v1 = vshrl.u32 %v10128_v57, %v5779_v33  ;;  %v1277_v22 = vshll.u32 %v10128_v57, %v5753_v13 }
  0xf8   :  { %v1283_v23 = vshll.u32 %v10129_v35, %v5753_v13  ;;  %v1657_v26 = vsel %vm1574_vm7, %v1656_v21, %v1655_v12  ;;  %v1539_v7 = vsel %vm5076_vm5, 0, %v5075_v42  ;;  %v1426_v53 = vshrl.u32 %v1425_v34, 30 }
  0xf9   :  { %v1280_v2 = vshll.u32 %v10113_v52, %v5753_v13  ;;  %v1660_v29 = vsel %vm6069_vm12, %v5720_v10, %v1657_v26  ;;  %v1540_v38 = vsub.s32 32, %v1539_v7  ;;  %v1544_v33 = vsub.s32 4294967266, %v1539_v7 }
  0xfa   :  { %v1285_v59 = vor.u32 %v1284_v44, %v1283_v23  ;;  %5417 = vcosq.f32 %v1660_v29  ;;  %v1427_v8 = vshll.u32 %v1426_v53, 30  ;;  %v1279_v28 = vor.u32 %v1278_v32, %v1277_v22 }
  0xfb   :  { %v1282_v61 = vor.u32 %v1281_v30, %v1280_v2  ;;  %5419 = vsinq.f32 %v1660_v29  ;;  %v1541_v11 = vshll.u32 %v6123_v45, %v1539_v7  ;;  %v1542_v12 = vshrl.u32 %v1524_v18, %v1540_v38 }
  0xfc   :  { %v1545_v42 = vadd.s32 127, %v1544_v33  ;;  %v6200_v21 = vsub.s32 %v1424_v43, %v1427_v8  ;;  %v1450_v34 = vsub.s32 4, %v1426_v53  ;;  %v1268_v13 = vor.u32 8388608, %v1267_v60 }
  0xfd   :  { %vm1292_vm7 = vcmp.lt.s32.totalorder %v5784_v41, 1  ;;  %v1543_v37 = vor.u32 %v1542_v12, %v1541_v11  ;;  %vm1294_vm10 = vcmp.lt.s32.totalorder %v5784_v41, 3  ;;  %v1297_v44 = vsel %vm1295_vm8, %v1285_v59, 2102212464 }
  0xfe   :  { %v1546_v26 = vshll.u32 %v1545_v42, 23  ;;  %v1430_v32 = vsub.s32 0, %v6200_v21  ;;  %v1300_v30 = vsel %vm1292_vm7, %v1279_v28, %v1282_v61  ;;  %v1302_v45 = vsel %vm1294_vm10, %v1285_v59, %v5827_v36 }
  0xff   :  { %v1304_v18 = vsel %vm1292_vm7, %v1282_v61, %v1285_v59  ;;  %vm1293_vm12 = vcmp.lt.s32.totalorder %v5784_v41, 2  ;;  %v1296_v8 = vsel %vm1292_vm7, %v1276_v1, %v1279_v28  ;;  %v1306_v43 = vsel %vm1294_vm10, %v5815_v39, %v5835_v54 }
 0x100   :  { %v1547_v22 = vor.u32 4788187, %v1546_v26  ;;  %v5070_v11 = vmin.u32 %v1430_v32, %v6200_v21  ;;  %v1451_v60 = vsel %vm1366_vm6, %v1450_v34, %v1426_v53  ;;  %v1298_v23 = vsel %vm1294_vm10, %v1282_v61, %v1297_v44 }
 0x101   :  { %v1307_v7 = vsel %vm1293_vm12, %v1304_v18, %v1306_v43  ;;  %v1550_v29 = vcvt.s32.f32 %v1543_v37  ;;  %v1303_v36 = vsel %vm1293_vm12, %v1300_v30, %v1302_v45  ;;  %v1308_v59 = vshll.u32 %v1268_v13, 8 }
 0x102   :  { %v1548_v2 = vand.u32 2147483647, %v1547_v22  ;;  %v6221_v28 = vsel %vm543_vm4, %v5877_v40, 0  ;;  %v1561_v39 = vadd.s32 3, %v1557_v15  ;;  %v10141_v54 = vand.u32 2147483647, %v5714_v6 }
 0x103   :  { %v1432_v61 = vclz %v5070_v11  ;;  %vm10042_vm13 = vcmask 1041408   ;;  %v6231_v33 = vmul.u32.u64.low %v1308_v59, %v1307_v7  ;;  %v6232_v12 = vmul.u32.u64.high %v1308_v59, %v1307_v7, %v6231_v33 }
 0x104   :  { %vm6225_vm8 = vcmp.le.f32.partialorder %v10141_v54, 0.7853982  ;;  %v1551_v53 = vmul.f32 %v1550_v29, %v1548_v2  ;;  %vm1664_vm14 = vweird.f32 %v5720_v10  ;;  %v1299_v15 = vsel %vm1293_vm12, %v1296_v8, %v1298_v23 }
 0x105   :  { %v1453_v38 = vsel %vm6225_vm8, 0, %v1451_v60  ;;  %v5071_v40 = vadd.s32 4294967294, %v1432_v61  ;;  %v6237_v42 = vmul.u32.u64.low %v1308_v59, %v1303_v36  ;;  %v6238_v34 = vmul.u32.u64.high %v1308_v59, %v1303_v36, %v6237_v42 }
 0x106   :  { %vm1667_vm15 = vcmp.lt.s32.totalorder %v6169_v20, 2  ;;  %vm1668_vm0 = vcmp.eq.s32.totalorder %v6169_v20, 0  ;;  %vm1671_vm1 = vcmp.eq.s32.totalorder %v6169_v20, 2  ;;  %v1552_v13 = vxor.u32 2147483648, %v1551_v53 }
 0x107   :  { %v6244_v37 = vand.u32 3, %v1561_v39  ;;  %v1420_v26 = vadd.s32 %v6108_v25, %v6106_v51  ;;  %vm5072_vm9 = vcmp.lt.s32.totalorder %v5071_v40, 0  ;;  %v1156_v41 = vand.u32 2147483647, %v5712_v5  ;;  %v5418_v44 = vpop.eup %5417 }
 0x108   :  { %v1553_v32 = vsel %vm1470_vm2, %v1552_v13, %v1551_v53  ;;  %v1435_v30 = vsel %vm5072_vm9, 0, %v5071_v40  ;;  %v6251_v45 = vadd.s32 3, %v1453_v38  ;;  %v1315_v18 = vmul.u32 %v1308_v59, %v1299_v15  ;;  %v5420_v22 = vpop.eup %5419 }
 0x109   :  { %v1672_v8 = vxor.u32 2147483648, %v5418_v44  ;;  %v1556_v43 = vsel %vm6165_vm3, %v5718_v9, %v1553_v32  ;;  %v1436_v11 = vsub.s32 32, %v1435_v30  ;;  %vm1317_vm4 = vc.u32 %v6232_v12, %v6237_v42 }
 0x10a   :  { %v1669_v51 = vxor.u32 2147483648, %v5420_v22  ;;  %5421 = vcosq.f32 %v1556_v43  ;;  %v1440_v25 = vsub.s32 4294967266, %v1435_v30  ;;  %v1318_v60 = vadd.s32 1, %v6238_v34 }
 0x10b   :  { %v1673_v23 = vsel %vm1671_vm1, %v1672_v8, %v5420_v22  ;;  %5423 = vsinq.f32 %v1556_v43  ;;  %v1438_v7 = vshrl.u32 %v1420_v26, %v1436_v11  ;;  %v6263_v2 = vand.u32 8388607, %v1156_v41 }
 0x10c   :  { %v1670_v62 = vsel %vm1668_vm0, %v5418_v44, %v1669_v51  ;;  %v1437_v29 = vshll.u32 %v6200_v21, %v1435_v30  ;;  %v1441_v36 = vadd.s32 127, %v1440_v25  ;;  %v1319_v59 = vsel %vm1317_vm4, %v1318_v60, %v6238_v34 }
 0x10d   :  { %v1674_v39 = vsel %vm1667_vm15, %v1670_v62, %v1673_v23  ;;  %v1320_v54 = vadd.s32 %v1319_v59, %v1315_v18  ;;  %v1174_v61 = vshrl.u32 %v10113_v52, %v5859_v19  ;;  %v1177_v53 = vshrl.u32 %v10129_v35, %v5859_v19 }
 0x10e   :  { %v1675_v38 = vsel %vm1664_vm14, nan, %v1674_v39  ;;  %v1439_v33 = vor.u32 %v1438_v7, %v1437_v29  ;;  %v1442_v40 = vshll.u32 %v1441_v36, 23  ;;  %v1180_v21 = vshrl.u32 %v10118_v16, %v5859_v19 }
 0x10f   :  { %5081 = vmatprep.subr.msk.mxu0 %vm10042_vm13, %v1675_v38  ;;  %v1321_v15 = vadd.s32 536870912, %v1320_v54  ;;  %v1179_v20 = vshll.u32 %v10129_v35, %v5831_v49  ;;  %v1182_v34 = vshll.u32 %v10118_v16, %v5831_v49  ;;  %v1183_v13 = vshrl.u32 %v10119_v56, %v5859_v19 }
 0x110   :  { %v1443_v26 = vor.u32 4788187, %v1442_v40  ;;  %vm1262_vm2 = vcmp.lt.s32.totalorder %v5708_v3, 0  ;;  %v1173_v10 = vshll.u32 %v10128_v57, %v5831_v49  ;;  %v1176_v44 = vshll.u32 %v10113_v52, %v5831_v49 }
 0x111   :  { %v1186_v32 = vshrl.u32 %v10121_v55, %v5859_v19  ;;  %vm1567_vm3 = vcmp.eq.s32.totalorder %v6244_v37, 2  ;;  %v1322_v30 = vshrl.u32 %v1321_v15, 30  ;;  %v1181_v18 = vor.u32 %v1180_v21, %v1179_v20 }
 0x112   :  { %v1184_v22 = vor.u32 %v1183_v13, %v1182_v34  ;;  %v1185_v8 = vshll.u32 %v10119_v56, %v5831_v49  ;;  %vm1564_vm5 = vcmp.eq.s32.totalorder %v6244_v37, 0  ;;  %v1444_v43 = vand.u32 2147483647, %v1443_v26 }
 0x113   :  { %v1446_v11 = vcvt.s32.f32 %v1439_v33  ;;  %v1175_v51 = vor.u32 %v1174_v61, %v1173_v10  ;;  %v1178_v25 = vor.u32 %v1177_v53, %v1176_v44  ;;  %vm1563_vm7 = vcmp.lt.s32.totalorder %v6244_v37, 2 }
 0x114   :  { %v1323_v60 = vshll.u32 %v1322_v30, 30  ;;  %v1172_v23 = vshrl.u32 %v10128_v57, %v5859_v19  ;;  %v1187_v7 = vor.u32 %v1186_v32, %v1185_v8  ;;  %vm1191_vm10 = vcmp.lt.s32.totalorder %v5852_v63, 4 }
 0x115   :  { %vm1560_vm12 = vweird.f32 %v5718_v9  ;;  %v1447_v62 = vmul.f32 %v1446_v11, %v1444_v43  ;;  %v1164_v49 = vor.u32 8388608, %v6263_v2  ;;  %vm1188_vm14 = vcmp.lt.s32.totalorder %v5852_v63, 1 }
 0x116   :  { %v1197_v29 = vsel %vm1191_vm10, %v1184_v22, 920167782  ;;  %v6306_v36 = vsub.s32 %v1320_v54, %v1323_v60  ;;  %v1346_v59 = vsub.s32 4, %v1322_v30  ;;  %vm1189_vm15 = vcmp.lt.s32.totalorder %v5852_v63, 2 }
 0x117   :  { %v1193_v19 = vsel %vm1191_vm10, %v1181_v18, 2102212464  ;;  %v1448_v39 = vxor.u32 2147483648, %v1447_v62  ;;  %vm1190_vm0 = vcmp.lt.s32.totalorder %v5852_v63, 3  ;;  %v1192_v61 = vsel %vm1188_vm14, %v1172_v23, %v1175_v51  ;;  %v5422_v38 = vpop.eup %5421 }
 0x118   :  { %v1196_v53 = vsel %vm1188_vm14, %v1175_v51, %v1178_v25  ;;  %v1326_v2 = vsub.s32 0, %v6306_v36  ;;  %v1198_v33 = vsel %vm1190_vm0, %v1181_v18, %v1197_v29  ;;  %v1200_v40 = vsel %vm1188_vm14, %v1178_v25, %v1181_v18  ;;  %v5424_v21 = vpop.eup %5423 }
 0x119   :  { %v1201_v54 = vsel %vm1191_vm10, %v1187_v7, 1326507024  ;;  %v1568_v15 = vxor.u32 2147483648, %v5422_v38  ;;  %v1449_v20 = vsel %vm1366_vm6, %v1448_v39, %v1447_v62  ;;  %v1194_v34 = vsel %vm1190_vm0, %v1178_v25, %v1193_v19 }
 0x11a   :  { %v1202_v13 = vsel %vm1190_vm0, %v1184_v22, %v1201_v54  ;;  %v1565_v26 = vxor.u32 2147483648, %v5424_v21  ;;  %v1452_v10 = vsel %vm6225_vm8, %v5714_v6, %v1449_v20  ;;  %v5066_v44 = vmin.u32 %v1326_v2, %v6306_v36 }
 0x11b   :  { %v1347_v32 = vsel %vm1262_vm2, %v1346_v59, %v1322_v30  ;;  %v1569_v18 = vsel %vm1567_vm3, %v1568_v15, %v5424_v21  ;;  %5425 = vcosq.f32 %v1452_v10  ;;  %v1199_v8 = vsel %vm1189_vm15, %v1196_v53, %v1198_v33 }
 0x11c   :  { %v1203_v22 = vsel %vm1189_vm15, %v1200_v40, %v1202_v13  ;;  %v1566_v43 = vsel %vm1564_vm5, %v5422_v38, %v1565_v26  ;;  %5427 = vsinq.f32 %v1452_v10  ;;  %v1328_v1 = vclz %v5066_v44 }
 0x11d   :  { %v1204_v11 = vshll.u32 %v1164_v49, 8  ;;  %v1570_v51 = vsel %vm1563_vm7, %v1566_v43, %v1569_v18  ;;  %v6334_v30 = vand.u32 3, %v6251_v45  ;;  %v10144_v25 = vand.u32 2147483647, %v5708_v3 }
 0x11e   :  { %v1195_v23 = vsel %vm1189_vm15, %v1192_v61, %v1194_v34  ;;  %v1571_v7 = vsel %vm1560_vm12, nan, %v1570_v51  ;;  %v5067_v62 = vadd.s32 4294967294, %v1328_v1  ;;  %v10001_v19 = vand.u32 2147483647, %v5710_v4  ;;  %v10149_v34 = vld [vmem:[#allocation19_spill] sm:$0xff] }
 0x11f   :  { %vm6338_vm6 = vcmp.le.f32.partialorder %v10144_v25, 0.7853982  ;;  %v6346_v49 = vmul.u32.u64.low %v1204_v11, %v1203_v22  ;;  %v6347_v29 = vmul.u32.u64.high %v1204_v11, %v1203_v22, %v6346_v49  ;;  %5082 = vmatpush1.msk.msra.mxu0 %vm10042_vm13, %v1571_v7  ;;  %v6359_v63 = vor.u32 %v6143_v48, %v6119_v58 }
 0x120   :  { %v1349_v37 = vsel %vm6338_vm6, 0, %v1347_v32  ;;  %v6352_v45 = vmul.u32.u64.low %v1204_v11, %v1199_v8  ;;  %v6353_v59 = vmul.u32.u64.high %v1204_v11, %v1199_v8, %v6352_v45  ;;  %v6362_v9 = vshrl.u32 %v6161_v24, 5 }
 0x121   :  { %v6365_v39 = vand.u32 31, %v6161_v24  ;;  %vm5068_vm8 = vcmp.lt.s32.totalorder %v5067_v62, 0  ;;  %v6370_v53 = vshrl.u32 %v6221_v28, 5  ;;  %v1316_v38 = vadd.s32 %v6237_v42, %v6232_v12  ;;  %v10148_v12 = vld [vmem:[#allocation21_spill] sm:$0xff] }
 0x122   :  { %v1331_v2 = vsel %vm5068_vm8, 0, %v5067_v62  ;;  %vm1463_vm1 = vcmp.eq.s32.totalorder %v6334_v30, 2  ;;  %v6375_v33 = vadd.s32 3, %v1349_v37  ;;  %v1211_v40 = vmul.u32 %v1204_v11, %v1195_v23 }
 0x123   :  { %10147 = vst [vmem:[#allocation38_spill] sm:$0xff] %v6365_v39  ;;  %v1332_v58 = vsub.s32 32, %v1331_v2  ;;  %v1336_v48 = vsub.s32 4294967266, %v1331_v2  ;;  %vm1460_vm9 = vcmp.eq.s32.totalorder %v6334_v30, 0  ;;  %vm1213_vm4 = vc.u32 %v6347_v29, %v6352_v45 }
 0x124   :  { %v1214_v24 = vadd.s32 1, %v6353_v59  ;;  %v6383_v54 = vand.u32 8388607, %v10001_v19  ;;  %v1068_v42 = vshrl.u32 %v10128_v57, %v10148_v12  ;;  %vm1459_vm3 = vcmp.lt.s32.totalorder %v6334_v30, 2 }
 0x125   :  { %v1333_v21 = vshll.u32 %v6306_v36, %v1331_v2  ;;  %v1334_v15 = vshrl.u32 %v1316_v38, %v1332_v58  ;;  %v1337_v20 = vadd.s32 127, %v1336_v48  ;;  %v1069_v13 = vshll.u32 %v10128_v57, %v10149_v34 }
 0x126   :  { %vm1456_vm5 = vweird.f32 %v5714_v6  ;;  %v1215_v26 = vsel %vm1213_vm4, %v1214_v24, %v6353_v59  ;;  %v1073_v10 = vshrl.u32 %v10129_v35, %v10148_v12  ;;  %v1076_v44 = vshrl.u32 %v10118_v16, %v10148_v12 }
 0x127   :  { %v1079_v32 = vshrl.u32 %v10119_v56, %v10148_v12  ;;  %v1335_v18 = vor.u32 %v1334_v15, %v1333_v21  ;;  %v1338_v36 = vshll.u32 %v1337_v20, 23  ;;  %v1216_v8 = vadd.s32 %v1215_v26, %v1211_v40  ;;  %v10150_v26 = vld [vmem:[#allocation20_spill] sm:$0xff] }
 0x128   :  { %v1078_v22 = vshll.u32 %v10118_v16, %v10149_v34  ;;  %v1070_v43 = vshrl.u32 %v10113_v52, %v10148_v12  ;;  %v1072_v1 = vshll.u32 %v10113_v52, %v10149_v34  ;;  %v1075_v11 = vshll.u32 %v10129_v35, %v10149_v34  ;;  %v5426_v25 = vpop.eup %5425 }
 0x129   :  { %v1082_v51 = vshrl.u32 %v10121_v55, %v10148_v12  ;;  %v1339_v23 = vor.u32 4788187, %v1338_v36  ;;  %v1217_v7 = vadd.s32 536870912, %v1216_v8  ;;  %v1060_v62 = vor.u32 8388608, %v6383_v54  ;;  %v5428_v37 = vpop.eup %5427 }
 0x12a   :  { %v1080_v49 = vor.u32 %v1079_v32, %v1078_v22  ;;  %v1464_v59 = vxor.u32 2147483648, %v5426_v25  ;;  %v1074_v38 = vor.u32 %v1073_v10, %v1072_v1  ;;  %v1077_v2 = vor.u32 %v1076_v44, %v1075_v11 }
 0x12b   :  { %v1081_v58 = vshll.u32 %v10119_v56, %v10149_v34  ;;  %v1461_v48 = vxor.u32 2147483648, %v5428_v37  ;;  %v1340_v40 = vand.u32 2147483647, %v1339_v23  ;;  %v1342_v24 = vcvt.s32.f32 %v1335_v18 }
 0x12c   :  { %v1218_v21 = vshrl.u32 %v1217_v7, 30  ;;  %v1465_v12 = vsel %vm1463_vm1, %v1464_v59, %v5428_v37  ;;  %v1071_v15 = vor.u32 %v1070_v43, %v1069_v13  ;;  %vm1087_vm7 = vcmp.lt.s32.totalorder %v10150_v26, 4 }
 0x12d   :  { %v1083_v20 = vor.u32 %v1082_v51, %v1081_v58  ;;  %v1462_v54 = vsel %vm1460_vm9, %v5426_v25, %v1461_v48  ;;  %v1343_v32 = vmul.f32 %v1342_v24, %v1340_v40  ;;  %v1093_v44 = vsel %vm1087_vm7, %v1080_v49, 920167782  ;;  %v10151_v24 = vld [vmem:[#allocation6_spill] sm:$0xff] }
 0x12e   :  { %v1219_v10 = vshll.u32 %v1218_v21, 30  ;;  %vm775_vm10 = vcmp.lt.s32.totalorder %v6030_v46, 4  ;;  %v1466_v34 = vsel %vm1459_vm3, %v1462_v54, %v1465_v12  ;;  %vm1084_vm12 = vcmp.lt.s32.totalorder %v10150_v26, 1 }
 0x12f   :  { %vm1085_vm14 = vcmp.lt.s32.totalorder %v10150_v26, 2  ;;  %vm1086_vm15 = vcmp.lt.s32.totalorder %v10150_v26, 3  ;;  %v1467_v13 = vsel %vm1456_vm5, nan, %v1466_v34  ;;  %v1344_v18 = vxor.u32 2147483648, %v1343_v32 }
 0x130   :  { %v6427_v36 = vsub.s32 %v1216_v8, %v1219_v10  ;;  %v1096_v22 = vsel %vm1084_vm12, %v1074_v38, %v1077_v2  ;;  %1753 = vmatprep.subr.mxu0 %v1467_v13  ;;  %v1089_v30 = vsel %vm1087_vm7, %v1077_v2, 2102212464  ;;  %v1092_v43 = vsel %vm1084_vm12, %v1071_v15, %v1074_v38 }
 0x131   :  { %v1094_v1 = vsel %vm1086_vm15, %v1077_v2, %v1093_v44  ;;  %v1097_v6 = vsel %vm1087_vm7, %v1083_v20, 1326507024  ;;  %v1345_v8 = vsel %vm1262_vm2, %v1344_v18, %v1343_v32  ;;  %v1242_v51 = vsub.s32 4, %v1218_v21 }
 0x132   :  { %v1222_v11 = vsub.s32 0, %v6427_v36  ;;  %v1098_v25 = vsel %vm1086_vm15, %v1080_v49, %v1097_v6  ;;  %v1348_v23 = vsel %vm6338_vm6, %v5708_v3, %v1345_v8  ;;  %v1088_v7 = vsel %vm1084_vm12, %v1068_v42, %v1071_v15 }
 0x133   :  { %v1099_v37 = vsel %vm1085_vm14, %v1096_v22, %v1098_v25  ;;  %v1100_v59 = vshll.u32 %v1060_v62, 8  ;;  %5429 = vcosq.f32 %v1348_v23  ;;  %v1090_v58 = vsel %vm1086_vm15, %v1074_v38, %v1089_v30  ;;  %v10155_v30 = vld [vmem:[#allocation16_spill] sm:$0xff] }
 0x134   :  { %v5062_v2 = vmin.u32 %v1222_v11, %v6427_v36  ;;  %v1095_v49 = vsel %vm1085_vm14, %v1092_v43, %v1094_v1  ;;  %5431 = vsinq.f32 %v1348_v23  ;;  %vm1158_vm2 = vcmp.lt.s32.totalorder %v5712_v5, 0 }
 0x135   :  { %v6457_v60 = vmul.u32.u64.low %v1100_v59, %v1099_v37  ;;  %v6458_v48 = vmul.u32.u64.high %v1100_v59, %v1099_v37, %v6457_v60  ;;  %v6461_v42 = vand.u32 31, %v6221_v28  ;;  %v6465_v62 = vsel %vm1158_vm2, %v1242_v51, %v1218_v21 }
 0x136   :  { %v1224_v40 = vclz %v5062_v2  ;;  %v10000_v12 = vand.u32 2147483647, %v10151_v24  ;;  %v6469_v38 = vand.u32 3, %v6375_v33  ;;  %v1091_v15 = vsel %vm1085_vm14, %v1088_v7, %v1090_v58 }
 0x137   :  { %v6473_v20 = vmul.u32.u64.low %v1100_v59, %v1095_v49  ;;  %v6474_v54 = vmul.u32.u64.high %v1100_v59, %v1095_v49, %v6473_v20  ;;  %v6480_v28 = vsel %vm775_vm10, %v6359_v63, 920167782  ;;  %v6483_v21 = vsub.s32 32, %v6365_v39 }
 0x138   :  { %vm6487_vm0 = vcmp.le.f32.partialorder %v1156_v41, 0.7853982  ;;  %v5063_v26 = vadd.s32 4294967294, %v1224_v40  ;;  %v6493_v32 = vshll.u32 %v10118_v16, %v6365_v39  ;;  %v6497_v10 = vshll.u32 %v10119_v56, %v6365_v39 }
 0x139   :  { %v1212_v44 = vadd.s32 %v6352_v45, %v6347_v29  ;;  %v1107_v41 = vmul.u32 %v1100_v59, %v1091_v15  ;;  %vm1109_vm8 = vc.u32 %v6458_v48, %v6473_v20  ;;  %v6508_v13 = vand.u32 8388607, %v10000_v12  ;;  %v10156_v45 = vld [vmem:[#allocation11_spill] sm:$0xff] }
 0x13a   :  { %10154 = vst [vmem:[#allocation21_spill] sm:$0xff] %v6497_v10  ;;  %vm5064_vm6 = vcmp.lt.s32.totalorder %v5063_v26, 0  ;;  %vm1359_vm1 = vcmp.eq.s32.totalorder %v6469_v38, 2  ;;  %v1110_v22 = vadd.s32 1, %v6474_v54  ;;  %v6514_v29 = vshrl.u32 %v10128_v57, %v10155_v30  ;;  %v10157_v10 = vld [vmem:[#allocation15_spill] sm:$0xff] }
 0x13b   :  { %v1227_v18 = vsel %vm5064_vm6, 0, %v5063_v26  ;;  %v965_v43 = vshll.u32 %v10128_v57, %v10156_v45  ;;  %vm1356_vm9 = vcmp.eq.s32.totalorder %v6469_v38, 0  ;;  %v966_v8 = vshrl.u32 %v10113_v52, %v10155_v30 }
 0x13c   :  { %v1228_v1 = vsub.s32 32, %v1227_v18  ;;  %v1232_v6 = vsub.s32 4294967266, %v1227_v18  ;;  %v969_v11 = vshrl.u32 %v10129_v35, %v10155_v30  ;;  %vm1355_vm4 = vcmp.lt.s32.totalorder %v6469_v38, 2 }
 0x13d   :  { %v1229_v51 = vshll.u32 %v6427_v36, %v1227_v18  ;;  %v1111_v25 = vsel %vm1109_vm8, %v1110_v22, %v6474_v54  ;;  %v972_v23 = vshrl.u32 %v10118_v16, %v10155_v30  ;;  %v975_v7 = vshrl.u32 %v10119_v56, %v10155_v30 }
 0x13e   :  { %vm1352_vm3 = vweird.f32 %v5708_v3  ;;  %v1230_v37 = vshrl.u32 %v1212_v44, %v1228_v1  ;;  %v1233_v59 = vadd.s32 127, %v1232_v6  ;;  %v1112_v2 = vadd.s32 %v1111_v25, %v1107_v41 }
 0x13f   :  { %v974_v58 = vshll.u32 %v10118_v16, %v10156_v45  ;;  %v968_v49 = vshll.u32 %v10113_v52, %v10156_v45  ;;  %v971_v36 = vshll.u32 %v10129_v35, %v10156_v45  ;;  %v977_v60 = vshll.u32 %v10119_v56, %v10156_v45 }
 0x140   :  { %v978_v40 = vshrl.u32 %v10121_v55, %v10155_v30  ;;  %v1231_v15 = vor.u32 %v1230_v37, %v1229_v51  ;;  %v1234_v54 = vshll.u32 %v1233_v59, 23  ;;  %v1113_v26 = vadd.s32 536870912, %v1112_v2  ;;  %v5430_v41 = vpop.eup %5429 }
 0x141   :  { %v976_v44 = vor.u32 %v975_v7, %v974_v58  ;;  %v956_v18 = vor.u32 8388608, %v6508_v13  ;;  %v967_v22 = vor.u32 %v966_v8, %v965_v43  ;;  %v970_v1 = vor.u32 %v969_v11, %v968_v49  ;;  %v5432_v25 = vpop.eup %5431 }
 0x142   :  { %v979_v6 = vor.u32 %v978_v40, %v977_v60  ;;  %v1360_v12 = vxor.u32 2147483648, %v5430_v41  ;;  %v1235_v19 = vor.u32 4788187, %v1234_v54  ;;  %v1114_v61 = vshrl.u32 %v1113_v26, 30 }
 0x143   :  { %v973_v34 = vor.u32 %v972_v23, %v971_v36  ;;  %v1357_v39 = vxor.u32 2147483648, %v5432_v25  ;;  %v1238_v45 = vcvt.s32.f32 %v1231_v15  ;;  %vm980_vm5 = vcmp.lt.s32.totalorder %v10157_v10, 1 }
 0x144   :  { %vm983_vm7 = vcmp.lt.s32.totalorder %v10157_v10, 4  ;;  %v1361_v30 = vsel %vm1359_vm1, %v1360_v12, %v5432_v25  ;;  %v1236_v51 = vand.u32 2147483647, %v1235_v19  ;;  %v1115_v7 = vshll.u32 %v1114_v61, 30 }
 0x145   :  { %v989_v13 = vsel %vm983_vm7, %v976_v44, 920167782  ;;  %v1358_v43 = vsel %vm1356_vm9, %v5430_v41, %v1357_v39  ;;  %vm981_vm12 = vcmp.lt.s32.totalorder %v10157_v10, 2  ;;  %vm982_vm14 = vcmp.lt.s32.totalorder %v10157_v10, 3 }
 0x146   :  { %v993_v8 = vsel %vm983_vm7, %v979_v6, 1326507024  ;;  %v1362_v11 = vsel %vm1355_vm4, %v1358_v43, %v1361_v30  ;;  %v1239_v23 = vmul.f32 %v1238_v45, %v1236_v51  ;;  %v6552_v37 = vsub.s32 %v1112_v2, %v1115_v7 }
 0x147   :  { %v992_v12 = vsel %vm980_vm5, %v970_v1, %v973_v34  ;;  %v1363_v19 = vsel %vm1352_vm3, nan, %v1362_v11  ;;  %v985_v59 = vsel %vm983_vm7, %v973_v34, 2102212464  ;;  %v988_v39 = vsel %vm980_vm5, %v967_v22, %v970_v1 }
 0x148   :  { %v990_v58 = vsel %vm982_vm14, %v973_v34, %v989_v13  ;;  %1754 = vmatpush1.msra.mxu0 %v1363_v19  ;;  %v1240_v49 = vxor.u32 2147483648, %v1239_v23  ;;  %v1118_v38 = vsub.s32 0, %v6552_v37  ;;  %v1138_v36 = vsub.s32 4, %v1114_v61 }
 0x149   :  { %v994_v2 = vsel %vm982_vm14, %v976_v44, %v993_v8  ;;  %v10158_v3 = vsel %vm6487_vm0, 0, %v6465_v62  ;;  %vm1054_vm15 = vcmp.lt.s32.totalorder %v5710_v4, 0  ;;  %v996_v15 = vshll.u32 %v956_v18, 8 }
 0x14a   :  { %v1249_v60 = vadd.s32 3, %v10158_v3  ;;  %v995_v40 = vsel %vm981_vm12, %v992_v12, %v994_v2  ;;  %v1241_v34 = vsel %vm1158_vm2, %v1240_v49, %v1239_v23  ;;  %v5058_v54 = vmin.u32 %v1118_v38, %v6552_v37 }
 0x14b   :  { %v984_v26 = vsel %vm980_vm5, %v6514_v29, %v967_v22  ;;  %v991_v44 = vsel %vm981_vm12, %v988_v39, %v990_v58  ;;  %v1244_v62 = vsel %vm6487_vm0, %v5712_v5, %v1241_v34  ;;  %v986_v41 = vsel %vm982_vm14, %v970_v1, %v985_v59  ;;  %v10160_v1 = vld [vmem:[#allocation5_spill] sm:$0xff] }
 0x14c   :  { %v6585_v18 = vmul.u32.u64.low %v996_v15, %v995_v40  ;;  %v6586_v6 = vmul.u32.u64.high %v996_v15, %v995_v40, %v6585_v18  ;;  %v10159_v25 = vor.u32 %v6156_v17, %v6136_v31  ;;  %5433 = vcosq.f32 %v1244_v62 }
 0x14d   :  { %v1120_v29 = vclz %v5058_v54  ;;  %v1139_v22 = vsel %vm1054_vm15, %v1138_v36, %v1114_v61  ;;  %5435 = vsinq.f32 %v1244_v62  ;;  %v10004_v51 = vand.u32 2147483647, %v10160_v1  ;;  %v10164_v36 = vld [vmem:[#allocation14_spill] sm:$0xff] }
 0x14e   :  { %v6593_v45 = vsel %vm775_vm10, %v10159_v25, 1326507024  ;;  %v6597_v33 = vmul.u32.u64.low %v996_v15, %v991_v44  ;;  %v6598_v30 = vmul.u32.u64.high %v996_v15, %v991_v44, %v6597_v33  ;;  %v6603_v7 = vsub.s32 32, %v6461_v42 }
 0x14f   :  { %v6607_v31 = vshll.u32 %v10118_v16, %v6461_v42  ;;  %v5059_v17 = vadd.s32 4294967294, %v1120_v29  ;;  %v987_v13 = vsel %vm981_vm12, %v984_v26, %v986_v41  ;;  %v6613_v61 = vshrl.u32 %v10119_v56, %v6483_v21  ;;  %v10165_v26 = vld [vmem:[#allocation9_spill] sm:$0xff] }
 0x150   :  { %v6617_v43 = vshll.u32 %v10119_v56, %v6461_v42  ;;  %v6619_v8 = vand.u32 3, %v1249_v60  ;;  %v10161_v11 = vand.u32 2147483647, %v5710_v4  ;;  %v1108_v10 = vadd.s32 %v6473_v20, %v6458_v48 }
 0x151   :  { %vm5060_vm0 = vcmp.lt.s32.totalorder %v5059_v17, 0  ;;  %vm1005_vm6 = vc.u32 %v6586_v6, %v6597_v33  ;;  %v1003_v59 = vmul.u32 %v996_v15, %v987_v13  ;;  %v1006_v39 = vadd.s32 1, %v6598_v30 }
 0x152   :  { %vm6623_vm2 = vcmp.le.f32.partialorder %v10161_v11, 0.7853982  ;;  %v1123_v19 = vsel %vm5060_vm0, 0, %v5059_v17  ;;  %v851_v58 = vand.u32 8388607, %v10004_v51  ;;  %v862_v2 = vshrl.u32 %v10113_v52, %v10164_v36 }
 0x153   :  { %v1141_v12 = vsel %vm6623_vm2, 0, %v1139_v22  ;;  %v1124_v49 = vsub.s32 32, %v1123_v19  ;;  %v1128_v38 = vsub.s32 4294967266, %v1123_v19  ;;  %v865_v48 = vshrl.u32 %v10129_v35, %v10164_v36 }
 0x154   :  { %v1125_v20 = vshll.u32 %v6552_v37, %v1123_v19  ;;  %v1007_v3 = vsel %vm1005_vm6, %v1006_v39, %v6598_v30  ;;  %v868_v60 = vshrl.u32 %v10118_v16, %v10164_v36  ;;  %v871_v40 = vshrl.u32 %v10119_v56, %v10164_v36 }
 0x155   :  { %vm1252_vm8 = vcmp.eq.s32.totalorder %v6619_v8, 0  ;;  %v1126_v15 = vshrl.u32 %v1108_v10, %v1124_v49  ;;  %v1129_v34 = vadd.s32 127, %v1128_v38  ;;  %v1008_v54 = vadd.s32 %v1007_v3, %v1003_v59 }
 0x156   :  { %v870_v44 = vshll.u32 %v10118_v16, %v10165_v26  ;;  %vm1251_vm1 = vcmp.lt.s32.totalorder %v6619_v8, 2  ;;  %v864_v37 = vshll.u32 %v10113_v52, %v10165_v26  ;;  %v867_v62 = vshll.u32 %v10129_v35, %v10165_v26 }
 0x157   :  { %v873_v41 = vshll.u32 %v10119_v56, %v10165_v26  ;;  %v874_v18 = vshrl.u32 %v10121_v55, %v10164_v36  ;;  %vm1248_vm9 = vweird.f32 %v5712_v5  ;;  %v1127_v25 = vor.u32 %v1126_v15, %v1125_v20  ;;  %v10166_v20 = vld [vmem:[#allocation13_spill] sm:$0xff] }
 0x158   :  { %v1130_v29 = vshll.u32 %v1129_v34, 23  ;;  %v1009_v22 = vadd.s32 536870912, %v1008_v54  ;;  %v872_v30 = vor.u32 %v871_v40, %v870_v44  ;;  %vm1255_vm4 = vcmp.eq.s32.totalorder %v6619_v8, 2 }
 0x159   :  { %v1145_v17 = vadd.s32 3, %v1141_v12  ;;  %v861_v13 = vshll.u32 %v10128_v57, %v10165_v26  ;;  %v875_v11 = vor.u32 %v874_v18, %v873_v41  ;;  %v866_v59 = vor.u32 %v865_v48, %v864_v37  ;;  %v5434_v49 = vpop.eup %5433 }
 0x15a   :  { %v1131_v10 = vor.u32 4788187, %v1130_v29  ;;  %v6662_v19 = vshrl.u32 %v1009_v22, 30  ;;  %v869_v39 = vor.u32 %v868_v60, %v867_v62  ;;  %v1134_v38 = vcvt.s32.f32 %v1127_v25  ;;  %v5436_v15 = vpop.eup %5435 }
 0x15b   :  { %v852_v3 = vor.u32 8388608, %v851_v58  ;;  %v863_v51 = vor.u32 %v862_v2, %v861_v13  ;;  %vm879_vm3 = vcmp.lt.s32.totalorder %v10166_v20, 4  ;;  %v1256_v40 = vxor.u32 2147483648, %v5434_v49 }
 0x15c   :  { %v1132_v34 = vand.u32 2147483647, %v1131_v10  ;;  %v1011_v12 = vshll.u32 %v6662_v19, 30  ;;  %v885_v26 = vsel %vm879_vm3, %v872_v30, 920167782  ;;  %v1253_v44 = vxor.u32 2147483648, %v5436_v15 }
 0x15d   :  { %vm876_vm5 = vcmp.lt.s32.totalorder %v10166_v20, 1  ;;  %vm878_vm7 = vcmp.lt.s32.totalorder %v10166_v20, 3  ;;  %v889_v48 = vsel %vm879_vm3, %v875_v11, 1326507024  ;;  %v1257_v58 = vsel %vm1255_vm4, %v1256_v40, %v5436_v15 }
 0x15e   :  { %v1135_v2 = vmul.f32 %v1134_v38, %v1132_v34  ;;  %v6674_v60 = vsub.s32 %v1008_v54, %v1011_v12  ;;  %v888_v37 = vsel %vm876_vm5, %v866_v59, %v869_v39  ;;  %v1254_v62 = vsel %vm1252_vm8, %v5434_v49, %v1253_v44 }
 0x15f   :  { %v884_v41 = vsel %vm876_vm5, %v863_v51, %v866_v59  ;;  %v886_v18 = vsel %vm878_vm7, %v869_v39, %v885_v26  ;;  %v890_v25 = vsel %vm878_vm7, %v872_v30, %v889_v48  ;;  %v1258_v29 = vsel %vm1251_vm1, %v1254_v62, %v1257_v58 }
 0x160   :  { %v1136_v54 = vxor.u32 2147483648, %v1135_v2  ;;  %v1014_v22 = vsub.s32 0, %v6674_v60  ;;  %vm877_vm12 = vcmp.lt.s32.totalorder %v10166_v20, 2  ;;  %v1259_v13 = vsel %vm1248_vm9, nan, %v1258_v29 }
 0x161   :  { %v881_v11 = vsel %vm879_vm3, %v869_v39, 2102212464  ;;  %v891_v10 = vsel %vm877_vm12, %v888_v37, %v890_v25  ;;  %v892_v49 = vshll.u32 %v852_v3, 8  ;;  %1755 = vmatprep.subr.mxu0 %v1259_v13  ;;  %v860_v38 = vshrl.u32 %v10128_v57, %v10164_v36  ;;  %v10167_v3 = vld [vmem:[#allocation12_spill] sm:$0xff] }
 0x162   :  { %v1137_v8 = vsel %vm1054_vm15, %v1136_v54, %v1135_v2  ;;  %v5054_v30 = vmin.u32 %v1014_v22, %v6674_v60  ;;  %v887_v5 = vsel %vm877_vm12, %v884_v41, %v886_v18  ;;  %v740_v34 = vand.u32 2147483647, %v10167_v3 }
 0x163   :  { %v1140_v39 = vsel %vm6623_vm2, %v5710_v4, %v1137_v8  ;;  %v6706_v15 = vmul.u32.u64.low %v892_v49, %v891_v10  ;;  %v6707_v40 = vmul.u32.u64.high %v892_v49, %v891_v10, %v6706_v15  ;;  %v880_v26 = vsel %vm876_vm5, %v860_v38, %v863_v51 }
 0x164   :  { %5437 = vcosq.f32 %v1140_v39  ;;  %v1016_v12 = vclz %v5054_v30  ;;  %v882_v36 = vsel %vm878_vm7, %v866_v59, %v881_v11  ;;  %v6716_v44 = vshrl.u32 %v10119_v56, %v6603_v7 }
 0x165   :  { %5439 = vsinq.f32 %v1140_v39  ;;  %v6718_v23 = vmul.u32.u64.low %v892_v49, %v887_v5  ;;  %v6719_v48 = vmul.u32.u64.high %v892_v49, %v887_v5, %v6718_v23  ;;  %v6724_v58 = vshrl.u32 %v10121_v55, %v6603_v7 }
 0x166   :  { %v6726_v2 = vand.u32 3, %v1145_v17  ;;  %vm950_vm14 = vcmp.lt.s32.totalorder %v10151_v24, 0  ;;  %v5055_v51 = vadd.s32 4294967294, %v1016_v12  ;;  %v1004_v59 = vadd.s32 %v6597_v33, %v6586_v6 }
 0x167   :  { %v1034_v37 = vsub.s32 4, %v6662_v19  ;;  %v883_v62 = vsel %vm877_vm12, %v880_v26, %v882_v36  ;;  %v747_v41 = vand.u32 8388607, %v740_v34  ;;  %vm901_vm2 = vc.u32 %v6707_v40, %v6718_v23 }
 0x168   :  { %vm5056_vm15 = vcmp.lt.s32.totalorder %v5055_v51, 0  ;;  %v757_v17 = vshll.u32 %v10128_v57, %v6015_v47  ;;  %v758_v18 = vshrl.u32 %v10113_v52, %v6053_v14  ;;  %v902_v6 = vadd.s32 1, %v6719_v48 }
 0x169   :  { %v1019_v25 = vsel %vm5056_vm15, 0, %v5055_v51  ;;  %v760_v33 = vshll.u32 %v10113_v52, %v6015_v47  ;;  %v761_v20 = vshrl.u32 %v10129_v35, %v6053_v14  ;;  %v899_v22 = vmul.u32 %v892_v49, %v883_v62 }
 0x16a   :  { %v1020_v29 = vsub.s32 32, %v1019_v25  ;;  %v1024_v54 = vsub.s32 4294967266, %v1019_v25  ;;  %v763_v13 = vshll.u32 %v10129_v35, %v6015_v47  ;;  %vm1151_vm0 = vcmp.eq.s32.totalorder %v6726_v2, 2 }
 0x16b   :  { %v903_v11 = vsel %vm901_vm2, %v902_v6, %v6719_v48  ;;  %v759_v10 = vor.u32 %v758_v18, %v757_v17  ;;  %v762_v8 = vor.u32 %v761_v20, %v760_v33  ;;  %v764_v30 = vshrl.u32 %v10118_v16, %v6053_v14 }
 0x16c   :  { %vm1148_vm6 = vcmp.eq.s32.totalorder %v6726_v2, 0  ;;  %v10168_v38 = vand.u32 2147483647, %v10151_v24  ;;  %v1021_v49 = vshll.u32 %v6674_v60, %v1019_v25  ;;  %v1022_v47 = vshrl.u32 %v1004_v59, %v1020_v29 }
 0x16d   :  { %v1025_v39 = vadd.s32 127, %v1024_v54  ;;  %v904_v15 = vadd.s32 %v903_v11, %v899_v22  ;;  %vm1147_vm1 = vcmp.lt.s32.totalorder %v6726_v2, 2  ;;  %v748_v12 = vor.u32 8388608, %v747_v41 }
 0x16e   :  { %vm6756_vm8 = vcmp.le.f32.partialorder %v10168_v38, 0.7853982  ;;  %v765_v26 = vor.u32 %v764_v30, %v763_v13  ;;  %vm772_vm9 = vcmp.lt.s32.totalorder %v6030_v46, 1  ;;  %vm774_vm4 = vcmp.lt.s32.totalorder %v6030_v46, 3 }
 0x16f   :  { %v1023_v36 = vor.u32 %v1022_v47, %v1021_v49  ;;  %v1026_v48 = vshll.u32 %v1025_v39, 23  ;;  %v905_v51 = vadd.s32 536870912, %v904_v15  ;;  %v786_v62 = vsel %vm774_vm4, %v6359_v63, %v6593_v45 }
 0x170   :  { %v1035_v60 = vsel %vm950_vm14, %v1034_v37, %v6662_v19  ;;  %v780_v59 = vsel %vm772_vm9, %v759_v10, %v762_v8  ;;  %v782_v41 = vsel %vm774_vm4, %v765_v26, %v6480_v28  ;;  %v784_v17 = vsel %vm772_vm9, %v762_v8, %v765_v26 }
 0x171   :  { %v1027_v18 = vor.u32 4788187, %v1026_v48  ;;  %v6778_v25 = vshrl.u32 %v905_v51, 30  ;;  %v756_v63 = vshrl.u32 %v10128_v57, %v6053_v14  ;;  %vm773_vm3 = vcmp.lt.s32.totalorder %v6030_v46, 2  ;;  %v5438_v45 = vpop.eup %5437 }
 0x172   :  { %v1030_v19 = vcvt.s32.f32 %v1023_v36  ;;  %v777_v37 = vsel %vm775_vm10, %v765_v26, 2102212464  ;;  %v787_v6 = vsel %vm773_vm3, %v784_v17, %v786_v62  ;;  %v788_v28 = vshll.u32 %v748_v12, 8  ;;  %v5440_v33 = vpop.eup %5439  ;;  %v10171_v17 = vld [vmem:[#allocation7_spill] sm:$0xff] }
 0x173   :  { %v1152_v20 = vxor.u32 2147483648, %v5438_v45  ;;  %v1028_v29 = vand.u32 2147483647, %v1027_v18  ;;  %v907_v54 = vshll.u32 %v6778_v25, 30  ;;  %v783_v22 = vsel %vm773_vm3, %v780_v59, %v782_v41 }
 0x174   :  { %v1149_v14 = vxor.u32 2147483648, %v5440_v33  ;;  %v776_v13 = vsel %vm772_vm9, %v756_v63, %v759_v10  ;;  %v6792_v11 = vmul.u32.u64.low %v788_v28, %v787_v6  ;;  %v6793_v30 = vmul.u32.u64.high %v788_v28, %v787_v6, %v6792_v11 }
 0x175   :  { %v1153_v38 = vsel %vm1151_vm0, %v1152_v20, %v5440_v33  ;;  %v1031_v49 = vmul.f32 %v1030_v19, %v1028_v29  ;;  %v6797_v47 = vsub.s32 %v904_v15, %v907_v54  ;;  %v778_v39 = vsel %vm774_vm4, %v762_v8, %v777_v37  ;;  %v10172_v33 = vld [vmem:[#allocation27_spill] sm:$0xff]  ;;  %v10173_v29 = vld [vmem:[#allocation22_spill] sm:$0xff] }
 0x176   :  { %v1150_v12 = vsel %vm1148_vm6, %v5438_v45, %v1149_v14  ;;  %v1037_v26 = vsel %vm6756_vm8, 0, %v1035_v60  ;;  %v6805_v36 = vmul.u32.u64.low %v788_v28, %v783_v22  ;;  %v6806_v10 = vmul.u32.u64.high %v788_v28, %v783_v22, %v6805_v36 }
 0x177   :  { %vm1144_vm10 = vweird.f32 %v5710_v4  ;;  %v1154_v48 = vsel %vm1147_vm1, %v1150_v12, %v1153_v38  ;;  %v1032_v15 = vxor.u32 2147483648, %v1031_v49  ;;  %v910_v51 = vsub.s32 0, %v6797_v47 }
 0x178   :  { %v6815_v8 = vor.u32 %v6716_v44, %v6607_v31  ;;  %v563_v62 = vor.u32 %v6724_v58, %v6617_v43  ;;  %v1155_v60 = vsel %vm1144_vm10, nan, %v1154_v48  ;;  %v779_v59 = vsel %vm773_vm3, %v776_v13, %v778_v39 }
 0x179   :  { %1756 = vmatpush1.msra.mxu0 %v1155_v60  ;;  %v1033_v4 = vsel %vm950_vm14, %v1032_v15, %v1031_v49  ;;  %v1041_v2 = vadd.s32 3, %v1037_v26  ;;  %v5050_v41 = vmin.u32 %v910_v51, %v6797_v47  ;;  %vm797_vm5 = vc.u32 %v6793_v30, %v6805_v36 }
 0x17a   :  { %v6828_v31 = vshrl.u32 %v10121_v55, %v6483_v21  ;;  %vm567_vm7 = vcmp.lt.s32.totalorder %v6370_v53, 4  ;;  %v1036_v46 = vsel %vm6756_vm8, %v10151_v24, %v1033_v4  ;;  %v798_v43 = vadd.s32 1, %v6806_v10 }
 0x17b   :  { %5441 = vcosq.f32 %v1036_v46  ;;  %v912_v44 = vclz %v5050_v41  ;;  %v795_v58 = vmul.u32 %v788_v28, %v779_v59  ;;  %v636_v18 = vand.u32 2147483647, %v10171_v17 }
 0x17c   :  { %v6839_v63 = vsel %vm567_vm7, %v6815_v8, 920167782  ;;  %v6843_v45 = vsel %vm567_vm7, %v563_v62, 1326507024  ;;  %5443 = vsinq.f32 %v1036_v46  ;;  %v799_v5 = vsel %vm797_vm5, %v798_v43, %v6806_v10 }
 0x17d   :  { %v6846_v19 = vand.u32 3, %v1041_v2  ;;  %vm846_vm12 = vcmp.lt.s32.totalorder %v10160_v1, 0  ;;  %v5051_v37 = vadd.s32 4294967294, %v912_v44  ;;  %v800_v6 = vadd.s32 %v799_v5, %v795_v58 }
 0x17e   :  { %v900_v28 = vadd.s32 %v6718_v23, %v6707_v40  ;;  %v654_v20 = vshrl.u32 %v10113_v52, %v10172_v33  ;;  %v656_v54 = vshll.u32 %v10113_v52, %v10173_v29  ;;  %v657_v22 = vshrl.u32 %v10129_v35, %v10172_v33 }
 0x17f   :  { %vm5052_vm14 = vcmp.lt.s32.totalorder %v5051_v37, 0  ;;  %v801_v14 = vadd.s32 536870912, %v800_v6  ;;  %v643_v13 = vand.u32 8388607, %v636_v18  ;;  %v660_v11 = vshrl.u32 %v10118_v16, %v10172_v33 }
 0x180   :  { %v915_v38 = vsel %vm5052_vm14, 0, %v5051_v37  ;;  %v653_v40 = vshll.u32 %v10128_v57, %v10173_v29  ;;  %v658_v23 = vor.u32 %v657_v22, %v656_v54  ;;  %v659_v49 = vshll.u32 %v10129_v35, %v10173_v29  ;;  %v10177_v22 = vld [vmem:[#allocation37_spill] sm:$0xff] }
 0x181   :  { %v10174_v39 = vand.u32 2147483647, %v10160_v1  ;;  %v916_v26 = vsub.s32 32, %v915_v38  ;;  %v920_v10 = vsub.s32 4294967266, %v915_v38  ;;  %v930_v48 = vsub.s32 4, %v6778_v25 }
 0x182   :  { %v6872_v15 = vshrl.u32 %v801_v14, 30  ;;  %v917_v51 = vshll.u32 %v6797_v47, %v915_v38  ;;  %v655_v62 = vor.u32 %v654_v20, %v653_v40  ;;  %v661_v60 = vor.u32 %v660_v11, %v659_v49 }
 0x183   :  { %vm6867_vm15 = vcmp.le.f32.partialorder %v10174_v39, 0.7853982  ;;  %vm668_vm2 = vcmp.lt.s32.totalorder %v5887_v0, 1  ;;  %v918_v59 = vshrl.u32 %v900_v28, %v916_v26  ;;  %v921_v4 = vadd.s32 127, %v920_v10 }
 0x184   :  { %v803_v2 = vshll.u32 %v6872_v15, 30  ;;  %vm670_vm0 = vcmp.lt.s32.totalorder %v5887_v0, 3  ;;  %v644_v41 = vor.u32 8388608, %v643_v13  ;;  %v652_v46 = vshrl.u32 %v10128_v57, %v10172_v33 }
 0x185   :  { %v680_v43 = vsel %vm668_vm2, %v658_v23, %v661_v60  ;;  %v682_v47 = vsel %vm670_vm0, %v6027_v27, %v6132_v50  ;;  %vm1040_vm6 = vweird.f32 %v10151_v24  ;;  %v919_v44 = vor.u32 %v918_v59, %v917_v51 }
 0x186   :  { %v922_v58 = vshll.u32 %v921_v4, 23  ;;  %v6887_v5 = vsub.s32 %v800_v6, %v803_v2  ;;  %v673_v37 = vsel %vm671_vm11, %v661_v60, 2102212464  ;;  %vm1044_vm8 = vcmp.eq.s32.totalorder %v6846_v19, 0  ;;  %v10178_v2 = vld [vmem:[#allocation18_spill] sm:$0xff] }
 0x187   :  { %vm1047_vm1 = vcmp.eq.s32.totalorder %v6846_v19, 2  ;;  %v931_v28 = vsel %vm846_vm12, %v930_v48, %v6778_v25  ;;  %vm669_vm9 = vcmp.lt.s32.totalorder %v5887_v0, 2  ;;  %v672_v6 = vsel %vm668_vm2, %v652_v46, %v655_v62 }
 0x188   :  { %v923_v27 = vor.u32 4788187, %v922_v58  ;;  %v806_v50 = vsub.s32 0, %v6887_v5  ;;  %v683_v33 = vsel %vm669_vm9, %v680_v43, %v682_v47  ;;  %v5442_v20 = vpop.eup %5441  ;;  %v674_v29 = vsel %vm670_vm0, %v658_v23, %v673_v37 }
 0x189   :  { %v676_v54 = vsel %vm668_vm2, %v655_v62, %v658_v23  ;;  %v678_v25 = vsel %vm670_vm0, %v661_v60, %v10177_v22  ;;  %v684_v14 = vshll.u32 %v644_v41, 8  ;;  %v5444_v13 = vpop.eup %5443  ;;  %v1048_v11 = vxor.u32 2147483648, %v5442_v20 }
 0x18a   :  { %v924_v38 = vand.u32 2147483647, %v923_v27  ;;  %v926_v40 = vcvt.s32.f32 %v919_v44  ;;  %v5046_v49 = vmin.u32 %v806_v50, %v6887_v5  ;;  %v1045_v39 = vxor.u32 2147483648, %v5444_v13 }
 0x18b   :  { %v933_v26 = vsel %vm6867_vm15, 0, %v931_v28  ;;  %v6912_v10 = vmul.u32.u64.low %v684_v14, %v683_v33  ;;  %v6913_v48 = vmul.u32.u64.high %v684_v14, %v683_v33, %v6912_v10  ;;  %v1049_v23 = vsel %vm1047_vm1, %v1048_v11, %v5444_v13 }
 0x18c   :  { %v927_v51 = vmul.f32 %v926_v40, %v924_v38  ;;  %v808_v62 = vclz %v5046_v49  ;;  %v679_v60 = vsel %vm669_vm9, %v676_v54, %v678_v25  ;;  %vm1043_vm11 = vcmp.lt.s32.totalorder %v6846_v19, 2 }
 0x18d   :  { %v1046_v59 = vsel %vm1044_vm8, %v5442_v20, %v1045_v39  ;;  %v675_v4 = vsel %vm669_vm9, %v672_v6, %v674_v29  ;;  %v532_v41 = vand.u32 2147483647, %v10178_v2  ;;  %v937_v47 = vadd.s32 3, %v933_v26 }
 0x18e   :  { %v1050_v46 = vsel %vm1043_vm11, %v1046_v59, %v1049_v23  ;;  %v928_v43 = vxor.u32 2147483648, %v927_v51  ;;  %vm742_vm4 = vcmp.lt.s32.totalorder %v10167_v3, 0  ;;  %v5047_v44 = vadd.s32 4294967294, %v808_v62 }
 0x18f   :  { %v1051_v58 = vsel %vm1040_vm6, nan, %v1050_v46  ;;  %v796_v37 = vadd.s32 %v6805_v36, %v6793_v30  ;;  %v6930_v28 = vmul.u32.u64.low %v684_v14, %v679_v60  ;;  %v6931_v19 = vmul.u32.u64.high %v684_v14, %v679_v60, %v6930_v28 }
 0x190   :  { %1757 = vmatprep.subr.mxu0 %v1051_v58  ;;  %v929_v0 = vsel %vm846_vm12, %v928_v43, %v927_v51  ;;  %vm5048_vm3 = vcmp.lt.s32.totalorder %v5047_v44, 0  ;;  %v826_v27 = vsub.s32 4, %v6872_v15  ;;  %v691_v50 = vmul.u32 %v684_v14, %v675_v4 }
 0x191   :  { %v932_v24 = vsel %vm6867_vm15, %v10160_v1, %v929_v0  ;;  %v811_v6 = vsel %vm5048_vm3, 0, %v5047_v44  ;;  %v539_v30 = vand.u32 8388607, %v532_v41  ;;  %v549_v36 = vshll.u32 %v10128_v57, %v6461_v42 }
 0x192   :  { %5445 = vcosq.f32 %v932_v24  ;;  %vm6946_vm10 = vcmp.le.f32.partialorder %v740_v34, 0.7853982  ;;  %v812_v20 = vsub.s32 32, %v811_v6  ;;  %v816_v29 = vsub.s32 4294967266, %v811_v6 }
 0x193   :  { %vm693_vm5 = vc.u32 %v6913_v48, %v6930_v28  ;;  %5447 = vsinq.f32 %v932_v24  ;;  %v813_v12 = vshll.u32 %v6887_v5, %v811_v6  ;;  %v694_v54 = vadd.s32 1, %v6931_v19 }
 0x194   :  { %v550_v22 = vshrl.u32 %v10113_v52, %v6603_v7  ;;  %v814_v25 = vshrl.u32 %v796_v37, %v812_v20  ;;  %v817_v14 = vadd.s32 127, %v816_v29  ;;  %v552_v34 = vshll.u32 %v10113_v52, %v6461_v42 }
 0x195   :  { %v553_v13 = vshrl.u32 %v10129_v35, %v6603_v7  ;;  %v695_v11 = vsel %vm693_vm5, %v694_v54, %v6931_v19  ;;  %v555_v40 = vshll.u32 %v10129_v35, %v6461_v42  ;;  %v556_v5 = vshrl.u32 %v10118_v16, %v6603_v7 }
 0x196   :  { %v551_v38 = vor.u32 %v550_v22, %v549_v36  ;;  %v815_v49 = vor.u32 %v814_v25, %v813_v12  ;;  %v818_v39 = vshll.u32 %v817_v14, 23  ;;  %v696_v26 = vadd.s32 %v695_v11, %v691_v50  ;;  %v10181_v25 = vld [vmem:[#allocation21_spill] sm:$0xff] }
 0x197   :  { %v554_v10 = vor.u32 %v553_v13, %v552_v34  ;;  %v938_v23 = vand.u32 3, %v937_v47  ;;  %v827_v51 = vsel %vm742_vm4, %v826_v27, %v6872_v15  ;;  %v540_v62 = vor.u32 8388608, %v539_v30 }
 0x198   :  { %v557_v60 = vor.u32 %v556_v5, %v555_v40  ;;  %v819_v59 = vor.u32 4788187, %v818_v39  ;;  %v697_v4 = vadd.s32 536870912, %v696_v26  ;;  %vm564_vm12 = vcmp.lt.s32.totalorder %v6370_v53, 1 }
 0x199   :  { %vm566_vm14 = vcmp.lt.s32.totalorder %v6370_v53, 3  ;;  %vm565_vm15 = vcmp.lt.s32.totalorder %v6370_v53, 2  ;;  %v572_v42 = vsel %vm564_vm12, %v551_v38, %v554_v10  ;;  %v822_v47 = vcvt.s32.f32 %v815_v49 }
 0x19a   :  { %v574_v46 = vsel %vm566_vm14, %v557_v60, %v6839_v63  ;;  %v576_v15 = vsel %vm564_vm12, %v554_v10, %v557_v60  ;;  %v820_v43 = vand.u32 2147483647, %v819_v59  ;;  %v6978_v44 = vshrl.u32 %v697_v4, 30 }
 0x19b   :  { %v575_v58 = vsel %vm565_vm15, %v572_v42, %v574_v46  ;;  %v829_v37 = vsel %vm6946_vm10, 0, %v827_v51  ;;  %v569_v19 = vsel %vm567_vm7, %v557_v60, 2102212464  ;;  %v578_v63 = vsel %vm566_vm14, %v6815_v8, %v6843_v45 }
 0x19c   :  { %v580_v0 = vshll.u32 %v540_v62, 8  ;;  %vm463_vm2 = vcmp.lt.s32.totalorder %v6362_v9, 4  ;;  %v823_v27 = vmul.f32 %v822_v47, %v820_v43  ;;  %v699_v50 = vshll.u32 %v6978_v44, 30  ;;  %v10182_v62 = vld [vmem:[#allocation17_spill] sm:$0xff] }
 0x19d   :  { %v548_v24 = vshrl.u32 %v10128_v57, %v6603_v7  ;;  %v579_v6 = vsel %vm565_vm15, %v576_v15, %v578_v63  ;;  %v570_v54 = vsel %vm566_vm14, %v554_v10, %v569_v19  ;;  %v7011_v22 = vor.u32 %v6613_v61, %v6493_v32 }
 0x19e   :  { %v6996_v30 = vmul.u32.u64.low %v580_v0, %v579_v6  ;;  %v6997_v36 = vmul.u32.u64.high %v580_v0, %v579_v6, %v6996_v30  ;;  %v6999_v20 = vmul.u32.u64.low %v580_v0, %v575_v58  ;;  %v7000_v29 = vmul.u32.u64.high %v580_v0, %v575_v58, %v6999_v20  ;;  %v10183_v58 = vld [vmem:[#allocation38_spill] sm:$0xff] }
 0x19f   :  { %v824_v8 = vxor.u32 2147483648, %v823_v27  ;;  %v7003_v45 = vsub.s32 %v696_v26, %v699_v50  ;;  %v568_v12 = vsel %vm564_vm12, %v548_v24, %v551_v38  ;;  %v5446_v7 = vpop.eup %5445  ;;  %v459_v14 = vor.u32 %v6828_v31, %v10181_v25 }
 0x1a0   :  { %vm936_vm7 = vweird.f32 %v10160_v1  ;;  %vm940_vm0 = vcmp.eq.s32.totalorder %v938_v23, 0  ;;  %v5448_v34 = vpop.eup %5447  ;;  %vm943_vm6 = vcmp.eq.s32.totalorder %v938_v23, 2  ;;  %v944_v13 = vxor.u32 2147483648, %v5446_v7 }
 0x1a1   :  { %v825_v11 = vsel %vm742_vm4, %v824_v8, %v823_v27  ;;  %v702_v38 = vsub.s32 0, %v7003_v45  ;;  %v941_v40 = vxor.u32 2147483648, %v5448_v34  ;;  %v833_v61 = vadd.s32 3, %v829_v37 }
 0x1a2   :  { %v828_v32 = vsel %vm6946_vm10, %v10167_v3, %v825_v11  ;;  %v571_v31 = vsel %vm565_vm15, %v568_v12, %v570_v54  ;;  %v945_v5 = vsel %vm943_vm6, %v944_v13, %v5448_v34  ;;  %vm589_vm8 = vc.u32 %v6997_v36, %v6999_v20  ;;  %v10186_v34 = vld [vmem:[#allocation25_spill] sm:$0xff] }
 0x1a3   :  { %5449 = vcosq.f32 %v828_v32  ;;  %v5042_v49 = vmin.u32 %v702_v38, %v7003_v45  ;;  %vm939_vm1 = vcmp.lt.s32.totalorder %v938_v23, 2  ;;  %v942_v39 = vsel %vm940_vm0, %v5446_v7, %v941_v40 }
 0x1a4   :  { %5451 = vsinq.f32 %v828_v32  ;;  %v590_v26 = vadd.s32 1, %v7000_v29  ;;  %v946_v10 = vsel %vm939_vm1, %v942_v39, %v945_v5  ;;  %v587_v51 = vmul.u32 %v580_v0, %v571_v31 }
 0x1a5   :  { %v704_v33 = vclz %v5042_v49  ;;  %v428_v60 = vand.u32 2147483647, %v10182_v62  ;;  %v469_v53 = vsel %vm463_vm2, %v7011_v22, 920167782  ;;  %v947_v59 = vsel %vm936_vm7, nan, %v946_v10 }
 0x1a6   :  { %v7035_v4 = vand.u32 3, %v833_v61  ;;  %v591_v23 = vsel %vm589_vm8, %v590_v26, %v7000_v29  ;;  %v473_v42 = vsel %vm463_vm2, %v459_v14, 1326507024  ;;  %1758 = vmatpush1.msra.mxu0 %v947_v59  ;;  %vm638_vm9 = vcmp.lt.s32.totalorder %v10171_v17, 0 }
 0x1a7   :  { %v5043_v46 = vadd.s32 4294967294, %v704_v33  ;;  %v592_v15 = vadd.s32 %v591_v23, %v587_v51  ;;  %v722_v43 = vsub.s32 4, %v6978_v44  ;;  %v446_v47 = vshrl.u32 %v10113_v52, %v6483_v21 }
 0x1a8   :  { %v448_v1 = vshll.u32 %v10113_v52, %v10183_v58  ;;  %v449_v37 = vshrl.u32 %v10129_v35, %v6483_v21  ;;  %v435_v63 = vand.u32 8388607, %v428_v60  ;;  %v452_v0 = vshrl.u32 %v10118_v16, %v6483_v21 }
 0x1a9   :  { %vm5044_vm11 = vcmp.lt.s32.totalorder %v5043_v46, 0  ;;  %v593_v19 = vadd.s32 536870912, %v592_v15  ;;  %vm839_vm4 = vcmp.eq.s32.totalorder %v7035_v4, 2  ;;  %v445_v50 = vshll.u32 %v10128_v57, %v10183_v58 }
 0x1aa   :  { %v707_v27 = vsel %vm5044_vm11, 0, %v5043_v46  ;;  %v450_v24 = vor.u32 %v449_v37, %v448_v1  ;;  %v451_v6 = vshll.u32 %v10129_v35, %v10183_v58  ;;  %vm836_vm3 = vcmp.eq.s32.totalorder %v7035_v4, 0 }
 0x1ab   :  { %v692_v30 = vadd.s32 %v6930_v28, %v6913_v48  ;;  %v708_v29 = vsub.s32 32, %v707_v27  ;;  %v712_v8 = vsub.s32 4294967266, %v707_v27  ;;  %v7060_v12 = vshrl.u32 %v593_v19, 30 }
 0x1ac   :  { %vm835_vm10 = vcmp.lt.s32.totalorder %v7035_v4, 2  ;;  %vm7065_vm5 = vcmp.le.f32.partialorder %v636_v18, 0.7853982  ;;  %v709_v7 = vshll.u32 %v7003_v45, %v707_v27  ;;  %v447_v25 = vor.u32 %v446_v47, %v445_v50  ;;  %v10187_v50 = vld [vmem:[#allocation29_spill] sm:$0xff] }
 0x1ad   :  { %v453_v14 = vor.u32 %v452_v0, %v451_v6  ;;  %vm460_vm12 = vcmp.lt.s32.totalorder %v6362_v9, 1  ;;  %vm359_vm14 = vcmp.lt.s32.totalorder %v10186_v34, 4  ;;  %vm832_vm15 = vweird.f32 %v10167_v3 }
 0x1ae   :  { %v710_v48 = vshrl.u32 %v692_v30, %v708_v29  ;;  %v713_v28 = vadd.s32 127, %v712_v8  ;;  %v595_v13 = vshll.u32 %v7060_v12, 30  ;;  %vm462_vm7 = vcmp.lt.s32.totalorder %v6362_v9, 3  ;;  %v10189_v30 = vld [vmem:[#allocation36_spill] sm:$0xff] }
 0x1af   :  { %v723_v18 = vsel %vm638_vm9, %v722_v43, %v6978_v44  ;;  %v436_v11 = vor.u32 8388608, %v435_v63  ;;  %v472_v45 = vsel %vm460_vm12, %v450_v24, %v453_v14  ;;  %v474_v38 = vsel %vm462_vm7, %v7011_v22, %v473_v42 }
 0x1b0   :  { %v711_v40 = vor.u32 %v710_v48, %v709_v7  ;;  %v714_v32 = vshll.u32 %v713_v28, 23  ;;  %v7083_v61 = vsub.s32 %v592_v15, %v595_v13  ;;  %v465_v31 = vsel %vm463_vm2, %v453_v14, 2102212464  ;;  %v5450_v5 = vpop.eup %5449  ;;  %v10190_v28 = vld [vmem:[#allocation30_spill] sm:$0xff]  ;;  %v10191_v13 = vld [vmem:[#allocation35_spill] sm:$0xff] }
 0x1b1   :  { %v444_v49 = vshrl.u32 %v10128_v57, %v6483_v21  ;;  %vm461_vm0 = vcmp.lt.s32.totalorder %v6362_v9, 2  ;;  %v468_v44 = vsel %vm460_vm12, %v447_v25, %v450_v24  ;;  %v470_v39 = vsel %vm462_vm7, %v453_v14, %v469_v53  ;;  %v5452_v22 = vpop.eup %5451 }
 0x1b2   :  { %v840_v26 = vxor.u32 2147483648, %v5450_v5  ;;  %v715_v10 = vor.u32 4788187, %v714_v32  ;;  %v598_v33 = vsub.s32 0, %v7083_v61  ;;  %v475_v51 = vsel %vm461_vm0, %v472_v45, %v474_v38  ;;  %v10193_v45 = vld [vmem:[#allocation33_spill] sm:$0xff]  ;;  %v10195_v32 = vld [vmem:[#allocation10_spill] sm:$0xff] }
 0x1b3   :  { %v837_v59 = vxor.u32 2147483648, %v5452_v22  ;;  %v464_v21 = vsel %vm460_vm12, %v444_v49, %v447_v25  ;;  %v466_v23 = vsel %vm462_vm7, %v450_v24, %v465_v31  ;;  %v476_v42 = vshll.u32 %v436_v11, 8  ;;  %v10188_v24 = vld [vmem:[#allocation32_spill] sm:$0xff]  ;;  %v10192_v11 = vld [vmem:[#allocation34_spill] sm:$0xff] }
 0x1b4   :  { %v841_v46 = vsel %vm839_vm4, %v840_v26, %v5452_v22  ;;  %v716_v53 = vand.u32 2147483647, %v715_v10  ;;  %v718_v15 = vcvt.s32.f32 %v711_v40  ;;  %v5038_v43 = vmin.u32 %v598_v33, %v7083_v61  ;;  %v10196_v22 = vld [vmem:[#allocation26_spill] sm:$0xff] }
 0x1b5   :  { %v838_v47 = vsel %vm836_vm3, %v5450_v5, %v837_v59  ;;  %v471_v58 = vsel %vm461_vm0, %v468_v44, %v470_v39  ;;  %v7108_v1 = vmul.u32.u64.low %v476_v42, %v475_v51  ;;  %v7109_v37 = vmul.u32.u64.high %v476_v42, %v475_v51, %v7108_v1  ;;  %v10197_v51 = vld [vmem:[#allocation31_spill] sm:$0xff] }
 0x1b6   :  { %v842_v19 = vsel %vm835_vm10, %v838_v47, %v841_v46  ;;  %v719_v63 = vmul.f32 %v718_v15, %v716_v53  ;;  %v725_v0 = vsel %vm7065_vm5, 0, %v723_v18  ;;  %v600_v27 = vclz %v5038_v43 }
 0x1b7   :  { %v7117_v6 = vor.u32 %v10188_v24, %v10187_v50  ;;  %v365_v29 = vsel %vm359_vm14, %v10189_v30, 920167782  ;;  %v843_v8 = vsel %vm832_vm15, nan, %v842_v19  ;;  %v467_v4 = vsel %vm461_vm0, %v464_v21, %v466_v23 }
 0x1b8   :  { %1759 = vmatprep.subr.mxu0 %v843_v8  ;;  %v720_v7 = vxor.u32 2147483648, %v719_v63  ;;  %v5039_v25 = vadd.s32 4294967294, %v600_v27  ;;  %v7126_v14 = vmul.u32.u64.low %v476_v42, %v471_v58  ;;  %v7127_v48 = vmul.u32.u64.high %v476_v42, %v471_v58, %v7126_v14 }
 0x1b9   :  { %v251_v18 = vor.u32 %v10191_v13, %v10190_v28  ;;  %v10194_v38 = vor.u32 %v10192_v11, %v10193_v45  ;;  %v729_v40 = vadd.s32 3, %v725_v0  ;;  %v324_v9 = vand.u32 2147483647, %v10195_v32 }
 0x1ba   :  { %v721_v31 = vsel %vm638_vm9, %v720_v7, %v719_v63  ;;  %v588_v5 = vadd.s32 %v6999_v20, %v6997_v36  ;;  %vm5040_vm2 = vcmp.lt.s32.totalorder %v5039_v25, 0  ;;  %v483_v49 = vmul.u32 %v476_v42, %v467_v4 }
 0x1bb   :  { %v369_v3 = vsel %vm359_vm14, %v10194_v38, 1326507024  ;;  %v724_v44 = vsel %vm7065_vm5, %v10171_v17, %v721_v31  ;;  %v603_v39 = vsel %vm5040_vm2, 0, %v5039_v25  ;;  %vm485_vm6 = vc.u32 %v7109_v37, %v7126_v14 }
 0x1bc   :  { %v341_v26 = vshll.u32 %v10128_v57, %v10196_v22  ;;  %5453 = vcosq.f32 %v724_v44  ;;  %vm534_vm8 = vcmp.lt.s32.totalorder %v10178_v2, 0  ;;  %v604_v10 = vsub.s32 32, %v603_v39 }
 0x1bd   :  { %v608_v33 = vsub.s32 4294967266, %v603_v39  ;;  %v331_v36 = vand.u32 8388607, %v324_v9  ;;  %5455 = vsinq.f32 %v724_v44  ;;  %v605_v20 = vshll.u32 %v7083_v61, %v603_v39 }
 0x1be   :  { %v486_v54 = vadd.s32 1, %v7127_v48  ;;  %v342_v59 = vshrl.u32 %v10113_v52, %v10197_v51  ;;  %v606_v21 = vshrl.u32 %v588_v5, %v604_v10  ;;  %v344_v42 = vshll.u32 %v10113_v52, %v10196_v22 }
 0x1bf   :  { %v609_v23 = vadd.s32 127, %v608_v33  ;;  %v345_v46 = vshrl.u32 %v10129_v35, %v10197_v51  ;;  %v347_v43 = vshll.u32 %v10129_v35, %v10196_v22  ;;  %v348_v61 = vshrl.u32 %v10118_v16, %v10197_v51 }
 0x1c0   :  { %v487_v53 = vsel %vm485_vm6, %v486_v54, %v7127_v48  ;;  %v343_v15 = vor.u32 %v342_v59, %v341_v26  ;;  %v607_v47 = vor.u32 %v606_v21, %v605_v20  ;;  %v730_v63 = vand.u32 3, %v729_v40 }
 0x1c1   :  { %v610_v58 = vshll.u32 %v609_v23, 23  ;;  %v488_v1 = vadd.s32 %v487_v53, %v483_v49  ;;  %v346_v19 = vor.u32 %v345_v46, %v344_v42  ;;  %v618_v0 = vsub.s32 4, %v7060_v12 }
 0x1c2   :  { %v332_v27 = vor.u32 8388608, %v331_v36  ;;  %v349_v50 = vor.u32 %v348_v61, %v347_v43  ;;  %vm356_vm1 = vcmp.lt.s32.totalorder %v10186_v34, 1  ;;  %vm358_vm9 = vcmp.lt.s32.totalorder %v10186_v34, 3 }
 0x1c3   :  { %v611_v24 = vor.u32 4788187, %v610_v58  ;;  %v489_v8 = vadd.s32 536870912, %v488_v1  ;;  %vm357_vm11 = vcmp.lt.s32.totalorder %v10186_v34, 2  ;;  %v364_v4 = vsel %vm356_vm1, %v343_v15, %v346_v19 }
 0x1c4   :  { %v366_v7 = vsel %vm358_vm9, %v349_v50, %v365_v29  ;;  %v368_v25 = vsel %vm356_vm1, %v346_v19, %v349_v50  ;;  %v614_v11 = vcvt.s32.f32 %v607_v47  ;;  %v619_v40 = vsel %vm534_vm8, %v618_v0, %v7060_v12 }
 0x1c5   :  { %v612_v48 = vand.u32 2147483647, %v611_v24  ;;  %v7175_v45 = vshrl.u32 %v489_v8, 30  ;;  %v367_v38 = vsel %vm357_vm11, %v364_v4, %v366_v7  ;;  %v361_v31 = vsel %vm359_vm14, %v349_v50, 2102212464  ;;  %v10200_v50 = vld [vmem:[#allocation8_spill] sm:$0xff] }
 0x1c6   :  { %v370_v29 = vsel %vm358_vm9, %v10189_v30, %v369_v3  ;;  %v372_v5 = vshll.u32 %v332_v27, 8  ;;  %v340_v39 = vshrl.u32 %v10128_v57, %v10197_v51  ;;  %v362_v3 = vsel %vm358_vm9, %v346_v19, %v361_v31  ;;  %v10201_v24 = vld [vmem:[#allocation24_spill] sm:$0xff] }
 0x1c7   :  { %v615_v49 = vmul.f32 %v614_v11, %v612_v48  ;;  %v491_v44 = vshll.u32 %v7175_v45, 30  ;;  %v371_v22 = vsel %vm357_vm11, %v368_v25, %v370_v29  ;;  %vm728_vm4 = vweird.f32 %v10171_v17 }
 0x1c8   :  { %v7192_v26 = vmul.u32.u64.low %v372_v5, %v371_v22  ;;  %v7193_v10 = vmul.u32.u64.high %v372_v5, %v371_v22, %v7192_v26  ;;  %v7195_v12 = vmul.u32.u64.low %v372_v5, %v367_v38  ;;  %v7196_v33 = vmul.u32.u64.high %v372_v5, %v367_v38, %v7195_v12  ;;  %v10202_v38 = vld [vmem:[#allocation28_spill] sm:$0xff] }
 0x1c9   :  { %v616_v36 = vxor.u32 2147483648, %v615_v49  ;;  %v7199_v20 = vsub.s32 %v488_v1, %v491_v44  ;;  %v360_v30 = vsel %vm356_vm1, %v340_v39, %v343_v15  ;;  %v5454_v54 = vpop.eup %5453  ;;  %vm731_vm3 = vcmp.lt.s32.totalorder %v730_v63, 2 }
 0x1ca   :  { %vm732_vm10 = vcmp.eq.s32.totalorder %v730_v63, 0  ;;  %vm7208_vm5 = vcmp.le.f32.partialorder %v532_v41, 0.7853982  ;;  %v5456_v59 = vpop.eup %5455  ;;  %v736_v21 = vxor.u32 2147483648, %v5454_v54  ;;  %vm735_vm12 = vcmp.eq.s32.totalorder %v730_v63, 2 }
 0x1cb   :  { %v617_v23 = vsel %vm534_vm8, %v616_v36, %v615_v49  ;;  %v621_v42 = vsel %vm7208_vm5, 0, %v619_v40  ;;  %v494_v46 = vsub.s32 0, %v7199_v20  ;;  %v733_v53 = vxor.u32 2147483648, %v5456_v59  ;;  %v10203_v40 = vld [vmem:[#allocation23_spill] sm:$0xff] }
 0x1cc   :  { %v620_v15 = vsel %vm7208_vm5, %v10178_v2, %v617_v23  ;;  %v363_v41 = vsel %vm357_vm11, %v360_v30, %v362_v3  ;;  %v737_v43 = vsel %vm735_vm12, %v736_v21, %v5456_v59  ;;  %vm381_vm14 = vc.u32 %v7193_v10, %v7195_v12 }
 0x1cd   :  { %5457 = vcosq.f32 %v620_v15  ;;  %v5034_v61 = vmin.u32 %v494_v46, %v7199_v20  ;;  %v734_v47 = vsel %vm732_vm10, %v5454_v54, %v733_v53  ;;  %v625_v58 = vadd.s32 3, %v621_v42 }
 0x1ce   :  { %5459 = vsinq.f32 %v620_v15  ;;  %v382_v1 = vadd.s32 1, %v7196_v33  ;;  %v738_v19 = vsel %vm731_vm3, %v734_v47, %v737_v43  ;;  %v379_v27 = vmul.u32 %v372_v5, %v363_v41 }
 0x1cf   :  { %v496_v0 = vclz %v5034_v61  ;;  %v220_v34 = vand.u32 2147483647, %v10200_v50  ;;  %vm255_vm15 = vcmp.lt.s32.totalorder %v10201_v24, 4  ;;  %v739_v8 = vsel %vm728_vm4, nan, %v738_v19 }
 0x1d0   :  { %v383_v4 = vsel %vm381_vm14, %v382_v1, %v7196_v33  ;;  %v261_v7 = vsel %vm255_vm15, %v7117_v6, 920167782  ;;  %v265_v63 = vsel %vm255_vm15, %v251_v18, 1326507024  ;;  %1760 = vmatpush1.msra.mxu0 %v739_v8  ;;  %v626_v11 = vand.u32 3, %v625_v58 }
 0x1d1   :  { %v5035_v25 = vadd.s32 4294967294, %v496_v0  ;;  %v384_v48 = vadd.s32 %v383_v4, %v379_v27  ;;  %v238_v17 = vshrl.u32 %v10113_v52, %v10202_v38  ;;  %v240_v31 = vshll.u32 %v10113_v52, %v10203_v40 }
 0x1d2   :  { %v241_v29 = vshrl.u32 %v10129_v35, %v10202_v38  ;;  %v227_v28 = vand.u32 8388607, %v220_v34  ;;  %v244_v13 = vshrl.u32 %v10118_v16, %v10202_v38  ;;  %v237_v49 = vshll.u32 %v10128_v57, %v10203_v40 }
 0x1d3   :  { %vm5036_vm7 = vcmp.lt.s32.totalorder %v5035_v25, 0  ;;  %v385_v5 = vadd.s32 536870912, %v384_v48  ;;  %v243_v39 = vshll.u32 %v10129_v35, %v10203_v40  ;;  %v484_v22 = vadd.s32 %v7126_v14, %v7109_v37 }
 0x1d4   :  { %v499_v18 = vsel %vm5036_vm7, 0, %v5035_v25  ;;  %v242_v44 = vor.u32 %v241_v29, %v240_v31  ;;  %v239_v3 = vor.u32 %v238_v17, %v237_v49  ;;  %vm252_vm0 = vcmp.lt.s32.totalorder %v10201_v24, 1 }
 0x1d5   :  { %v500_v26 = vsub.s32 32, %v499_v18  ;;  %v504_v33 = vsub.s32 4294967266, %v499_v18  ;;  %v7257_v36 = vshrl.u32 %v385_v5, 30  ;;  %v501_v30 = vshll.u32 %v7199_v20, %v499_v18 }
 0x1d6   :  { %v245_v54 = vor.u32 %v244_v13, %v243_v39  ;;  %vm254_vm2 = vcmp.lt.s32.totalorder %v10201_v24, 3  ;;  %vm627_vm6 = vcmp.lt.s32.totalorder %v626_v11, 2  ;;  %v228_v23 = vor.u32 8388608, %v227_v28 }
 0x1d7   :  { %v502_v51 = vshrl.u32 %v484_v22, %v500_v26  ;;  %v505_v59 = vadd.s32 127, %v504_v33  ;;  %v387_v21 = vshll.u32 %v7257_v36, 30  ;;  %v266_v14 = vsel %vm254_vm2, %v7117_v6, %v265_v63 }
 0x1d8   :  { %v264_v37 = vsel %vm252_vm0, %v242_v44, %v245_v54  ;;  %vm628_vm8 = vcmp.eq.s32.totalorder %v626_v11, 0  ;;  %vm631_vm1 = vcmp.eq.s32.totalorder %v626_v11, 2  ;;  %vm253_vm9 = vcmp.lt.s32.totalorder %v10201_v24, 2 }
 0x1d9   :  { %v503_v20 = vor.u32 %v502_v51, %v501_v30  ;;  %v506_v42 = vshll.u32 %v505_v59, 23  ;;  %v7268_v46 = vsub.s32 %v384_v48, %v387_v21  ;;  %v260_v15 = vsel %vm252_vm0, %v239_v3, %v242_v44  ;;  %v5585_v51 = vld [vmem:[%s9935_s1 + $0xa0] sm:$0x3] }
 0x1da   :  { %v5458_v53 = vpop.eup %5457  ;;  %v262_v41 = vsel %vm254_vm2, %v245_v54, %v261_v7  ;;  %v267_v58 = vsel %vm253_vm9, %v264_v37, %v266_v14  ;;  %v236_v19 = vshrl.u32 %v10128_v57, %v10202_v38  ;;  %v257_v0 = vsel %vm255_vm15, %v245_v54, 2102212464 }
 0x1db   :  { %v5460_v43 = vpop.eup %5459  ;;  %v632_v61 = vxor.u32 2147483648, %v5458_v53  ;;  %v507_v47 = vor.u32 4788187, %v506_v42  ;;  %v390_v6 = vsub.s32 0, %v7268_v46  ;;  %v268_v27 = vshll.u32 %v228_v23, 8 }
 0x1dc   :  { %v629_v1 = vxor.u32 2147483648, %v5460_v43  ;;  %v510_v63 = vcvt.s32.f32 %v503_v20  ;;  %v263_v48 = vsel %vm253_vm9, %v260_v15, %v262_v41  ;;  %vm624_vm11 = vweird.f32 %v10178_v2 }
 0x1dd   :  { %v633_v8 = vsel %vm631_vm1, %v632_v61, %v5460_v43  ;;  %v508_v4 = vand.u32 2147483647, %v507_v47  ;;  %v5030_v7 = vmin.u32 %v390_v6, %v7268_v46  ;;  %v256_v28 = vsel %vm252_vm0, %v236_v19, %v239_v3 }
 0x1de   :  { %v630_v25 = vsel %vm628_vm8, %v5458_v53, %v629_v1  ;;  %v7286_v17 = vmul.u32.u64.low %v268_v27, %v267_v58  ;;  %v7287_v40 = vmul.u32.u64.high %v268_v27, %v267_v58, %v7286_v17  ;;  %v258_v13 = vsel %vm254_vm2, %v242_v44, %v257_v0  ;;  %v5587_v53 = vld [vmem:[%s9935_s1 + $0x98] sm:$0xff]  ;;  %v5589_v58 = vld [vmem:[%s9935_s1 + $0x88] sm:$0xff] }
 0x1df   :  { %v634_v38 = vsel %vm627_vm6, %v630_v25, %v633_v8  ;;  %v511_v31 = vmul.f32 %v510_v63, %v508_v4  ;;  %v392_v29 = vclz %v5030_v7  ;;  %vm430_vm4 = vcmp.lt.s32.totalorder %v10182_v62, 0  ;;  %v5590_v63 = vld [vmem:[%s9935_s1 + $0x80] sm:$0xff] }
 0x1e0   :  { %v635_v5 = vsel %vm624_vm11, nan, %v634_v38  ;;  %v7295_v39 = vmul.u32.u64.low %v268_v27, %v263_v48  ;;  %v7296_v22 = vmul.u32.u64.high %v268_v27, %v263_v48, %v7295_v39  ;;  %v514_v2 = vsub.s32 4, %v7175_v45 }
 0x1e1   :  { %1761 = vmatprep.subr.mxu0 %v635_v5  ;;  %v512_v18 = vxor.u32 2147483648, %v511_v31  ;;  %v5031_v49 = vadd.s32 4294967294, %v392_v29  ;;  %vm7303_vm3 = vcmp.le.f32.partialorder %v428_v60, 0.7853982  ;;  %v10005_v26 = vmov 0.0   ;;  %v15_v29 = vld [vmem:[%s9935_s1 + $0x18] sm:$0xff] }
 0x1e2   :  { %1797 = vmatprep.mubr.f32.mxu0 %v10005_v26  ;;  %v5631_v33 = vmov 3   ;;  %v380_v3 = vadd.s32 %v7195_v12, %v7193_v10  ;;  %v259_v54 = vsel %vm253_vm9, %v256_v28, %v258_v13  ;;  %vm277_vm5 = vc.u32 %v7287_v40, %v7295_v39  ;;  %v5586_v10 = vld [vmem:[%s9935_s1 + $0x90] sm:$0xff]  ;;  %3415 = vmatprep.mubr.f32.mxu1 %v10005_v26 }
 0x1e3   :  { %v513_v44 = vsel %vm430_vm4, %v512_v18, %v511_v31  ;;  %vm5032_vm10 = vcmp.lt.s32.totalorder %v5031_v49, 0  ;;  %5412 = vset.pattern.permute.xlu1 %v5631_v33  ;;  %5413 = vset.pattern.permute.xlu0 %v5631_v33  ;;  %v515_v12 = vsel %vm430_vm4, %v514_v2, %v7175_v45  ;;  %v278_v24 = vadd.s32 1, %v7296_v22 }
 0x1e4   :  { %v516_v30 = vsel %vm7303_vm3, %v10182_v62, %v513_v44  ;;  %v395_v60 = vsel %vm5032_vm10, 0, %v5031_v49  ;;  %1701 = vperm.xlu1 %5412, %v5585_v51   ;;  %1693 = vperm.xlu0 %5413, %v5586_v10   ;;  %v275_v20 = vmul.u32 %v268_v27, %v259_v54  ;;  %v517_v15 = vsel %vm7303_vm3, 0, %v515_v12  ;;  %v5591_v49 = vld [vmem:[%s9935_s1 + $0x70] sm:$0xff] }
 0x1e5   :  { %5461 = vcosq.f32 %v516_v30  ;;  %v396_v59 = vsub.s32 32, %v395_v60  ;;  %v400_v21 = vsub.s32 4294967266, %v395_v60  ;;  %v397_v23 = vshll.u32 %v7268_v46, %v395_v60  ;;  %v5588_v46 = vld [vmem:[%s9935_s1 + $0x78] sm:$0xff] }
 0x1e6   :  { %5463 = vsinq.f32 %v516_v30  ;;  %v279_v42 = vsel %vm277_vm5, %v278_v24, %v7296_v22  ;;  %v521_v6 = vadd.s32 3, %v517_v15  ;;  %vm326_vm12 = vcmp.lt.s32.totalorder %v10195_v32, 0 }
 0x1e7   :  { %v398_v37 = vshrl.u32 %v380_v3, %v396_v59  ;;  %v401_v14 = vadd.s32 127, %v400_v21  ;;  %v280_v43 = vadd.s32 %v279_v42, %v275_v20  ;;  %v410_v17 = vsub.s32 4, %v7257_v36 }
 0x1e8   :  { %1697 = vperm.xlu1 %5412, %v5587_v53   ;;  %1681 = vperm.xlu0 %5413, %v5588_v46   ;;  %v522_v4 = vand.u32 3, %v521_v6  ;;  %vm7353_vm14 = vcmp.le.f32.partialorder %v324_v9, 0.7853982  ;;  %vm520_vm2 = vweird.f32 %v10182_v62  ;;  %v276_v59 = vadd.s32 %v7295_v39, %v7287_v40 }
 0x1e9   :  { %v399_v41 = vor.u32 %v398_v37, %v397_v23  ;;  %v402_v45 = vshll.u32 %v401_v14, 23  ;;  %v281_v47 = vadd.s32 536870912, %v280_v43  ;;  %v411_v11 = vsel %vm326_vm12, %v410_v17, %v7257_v36 }
 0x1ea   :  { %vm527_vm15 = vcmp.eq.s32.totalorder %v522_v4, 2  ;;  %vm524_vm7 = vcmp.eq.s32.totalorder %v522_v4, 0  ;;  %vm523_vm0 = vcmp.lt.s32.totalorder %v522_v4, 2  ;;  %v413_v3 = vsel %vm7353_vm14, 0, %v411_v11 }
 0x1eb   :  { %v403_v61 = vor.u32 4788187, %v402_v45  ;;  %v406_v19 = vcvt.s32.f32 %v399_v41  ;;  %v7343_v0 = vshrl.u32 %v281_v47, 30  ;;  %v417_v54 = vadd.s32 3, %v413_v3 }
 0x1ec   :  { %1689 = vperm.xlu1 %5412, %v5589_v58   ;;  %vm416_vm11 = vweird.f32 %v10195_v32  ;;  %vm222_vm4 = vcmp.lt.s32.totalorder %v10200_v50, 0  ;;  %vm221_vm3 = vcmp.le.f32.partialorder %v220_v34, 0.7853982 }
 0x1ed   :  { %v404_v1 = vand.u32 2147483647, %v403_v61  ;;  %v283_v8 = vshll.u32 %v7343_v0, 30  ;;  %v418_v62 = vand.u32 3, %v417_v54  ;;  %v306_v6 = vsub.s32 4, %v7343_v0 }
 0x1ef   :  { %v407_v27 = vmul.f32 %v406_v19, %v404_v1  ;;  %v284_v25 = vsub.s32 %v280_v43, %v283_v8  ;;  %vm423_vm8 = vcmp.eq.s32.totalorder %v418_v62, 2  ;;  %vm420_vm1 = vcmp.eq.s32.totalorder %v418_v62, 0 }
 0x1f0   :  { %1685 = vperm.xlu1 %5412, %v5590_v63   ;;  %vm419_vm9 = vcmp.lt.s32.totalorder %v418_v62, 2  ;;  %v307_v19 = vsel %vm222_vm4, %v306_v6, %v7343_v0  ;;  %v12_v0 = vld [vmem:[%s9935_s1] sm:$0xff] }
 0x1f1   :  { %v408_v7 = vxor.u32 2147483648, %v407_v27  ;;  %v286_v28 = vsub.s32 0, %v284_v25 }
 0x1f2   :  { %v5462_v48 = vpop.eup %5461 }
 0x1f3   :  { %v5464_v38 = vpop.eup %5463  ;;  %v528_v31 = vxor.u32 2147483648, %v5462_v48  ;;  %v409_v5 = vsel %vm326_vm12, %v408_v7, %v407_v27  ;;  %v5026_v22 = vmin.u32 %v286_v28, %v284_v25  ;;  %v17_v28 = vld [vmem:[%s9935_s1 + $0x28] sm:$0xff] }
 0x1f4   :  { %v525_v13 = vxor.u32 2147483648, %v5464_v38  ;;  %v412_v18 = vsel %vm7353_vm14, %v10195_v32, %v409_v5  ;;  %1677 = vperm.xlu1 %5412, %v5591_v49   ;;  %v309_v32 = vsel %vm221_vm3, 0, %v307_v19  ;;  %vm312_vm14 = vweird.f32 %v10200_v50  ;;  %v16_v5 = vld [vmem:[%s9935_s1 + $0x20] sm:$0xff] }
 0x1f5   :  { %v529_v9 = vsel %vm527_vm15, %v528_v31, %v5464_v38  ;;  %5465 = vcosq.f32 %v412_v18  ;;  %v288_v33 = vclz %v5026_v22  ;;  %v313_v27 = vadd.s32 3, %v309_v32  ;;  %v13_v31 = vld [vmem:[%s9935_s1 + $0x8] sm:$0xff] }
 0x1f6   :  { %v526_v2 = vsel %vm524_vm7, %v5462_v48, %v525_v13  ;;  %5467 = vsinq.f32 %v412_v18  ;;  %vm10039_vm15 = vcmask 408576   ;;  %v18_v13 = vld [vmem:[%s9935_s1 + $0x30] sm:$0x3] }
 0x1f7   :  { %v530_v44 = vsel %vm523_vm0, %v526_v2, %v529_v9  ;;  %v5027_v60 = vadd.s32 4294967294, %v288_v33  ;;  %v314_v8 = vand.u32 3, %v313_v27 }
 0x1f8   :  { %v531_v30 = vsel %vm520_vm2, nan, %v530_v44 }
 0x1f9   :  { %1762 = vmatpush1.msra.mxu0 %v531_v30  ;;  %vm5028_vm6 = vcmp.lt.s32.totalorder %v5027_v60, 0  ;;  %vm319_vm10 = vcmp.eq.s32.totalorder %v314_v8, 2  ;;  %vm316_vm5 = vcmp.eq.s32.totalorder %v314_v8, 0  ;;  %vm315_vm12 = vcmp.lt.s32.totalorder %v314_v8, 2 }
 0x1fa   :  { %v291_v51 = vsel %vm5028_vm6, 0, %v5027_v60 }
 0x1fb   :  { %v292_v21 = vsub.s32 32, %v291_v51  ;;  %v296_v10 = vsub.s32 4294967266, %v291_v51  ;;  %v293_v36 = vshll.u32 %v284_v25, %v291_v51 }
 0x1fd   :  { %v294_v12 = vshrl.u32 %v276_v59, %v292_v21  ;;  %v297_v24 = vadd.s32 127, %v296_v10 }
 0x1ff   :  { %v295_v23 = vor.u32 %v294_v12, %v293_v36  ;;  %v298_v37 = vshll.u32 %v297_v24, 23 }
 0x201   :  { %v299_v53 = vor.u32 4788187, %v298_v37  ;;  %v302_v43 = vcvt.s32.f32 %v295_v23 }
 0x202   :  { %v5466_v14 = vpop.eup %5465 }
 0x203   :  { %v5468_v20 = vpop.eup %5467  ;;  %v424_v42 = vxor.u32 2147483648, %v5466_v14  ;;  %v300_v45 = vand.u32 2147483647, %v299_v53 }
 0x204   :  { %v421_v15 = vxor.u32 2147483648, %v5468_v20 }
 0x205   :  { %v425_v41 = vsel %vm423_vm8, %v424_v42, %v5468_v20  ;;  %v303_v46 = vmul.f32 %v302_v43, %v300_v45 }
 0x206   :  { %v422_v40 = vsel %vm420_vm1, %v5466_v14, %v421_v15 }
 0x207   :  { %v426_v39 = vsel %vm419_vm9, %v422_v40, %v425_v41  ;;  %v304_v47 = vxor.u32 2147483648, %v303_v46 }
 0x208   :  { %v427_v61 = vsel %vm416_vm11, nan, %v426_v39 }
 0x209   :  { %1763 = vmatprep.subr.mxu0 %v427_v61  ;;  %v305_v58 = vsel %vm222_vm4, %v304_v47, %v303_v46 }
 0x20a   :  { %v308_v1 = vsel %vm221_vm3, %v10200_v50, %v305_v58  ;;  %v14_v50 = vld [vmem:[%s9935_s1 + $0x10] sm:$0xff] }
 0x20b   :  { %5469 = vcosq.f32 %v308_v1 }
 0x20c   :  { %5471 = vsinq.f32 %v308_v1 }
 0x218   :  { %v5470_v4 = vpop.eup %5469 }
 0x219   :  { %v5472_v63 = vpop.eup %5471  ;;  %v320_v7 = vxor.u32 2147483648, %v5470_v4 }
 0x21a   :  { %v317_v25 = vxor.u32 2147483648, %v5472_v63 }
 0x21b   :  { %v321_v48 = vsel %vm319_vm10, %v320_v7, %v5472_v63 }
 0x21c   :  { %v318_v17 = vsel %vm316_vm5, %v5470_v4, %v317_v25 }
 0x21d   :  { %v322_v34 = vsel %vm315_vm12, %v318_v17, %v321_v48 }
 0x21e   :  { %v323_v38 = vsel %vm312_vm14, nan, %v322_v34 }
 0x21f   :  { %1764 = vmatpush1.msra.mxu0 %v323_v38 }
 0x220   :  { %5083 = vmatmul.mubr.msk.f32.vlgmr.msra.gmra.mxu0 %vm10039_vm15, %v12_v0 }
 0x221   :  { %1803 = vmatprep.mubr.f32.mxu0 %v10005_v26 }
 0x224   :  { %5084 = vmatmul.mubr.msk.f32.gmra.mxu0 %vm10039_vm15, %v13_v31 }
 0x225   :  { %1809 = vmatprep.mubr.f32.mxu0 %v10005_v26 }
 0x228   :  { %5085 = vmatmul.mubr.msk.f32.gmra.mxu0 %vm10039_vm15, %v14_v50 }
 0x229   :  { %1815 = vmatprep.mubr.f32.mxu0 %v10005_v26 }
 0x22c   :  { %5086 = vmatmul.mubr.msk.f32.gmra.mxu0 %vm10039_vm15, %v15_v29 }
 0x22d   :  { %1821 = vmatprep.mubr.f32.mxu0 %v10005_v26 }
 0x230   :  { %5087 = vmatmul.mubr.msk.f32.gmra.mxu0 %vm10039_vm15, %v16_v5 }
 0x231   :  { %1827 = vmatprep.mubr.f32.mxu0 %v10005_v26 }
 0x234   :  { %5088 = vmatmul.mubr.msk.f32.gmra.mxu0 %vm10039_vm15, %v17_v28 }
 0x235   :  { %1833 = vmatprep.mubr.f32.mxu0 %v10005_v26 }
 0x238   :  { %5089 = vmatmul.mubr.msk.f32.gmra.mxu0 %vm10039_vm15, %v18_v13 }
 0x239   :  { %4992 = vmatprep.mubr.f32.mxu0 %v10005_v26 }
 0x25f   :  { %v7416_v18 = vpop.permute.xlu1 %1701  ;;  %v7424_v2 = vpop.permute.xlu0 %1693 }
 0x263   :  { %v7418_v49 = vpop.permute.xlu1 %1697  ;;  %v1682_v51 = vpop.permute.xlu0 %1681 }
 0x267   :  { %v7420_v9 = vpop.permute.xlu1 %1689 }
 0x26b   :  { %v7422_v22 = vpop.permute.xlu1 %1685 }
 0x26f   :  { %v1678_v11 = vpop.permute.xlu1 %1677 }
 0x2e0   :  { %v1799_v44 = vpop.f32.mrf.mxu0 }
 0x2e1   :  { %v7426_v33 = vadd.f32 %v1799_v44, %v1678_v11 }
 0x2e2   :  { %v1801_v30 = vpop.f32.mrf.mxu0 }
 0x2e3   :  { %10208 = vst [vmem:[#allocation19_spill] sm:$0xff] %v7426_v33  ;;  %v10007_v3 = vand.u32 2147483647, %v7426_v33  ;;  %v1843_v60 = vand.u32 2139095040, %v7426_v33  ;;  %v7430_v54 = vadd.f32 %v1801_v30, %v1678_v11 }
 0x2e4   :  { %v1805_v59 = vpop.f32.mrf.mxu0 }
 0x2e5   :  { %10209 = vst [vmem:[#allocation20_spill] sm:$0xff] %v7430_v54  ;;  %v1844_v21 = vshrl.u32 %v1843_v60, 23  ;;  %v10008_v10 = vand.u32 2147483647, %v7430_v54  ;;  %v1847_v36 = vand.u32 8388607, %v10007_v3  ;;  %v7436_v24 = vadd.f32 %v1805_v59, %v1682_v51 }
 0x2e6   :  { %v1947_v12 = vand.u32 2139095040, %v7430_v54  ;;  %v1807_v45 = vpop.f32.mrf.mxu0 }
 0x2e7   :  { %10210 = vst [vmem:[#allocation6_spill] sm:$0xff] %v7436_v24  ;;  %v5090_v62 = vadd.s32 4294967169, %v1844_v21  ;;  %v1951_v23 = vand.u32 8388607, %v10008_v10  ;;  %v2051_v14 = vand.u32 2139095040, %v7436_v24  ;;  %v1848_v42 = vor.u32 8388608, %v1847_v36 }
 0x2e8   :  { %v1948_v37 = vshrl.u32 %v1947_v12, 23  ;;  %v7441_v47 = vadd.f32 %v1807_v45, %v1682_v51  ;;  %v10009_v1 = vand.u32 2147483647, %v7436_v24 }
 0x2e9   :  { %v1850_v20 = vadd.s32 1, %v5090_v62  ;;  %v1952_v15 = vor.u32 8388608, %v1951_v23  ;;  %v2052_v41 = vshrl.u32 %v2051_v14, 23  ;;  %v7443_v6 = vshll.u32 %v1848_v42, 8 }
 0x2ea   :  { %v5094_v53 = vadd.s32 4294967169, %v1948_v37  ;;  %10211 = vst [vmem:[#allocation16_spill] sm:$0xff] %v7441_v47 }
 0x2eb   :  { %vm1851_vm7 = vcmp.gt.s32.totalorder %v1850_v20, 0  ;;  %v5098_v39 = vadd.s32 4294967169, %v2052_v41  ;;  %v7445_v58 = vshll.u32 %v1952_v15, 8 }
 0x2ec   :  { %v1852_v43 = vsel %vm1851_vm7, %v1850_v20, 0  ;;  %v1954_v40 = vadd.s32 1, %v5094_v53 }
 0x2ed   :  { %v1853_v46 = vshrl.u32 %v1852_v43, 5  ;;  %v1854_v61 = vand.u32 31, %v1852_v43  ;;  %v7450_v8 = vadd.s32 1, %v5098_v39 }
 0x2ee   :  { %vm1955_vm0 = vcmp.gt.s32.totalorder %v1954_v40, 0 }
 0x2ef   :  { %v1855_v19 = vsub.s32 32, %v1854_v61  ;;  %v1857_v32 = vshll.u32 %v10128_v57, %v1854_v61  ;;  %v1860_v27 = vshll.u32 %v10113_v52, %v1854_v61  ;;  %v1863_v4 = vshll.u32 %v10129_v35, %v1854_v61 }
 0x2f0   :  { %v1866_v63 = vshll.u32 %v10118_v16, %v1854_v61  ;;  %v1869_v7 = vshll.u32 %v10119_v56, %v1854_v61  ;;  %vm1872_vm2 = vcmp.lt.s32.totalorder %v1853_v46, 1  ;;  %vm1873_vm6 = vcmp.lt.s32.totalorder %v1853_v46, 2 }
 0x2f1   :  { %v1858_v25 = vshrl.u32 %v10113_v52, %v1855_v19  ;;  %v1861_v48 = vshrl.u32 %v10129_v35, %v1855_v19  ;;  %v1864_v17 = vshrl.u32 %v10118_v16, %v1855_v19  ;;  %v1856_v34 = vshrl.u32 %v10128_v57, %v1855_v19 }
 0x2f2   :  { %v1867_v0 = vshrl.u32 %v10119_v56, %v1855_v19  ;;  %v1870_v38 = vshrl.u32 %v10121_v55, %v1855_v19  ;;  %vm1874_vm8 = vcmp.lt.s32.totalorder %v1853_v46, 3  ;;  %v1956_v5 = vsel %vm1955_vm0, %v1954_v40, 0 }
 0x2f3   :  { %v1859_v31 = vor.u32 %v1858_v25, %v1857_v32  ;;  %v1862_v50 = vor.u32 %v1861_v48, %v1860_v27  ;;  %v1865_v29 = vor.u32 %v1864_v17, %v1863_v4  ;;  %vm1875_vm1 = vcmp.lt.s32.totalorder %v1853_v46, 4 }
 0x2f4   :  { %v1868_v28 = vor.u32 %v1867_v0, %v1866_v63  ;;  %v1871_v13 = vor.u32 %v1870_v38, %v1869_v7  ;;  %v1958_v11 = vand.u32 31, %v1956_v5  ;;  %v1957_v14 = vshrl.u32 %v1956_v5, 5 }
 0x2f5   :  { %v1876_v44 = vsel %vm1872_vm2, %v1856_v34, %v1859_v31  ;;  %v1877_v30 = vsel %vm1875_vm1, %v1865_v29, 2102212464  ;;  %v1880_v60 = vsel %vm1872_vm2, %v1859_v31, %v1862_v50  ;;  %v1884_v51 = vsel %vm1872_vm2, %v1862_v50, %v1865_v29 }
 0x2f6   :  { %v1878_v59 = vsel %vm1874_vm8, %v1862_v50, %v1877_v30  ;;  %v1881_v21 = vsel %vm1875_vm1, %v1868_v28, 920167782  ;;  %v1885_v36 = vsel %vm1875_vm1, %v1871_v13, 1326507024  ;;  %v1959_v12 = vsub.s32 32, %v1958_v11 }
 0x2f7   :  { %v1879_v62 = vsel %vm1873_vm6, %v1876_v44, %v1878_v59  ;;  %v1882_v23 = vsel %vm1874_vm8, %v1865_v29, %v1881_v21  ;;  %v1886_v37 = vsel %vm1874_vm8, %v1868_v28, %v1885_v36  ;;  %v1961_v15 = vshll.u32 %v10128_v57, %v1958_v11 }
 0x2f8   :  { %v1883_v20 = vsel %vm1873_vm6, %v1880_v60, %v1882_v23  ;;  %v1887_v42 = vsel %vm1873_vm6, %v1884_v51, %v1886_v37  ;;  %v1895_v53 = vmul.u32 %v7443_v6, %v1879_v62  ;;  %v1960_v39 = vshrl.u32 %v10128_v57, %v1959_v12 }
 0x2f9   :  { %v7474_v41 = vmul.u32.u64.low %v7443_v6, %v1887_v42  ;;  %v7475_v45 = vmul.u32.u64.high %v7443_v6, %v1887_v42, %v7474_v41  ;;  %v7478_v43 = vmul.u32.u64.low %v7443_v6, %v1883_v20  ;;  %v7479_v40 = vmul.u32.u64.high %v7443_v6, %v1883_v20, %v7478_v43 }
 0x2fa   :  { %v1962_v61 = vshrl.u32 %v10113_v52, %v1959_v12  ;;  %v1964_v46 = vshll.u32 %v10113_v52, %v1958_v11  ;;  %v1965_v19 = vshrl.u32 %v10129_v35, %v1959_v12  ;;  %v1967_v32 = vshll.u32 %v10129_v35, %v1958_v11 }
 0x2fb   :  { %v1968_v27 = vshrl.u32 %v10118_v16, %v1959_v12  ;;  %v1970_v4 = vshll.u32 %v10118_v16, %v1958_v11  ;;  %v1971_v63 = vshrl.u32 %v10119_v56, %v1959_v12  ;;  %v1973_v25 = vshll.u32 %v10119_v56, %v1958_v11 }
 0x2fc   :  { %v1963_v7 = vor.u32 %v1962_v61, %v1961_v15  ;;  %v1966_v6 = vor.u32 %v1965_v19, %v1964_v46  ;;  %v1974_v48 = vshrl.u32 %v10121_v55, %v1959_v12  ;;  %vm1897_vm9 = vc.u32 %v7475_v45, %v7478_v43 }
 0x2fd   :  { %v1898_v17 = vadd.s32 1, %v7479_v40  ;;  %v1969_v34 = vor.u32 %v1968_v27, %v1967_v32  ;;  %vm1976_vm11 = vcmp.lt.s32.totalorder %v1957_v14, 1  ;;  %v1972_v0 = vor.u32 %v1971_v63, %v1970_v4 }
 0x2fe   :  { %v1975_v38 = vor.u32 %v1974_v48, %v1973_v25  ;;  %vm1977_vm4 = vcmp.lt.s32.totalorder %v1957_v14, 2  ;;  %vm1978_vm3 = vcmp.lt.s32.totalorder %v1957_v14, 3  ;;  %vm1979_vm10 = vcmp.lt.s32.totalorder %v1957_v14, 4 }
 0x2ff   :  { %v1899_v31 = vsel %vm1897_vm9, %v1898_v17, %v7479_v40  ;;  %v1980_v50 = vsel %vm1976_vm11, %v1960_v39, %v1963_v7  ;;  %v1984_v29 = vsel %vm1976_vm11, %v1963_v7, %v1966_v6  ;;  %v1981_v28 = vsel %vm1979_vm10, %v1969_v34, 2102212464 }
 0x300   :  { %v1900_v5 = vadd.s32 %v1899_v31, %v1895_v53  ;;  %v1985_v13 = vsel %vm1979_vm10, %v1972_v0, 920167782  ;;  %v1988_v11 = vsel %vm1976_vm11, %v1966_v6, %v1969_v34  ;;  %v1982_v44 = vsel %vm1978_vm3, %v1966_v6, %v1981_v28 }
 0x301   :  { %v1986_v30 = vsel %vm1978_vm3, %v1969_v34, %v1985_v13  ;;  %v1989_v60 = vsel %vm1979_vm10, %v1975_v38, 1326507024  ;;  %vm2059_vm5 = vcmp.gt.s32.totalorder %v7450_v8, 0  ;;  %v2055_v36 = vand.u32 8388607, %v10009_v1 }
 0x302   :  { %v1901_v51 = vadd.s32 536870912, %v1900_v5  ;;  %v1987_v59 = vsel %vm1977_vm4, %v1984_v29, %v1986_v30  ;;  %v1990_v21 = vsel %vm1978_vm3, %v1972_v0, %v1989_v60  ;;  %v1983_v12 = vsel %vm1977_vm4, %v1980_v50, %v1982_v44 }
 0x303   :  { %v1991_v62 = vsel %vm1977_vm4, %v1988_v11, %v1990_v21  ;;  %v7503_v23 = vmul.u32.u64.low %v7445_v58, %v1987_v59  ;;  %v7504_v37 = vmul.u32.u64.high %v7445_v58, %v1987_v59, %v7503_v23  ;;  %v2060_v15 = vsel %vm2059_vm5, %v7450_v8, 0 }
 0x304   :  { %v7507_v20 = vshrl.u32 %v1901_v51, 30  ;;  %v7510_v42 = vmul.u32.u64.low %v7445_v58, %v1991_v62  ;;  %v7511_v53 = vmul.u32.u64.high %v7445_v58, %v1991_v62, %v7510_v42  ;;  %v2062_v41 = vand.u32 31, %v2060_v15 }
 0x305   :  { %v2056_v39 = vor.u32 8388608, %v2055_v36  ;;  %v2155_v14 = vand.u32 2139095040, %v7441_v47  ;;  %v1999_v61 = vmul.u32 %v7445_v58, %v1983_v12  ;;  %v2002_v46 = vadd.s32 1, %v7504_v37 }
 0x306   :  { %10212 = vst [vmem:[#allocation11_spill] sm:$0xff] %v7507_v20  ;;  %v1903_v40 = vshll.u32 %v7507_v20, 30  ;;  %v2061_v19 = vshrl.u32 %v2060_v15, 5  ;;  %v2063_v32 = vsub.s32 32, %v2062_v41  ;;  %vm2001_vm12 = vc.u32 %v7511_v53, %v7503_v23 }
 0x307   :  { %v2065_v4 = vshll.u32 %v10128_v57, %v2062_v41  ;;  %v2068_v8 = vshll.u32 %v10113_v52, %v2062_v41  ;;  %v2003_v63 = vsel %vm2001_vm12, %v2002_v46, %v7504_v37  ;;  %v2071_v58 = vshll.u32 %v10129_v35, %v2062_v41 }
 0x308   :  { %v7518_v27 = vsub.s32 %v1900_v5, %v1903_v40  ;;  %v2066_v7 = vshrl.u32 %v10113_v52, %v2063_v32  ;;  %v2069_v6 = vshrl.u32 %v10129_v35, %v2063_v32  ;;  %v2004_v48 = vadd.s32 %v2003_v63, %v1999_v61 }
 0x309   :  { %v2072_v17 = vshrl.u32 %v10118_v16, %v2063_v32  ;;  %v2074_v34 = vshll.u32 %v10118_v16, %v2062_v41  ;;  %v2075_v31 = vshrl.u32 %v10119_v56, %v2063_v32  ;;  %v2077_v50 = vshll.u32 %v10119_v56, %v2062_v41 }
 0x30a   :  { %v1906_v25 = vsub.s32 0, %v7518_v27  ;;  %v2067_v0 = vor.u32 %v2066_v7, %v2065_v4  ;;  %v2070_v38 = vor.u32 %v2069_v6, %v2068_v8  ;;  %v2005_v5 = vadd.s32 536870912, %v2004_v48  ;;  %v1811_v7 = vpop.f32.mrf.mxu0 }
 0x30b   :  { %v2073_v28 = vor.u32 %v2072_v17, %v2071_v58  ;;  %v2078_v13 = vshrl.u32 %v10121_v55, %v2063_v32  ;;  %v2064_v11 = vshrl.u32 %v10128_v57, %v2063_v32  ;;  %v2076_v44 = vor.u32 %v2075_v31, %v2074_v34 }
 0x30c   :  { %v5091_v29 = vmin.u32 %v1906_v25, %v7518_v27  ;;  %v2096_v30 = vshll.u32 %v2056_v39, 8  ;;  %v2156_v60 = vshrl.u32 %v2155_v14, 23  ;;  %v7536_v51 = vshrl.u32 %v2005_v5, 30 }
 0x30d   :  { %v2079_v59 = vor.u32 %v2078_v13, %v2077_v50  ;;  %vm2080_vm14 = vcmp.lt.s32.totalorder %v2061_v19, 1  ;;  %vm2083_vm7 = vcmp.lt.s32.totalorder %v2061_v19, 4  ;;  %vm2081_vm0 = vcmp.lt.s32.totalorder %v2061_v19, 2 }
 0x30e   :  { %10213 = vst [vmem:[#allocation15_spill] sm:$0xff] %v7536_v51  ;;  %vm2082_vm2 = vcmp.lt.s32.totalorder %v2061_v19, 3  ;;  %v2088_v21 = vsel %vm2080_vm14, %v2067_v0, %v2070_v38  ;;  %v2089_v36 = vsel %vm2083_vm7, %v2076_v44, 920167782  ;;  %v1908_v12 = vclz %v5091_v29 }
 0x30f   :  { %v2007_v62 = vshll.u32 %v7536_v51, 30  ;;  %v2085_v37 = vsel %vm2083_vm7, %v2073_v28, 2102212464  ;;  %v2090_v42 = vsel %vm2082_vm2, %v2073_v28, %v2089_v36  ;;  %v2092_v41 = vsel %vm2080_vm14, %v2070_v38, %v2073_v28 }
 0x310   :  { %v2091_v15 = vsel %vm2081_vm0, %v2088_v21, %v2090_v42  ;;  %v2093_v40 = vsel %vm2083_vm7, %v2079_v59, 1326507024  ;;  %v5102_v39 = vadd.s32 4294967169, %v2156_v60  ;;  %v2084_v61 = vsel %vm2080_vm14, %v2064_v11, %v2067_v0 }
 0x311   :  { %v7540_v14 = vsub.s32 %v2004_v48, %v2007_v62  ;;  %v2094_v46 = vsel %vm2082_vm2, %v2076_v44, %v2093_v40  ;;  %v2086_v32 = vsel %vm2082_vm2, %v2070_v38, %v2085_v37  ;;  %v5092_v6 = vadd.s32 4294967294, %v1908_v12 }
 0x312   :  { %v2095_v4 = vsel %vm2081_vm0, %v2092_v41, %v2094_v46  ;;  %v7543_v8 = vmul.u32.u64.low %v2096_v30, %v2091_v15  ;;  %v7544_v63 = vmul.u32.u64.high %v2096_v30, %v2091_v15, %v7543_v8  ;;  %v2162_v34 = vadd.s32 1, %v5102_v39 }
 0x313   :  { %v2010_v58 = vsub.s32 0, %v7540_v14  ;;  %v7548_v25 = vmul.u32.u64.low %v2096_v30, %v2095_v4  ;;  %v7549_v17 = vmul.u32.u64.high %v2096_v30, %v2095_v4, %v7548_v25  ;;  %v2087_v48 = vsel %vm2081_vm0, %v2084_v61, %v2086_v32 }
 0x314   :  { %v10010_v0 = vand.u32 2147483647, %v7441_v47  ;;  %v7554_v38 = vadd.f32 %v1811_v7, %v7422_v22  ;;  %v2106_v50 = vadd.s32 1, %v7544_v63  ;;  %vm2163_vm6 = vcmp.gt.s32.totalorder %v2162_v34, 0 }
 0x315   :  { %v5095_v31 = vmin.u32 %v2010_v58, %v7540_v14  ;;  %vm5093_vm8 = vcmp.lt.s32.totalorder %v5092_v6, 0  ;;  %v2164_v29 = vsel %vm2163_vm6, %v2162_v34, 0  ;;  %v2103_v5 = vmul.u32 %v2096_v30, %v2087_v48 }
 0x316   :  { %10214 = vst [vmem:[#allocation5_spill] sm:$0xff] %v7554_v38  ;;  %vm2105_vm1 = vc.u32 %v7549_v17, %v7543_v8  ;;  %v2166_v28 = vand.u32 31, %v2164_v29  ;;  %v2159_v13 = vand.u32 8388607, %v10010_v0  ;;  %v2259_v11 = vand.u32 2139095040, %v7554_v38 }
 0x317   :  { %v2107_v19 = vsel %vm2105_vm1, %v2106_v50, %v7544_v63  ;;  %v7564_v44 = vsel %vm5093_vm8, 0, %v5092_v6  ;;  %v2012_v60 = vclz %v5095_v31  ;;  %v1896_v4 = vadd.s32 %v7478_v43, %v7475_v45 }
 0x318   :  { %v2108_v59 = vadd.s32 %v2107_v19, %v2103_v5  ;;  %v2167_v21 = vsub.s32 32, %v2166_v28  ;;  %v1916_v12 = vsub.s32 4294967266, %v7564_v44  ;;  %v2160_v30 = vor.u32 8388608, %v2159_v13 }
 0x319   :  { %v2260_v37 = vshrl.u32 %v2259_v11, 23  ;;  %v5096_v42 = vadd.s32 4294967294, %v2012_v60  ;;  %v2169_v39 = vshll.u32 %v10128_v57, %v2166_v28  ;;  %v2172_v61 = vshll.u32 %v10113_v52, %v2166_v28 }
 0x31a   :  { %v2109_v36 = vadd.s32 536870912, %v2108_v59  ;;  %v2170_v62 = vshrl.u32 %v10113_v52, %v2167_v21  ;;  %v2173_v41 = vshrl.u32 %v10129_v35, %v2167_v21  ;;  %v2176_v40 = vshrl.u32 %v10118_v16, %v2167_v21 }
 0x31b   :  { %v2178_v46 = vshll.u32 %v10118_v16, %v2166_v28  ;;  %v2179_v32 = vshrl.u32 %v10119_v56, %v2167_v21  ;;  %v2165_v7 = vshrl.u32 %v2164_v29, 5  ;;  %v2175_v6 = vshll.u32 %v10129_v35, %v2166_v28 }
 0x31c   :  { %v7568_v15 = vshrl.u32 %v2109_v36, 30  ;;  %v1917_v58 = vadd.s32 127, %v1916_v12  ;;  %v2171_v25 = vor.u32 %v2170_v62, %v2169_v39  ;;  %v2174_v34 = vor.u32 %v2173_v41, %v2172_v61 }
 0x31d   :  { %v2180_v48 = vor.u32 %v2179_v32, %v2178_v46  ;;  %v2177_v31 = vor.u32 %v2176_v40, %v2175_v6  ;;  %v2181_v50 = vshll.u32 %v10119_v56, %v2166_v28  ;;  %v2182_v5 = vshrl.u32 %v10121_v55, %v2167_v21 }
 0x31e   :  { %10215 = vst [vmem:[#allocation14_spill] sm:$0xff] %v7568_v15  ;;  %v2111_v63 = vshll.u32 %v7568_v15, 30  ;;  %v2200_v19 = vshll.u32 %v2160_v30, 8  ;;  %v1912_v13 = vsub.s32 32, %v7564_v44  ;;  %vm5097_vm9 = vcmp.lt.s32.totalorder %v5096_v42, 0 }
 0x31f   :  { %v10011_v45 = vand.u32 2147483647, %v7554_v38  ;;  %v5106_v43 = vadd.s32 4294967169, %v2260_v37  ;;  %v2183_v29 = vor.u32 %v2182_v5, %v2181_v50  ;;  %vm2184_vm11 = vcmp.lt.s32.totalorder %v2165_v7, 1 }
 0x320   :  { %v7584_v11 = vsub.s32 %v2108_v59, %v2111_v63  ;;  %vm2187_vm4 = vcmp.lt.s32.totalorder %v2165_v7, 4  ;;  %v1918_v60 = vshll.u32 %v1917_v58, 23  ;;  %vm2186_vm3 = vcmp.lt.s32.totalorder %v2165_v7, 3 }
 0x321   :  { %v2192_v36 = vsel %vm2184_vm11, %v2171_v25, %v2174_v34  ;;  %v2193_v12 = vsel %vm2187_vm4, %v2180_v48, 920167782  ;;  %vm2185_vm10 = vcmp.lt.s32.totalorder %v2165_v7, 2  ;;  %v2189_v28 = vsel %vm2187_vm4, %v2177_v31, 2102212464 }
 0x322   :  { %v2194_v62 = vsel %vm2186_vm3, %v2177_v31, %v2193_v12  ;;  %v2196_v30 = vsel %vm2184_vm11, %v2174_v34, %v2177_v31  ;;  %v7588_v41 = vsel %vm5097_vm9, 0, %v5096_v42  ;;  %v2168_v40 = vshrl.u32 %v10128_v57, %v2167_v21 }
 0x323   :  { %v2195_v59 = vsel %vm2185_vm10, %v2192_v36, %v2194_v62  ;;  %v2197_v37 = vsel %vm2187_vm4, %v2183_v29, 1326507024  ;;  %v2114_v39 = vsub.s32 0, %v7584_v11  ;;  %v2190_v6 = vsel %vm2186_vm3, %v2174_v34, %v2189_v28 }
 0x324   :  { %v2198_v61 = vsel %vm2186_vm3, %v2180_v48, %v2197_v37  ;;  %v7593_v46 = vmul.u32.u64.low %v2200_v19, %v2195_v59  ;;  %v7594_v32 = vmul.u32.u64.high %v2200_v19, %v2195_v59, %v7593_v46  ;;  %v2188_v63 = vsel %vm2184_vm11, %v2168_v40, %v2171_v25  ;;  %v1813_v25 = vpop.f32.mrf.mxu0 }
 0x325   :  { %v2199_v58 = vsel %vm2185_vm10, %v2196_v30, %v2198_v61  ;;  %v2266_v31 = vadd.s32 1, %v5106_v43  ;;  %v1914_v42 = vshrl.u32 %v1896_v4, %v1912_v13  ;;  %v7599_v50 = vor.u32 4788187, %v1918_v60 }
 0x326   :  { %v7601_v21 = vmul.u32.u64.low %v2200_v19, %v2199_v58  ;;  %v7602_v5 = vmul.u32.u64.high %v2200_v19, %v2199_v58, %v7601_v21  ;;  %v1913_v29 = vshll.u32 %v7518_v27, %v7564_v44  ;;  %v2020_v48 = vsub.s32 4294967266, %v7588_v41 }
 0x327   :  { %v2263_v36 = vand.u32 8388607, %v10011_v45  ;;  %vm2267_vm5 = vcmp.gt.s32.totalorder %v2266_v31, 0  ;;  %v5099_v34 = vmin.u32 %v2114_v39, %v7584_v11  ;;  %v2191_v43 = vsel %vm2185_vm10, %v2188_v63, %v2190_v6 }
 0x328   :  { %v2210_v4 = vadd.s32 1, %v7594_v32  ;;  %v2268_v13 = vsel %vm2267_vm5, %v2266_v31, 0  ;;  %v7612_v12 = vor.u32 %v1914_v42, %v1913_v29  ;;  %v1920_v28 = vand.u32 2147483647, %v7599_v50 }
 0x329   :  { %v2270_v60 = vand.u32 31, %v2268_v13  ;;  %v2000_v27 = vadd.s32 %v7503_v23, %v7511_v53  ;;  %v7618_v44 = vadd.f32 %v1813_v25, %v7422_v22  ;;  %v2016_v62 = vsub.s32 32, %v7588_v41 }
 0x32a   :  { %v2207_v30 = vmul.u32 %v2200_v19, %v2191_v43  ;;  %vm2209_vm12 = vc.u32 %v7602_v5, %v7593_v46  ;;  %v2021_v40 = vadd.s32 127, %v2020_v48  ;;  %v2116_v59 = vclz %v5099_v34 }
 0x32b   :  { %v2271_v7 = vsub.s32 32, %v2270_v60  ;;  %v2211_v37 = vsel %vm2209_vm12, %v2210_v4, %v7594_v32  ;;  %v2264_v39 = vor.u32 8388608, %v2263_v36  ;;  %v2269_v63 = vshrl.u32 %v2268_v13, 5 }
 0x32c   :  { %v2212_v61 = vadd.s32 %v2211_v37, %v2207_v30  ;;  %v2273_v22 = vshll.u32 %v10128_v57, %v2270_v60  ;;  %v2276_v53 = vshll.u32 %v10113_v52, %v2270_v60  ;;  %v2279_v19 = vshll.u32 %v10129_v35, %v2270_v60 }
 0x32d   :  { %v2274_v6 = vshrl.u32 %v10113_v52, %v2271_v7  ;;  %v2277_v23 = vshrl.u32 %v10129_v35, %v2271_v7  ;;  %v2280_v58 = vshrl.u32 %v10118_v16, %v2271_v7  ;;  %v2018_v31 = vshrl.u32 %v2000_v27, %v2016_v62 }
 0x32e   :  { %v2213_v42 = vadd.s32 536870912, %v2212_v61  ;;  %v2282_v21 = vshll.u32 %v10118_v16, %v2270_v60  ;;  %v2283_v32 = vshrl.u32 %v10119_v56, %v2271_v7  ;;  %v2022_v29 = vshll.u32 %v2021_v40, 23 }
 0x32f   :  { %v2275_v48 = vor.u32 %v2274_v6, %v2273_v22  ;;  %v2278_v36 = vor.u32 %v2277_v23, %v2276_v53  ;;  %v2281_v25 = vor.u32 %v2280_v58, %v2279_v19  ;;  %v2285_v4 = vshll.u32 %v10119_v56, %v2270_v60 }
 0x330   :  { %v7632_v34 = vshrl.u32 %v2213_v42, 30  ;;  %v2284_v43 = vor.u32 %v2283_v32, %v2282_v21  ;;  %v2286_v13 = vshrl.u32 %v10121_v55, %v2271_v7  ;;  %v5100_v30 = vadd.s32 4294967294, %v2116_v59 }
 0x331   :  { %vm2291_vm14 = vcmp.lt.s32.totalorder %v2269_v63, 4  ;;  %v2304_v37 = vshll.u32 %v2264_v39, 8  ;;  %v2363_v27 = vand.u32 2139095040, %v7618_v44  ;;  %vm2288_vm7 = vcmp.lt.s32.totalorder %v2269_v63, 1 }
 0x332   :  { %10216 = vst [vmem:[#allocation9_spill] sm:$0xff] %v7632_v34  ;;  %v2215_v62 = vshll.u32 %v7632_v34, 30  ;;  %v2287_v26 = vor.u32 %v2286_v13, %v2285_v4  ;;  %v2293_v40 = vsel %vm2291_vm14, %v2281_v25, 2102212464  ;;  %v2272_v6 = vshrl.u32 %v10128_v57, %v2271_v7 }
 0x333   :  { %vm2290_vm0 = vcmp.lt.s32.totalorder %v2269_v63, 3  ;;  %v2296_v23 = vsel %vm2288_vm7, %v2275_v48, %v2278_v36  ;;  %v2297_v22 = vsel %vm2291_vm14, %v2284_v43, 920167782  ;;  %vm2289_vm2 = vcmp.lt.s32.totalorder %v2269_v63, 2 }
 0x334   :  { %v7641_v60 = vsub.s32 %v2212_v61, %v2215_v62  ;;  %v2298_v59 = vsel %vm2290_vm0, %v2281_v25, %v2297_v22  ;;  %v2300_v53 = vsel %vm2288_vm7, %v2278_v36, %v2281_v25  ;;  %v2292_v39 = vsel %vm2288_vm7, %v2272_v6, %v2275_v48  ;;  %v1817_v48 = vpop.f32.mrf.mxu0 }
 0x335   :  { %v2294_v19 = vsel %vm2290_vm0, %v2278_v36, %v2293_v40  ;;  %v2299_v58 = vsel %vm2289_vm2, %v2296_v23, %v2298_v59  ;;  %v2301_v42 = vsel %vm2291_vm14, %v2287_v26, 1326507024  ;;  %v2017_v61 = vshll.u32 %v7540_v14, %v7588_v41 }
 0x336   :  { %v2218_v21 = vsub.s32 0, %v7641_v60  ;;  %v2302_v32 = vsel %vm2290_vm0, %v2284_v43, %v2301_v42  ;;  %v7646_v4 = vmul.u32.u64.low %v2304_v37, %v2299_v58  ;;  %v7647_v7 = vmul.u32.u64.high %v2304_v37, %v2299_v58, %v7646_v4 }
 0x337   :  { %vm5101_vm6 = vcmp.lt.s32.totalorder %v5100_v30, 0  ;;  %v2303_v13 = vsel %vm2289_vm2, %v2300_v53, %v2302_v32  ;;  %v2364_v25 = vshrl.u32 %v2363_v27, 23  ;;  %v2023_v36 = vor.u32 4788187, %v2022_v29 }
 0x338   :  { %v7653_v62 = vmul.u32.u64.low %v2304_v37, %v2303_v13  ;;  %v7654_v40 = vmul.u32.u64.high %v2304_v37, %v2303_v13, %v7653_v62  ;;  %v10012_v26 = vand.u32 2147483647, %v7618_v44  ;;  %v1922_v43 = vcvt.s32.f32 %v7612_v12 }
 0x339   :  { %v5103_v6 = vmin.u32 %v2218_v21, %v7641_v60  ;;  %v2295_v23 = vsel %vm2289_vm2, %v2292_v39, %v2294_v19  ;;  %v5110_v22 = vadd.s32 4294967169, %v2364_v25  ;;  %v2019_v59 = vor.u32 %v2018_v31, %v2017_v61 }
 0x33a   :  { %v2119_v14 = vsel %vm5101_vm6, 0, %v5100_v30  ;;  %v2314_v41 = vadd.s32 1, %v7647_v7  ;;  %v7662_v27 = vadd.f32 %v1817_v48, %v7420_v9  ;;  %v7666_v29 = vmul.f32 %v1922_v43, %v1920_v28 }
 0x33b   :  { %v2370_v53 = vadd.s32 1, %v5110_v22  ;;  %v2024_v58 = vand.u32 2147483647, %v2023_v36  ;;  %v2311_v42 = vmul.u32 %v2304_v37, %v2295_v23  ;;  %vm2313_vm8 = vc.u32 %v7654_v40, %v7646_v4 }
 0x33c   :  { %v2367_v12 = vand.u32 8388607, %v10012_v26  ;;  %v2120_v63 = vsub.s32 32, %v2119_v14  ;;  %v2220_v31 = vclz %v5103_v6  ;;  %v2315_v30 = vsel %vm2313_vm8, %v2314_v41, %v7647_v7 }
 0x33d   :  { %vm2371_vm1 = vcmp.gt.s32.totalorder %v2370_v53, 0  ;;  %v2026_v39 = vcvt.s32.f32 %v2019_v59  ;;  %v2316_v19 = vadd.s32 %v2315_v30, %v2311_v42  ;;  %v2467_v50 = vand.u32 2139095040, %v7662_v27 }
 0x33e   :  { %v2372_v21 = vsel %vm2371_vm1, %v2370_v53, 0  ;;  %v1924_v28 = vxor.u32 2147483648, %v7666_v29  ;;  %v2104_v37 = vadd.s32 %v7543_v8, %v7549_v17  ;;  %v2121_v13 = vshll.u32 %v7584_v11, %v2119_v14 }
 0x33f   :  { %v2374_v32 = vand.u32 31, %v2372_v21  ;;  %v7677_v61 = vmul.f32 %v2026_v39, %v2024_v58  ;;  %v2124_v25 = vsub.s32 4294967266, %v2119_v14  ;;  %v2317_v48 = vadd.s32 536870912, %v2316_v19 }
 0x340   :  { %v2122_v36 = vshrl.u32 %v2104_v37, %v2120_v63  ;;  %v5104_v7 = vadd.s32 4294967294, %v2220_v31  ;;  %v2368_v62 = vor.u32 8388608, %v2367_v12  ;;  %v2468_v59 = vshrl.u32 %v2467_v50, 23 }
 0x341   :  { %v2375_v43 = vsub.s32 32, %v2374_v32  ;;  %v7680_v6 = vshrl.u32 %v2317_v48, 30  ;;  %v2377_v23 = vshll.u32 %v10128_v57, %v2374_v32  ;;  %v2380_v22 = vshll.u32 %v10113_v52, %v2374_v32 }
 0x342   :  { %v2383_v41 = vshll.u32 %v10129_v35, %v2374_v32  ;;  %v2373_v53 = vshrl.u32 %v2372_v21, 5  ;;  %v2386_v58 = vshll.u32 %v10118_v16, %v2374_v32  ;;  %v2125_v12 = vadd.s32 127, %v2124_v25 }
 0x343   :  { %10217 = vst [vmem:[#allocation13_spill] sm:$0xff] %v7680_v6  ;;  %v2378_v8 = vshrl.u32 %v10113_v52, %v2375_v43  ;;  %v2381_v17 = vshrl.u32 %v10129_v35, %v2375_v43  ;;  %v2384_v11 = vshrl.u32 %v10118_v16, %v2375_v43  ;;  %v2319_v14 = vshll.u32 %v7680_v6, 30 }
 0x344   :  { %v2387_v42 = vshrl.u32 %v10119_v56, %v2375_v43  ;;  %vm10040_vm9 = vcmp.lt.s32.totalorder %v7426_v33, 0  ;;  %v7692_v39 = vor.u32 %v2122_v36, %v2121_v13  ;;  %v2408_v48 = vshll.u32 %v2368_v62, 8 }
 0x345   :  { %v2379_v63 = vor.u32 %v2378_v8, %v2377_v23  ;;  %v2382_v31 = vor.u32 %v2381_v17, %v2380_v22  ;;  %v2385_v30 = vor.u32 %v2384_v11, %v2383_v41  ;;  %v7694_v50 = vsub.s32 %v2316_v19, %v2319_v14  ;;  %v1819_v41 = vpop.f32.mrf.mxu0 }
 0x346   :  { %v2388_v37 = vor.u32 %v2387_v42, %v2386_v58  ;;  %vm5105_vm11 = vcmp.lt.s32.totalorder %v5104_v7, 0  ;;  %v2389_v3 = vshll.u32 %v10119_v56, %v2374_v32  ;;  %v2390_v21 = vshrl.u32 %v10121_v55, %v2375_v43 }
 0x347   :  { %v5114_v10 = vadd.s32 4294967169, %v2468_v59  ;;  %v2322_v1 = vsub.s32 0, %v7694_v50  ;;  %vm2392_vm4 = vcmp.lt.s32.totalorder %v2373_v53, 1  ;;  %vm2394_vm3 = vcmp.lt.s32.totalorder %v2373_v53, 3 }
 0x348   :  { %vm2395_vm10 = vcmp.lt.s32.totalorder %v2373_v53, 4  ;;  %v2391_v25 = vor.u32 %v2390_v21, %v2389_v3  ;;  %v2400_v13 = vsel %vm2392_vm4, %v2379_v63, %v2382_v31  ;;  %v2376_v19 = vshrl.u32 %v10128_v57, %v2375_v43 }
 0x349   :  { %v2397_v23 = vsel %vm2395_vm10, %v2385_v30, 2102212464  ;;  %v2401_v36 = vsel %vm2395_vm10, %v2388_v37, 920167782  ;;  %vm2393_vm5 = vcmp.lt.s32.totalorder %v2373_v53, 2  ;;  %v5107_v22 = vmin.u32 %v2322_v1, %v7694_v50 }
 0x34a   :  { %v2402_v62 = vsel %vm2394_vm3, %v2385_v30, %v2401_v36  ;;  %v10013_v32 = vand.u32 2147483647, %v7662_v27  ;;  %v2404_v8 = vsel %vm2392_vm4, %v2382_v31, %v2385_v30  ;;  %v2405_v17 = vsel %vm2395_vm10, %v2391_v25, 1326507024 }
 0x34b   :  { %v2403_v59 = vsel %vm2393_vm5, %v2400_v13, %v2402_v62  ;;  %v7707_v3 = vsel %vm5105_vm11, 0, %v5104_v7  ;;  %v2396_v11 = vsel %vm2392_vm4, %v2376_v19, %v2379_v63  ;;  %v2398_v43 = vsel %vm2394_vm3, %v2382_v31, %v2397_v23 }
 0x34c   :  { %v2406_v14 = vsel %vm2394_vm3, %v2388_v37, %v2405_v17  ;;  %v7713_v42 = vmul.u32.u64.low %v2408_v48, %v2403_v59  ;;  %v7714_v21 = vmul.u32.u64.high %v2408_v48, %v2403_v59, %v7713_v42  ;;  %v2474_v1 = vadd.s32 1, %v5114_v10 }
 0x34d   :  { %v2407_v58 = vsel %vm2393_vm5, %v2404_v8, %v2406_v14  ;;  %v2126_v13 = vshll.u32 %v2125_v12, 23  ;;  %v7721_v7 = vadd.f32 %v1819_v41, %v7420_v9  ;;  %v7728_v63 = vsel %vm10040_vm9, %v1924_v28, %v7666_v29 }
 0x34e   :  { %v7717_v30 = vmul.u32.u64.low %v2408_v48, %v2407_v58  ;;  %v7718_v25 = vmul.u32.u64.high %v2408_v48, %v2407_v58, %v7717_v30  ;;  %10218 = vst [vmem:[#allocation12_spill] sm:$0xff] %v7728_v63  ;;  %v2324_v31 = vclz %v5107_v22  ;;  %vm2475_vm12 = vcmp.gt.s32.totalorder %v2474_v1, 0 }
 0x34f   :  { %v2228_v37 = vsub.s32 4294967266, %v7707_v3  ;;  %v2399_v10 = vsel %vm2393_vm5, %v2396_v11, %v2398_v43  ;;  %v2471_v12 = vand.u32 8388607, %v10013_v32  ;;  %v2476_v23 = vsel %vm2475_vm12, %v2474_v1, 0 }
 0x350   :  { %v7737_v36 = vadd.s32 %v7593_v46, %v7602_v5  ;;  %v2418_v19 = vadd.s32 1, %v7714_v21  ;;  %v2478_v29 = vand.u32 31, %v2476_v23  ;;  %v7740_v28 = vor.u32 4788187, %v2126_v13 }
 0x351   :  { %v2571_v22 = vand.u32 2139095040, %v7721_v7  ;;  %v5108_v59 = vadd.s32 4294967294, %v2324_v31  ;;  %v2415_v8 = vmul.u32 %v2408_v48, %v2399_v10  ;;  %vm2417_vm14 = vc.u32 %v7718_v25, %v7713_v42 }
 0x352   :  { %v2479_v17 = vsub.s32 32, %v2478_v29  ;;  %v2224_v46 = vsub.s32 32, %v7707_v3  ;;  %v2229_v5 = vadd.s32 127, %v2228_v37  ;;  %v2419_v41 = vsel %vm2417_vm14, %v2418_v19, %v7714_v21 }
 0x353   :  { %v2472_v11 = vor.u32 8388608, %v2471_v12  ;;  %v2420_v43 = vadd.s32 %v2419_v41, %v2415_v8  ;;  %v2477_v14 = vshrl.u32 %v2476_v23, 5  ;;  %v2481_v13 = vshll.u32 %v10128_v57, %v2478_v29 }
 0x354   :  { %v2482_v58 = vshrl.u32 %v10113_v52, %v2479_v17  ;;  %v2485_v1 = vshrl.u32 %v10129_v35, %v2479_v17  ;;  %v2484_v48 = vshll.u32 %v10113_v52, %v2478_v29  ;;  %v2487_v30 = vshll.u32 %v10129_v35, %v2478_v29 }
 0x355   :  { %v2488_v31 = vshrl.u32 %v10118_v16, %v2479_v17  ;;  %vm5109_vm7 = vcmp.lt.s32.totalorder %v5108_v59, 0  ;;  %v2421_v10 = vadd.s32 536870912, %v2420_v43  ;;  %v2490_v37 = vshll.u32 %v10118_v16, %v2478_v29 }
 0x356   :  { %v2491_v21 = vshrl.u32 %v10119_v56, %v2479_v17  ;;  %v2230_v12 = vshll.u32 %v2229_v5, 23  ;;  %v2483_v23 = vor.u32 %v2482_v58, %v2481_v13  ;;  %v2486_v19 = vor.u32 %v2485_v1, %v2484_v48 }
 0x357   :  { %v2489_v8 = vor.u32 %v2488_v31, %v2487_v30  ;;  %v7757_v41 = vshrl.u32 %v2421_v10, 30  ;;  %v2493_v45 = vshll.u32 %v10119_v56, %v2478_v29  ;;  %v2494_v26 = vshrl.u32 %v10121_v55, %v2479_v17 }
 0x358   :  { %v2492_v0 = vor.u32 %v2491_v21, %v2490_v37  ;;  %v2327_v32 = vsel %vm5109_vm7, 0, %v5108_v59  ;;  %vm2499_vm0 = vcmp.lt.s32.totalorder %v2477_v14, 4  ;;  %v2512_v62 = vshll.u32 %v2472_v11, 8 }
 0x359   :  { %10219 = vst [vmem:[#allocation7_spill] sm:$0xff] %v7757_v41  ;;  %v2572_v9 = vshrl.u32 %v2571_v22, 23  ;;  %v2423_v53 = vshll.u32 %v7757_v41, 30  ;;  %v2495_v63 = vor.u32 %v2494_v26, %v2493_v45  ;;  %vm2496_vm2 = vcmp.lt.s32.totalorder %v2477_v14, 1 }
 0x35a   :  { %v2501_v5 = vsel %vm2499_vm0, %v2489_v8, 2102212464  ;;  %v2480_v58 = vshrl.u32 %v10128_v57, %v2479_v17  ;;  %vm2498_vm6 = vcmp.lt.s32.totalorder %v2477_v14, 3  ;;  %v2504_v1 = vsel %vm2496_vm2, %v2483_v23, %v2486_v19 }
 0x35b   :  { %v2505_v13 = vsel %vm2499_vm0, %v2492_v0, 920167782  ;;  %v7765_v48 = vsub.s32 %v2420_v43, %v2423_v53  ;;  %vm2497_vm8 = vcmp.lt.s32.totalorder %v2477_v14, 2  ;;  %v2508_v59 = vsel %vm2496_vm2, %v2486_v19, %v2489_v8  ;;  %v1823_v53 = vpop.f32.mrf.mxu0 }
 0x35c   :  { %v2506_v29 = vsel %vm2498_vm6, %v2489_v8, %v2505_v13  ;;  %vm10041_vm1 = vcmp.lt.s32.totalorder %v7430_v54, 0  ;;  %v2500_v22 = vsel %vm2496_vm2, %v2480_v58, %v2483_v23  ;;  %v2502_v11 = vsel %vm2498_vm6, %v2486_v19, %v2501_v5 }
 0x35d   :  { %v2507_v45 = vsel %vm2497_vm8, %v2504_v1, %v2506_v29  ;;  %v2509_v26 = vsel %vm2499_vm0, %v2495_v63, 1326507024  ;;  %v2426_v30 = vsub.s32 0, %v7765_v48  ;;  %v2328_v43 = vsub.s32 32, %v2327_v32 }
 0x35e   :  { %v2510_v17 = vsel %vm2498_vm6, %v2492_v0, %v2509_v26  ;;  %v7771_v31 = vmul.u32.u64.low %v2512_v62, %v2507_v45  ;;  %v7772_v10 = vmul.u32.u64.high %v2512_v62, %v2507_v45, %v7771_v31  ;;  %v2332_v37 = vsub.s32 4294967266, %v2327_v32 }
 0x35f   :  { %v2511_v21 = vsel %vm2497_vm8, %v2508_v59, %v2510_v17  ;;  %v5118_v8 = vadd.s32 4294967169, %v2572_v9  ;;  %v2128_v23 = vand.u32 2147483647, %v7740_v28  ;;  %v5111_v19 = vmin.u32 %v2426_v30, %v7765_v48 }
 0x360   :  { %v7778_v5 = vmul.u32.u64.low %v2512_v62, %v2511_v21  ;;  %v7779_v58 = vmul.u32.u64.high %v2512_v62, %v2511_v21, %v7778_v5  ;;  %v2312_v0 = vadd.s32 %v7646_v4, %v7654_v40  ;;  %v2503_v63 = vsel %vm2497_vm8, %v2500_v22, %v2502_v11 }
 0x361   :  { %v2578_v1 = vadd.s32 1, %v5118_v8  ;;  %v7785_v13 = vadd.f32 %v1823_v53, %v7424_v2  ;;  %v2225_v29 = vshll.u32 %v7641_v60, %v7707_v3  ;;  %v2226_v9 = vshrl.u32 %v7737_v36, %v2224_v46 }
 0x362   :  { %v7790_v28 = vor.u32 4788187, %v2230_v12  ;;  %v2522_v59 = vadd.s32 1, %v7772_v10  ;;  %v2330_v45 = vshrl.u32 %v2312_v0, %v2328_v43  ;;  %v7793_v26 = vadd.s32 127, %v2332_v37 }
 0x363   :  { %v10220_v4 = vand.u32 2147483647, %v7721_v7  ;;  %vm2579_vm11 = vcmp.gt.s32.totalorder %v2578_v1, 0  ;;  %v2428_v14 = vclz %v5111_v19  ;;  %v2519_v22 = vmul.u32 %v2512_v62, %v2503_v63 }
 0x364   :  { %vm2521_vm4 = vc.u32 %v7779_v58, %v7771_v31  ;;  %v2580_v11 = vsel %vm2579_vm11, %v2578_v1, 0  ;;  %v2329_v60 = vshll.u32 %v7694_v50, %v2327_v32  ;;  %v2675_v46 = vand.u32 2139095040, %v7785_v13  ;;  %v1825_v50 = vpop.f32.mrf.mxu0 }
 0x365   :  { %v2575_v40 = vand.u32 8388607, %v10220_v4  ;;  %v2523_v3 = vsel %vm2521_vm4, %v2522_v59, %v7772_v10  ;;  %v2582_v36 = vand.u32 31, %v2580_v11  ;;  %v10221_v12 = vxor.u32 2147483648, %v7677_v61 }
 0x366   :  { %v10223_v62 = vcvt.s32.f32 %v7692_v39  ;;  %v7813_v53 = vor.u32 %v2226_v9, %v2225_v29  ;;  %v2524_v43 = vadd.s32 %v2523_v3, %v2519_v22  ;;  %v7816_v10 = vor.u32 %v2330_v45, %v2329_v60 }
 0x367   :  { %v7807_v30 = vsel %vm10041_vm1, %v10221_v12, %v7677_v61  ;;  %v2583_v37 = vsub.s32 32, %v2582_v36  ;;  %v10016_v21 = vand.u32 2147483647, %v7785_v13  ;;  %v5112_v19 = vadd.s32 4294967294, %v2428_v14 }
 0x368   :  { %10222 = vst [vmem:[#allocation27_spill] sm:$0xff] %v7807_v30  ;;  %v7811_v17 = vmul.f32 %v10223_v62, %v2128_v23  ;;  %v2525_v61 = vadd.s32 536870912, %v2524_v43  ;;  %v2576_v5 = vor.u32 8388608, %v2575_v40  ;;  %v2676_v0 = vshrl.u32 %v2675_v46, 23 }
 0x369   :  { %v2586_v39 = vshrl.u32 %v10113_v52, %v2583_v37  ;;  %v2589_v23 = vshrl.u32 %v10129_v35, %v2583_v37  ;;  %v7823_v63 = vadd.f32 %v1825_v50, %v7424_v2  ;;  %v2585_v29 = vshll.u32 %v10128_v57, %v2582_v36 }
 0x36a   :  { %v7825_v1 = vshrl.u32 %v2525_v61, 30  ;;  %v2588_v9 = vshll.u32 %v10113_v52, %v2582_v36  ;;  %v2592_v59 = vshrl.u32 %v10118_v16, %v2583_v37  ;;  %v2581_v45 = vshrl.u32 %v2580_v11, 5 }
 0x36b   :  { %v2591_v4 = vshll.u32 %v10129_v35, %v2582_v36  ;;  %v2594_v40 = vshll.u32 %v10118_v16, %v2582_v36  ;;  %v2595_v14 = vshrl.u32 %v10119_v56, %v2583_v37  ;;  %vm5113_vm3 = vcmp.lt.s32.totalorder %v5112_v19, 0 }
 0x36c   :  { %v2527_v22 = vshll.u32 %v7825_v1, 30  ;;  %v2587_v2 = vor.u32 %v2586_v39, %v2585_v29  ;;  %v2590_v60 = vor.u32 %v2589_v23, %v2588_v9  ;;  %v2597_v12 = vshll.u32 %v10119_v56, %v2582_v36 }
 0x36d   :  { %v2593_v3 = vor.u32 %v2592_v59, %v2591_v4  ;;  %v2596_v46 = vor.u32 %v2595_v14, %v2594_v40  ;;  %v2598_v62 = vshrl.u32 %v10121_v55, %v2583_v37  ;;  %v2616_v11 = vshll.u32 %v2576_v5, 8 }
 0x36e   :  { %v7836_v50 = vsub.s32 %v2524_v43, %v2527_v22  ;;  %v5122_v61 = vadd.s32 4294967169, %v2676_v0  ;;  %v2679_v8 = vand.u32 8388607, %v10016_v21  ;;  %v7840_v32 = vsel %vm5113_vm3, 0, %v5112_v19 }
 0x36f   :  { %v2599_v20 = vor.u32 %v2598_v62, %v2597_v12  ;;  %vm2600_vm10 = vcmp.lt.s32.totalorder %v2581_v45, 1  ;;  %v2779_v39 = vand.u32 2139095040, %v7823_v63  ;;  %vm2602_vm5 = vcmp.lt.s32.totalorder %v2581_v45, 3 }
 0x370   :  { %v2530_v23 = vsub.s32 0, %v7836_v50  ;;  %vm2603_vm12 = vcmp.lt.s32.totalorder %v2581_v45, 4  ;;  %v2608_v36 = vsel %vm2600_vm10, %v2587_v2, %v2590_v60  ;;  %v2612_v5 = vsel %vm2600_vm10, %v2590_v60, %v2593_v3 }
 0x371   :  { %v2605_v29 = vsel %vm2603_vm12, %v2593_v3, 2102212464  ;;  %v2609_v43 = vsel %vm2603_vm12, %v2596_v46, 920167782  ;;  %v2613_v0 = vsel %vm2603_vm12, %v2599_v20, 1326507024  ;;  %v2584_v19 = vshrl.u32 %v10128_v57, %v2583_v37 }
 0x372   :  { %v5115_v9 = vmin.u32 %v2530_v23, %v7836_v50  ;;  %vm2601_vm14 = vcmp.lt.s32.totalorder %v2581_v45, 2  ;;  %v2610_v59 = vsel %vm2602_vm5, %v2593_v3, %v2609_v43  ;;  %v2436_v4 = vsub.s32 4294967266, %v7840_v32 }
 0x373   :  { %v2611_v40 = vsel %vm2601_vm14, %v2608_v36, %v2610_v59  ;;  %v2614_v14 = vsel %vm2602_vm5, %v2596_v46, %v2613_v0  ;;  %v2682_v22 = vadd.s32 1, %v5122_v61  ;;  %v2604_v62 = vsel %vm2600_vm10, %v2584_v19, %v2587_v2 }
 0x374   :  { %v2532_v12 = vclz %v5115_v9  ;;  %v2606_v21 = vsel %vm2602_vm5, %v2590_v60, %v2605_v29  ;;  %v2615_v20 = vsel %vm2601_vm14, %v2612_v5, %v2614_v14  ;;  %v2234_v36 = vcvt.s32.f32 %v7813_v53 }
 0x375   :  { %v7855_v23 = vmul.u32.u64.low %v2616_v11, %v2615_v20  ;;  %v7856_v33 = vmul.u32.u64.high %v2616_v11, %v2615_v20, %v7855_v23  ;;  %v7858_v37 = vmul.u32.u64.low %v2616_v11, %v2611_v40  ;;  %v7859_v30 = vmul.u32.u64.high %v2616_v11, %v2611_v40, %v7858_v37 }
 0x376   :  { %v2680_v46 = vor.u32 8388608, %v2679_v8  ;;  %vm2683_vm7 = vcmp.gt.s32.totalorder %v2682_v22, 0  ;;  %v2437_v61 = vadd.s32 127, %v2436_v4  ;;  %v2607_v2 = vsel %vm2601_vm14, %v2604_v62, %v2606_v21 }
 0x377   :  { %v2684_v43 = vsel %vm2683_vm7, %v2682_v22, 0  ;;  %v2780_v60 = vshrl.u32 %v2779_v39, 23  ;;  %v10224_v29 = vand.u32 2147483647, %v7790_v28  ;;  %v2416_v0 = vadd.s32 %v7713_v42, %v7718_v25 }
 0x378   :  { %v5116_v9 = vadd.s32 4294967294, %v2532_v12  ;;  %v2686_v19 = vand.u32 31, %v2684_v43  ;;  %v10225_v59 = vshll.u32 %v7793_v26, 23  ;;  %vm2625_vm0 = vc.u32 %v7856_v33, %v7858_v37 }
 0x379   :  { %v7867_v5 = vmul.f32 %v2234_v36, %v10224_v29  ;;  %v2626_v21 = vadd.s32 1, %v7859_v30  ;;  %v2623_v8 = vmul.u32 %v2616_v11, %v2607_v2  ;;  %v7879_v45 = vshll.u32 %v2680_v46, 8 }
 0x37a   :  { %v7873_v40 = vor.u32 4788187, %v10225_v59  ;;  %v2687_v28 = vsub.s32 32, %v2686_v19  ;;  %v2432_v42 = vsub.s32 32, %v7840_v32  ;;  %v2438_v25 = vshll.u32 %v2437_v61, 23 }
 0x37b   :  { %v2627_v26 = vsel %vm2625_vm0, %v2626_v21, %v7859_v30  ;;  %v5126_v4 = vadd.s32 4294967169, %v2780_v60  ;;  %vm5117_vm2 = vcmp.lt.s32.totalorder %v5116_v9, 0  ;;  %v2689_v22 = vshll.u32 %v10128_v57, %v2686_v19 }
 0x37c   :  { %v2628_v14 = vadd.s32 %v2627_v26, %v2623_v8  ;;  %v2692_v12 = vshll.u32 %v10113_v52, %v2686_v19  ;;  %v2690_v62 = vshrl.u32 %v10113_v52, %v2687_v28  ;;  %v2693_v11 = vshrl.u32 %v10129_v35, %v2687_v28 }
 0x37d   :  { %v2695_v20 = vshll.u32 %v10129_v35, %v2686_v19  ;;  %v2696_v23 = vshrl.u32 %v10118_v16, %v2687_v28  ;;  %v2685_v46 = vshrl.u32 %v2684_v43, 5  ;;  %v2698_v61 = vshll.u32 %v10118_v16, %v2686_v19 }
 0x37e   :  { %v2629_v36 = vadd.s32 536870912, %v2628_v14  ;;  %v2699_v30 = vshrl.u32 %v10119_v56, %v2687_v28  ;;  %v2433_v2 = vshll.u32 %v7765_v48, %v7840_v32  ;;  %v2691_v60 = vor.u32 %v2690_v62, %v2689_v22 }
 0x37f   :  { %v2694_v29 = vor.u32 %v2693_v11, %v2692_v12  ;;  %v2697_v59 = vor.u32 %v2696_v23, %v2695_v20  ;;  %v2434_v21 = vshrl.u32 %v2416_v0, %v2432_v42  ;;  %v2439_v8 = vor.u32 4788187, %v2438_v25 }
 0x380   :  { %v7894_v26 = vshrl.u32 %v2629_v36, 30  ;;  %v2700_v3 = vor.u32 %v2699_v30, %v2698_v61  ;;  %v2535_v53 = vsel %vm5117_vm2, 0, %v5116_v9  ;;  %v2701_v39 = vshll.u32 %v10119_v56, %v2686_v19 }
 0x381   :  { %v2702_v43 = vshrl.u32 %v10121_v55, %v2687_v28  ;;  %v2786_v54 = vadd.s32 1, %v5126_v4  ;;  %vm2704_vm6 = vcmp.lt.s32.totalorder %v2685_v46, 1  ;;  %vm2706_vm8 = vcmp.lt.s32.totalorder %v2685_v46, 3 }
 0x382   :  { %v2631_v51 = vshll.u32 %v7894_v26, 30  ;;  %vm2707_vm11 = vcmp.lt.s32.totalorder %v2685_v46, 4  ;;  %v2712_v0 = vsel %vm2704_vm6, %v2691_v60, %v2694_v29  ;;  %v2688_v22 = vshrl.u32 %v10128_v57, %v2687_v28 }
 0x383   :  { %v2703_v48 = vor.u32 %v2702_v43, %v2701_v39  ;;  %v2709_v32 = vsel %vm2707_vm11, %v2697_v59, 2102212464  ;;  %v2713_v42 = vsel %vm2707_vm11, %v2700_v3, 920167782  ;;  %vm2705_vm4 = vcmp.lt.s32.totalorder %v2685_v46, 2 }
 0x384   :  { %v7901_v25 = vsub.s32 %v2628_v14, %v2631_v51  ;;  %v2714_v9 = vsel %vm2706_vm8, %v2697_v59, %v2713_v42  ;;  %v2536_v19 = vsub.s32 32, %v2535_v53  ;;  %v2716_v12 = vsel %vm2704_vm6, %v2694_v29, %v2697_v59  ;;  %v1829_v51 = vpop.f32.mrf.mxu0 }
 0x385   :  { %v2715_v4 = vsel %vm2705_vm4, %v2712_v0, %v2714_v9  ;;  %v2717_v62 = vsel %vm2707_vm11, %v2703_v48, 1326507024  ;;  %v2540_v11 = vsub.s32 4294967266, %v2535_v53  ;;  %v2708_v39 = vsel %vm2704_vm6, %v2688_v22, %v2691_v60 }
 0x386   :  { %v2710_v20 = vsel %vm2706_vm8, %v2694_v29, %v2709_v32  ;;  %v2718_v23 = vsel %vm2706_vm8, %v2700_v3, %v2717_v62  ;;  %v2435_v14 = vor.u32 %v2434_v21, %v2433_v2  ;;  %v2520_v30 = vadd.s32 %v7771_v31, %v7779_v58 }
 0x387   :  { %v2719_v28 = vsel %vm2705_vm4, %v2716_v12, %v2718_v23  ;;  %v7912_v36 = vmul.u32.u64.low %v7879_v45, %v2715_v4  ;;  %v7913_v61 = vmul.u32.u64.high %v7879_v45, %v2715_v4, %v7912_v36  ;;  %v2634_v59 = vsub.s32 0, %v7901_v25 }
 0x388   :  { %v7920_v60 = vmul.u32.u64.low %v7879_v45, %v2719_v28  ;;  %v7921_v43 = vmul.u32.u64.high %v7879_v45, %v2719_v28, %v7920_v60  ;;  %v2336_v3 = vand.u32 2147483647, %v7873_v40  ;;  %v2711_v2 = vsel %vm2705_vm4, %v2708_v39, %v2710_v20 }
 0x389   :  { %vm2787_vm3 = vcmp.gt.s32.totalorder %v2786_v54, 0  ;;  %v7926_v29 = vadd.f32 %v1829_v51, %v7418_v49  ;;  %v2440_v21 = vand.u32 2147483647, %v2439_v8  ;;  %v2538_v48 = vshrl.u32 %v2520_v30, %v2536_v19 }
 0x38a   :  { %v2541_v32 = vadd.s32 127, %v2540_v11  ;;  %v2788_v0 = vsel %vm2787_vm3, %v2786_v54, 0  ;;  %v2442_v42 = vcvt.s32.f32 %v2435_v14  ;;  %v2730_v31 = vadd.s32 1, %v7913_v61 }
 0x38b   :  { %v10226_v58 = vand.u32 2147483647, %v7823_v63  ;;  %v2790_v9 = vand.u32 31, %v2788_v0  ;;  %v2537_v4 = vshll.u32 %v7836_v50, %v2535_v53  ;;  %v5119_v40 = vmin.u32 %v2634_v59, %v7901_v25 }
 0x38c   :  { %v2727_v46 = vmul.u32 %v7879_v45, %v2711_v2  ;;  %vm2729_vm10 = vc.u32 %v7921_v43, %v7912_v36  ;;  %v2236_v8 = vxor.u32 2147483648, %v7867_v5  ;;  %v10227_v54 = vcvt.s32.f32 %v7816_v10 }
 0x38d   :  { %v2783_v22 = vand.u32 8388607, %v10226_v58  ;;  %v2731_v12 = vsel %vm2729_vm10, %v2730_v31, %v7913_v61  ;;  %v2791_v62 = vsub.s32 32, %v2790_v9  ;;  %v7942_v11 = vmul.f32 %v2442_v42, %v2440_v21 }
 0x38e   :  { %v7939_v19 = vmul.f32 %v10227_v54, %v2336_v3  ;;  %v7944_v39 = vor.u32 %v2538_v48, %v2537_v4  ;;  %v2542_v50 = vshll.u32 %v2541_v32, 23  ;;  %v2732_v53 = vadd.s32 %v2731_v12, %v2727_v46 }
 0x38f   :  { %v2784_v20 = vor.u32 8388608, %v2783_v22  ;;  %v2794_v45 = vshrl.u32 %v10113_v52, %v2791_v62  ;;  %v2797_v23 = vshrl.u32 %v10129_v35, %v2791_v62  ;;  %v2883_v51 = vand.u32 2139095040, %v7926_v29 }
 0x390   :  { %v2636_v14 = vclz %v5119_v40  ;;  %v2733_v10 = vadd.s32 536870912, %v2732_v53  ;;  %v2793_v28 = vshll.u32 %v10128_v57, %v2790_v9  ;;  %v2796_v61 = vshll.u32 %v10113_v52, %v2790_v9 }
 0x391   :  { %v2799_v30 = vshll.u32 %v10129_v35, %v2790_v9  ;;  %v2800_v59 = vshrl.u32 %v10118_v16, %v2791_v62  ;;  %v2802_v60 = vshll.u32 %v10118_v16, %v2790_v9  ;;  %v2803_v3 = vshrl.u32 %v10119_v56, %v2791_v62 }
 0x392   :  { %v7955_v2 = vshrl.u32 %v2733_v10, 30  ;;  %v2789_v21 = vshrl.u32 %v2788_v0, 5  ;;  %v2795_v48 = vor.u32 %v2794_v45, %v2793_v28  ;;  %v2798_v32 = vor.u32 %v2797_v23, %v2796_v61 }
 0x393   :  { %v2801_v42 = vor.u32 %v2800_v59, %v2799_v30  ;;  %v2804_v31 = vor.u32 %v2803_v3, %v2802_v60  ;;  %v2805_v58 = vshll.u32 %v10119_v56, %v2790_v9  ;;  %v2806_v22 = vshrl.u32 %v10121_v55, %v2791_v62 }
 0x394   :  { %vm10043_vm5 = vcmp.lt.s32.totalorder %v7436_v24, 0  ;;  %v2543_v4 = vor.u32 4788187, %v2542_v50  ;;  %v2546_v40 = vcvt.s32.f32 %v7944_v39  ;;  %v2735_v46 = vshll.u32 %v7955_v2, 30 }
 0x395   :  { %v10023_v54 = vand.u32 2147483647, %v7926_v29  ;;  %v5120_v12 = vadd.s32 4294967294, %v2636_v14  ;;  %v2807_v10 = vor.u32 %v2806_v22, %v2805_v58  ;;  %v2824_v0 = vshll.u32 %v2784_v20, 8 }
 0x396   :  { %v2884_v45 = vshrl.u32 %v2883_v51, 23  ;;  %vm10044_vm12 = vcmp.lt.s32.totalorder %v7441_v47, 0  ;;  %v7964_v23 = vsub.s32 %v2732_v53, %v2735_v46  ;;  %v2792_v9 = vshrl.u32 %v10128_v57, %v2791_v62 }
 0x397   :  { %vm2808_vm14 = vcmp.lt.s32.totalorder %v2789_v21, 1  ;;  %vm2811_vm7 = vcmp.lt.s32.totalorder %v2789_v21, 4  ;;  %vm2810_vm0 = vcmp.lt.s32.totalorder %v2789_v21, 3  ;;  %vm10045_vm2 = vcmp.lt.s32.totalorder %v7554_v38, 0 }
 0x398   :  { %v2813_v50 = vsel %vm2811_vm7, %v2801_v42, 2102212464  ;;  %v2816_v39 = vsel %vm2808_vm14, %v2795_v48, %v2798_v32  ;;  %v2817_v28 = vsel %vm2811_vm7, %v2804_v31, 920167782  ;;  %v2738_v14 = vsub.s32 0, %v7964_v23 }
 0x399   :  { %vm2809_vm6 = vcmp.lt.s32.totalorder %v2789_v21, 2  ;;  %v2818_v20 = vsel %vm2810_vm0, %v2801_v42, %v2817_v28  ;;  %v2820_v51 = vsel %vm2808_vm14, %v2798_v32, %v2801_v42  ;;  %vm2362_vm8 = vcmp.lt.s32.totalorder %v7618_v44, 0 }
 0x39a   :  { %vm5121_vm11 = vcmp.lt.s32.totalorder %v5120_v12, 0  ;;  %v2819_v62 = vsel %vm2809_vm6, %v2816_v39, %v2818_v20  ;;  %v2821_v53 = vsel %vm2811_vm7, %v2807_v10, 1326507024  ;;  %v5130_v61 = vadd.s32 4294967169, %v2884_v45 }
 0x39b   :  { %v2544_v30 = vand.u32 2147483647, %v2543_v4  ;;  %v2812_v59 = vsel %vm2808_vm14, %v2792_v9, %v2795_v48  ;;  %v2814_v60 = vsel %vm2810_vm0, %v2798_v32, %v2813_v50  ;;  %v2822_v3 = vsel %vm2810_vm0, %v2804_v31, %v2821_v53  ;;  %v1831_v9 = vpop.f32.mrf.mxu0 }
 0x39c   :  { %v2823_v58 = vsel %vm2809_vm6, %v2820_v51, %v2822_v3  ;;  %v7978_v22 = vmul.u32.u64.low %v2824_v0, %v2819_v62  ;;  %v7979_v46 = vmul.u32.u64.high %v2824_v0, %v2819_v62, %v7978_v22  ;;  %v2890_v42 = vadd.s32 1, %v5130_v61 }
 0x39d   :  { %v7982_v28 = vsel %vm5121_vm11, 0, %v5120_v12  ;;  %v5123_v39 = vmin.u32 %v2738_v14, %v7964_v23  ;;  %v7985_v10 = vmul.u32.u64.low %v2824_v0, %v2823_v58  ;;  %v7986_v45 = vmul.u32.u64.high %v2824_v0, %v2823_v58, %v7985_v10 }
 0x39e   :  { %v10228_v48 = vxor.u32 2147483648, %v7811_v17  ;;  %v2340_v31 = vxor.u32 2147483648, %v7939_v19  ;;  %v2815_v4 = vsel %vm2809_vm6, %v2812_v59, %v2814_v60  ;;  %vm2891_vm4 = vcmp.gt.s32.totalorder %v2890_v42, 0 }
 0x39f   :  { %v2444_v12 = vxor.u32 2147483648, %v7942_v11  ;;  %v7998_v50 = vmul.f32 %v2546_v40, %v2544_v30  ;;  %v2887_v14 = vand.u32 8388607, %v10023_v54  ;;  %v2892_v20 = vsel %vm2891_vm4, %v2890_v42, 0 }
 0x3a0   :  { %v7993_v32 = vsel %vm10043_vm5, %v10228_v48, %v7811_v17  ;;  %v8007_v17 = vsel %vm10044_vm12, %v2236_v8, %v7867_v5  ;;  %v2640_v21 = vsub.s32 32, %v7982_v28  ;;  %v2834_v51 = vadd.s32 1, %v7979_v46 }
 0x3a1   :  { %10229 = vst [vmem:[#allocation22_spill] sm:$0xff] %v7993_v32  ;;  %10230 = vst [vmem:[#allocation37_spill] sm:$0xff] %v8007_v17  ;;  %v2894_v62 = vand.u32 31, %v2892_v20  ;;  %v2740_v53 = vclz %v5123_v39  ;;  %v2831_v61 = vmul.u32 %v2824_v0, %v2815_v4  ;;  %vm2833_vm3 = vc.u32 %v7986_v45, %v7978_v22 }
 0x3a2   :  { %v8014_v40 = vadd.f32 %v1831_v9, %v7418_v49  ;;  %v8019_v30 = vsel %vm10045_vm2, %v2340_v31, %v7939_v19  ;;  %v2624_v5 = vadd.s32 %v7858_v37, %v7856_v33  ;;  %v2835_v8 = vsel %vm2833_vm3, %v2834_v51, %v7979_v46 }
 0x3a3   :  { %10231 = vst [vmem:[#allocation18_spill] sm:$0xff] %v8019_v30  ;;  %v2895_v59 = vsub.s32 32, %v2894_v62  ;;  %v8027_v0 = vsel %vm2362_vm8, %v2444_v12, %v7942_v11  ;;  %v2836_v49 = vadd.s32 %v2835_v8, %v2831_v61  ;;  %v2888_v3 = vor.u32 8388608, %v2887_v14 }
 0x3a4   :  { %10232 = vst [vmem:[#allocation21_spill] sm:$0xff] %v8027_v0  ;;  %v8030_v58 = vshrl.u32 %v2624_v5, %v2640_v21  ;;  %v2644_v19 = vsub.s32 4294967266, %v7982_v28  ;;  %v5124_v37 = vadd.s32 4294967294, %v2740_v53  ;;  %v2897_v39 = vshll.u32 %v10128_v57, %v2894_v62 }
 0x3a5   :  { %v2898_v42 = vshrl.u32 %v10113_v52, %v2895_v59  ;;  %v2901_v33 = vshrl.u32 %v10129_v35, %v2895_v59  ;;  %v2837_v46 = vadd.s32 536870912, %v2836_v49  ;;  %v2987_v10 = vand.u32 2139095040, %v8014_v40 }
 0x3a6   :  { %v2893_v11 = vshrl.u32 %v2892_v20, 5  ;;  %v2900_v48 = vshll.u32 %v10113_v52, %v2894_v62  ;;  %v2903_v31 = vshll.u32 %v10129_v35, %v2894_v62  ;;  %v2904_v4 = vshrl.u32 %v10118_v16, %v2895_v59 }
 0x3a7   :  { %v8040_v9 = vshrl.u32 %v2837_v46, 30  ;;  %v2899_v12 = vor.u32 %v2898_v42, %v2897_v39  ;;  %v2906_v14 = vshll.u32 %v10118_v16, %v2894_v62  ;;  %v2907_v21 = vshrl.u32 %v10119_v56, %v2895_v59 }
 0x3a8   :  { %v2902_v51 = vor.u32 %v2901_v33, %v2900_v48  ;;  %v2905_v53 = vor.u32 %v2904_v4, %v2903_v31  ;;  %v2909_v61 = vshll.u32 %v10119_v56, %v2894_v62  ;;  %v2910_v5 = vshrl.u32 %v10121_v55, %v2895_v59 }
 0x3a9   :  { %v2645_v20 = vadd.s32 127, %v2644_v19  ;;  %v2839_v8 = vshll.u32 %v8040_v9, 30  ;;  %v2908_v60 = vor.u32 %v2907_v21, %v2906_v14  ;;  %v2928_v54 = vshll.u32 %v2888_v3, 8 }
 0x3aa   :  { %vm5125_vm10 = vcmp.lt.s32.totalorder %v5124_v37, 0  ;;  %v2911_v32 = vor.u32 %v2910_v5, %v2909_v61  ;;  %v2988_v42 = vshrl.u32 %v2987_v10, 23  ;;  %v2896_v15 = vshrl.u32 %v10128_v57, %v2895_v59 }
 0x3ab   :  { %v8048_v39 = vsub.s32 %v2836_v49, %v2839_v8  ;;  %vm2912_vm14 = vcmp.lt.s32.totalorder %v2893_v11, 1  ;;  %vm2915_vm7 = vcmp.lt.s32.totalorder %v2893_v11, 4  ;;  %vm2914_vm0 = vcmp.lt.s32.totalorder %v2893_v11, 3  ;;  %v1835_v8 = vpop.f32.mrf.mxu0 }
 0x3ac   :  { %v2917_v62 = vsel %vm2915_vm7, %v2905_v53, 2102212464  ;;  %v2920_v33 = vsel %vm2912_vm14, %v2899_v12, %v2902_v51  ;;  %v2921_v48 = vsel %vm2915_vm7, %v2908_v60, 920167782  ;;  %vm2913_vm6 = vcmp.lt.s32.totalorder %v2893_v11, 2 }
 0x3ad   :  { %v2842_v19 = vsub.s32 0, %v8048_v39  ;;  %v2922_v31 = vsel %vm2914_vm0, %v2905_v53, %v2921_v48  ;;  %v2924_v3 = vsel %vm2912_vm14, %v2902_v51, %v2905_v53  ;;  %v8053_v4 = vsel %vm5125_vm10, 0, %v5124_v37 }
 0x3ae   :  { %v2923_v10 = vsel %vm2913_vm6, %v2920_v33, %v2922_v31  ;;  %v2925_v49 = vsel %vm2915_vm7, %v2911_v32, 1326507024  ;;  %v5134_v14 = vadd.s32 4294967169, %v2988_v42  ;;  %v2916_v21 = vsel %vm2912_vm14, %v2896_v15, %v2899_v12 }
 0x3af   :  { %v5127_v59 = vmin.u32 %v2842_v19, %v8048_v39  ;;  %v2918_v61 = vsel %vm2914_vm0, %v2902_v51, %v2917_v62  ;;  %v2926_v5 = vsel %vm2914_vm0, %v2908_v60, %v2925_v49  ;;  %v2646_v48 = vshll.u32 %v2645_v20, 23 }
 0x3b0   :  { %v2927_v46 = vsel %vm2913_vm6, %v2924_v3, %v2926_v5  ;;  %v8058_v24 = vmul.u32.u64.low %v2928_v54, %v2923_v10  ;;  %v8059_v17 = vmul.u32.u64.high %v2928_v54, %v2923_v10, %v8058_v24  ;;  %v2994_v53 = vadd.s32 1, %v5134_v14 }
 0x3b1   :  { %v2844_v37 = vclz %v5127_v59  ;;  %v8062_v34 = vmul.u32.u64.low %v2928_v54, %v2927_v46  ;;  %v8063_v47 = vmul.u32.u64.high %v2928_v54, %v2927_v46, %v8062_v34  ;;  %v2641_v32 = vshll.u32 %v7901_v25, %v7982_v28 }
 0x3b2   :  { %v2919_v15 = vsel %vm2913_vm6, %v2916_v21, %v2918_v61  ;;  %vm2995_vm11 = vcmp.gt.s32.totalorder %v2994_v53, 0  ;;  %v8069_v60 = vadd.f32 %v1835_v8, %v7416_v18  ;;  %v8073_v12 = vadd.s32 %v7912_v36, %v7921_v43 }
 0x3b3   :  { %v2748_v51 = vsub.s32 4294967266, %v8053_v4  ;;  %v5128_v20 = vadd.s32 4294967294, %v2844_v37  ;;  %v2996_v42 = vsel %vm2995_vm11, %v2994_v53, 0  ;;  %v8077_v46 = vor.u32 %v8030_v58, %v2641_v32 }
 0x3b4   :  { %v2938_v34 = vadd.s32 1, %v8059_v17  ;;  %v10233_v25 = vand.u32 2147483647, %v8014_v40  ;;  %v2998_v11 = vand.u32 31, %v2996_v42  ;;  %v8082_v62 = vor.u32 4788187, %v2646_v48 }
 0x3b5   :  { %vm5129_vm4 = vcmp.lt.s32.totalorder %v5128_v20, 0  ;;  %v2935_v33 = vmul.u32 %v2928_v54, %v2919_v15  ;;  %vm2937_vm3 = vc.u32 %v8063_v47, %v8058_v24  ;;  %v10036_v58 = vand.u32 2147483647, %v8069_v60 }
 0x3b6   :  { %v2991_v28 = vand.u32 8388607, %v10233_v25  ;;  %v8086_v36 = vsel %vm5129_vm4, 0, %v5128_v20  ;;  %v2939_v43 = vsel %vm2937_vm3, %v2938_v34, %v8059_v17  ;;  %v2999_v19 = vsub.s32 32, %v2998_v11 }
 0x3b7   :  { %v2744_v31 = vsub.s32 32, %v8053_v4  ;;  %v8091_v3 = vadd.s32 127, %v2748_v51  ;;  %v2832_v10 = vadd.s32 %v7978_v22, %v7986_v45  ;;  %v2940_v49 = vadd.s32 %v2939_v43, %v2935_v33 }
 0x3b8   :  { %v2992_v14 = vor.u32 8388608, %v2991_v28  ;;  %v3002_v54 = vshrl.u32 %v10113_v52, %v2999_v19  ;;  %v3005_v59 = vshrl.u32 %v10129_v35, %v2999_v19  ;;  %v3091_v21 = vand.u32 2139095040, %v8069_v60 }
 0x3b9   :  { %v2848_v17 = vsub.s32 32, %v8086_v36  ;;  %v2941_v61 = vadd.s32 536870912, %v2940_v49  ;;  %v2997_v5 = vshrl.u32 %v2996_v42, 5  ;;  %v3001_v8 = vshll.u32 %v10128_v57, %v2998_v11 }
 0x3ba   :  { %v2852_v53 = vsub.s32 4294967266, %v8086_v36  ;;  %v3004_v48 = vshll.u32 %v10113_v52, %v2998_v11  ;;  %v3007_v22 = vshll.u32 %v10129_v35, %v2998_v11  ;;  %v3008_v45 = vshrl.u32 %v10118_v16, %v2999_v19 }
 0x3bb   :  { %v8104_v37 = vshrl.u32 %v2941_v61, 30  ;;  %v3003_v32 = vor.u32 %v3002_v54, %v3001_v8  ;;  %v3010_v15 = vshll.u32 %v10118_v16, %v2998_v11  ;;  %v3011_v51 = vshrl.u32 %v10119_v56, %v2999_v19 }
 0x3bc   :  { %v3006_v20 = vor.u32 %v3005_v59, %v3004_v48  ;;  %v3009_v34 = vor.u32 %v3008_v45, %v3007_v22  ;;  %v3013_v42 = vshll.u32 %v10119_v56, %v2998_v11  ;;  %v3014_v25 = vshrl.u32 %v10121_v55, %v2999_v19 }
 0x3bd   :  { %v2943_v28 = vshll.u32 %v8104_v37, 30  ;;  %v3012_v33 = vor.u32 %v3011_v51, %v3010_v15  ;;  %v3032_v43 = vshll.u32 %v2992_v14, 8  ;;  %v3095_v30 = vand.u32 8388607, %v10036_v58 }
 0x3be   :  { %v2853_v61 = vadd.s32 127, %v2852_v53  ;;  %v3000_v54 = vshrl.u32 %v10128_v57, %v2999_v19  ;;  %v3015_v8 = vor.u32 %v3014_v25, %v3013_v42  ;;  %v3092_v6 = vshrl.u32 %v3091_v21, 23 }
 0x3bf   :  { %v2850_v38 = vshrl.u32 %v2832_v10, %v2848_v17  ;;  %v8114_v0 = vsub.s32 %v2940_v49, %v2943_v28  ;;  %vm3016_vm10 = vcmp.lt.s32.totalorder %v2997_v5, 1  ;;  %vm3019_vm14 = vcmp.lt.s32.totalorder %v2997_v5, 4 }
 0x3c0   :  { %vm3018_vm7 = vcmp.lt.s32.totalorder %v2997_v5, 3  ;;  %v3021_v11 = vsel %vm3019_vm14, %v3009_v34, 2102212464  ;;  %v3024_v59 = vsel %vm3016_vm10, %v3003_v32, %v3006_v20  ;;  %v3025_v48 = vsel %vm3019_vm14, %v3012_v33, 920167782 }
 0x3c1   :  { %v2946_v22 = vsub.s32 0, %v8114_v0  ;;  %vm3017_vm0 = vcmp.lt.s32.totalorder %v2997_v5, 2  ;;  %v3026_v14 = vsel %vm3018_vm7, %v3009_v34, %v3025_v48  ;;  %v3028_v45 = vsel %vm3016_vm10, %v3006_v20, %v3009_v34 }
 0x3c2   :  { %v2854_v15 = vshll.u32 %v2853_v61, 23  ;;  %v3027_v53 = vsel %vm3017_vm0, %v3024_v59, %v3026_v14  ;;  %v3029_v19 = vsel %vm3019_vm14, %v3015_v8, 1326507024  ;;  %v5138_v51 = vadd.s32 4294967169, %v3092_v6  ;;  %v1837_v6 = vpop.f32.mrf.mxu0 }
 0x3c3   :  { %v5131_v10 = vmin.u32 %v2946_v22, %v8114_v0  ;;  %v3020_v49 = vsel %vm3016_vm10, %v3000_v54, %v3003_v32  ;;  %v3022_v21 = vsel %vm3018_vm7, %v3006_v20, %v3021_v11  ;;  %v3030_v17 = vsel %vm3018_vm7, %v3012_v33, %v3029_v19 }
 0x3c4   :  { %v3031_v42 = vsel %vm3017_vm0, %v3028_v45, %v3030_v17  ;;  %v8120_v25 = vmul.u32.u64.low %v3032_v43, %v3027_v53  ;;  %v8121_v28 = vmul.u32.u64.high %v3032_v43, %v3027_v53, %v8120_v25  ;;  %v3098_v58 = vadd.s32 1, %v5138_v51 }
 0x3c5   :  { %v2849_v34 = vshll.u32 %v8048_v39, %v8086_v36  ;;  %v2948_v61 = vclz %v5131_v10  ;;  %v8126_v48 = vmul.u32.u64.low %v3032_v43, %v3031_v42  ;;  %v8127_v59 = vmul.u32.u64.high %v3032_v43, %v3031_v42, %v8126_v48 }
 0x3c6   :  { %v8132_v20 = vshrl.u32 %v8073_v12, %v2744_v31  ;;  %v3023_v33 = vsel %vm3017_vm0, %v3020_v49, %v3022_v21  ;;  %vm3099_vm6 = vcmp.gt.s32.totalorder %v3098_v58, 0  ;;  %v8137_v8 = vor.u32 4788187, %v2854_v15 }
 0x3c7   :  { %v8135_v54 = vor.u32 %v2850_v38, %v2849_v34  ;;  %v5132_v11 = vadd.s32 4294967294, %v2948_v61  ;;  %v3100_v39 = vsel %vm3099_vm6, %v3098_v58, 0  ;;  %v3042_v36 = vadd.s32 1, %v8121_v28 }
 0x3c8   :  { %v3096_v22 = vor.u32 8388608, %v3095_v30  ;;  %v3102_v14 = vand.u32 31, %v3100_v39  ;;  %v8141_v45 = vadd.f32 %v1837_v6, %v7416_v18  ;;  %v3039_v12 = vmul.u32 %v3032_v43, %v3023_v33 }
 0x3c9   :  { %vm5133_vm11 = vcmp.lt.s32.totalorder %v5132_v11, 0  ;;  %vm3041_vm4 = vc.u32 %v8127_v59, %v8120_v25  ;;  %v2936_v38 = vadd.s32 %v8058_v24, %v8063_v47  ;;  %v3101_v47 = vshrl.u32 %v3100_v39, 5 }
 0x3ca   :  { %v2951_v31 = vsel %vm5133_vm11, 0, %v5132_v11  ;;  %v3043_v58 = vsel %vm3041_vm4, %v3042_v36, %v8121_v28  ;;  %v3103_v5 = vsub.s32 32, %v3102_v14  ;;  %v8153_v10 = vshll.u32 %v3096_v22, 8 }
 0x3cb   :  { %v2956_v18 = vsub.s32 4294967266, %v2951_v31  ;;  %v3044_v19 = vadd.s32 %v3043_v58, %v3039_v12  ;;  %v3195_v49 = vand.u32 2139095040, %v8141_v45  ;;  %v2952_v21 = vsub.s32 32, %v2951_v31 }
 0x3cc   :  { %v3106_v51 = vshrl.u32 %v10113_v52, %v3103_v5  ;;  %v3109_v43 = vshrl.u32 %v10129_v35, %v3103_v5  ;;  %v3105_v17 = vshll.u32 %v10128_v57, %v3102_v14  ;;  %v3108_v28 = vshll.u32 %v10113_v52, %v3102_v14 }
 0x3cd   :  { %v3045_v24 = vadd.s32 536870912, %v3044_v19  ;;  %v2957_v42 = vadd.s32 127, %v2956_v18  ;;  %v3111_v34 = vshll.u32 %v10129_v35, %v3102_v14  ;;  %v3112_v61 = vshrl.u32 %v10118_v16, %v3103_v5 }
 0x3ce   :  { %v3107_v6 = vor.u32 %v3106_v51, %v3105_v17  ;;  %v3114_v33 = vshll.u32 %v10118_v16, %v3102_v14  ;;  %v3115_v11 = vshrl.u32 %v10119_v56, %v3103_v5  ;;  %v3110_v36 = vor.u32 %v3109_v43, %v3108_v28 }
 0x3cf   :  { %v8160_v48 = vshrl.u32 %v3045_v24, 30  ;;  %v3113_v22 = vor.u32 %v3112_v61, %v3111_v34  ;;  %v3117_v39 = vshll.u32 %v10119_v56, %v3102_v14  ;;  %v3118_v12 = vshrl.u32 %v10121_v55, %v3103_v5 }
 0x3d0   :  { %v3116_v18 = vor.u32 %v3115_v11, %v3114_v33  ;;  %v3196_v15 = vshrl.u32 %v3195_v49, 23  ;;  %v3192_v30 = vand.u32 2147483647, %v8141_v45  ;;  %v2953_v24 = vshll.u32 %v8114_v0, %v2951_v31 }
 0x3d1   :  { %v3047_v58 = vshll.u32 %v8160_v48, 30  ;;  %v2954_v53 = vshrl.u32 %v2936_v38, %v2952_v21  ;;  %v3104_v51 = vshrl.u32 %v10128_v57, %v3103_v5  ;;  %v3119_v17 = vor.u32 %v3118_v12, %v3117_v39 }
 0x3d2   :  { %v2958_v32 = vshll.u32 %v2957_v42, 23  ;;  %vm3120_vm3 = vcmp.lt.s32.totalorder %v3101_v47, 1  ;;  %vm3123_vm10 = vcmp.lt.s32.totalorder %v3101_v47, 4  ;;  %vm3122_vm14 = vcmp.lt.s32.totalorder %v3101_v47, 3 }
 0x3d3   :  { %v8170_v41 = vsub.s32 %v3044_v19, %v3047_v58  ;;  %v3125_v14 = vsel %vm3123_vm10, %v3113_v22, 2102212464  ;;  %v3128_v43 = vsel %vm3120_vm3, %v3107_v6, %v3110_v36  ;;  %v3129_v28 = vsel %vm3123_vm10, %v3116_v18, 920167782 }
 0x3d4   :  { %vm3121_vm7 = vcmp.lt.s32.totalorder %v3101_v47, 2  ;;  %v3130_v49 = vsel %vm3122_vm14, %v3113_v22, %v3129_v28  ;;  %v3132_v61 = vsel %vm3120_vm3, %v3110_v36, %v3113_v22  ;;  %v2955_v33 = vor.u32 %v2954_v53, %v2953_v24 }
 0x3d5   :  { %v3050_v34 = vsub.s32 0, %v8170_v41  ;;  %v3131_v0 = vsel %vm3121_vm7, %v3128_v43, %v3130_v49  ;;  %v3133_v38 = vsel %vm3123_vm10, %v3119_v17, 1326507024  ;;  %v5142_v31 = vadd.s32 4294967169, %v3196_v15 }
 0x3d6   :  { %v3124_v19 = vsel %vm3120_vm3, %v3104_v51, %v3107_v6  ;;  %v3126_v21 = vsel %vm3122_vm14, %v3110_v36, %v3125_v14  ;;  %v3134_v42 = vsel %vm3122_vm14, %v3116_v18, %v3133_v38  ;;  %v2959_v28 = vor.u32 4788187, %v2958_v32 }
 0x3d7   :  { %v5135_v5 = vmin.u32 %v3050_v34, %v8170_v41  ;;  %v3135_v11 = vsel %vm3121_vm7, %v3132_v61, %v3134_v42  ;;  %v8177_v39 = vmul.u32.u64.low %v8153_v10, %v3131_v0  ;;  %v8178_v12 = vmul.u32.u64.high %v8153_v10, %v3131_v0, %v8177_v39 }
 0x3d8   :  { %v3202_v58 = vadd.s32 1, %v5142_v31  ;;  %v8182_v53 = vmul.u32.u64.low %v8153_v10, %v3135_v11  ;;  %v8183_v24 = vmul.u32.u64.high %v8153_v10, %v3135_v11, %v8182_v53  ;;  %v10234_v15 = vshll.u32 %v7964_v23, %v8053_v4 }
 0x3d9   :  { %v3052_v22 = vclz %v5135_v5  ;;  %v3127_v36 = vsel %vm3121_vm7, %v3124_v19, %v3126_v21  ;;  %v3199_v18 = vand.u32 8388607, %v3192_v30  ;;  %v10235_v51 = vshll.u32 %v8091_v3, 23 }
 0x3da   :  { %v8189_v6 = vor.u32 %v8132_v20, %v10234_v15  ;;  %vm3203_vm0 = vcmp.gt.s32.totalorder %v3202_v58, 0  ;;  %v10236_v17 = vand.u32 2147483647, %v8137_v8  ;;  %v10237_v14 = vcvt.s32.f32 %v8135_v54 }
 0x3db   :  { %v8196_v32 = vor.u32 4788187, %v10235_v51  ;;  %v5136_v23 = vadd.s32 4294967294, %v3052_v22  ;;  %v3204_v4 = vsel %vm3203_vm0, %v3202_v58, 0  ;;  %v2962_v20 = vcvt.s32.f32 %v2955_v33 }
 0x3dc   :  { %v8202_v43 = vmul.f32 %v10237_v14, %v10236_v17  ;;  %v3040_v47 = vadd.s32 %v8120_v25, %v8127_v59  ;;  %v3146_v34 = vadd.s32 1, %v8178_v12  ;;  %v3206_v49 = vand.u32 31, %v3204_v4 }
 0x3dd   :  { %v2960_v61 = vand.u32 2147483647, %v2959_v28  ;;  %vm5137_vm6 = vcmp.lt.s32.totalorder %v5136_v23, 0  ;;  %v3143_v3 = vmul.u32 %v8153_v10, %v3127_v36  ;;  %vm3145_vm11 = vc.u32 %v8183_v24, %v8177_v39 }
 0x3de   :  { %v3055_v8 = vsel %vm5137_vm6, 0, %v5136_v23  ;;  %v3147_v54 = vsel %vm3145_vm11, %v3146_v34, %v8178_v12  ;;  %v3207_v0 = vsub.s32 32, %v3206_v49  ;;  %v3200_v38 = vor.u32 8388608, %v3199_v18 }
 0x3df   :  { %v3056_v31 = vsub.s32 32, %v3055_v8  ;;  %v3060_v33 = vsub.s32 4294967266, %v3055_v8  ;;  %v3148_v5 = vadd.s32 %v3147_v54, %v3143_v3  ;;  %v3205_v19 = vshrl.u32 %v3204_v4, 5 }
 0x3e0   :  { %v3218_v25 = vshll.u32 %v10118_v16, %v3206_v49  ;;  %v3219_v59 = vshrl.u32 %v10119_v56, %v3207_v0  ;;  %v3221_v21 = vshll.u32 %v10119_v56, %v3206_v49  ;;  %v3222_v10 = vshrl.u32 %v10121_v55, %v3207_v0 }
 0x3e1   :  { %v3057_v42 = vshll.u32 %v8170_v41, %v3055_v8  ;;  %v3058_v11 = vshrl.u32 %v3040_v47, %v3056_v31  ;;  %v3061_v58 = vadd.s32 127, %v3060_v33  ;;  %v3149_v28 = vadd.s32 536870912, %v3148_v5 }
 0x3e2   :  { %v3220_v12 = vor.u32 %v3219_v59, %v3218_v25  ;;  %v3223_v22 = vor.u32 %v3222_v10, %v3221_v21  ;;  %v3209_v53 = vshll.u32 %v10128_v57, %v3206_v49  ;;  %v3210_v15 = vshrl.u32 %v10113_v52, %v3207_v0 }
 0x3e3   :  { %v2963_v36 = vmul.f32 %v2962_v20, %v2960_v61  ;;  %v3059_v18 = vor.u32 %v3058_v11, %v3057_v42  ;;  %v3062_v51 = vshll.u32 %v3061_v58, 23  ;;  %v8218_v17 = vshrl.u32 %v3149_v28, 30 }
 0x3e4   :  { %vm3227_vm4 = vcmp.lt.s32.totalorder %v3205_v19, 4  ;;  %v3211_v14 = vor.u32 %v3210_v15, %v3209_v53  ;;  %v3212_v23 = vshll.u32 %v10113_v52, %v3206_v49  ;;  %v3213_v41 = vshrl.u32 %v10129_v35, %v3207_v0 }
 0x3e5   :  { %v3063_v4 = vor.u32 4788187, %v3062_v51  ;;  %v3151_v47 = vshll.u32 %v8218_v17, 30  ;;  %v3233_v34 = vsel %vm3227_vm4, %v3220_v12, 920167782  ;;  %v3240_v3 = vshll.u32 %v3200_v38, 8 }
 0x3e6   :  { %v3237_v8 = vsel %vm3227_vm4, %v3223_v22, 1326507024  ;;  %v3214_v54 = vor.u32 %v3213_v41, %v3212_v23  ;;  %v3215_v20 = vshll.u32 %v10129_v35, %v3206_v49  ;;  %v3216_v61 = vshrl.u32 %v10118_v16, %v3207_v0 }
 0x3e7   :  { %vm2882_vm3 = vcmp.lt.s32.totalorder %v7926_v29, 0  ;;  %v3064_v31 = vand.u32 2147483647, %v3063_v4  ;;  %v3066_v33 = vcvt.s32.f32 %v3059_v18  ;;  %v8228_v25 = vsub.s32 %v3148_v5, %v3151_v47 }
 0x3e8   :  { %vm3224_vm10 = vcmp.lt.s32.totalorder %v3205_v19, 1  ;;  %v3208_v59 = vshrl.u32 %v10128_v57, %v3207_v0  ;;  %v3217_v21 = vor.u32 %v3216_v61, %v3215_v20  ;;  %vm3226_vm14 = vcmp.lt.s32.totalorder %v3205_v19, 3 }
 0x3e9   :  { %v3232_v10 = vsel %vm3224_vm10, %v3211_v14, %v3214_v54  ;;  %v3067_v38 = vmul.f32 %v3066_v33, %v3064_v31  ;;  %v3154_v42 = vsub.s32 0, %v8228_v25  ;;  %vm3225_vm7 = vcmp.lt.s32.totalorder %v3205_v19, 2 }
 0x3ea   :  { %v3238_v11 = vsel %vm3226_vm14, %v3220_v12, %v3237_v8  ;;  %v3228_v49 = vsel %vm3224_vm10, %v3208_v59, %v3211_v14  ;;  %v3229_v58 = vsel %vm3227_vm4, %v3217_v21, 2102212464  ;;  %v3234_v28 = vsel %vm3226_vm14, %v3217_v21, %v3233_v34 }
 0x3eb   :  { %v3236_v22 = vsel %vm3224_vm10, %v3214_v54, %v3217_v21  ;;  %v3068_v53 = vxor.u32 2147483648, %v3067_v38  ;;  %v5139_v5 = vmin.u32 %v3154_v42, %v8228_v25  ;;  %v3230_v15 = vsel %vm3226_vm14, %v3214_v54, %v3229_v58 }
 0x3ec   :  { %v3235_v18 = vsel %vm3225_vm7, %v3232_v10, %v3234_v28  ;;  %v2964_v0 = vxor.u32 2147483648, %v2963_v36  ;;  %v3239_v51 = vsel %vm3225_vm7, %v3236_v22, %v3238_v11  ;;  %vm2778_vm0 = vcmp.lt.s32.totalorder %v7823_v63, 0 }
 0x3ed   :  { %v8236_v23 = vmul.u32.u64.low %v3240_v3, %v3235_v18  ;;  %v8237_v41 = vmul.u32.u64.high %v3240_v3, %v3235_v18, %v8236_v23  ;;  %vm2986_vm6 = vcmp.lt.s32.totalorder %v8014_v40, 0  ;;  %v3156_v12 = vclz %v5139_v5 }
 0x3ee   :  { %v8242_v14 = vmul.u32.u64.low %v3240_v3, %v3239_v51  ;;  %v8243_v4 = vmul.u32.u64.high %v3240_v3, %v3239_v51, %v8242_v14  ;;  %v2648_v47 = vand.u32 2147483647, %v8082_v62  ;;  %v2650_v34 = vcvt.s32.f32 %v8077_v46 }
 0x3ef   :  { %v3069_v8 = vsel %vm2986_vm6, %v3068_v53, %v3067_v38  ;;  %v3231_v54 = vsel %vm3225_vm7, %v3228_v49, %v3230_v15  ;;  %v2752_v20 = vand.u32 2147483647, %v8196_v32  ;;  %v2754_v61 = vcvt.s32.f32 %v8189_v6 }
 0x3f0   :  { %v2860_v31 = vxor.u32 2147483648, %v8202_v43  ;;  %v5140_v33 = vadd.s32 4294967294, %v3156_v12  ;;  %v2965_v59 = vsel %vm2882_vm3, %v2964_v0, %v2963_v36  ;;  %v3250_v21 = vadd.s32 1, %v8237_v41 }
 0x3f1   :  { %v10238_v62 = vand.u32 2147483647, %v8014_v40  ;;  %v3070_v19 = vsub.s32 4, %v8160_v48  ;;  %v3247_v32 = vmul.u32 %v3240_v3, %v3231_v54  ;;  %vm3249_vm10 = vc.u32 %v8243_v4, %v8236_v23 }
 0x3f2   :  { %vm5141_vm4 = vcmp.lt.s32.totalorder %v5140_v33, 0  ;;  %v3144_v36 = vadd.s32 %v8177_v39, %v8183_v24  ;;  %v3251_v38 = vsel %vm3249_vm10, %v3250_v21, %v8237_v41  ;;  %v2966_v42 = vsub.s32 4, %v8104_v37 }
 0x3f3   :  { %vm8258_vm11 = vcmp.le.f32.partialorder %v10238_v62, 0.7853982  ;;  %v3159_v10 = vsel %vm5141_vm4, 0, %v5140_v33  ;;  %v3252_v58 = vadd.s32 %v3251_v38, %v3247_v32  ;;  %v10241_v3 = vand.u32 2147483647, %v7926_v29 }
 0x3f4   :  { %v3072_v6 = vsel %vm8258_vm11, %v8014_v40, %v3069_v8  ;;  %v3160_v11 = vsub.s32 32, %v3159_v10  ;;  %v3164_v49 = vsub.s32 4294967266, %v3159_v10  ;;  %v3174_v22 = vsub.s32 4, %v8218_v17 }
 0x3f5   :  { %vm8274_vm14 = vcmp.le.f32.partialorder %v10241_v3, 0.7853982  ;;  %v3071_v39 = vsel %vm2986_vm6, %v3070_v19, %v8160_v48  ;;  %5473 = vcosq.f32 %v3072_v6  ;;  %vm2466_vm7 = vcmp.lt.s32.totalorder %v7662_v27, 0 }
 0x3f6   :  { %v2968_v24 = vsel %vm8274_vm14, %v7926_v29, %v2965_v59  ;;  %vm2674_vm4 = vcmp.lt.s32.totalorder %v7785_v13, 0  ;;  %v3161_v53 = vshll.u32 %v8228_v25, %v3159_v10  ;;  %v3162_v5 = vshrl.u32 %v3144_v36, %v3160_v11 }
 0x3f7   :  { %v3165_v15 = vadd.s32 127, %v3164_v49  ;;  %v3253_v18 = vadd.s32 536870912, %v3252_v58  ;;  %v2755_v0 = vmul.f32 %v2754_v61, %v2752_v20  ;;  %v2861_v51 = vsel %vm2778_vm0, %v2860_v31, %v8202_v43 }
 0x3f8   :  { %5475 = vsinq.f32 %v3072_v6  ;;  %v2967_v48 = vsel %vm2882_vm3, %v2966_v42, %v8104_v37  ;;  %vm2570_vm6 = vcmp.lt.s32.totalorder %v7721_v7, 0  ;;  %v3163_v41 = vor.u32 %v3162_v5, %v3161_v53 }
 0x3f9   :  { %v3166_v12 = vshll.u32 %v3165_v15, 23  ;;  %v3254_v14 = vshrl.u32 %v3253_v18, 30  ;;  %5477 = vcosq.f32 %v2968_v24  ;;  %v2651_v25 = vmul.f32 %v2650_v34, %v2648_v47 }
 0x3fa   :  { %vm3090_vm10 = vcmp.lt.s32.totalorder %v8069_v60, 0  ;;  %v3073_v8 = vsel %vm8258_vm11, 0, %v3071_v39  ;;  %5479 = vsinq.f32 %v2968_v24  ;;  %v10244_v37 = vand.u32 2147483647, %v7823_v63 }
 0x3fb   :  { %v3167_v54 = vor.u32 4788187, %v3166_v12  ;;  %v3255_v43 = vshll.u32 %v3254_v14, 30  ;;  %v3175_v20 = vsel %vm3090_vm10, %v3174_v22, %v8218_v17  ;;  %v2756_v31 = vxor.u32 2147483648, %v2755_v0 }
 0x3fc   :  { %vm8303_vm3 = vcmp.le.f32.partialorder %v10244_v37, 0.7853982  ;;  %v10247_v47 = vand.u32 2147483647, %v8069_v60  ;;  %v2969_v33 = vsel %vm8274_vm14, 0, %v2967_v48  ;;  %v3170_v21 = vcvt.s32.f32 %v3163_v41 }
 0x3fd   :  { %v2864_v17 = vsel %vm8303_vm3, %v7823_v63, %v2861_v51  ;;  %v3168_v59 = vand.u32 2147483647, %v3167_v54  ;;  %v8318_v62 = vsub.s32 %v3252_v58, %v3255_v43  ;;  %v3278_v46 = vsub.s32 4, %v3254_v14 }
 0x3fe   :  { %vm8309_vm15 = vcmp.le.f32.partialorder %v10247_v47, 0.7853982  ;;  %v2652_v19 = vxor.u32 2147483648, %v2651_v25  ;;  %v3077_v6 = vadd.s32 3, %v3073_v8  ;;  %v2862_v36 = vsub.s32 4, %v8040_v9 }
 0x3ff   :  { %v3177_v32 = vsel %vm8309_vm15, 0, %v3175_v20  ;;  %v3171_v10 = vmul.f32 %v3170_v21, %v3168_v59  ;;  %v3258_v38 = vsub.s32 0, %v8318_v62  ;;  %v2973_v42 = vadd.s32 3, %v2969_v33 }
 0x400   :  { %5481 = vcosq.f32 %v2864_v17  ;;  %v10250_v11 = vxor.u32 2147483648, %v7998_v50  ;;  %v2757_v58 = vsel %vm2674_vm4, %v2756_v31, %v2755_v0  ;;  %vm3194_vm11 = vcmp.lt.s32.totalorder %v8141_v45, 0 }
 0x401   :  { %5483 = vsinq.f32 %v2864_v17  ;;  %v3172_v3 = vxor.u32 2147483648, %v3171_v10  ;;  %v5143_v28 = vmin.u32 %v3258_v38, %v8318_v62  ;;  %v3279_v22 = vsel %vm3194_vm11, %v3278_v46, %v3254_v14 }
 0x402   :  { %v8329_v49 = vsel %vm2466_vm7, %v10250_v11, %v7998_v50  ;;  %v3181_v39 = vadd.s32 3, %v3177_v32  ;;  %v2653_v24 = vsel %vm2570_vm6, %v2652_v19, %v2651_v25  ;;  %vm8341_vm14 = vcmp.le.f32.partialorder %v3192_v30, 0.7853982  ;;  %v5474_v15 = vpop.eup %5473 }
 0x403   :  { %v8345_v53 = vand.u32 3, %v3077_v6  ;;  %v2863_v5 = vsel %vm2778_vm0, %v2862_v36, %v8040_v9  ;;  %v3173_v18 = vsel %vm3090_vm10, %v3172_v3, %v3171_v10  ;;  %v3260_v0 = vclz %v5143_v28 }
 0x404   :  { %v8352_v51 = vand.u32 3, %v2973_v42  ;;  %v10253_v48 = vand.u32 2147483647, %v7785_v13  ;;  %v3248_v41 = vadd.s32 %v8236_v23, %v8243_v4  ;;  %v3281_v12 = vsel %vm8341_vm14, 0, %v3279_v22 }
 0x405   :  { %v3176_v9 = vsel %vm8309_vm15, %v8069_v60, %v3173_v18  ;;  %v5476_v25 = vpop.eup %5475  ;;  %v5144_v8 = vadd.s32 4294967294, %v3260_v0  ;;  %v8370_v54 = vand.u32 3, %v3181_v39  ;;  %v2865_v43 = vsel %vm8303_vm3, 0, %v2863_v5 }
 0x406   :  { %vm8356_vm9 = vcmp.le.f32.partialorder %v10253_v48, 0.7853982  ;;  %5485 = vcosq.f32 %v3176_v9  ;;  %v5478_v23 = vpop.eup %5477  ;;  %vm3080_vm0 = vcmp.eq.s32.totalorder %v8345_v53, 0  ;;  %vm3083_vm10 = vcmp.eq.s32.totalorder %v8345_v53, 2 }
 0x407   :  { %v2760_v14 = vsel %vm8356_vm9, %v7785_v13, %v2757_v58  ;;  %5487 = vsinq.f32 %v3176_v9  ;;  %v2758_v4 = vsub.s32 4, %v7955_v2  ;;  %v5480_v20 = vpop.eup %5479  ;;  %vm5145_vm15 = vcmp.lt.s32.totalorder %v5144_v8, 0 }
 0x408   :  { %v3285_v37 = vadd.s32 3, %v3281_v12  ;;  %vm3079_vm1 = vcmp.lt.s32.totalorder %v8345_v53, 2  ;;  %vm2976_vm13 = vcmp.eq.s32.totalorder %v8352_v51, 0  ;;  %5489 = vcosq.f32 %v2760_v14 }
 0x409   :  { %v3263_v31 = vsel %vm5145_vm15, 0, %v5144_v8  ;;  %v3084_v47 = vxor.u32 2147483648, %v5474_v15  ;;  %v2869_v61 = vadd.s32 3, %v2865_v43  ;;  %5491 = vsinq.f32 %v2760_v14 }
 0x40a   :  { %v3264_v34 = vsub.s32 32, %v3263_v31  ;;  %v3268_v33 = vsub.s32 4294967266, %v3263_v31  ;;  %v3081_v17 = vxor.u32 2147483648, %v5476_v25  ;;  %vm2975_vm3 = vcmp.lt.s32.totalorder %v8352_v51, 2 }
 0x40b   :  { %vm2979_vm5 = vcmp.eq.s32.totalorder %v8352_v51, 2  ;;  %v3265_v59 = vshll.u32 %v8318_v62, %v3263_v31  ;;  %v2977_v21 = vxor.u32 2147483648, %v5480_v20  ;;  %v2980_v46 = vxor.u32 2147483648, %v5478_v23 }
 0x40c   :  { %v2759_v19 = vsel %vm2674_vm4, %v2758_v4, %v7955_v2  ;;  %v3266_v32 = vshrl.u32 %v3248_v41, %v3264_v34  ;;  %v3269_v6 = vadd.s32 127, %v3268_v33  ;;  %v10256_v36 = vand.u32 2147483647, %v7721_v7 }
 0x40d   :  { %v2654_v38 = vsub.s32 4, %v7894_v26  ;;  %v5482_v42 = vpop.eup %5481  ;;  %v8392_v11 = vand.u32 3, %v3285_v37  ;;  %vm3076_vm12 = vweird.f32 %v8014_v40  ;;  %v3085_v62 = vsel %vm3083_vm10, %v3084_v47, %v5476_v25 }
 0x40e   :  { %vm8387_vm15 = vcmp.le.f32.partialorder %v10256_v36, 0.7853982  ;;  %v2870_v58 = vand.u32 3, %v2869_v61  ;;  %v5484_v3 = vpop.eup %5483  ;;  %v3267_v28 = vor.u32 %v3266_v32, %v3265_v59  ;;  %v3270_v22 = vshll.u32 %v3269_v6, 23  ;;  %v10265_v36 = vld [vmem:[#allocation7_spill] sm:$0xff] }
 0x40f   :  { %v2656_v2 = vsel %vm8387_vm15, %v7721_v7, %v2653_v24  ;;  %v3082_v39 = vsel %vm3080_vm0, %v5474_v15, %v3081_v17  ;;  %vm2972_vm4 = vweird.f32 %v7926_v29  ;;  %vm3187_vm2 = vcmp.eq.s32.totalorder %v8370_v54, 2 }
 0x410   :  { %5493 = vcosq.f32 %v2656_v2  ;;  %v2978_v5 = vsel %vm2976_vm13, %v5478_v23, %v2977_v21  ;;  %v2981_v18 = vsel %vm2979_vm5, %v2980_v46, %v5480_v20  ;;  %v2761_v24 = vsel %vm8356_vm9, 0, %v2759_v19 }
 0x411   :  { %5495 = vsinq.f32 %v2656_v2  ;;  %v3271_v0 = vor.u32 4788187, %v3270_v22  ;;  %vm3184_vm10 = vcmp.eq.s32.totalorder %v8370_v54, 0  ;;  %v2873_v48 = vxor.u32 2147483648, %v5484_v3 }
 0x412   :  { %v2876_v15 = vxor.u32 2147483648, %v5482_v42  ;;  %v2655_v41 = vsel %vm2570_vm6, %v2654_v38, %v7894_v26  ;;  %v3086_v12 = vsel %vm3079_vm1, %v3082_v39, %v3085_v62  ;;  %vm2872_vm13 = vcmp.eq.s32.totalorder %v2870_v58, 0 }
 0x413   :  { %v10259_v9 = vand.u32 2147483647, %v7662_v27  ;;  %v2550_v30 = vsub.s32 4, %v7825_v1  ;;  %v3272_v25 = vand.u32 2147483647, %v3271_v0  ;;  %v3274_v8 = vcvt.s32.f32 %v3267_v28  ;;  %v5486_v53 = vpop.eup %5485 }
 0x414   :  { %vm2868_vm9 = vweird.f32 %v7823_v63  ;;  %v2765_v43 = vadd.s32 3, %v2761_v24  ;;  %vm3183_vm1 = vcmp.lt.s32.totalorder %v8370_v54, 2  ;;  %v2982_v23 = vsel %vm2975_vm3, %v2978_v5, %v2981_v18  ;;  %v5488_v20 = vpop.eup %5487 }
 0x415   :  { %vm8418_vm5 = vcmp.le.f32.partialorder %v10259_v9, 0.7853982  ;;  %vm2875_vm6 = vcmp.eq.s32.totalorder %v2870_v58, 2  ;;  %v2657_v4 = vsel %vm8387_vm15, 0, %v2655_v41  ;;  %v3275_v37 = vmul.f32 %v3274_v8, %v3272_v25  ;;  %v5490_v34 = vpop.eup %5489  ;;  %v10267_v41 = vld [vmem:[#allocation5_spill] sm:$0xff]  ;;  %v10272_v25 = vld [vmem:[#allocation18_spill] sm:$0xff] }
 0x416   :  { %v2552_v26 = vsel %vm8418_vm5, %v7662_v27, %v8329_v49  ;;  %v3188_v31 = vxor.u32 2147483648, %v5486_v53  ;;  %v2874_v47 = vsel %vm2872_vm13, %v5482_v42, %v2873_v48  ;;  %v2877_v61 = vsel %vm2875_vm6, %v2876_v15, %v5484_v3  ;;  %v5492_v51 = vpop.eup %5491  ;;  %v10266_v3 = vld [vmem:[#allocation21_spill] sm:$0xff] }
 0x417   :  { %5497 = vcosq.f32 %v2552_v26  ;;  %v3185_v33 = vxor.u32 2147483648, %v5488_v20  ;;  %vm2871_vm0 = vcmp.lt.s32.totalorder %v2870_v58, 2  ;;  %v2551_v49 = vsel %vm2466_vm7, %v2550_v30, %v7825_v1  ;;  %v10271_v9 = vld [vmem:[#allocation13_spill] sm:$0xff] }
 0x418   :  { %5499 = vsinq.f32 %v2552_v26  ;;  %v3276_v17 = vxor.u32 2147483648, %v3275_v37  ;;  %v8439_v59 = vsel %vm3076_vm12, nan, %v3086_v12  ;;  %v2766_v21 = vand.u32 3, %v2765_v43 }
 0x419   :  { %v2661_v46 = vadd.s32 3, %v2657_v4  ;;  %vm3180_vm3 = vweird.f32 %v8069_v60  ;;  %v8444_v19 = vsel %vm2972_vm4, nan, %v2982_v23  ;;  %v2878_v32 = vsel %vm2871_vm0, %v2874_v47, %v2877_v61  ;;  %v10274_v47 = vld [vmem:[#allocation16_spill] sm:$0xff] }
 0x41a   :  { %v10262_v6 = vand.u32 2147483647, %v7618_v44  ;;  %v2446_v10 = vsub.s32 4, %v10265_v36  ;;  %v3277_v40 = vsel %vm3194_vm11, %v3276_v17, %v3275_v37  ;;  %v3189_v38 = vsel %vm3187_vm2, %v3188_v31, %v5488_v20 }
 0x41b   :  { %v2772_v42 = vxor.u32 2147483648, %v5490_v34  ;;  %v2553_v29 = vsel %vm8418_vm5, 0, %v2551_v49  ;;  %v3280_v62 = vsel %vm8341_vm14, %v8141_v45, %v3277_v40  ;;  %v3186_v58 = vsel %vm3184_vm10, %v5486_v53, %v3185_v33 }
 0x41c   :  { %vm8448_vm15 = vcmp.le.f32.partialorder %v10262_v6, 0.7853982  ;;  %v2769_v2 = vxor.u32 2147483648, %v5492_v51  ;;  %5501 = vcosq.f32 %v3280_v62  ;;  %vm2767_vm12 = vcmp.lt.s32.totalorder %v2766_v21, 2 }
 0x41d   :  { %v2448_v28 = vsel %vm8448_vm15, %v7618_v44, %v10266_v3  ;;  %vm2768_vm2 = vcmp.eq.s32.totalorder %v2766_v21, 0  ;;  %v2662_v22 = vand.u32 3, %v2661_v46  ;;  %v5494_v39 = vpop.eup %5493  ;;  %5503 = vsinq.f32 %v3280_v62 }
 0x41e   :  { %v8470_v5 = vsel %vm2868_vm9, nan, %v2878_v32  ;;  %vm2771_vm7 = vcmp.eq.s32.totalorder %v2766_v21, 2  ;;  %v2447_v50 = vsel %vm2362_vm8, %v2446_v10, %v10265_v36  ;;  %v5496_v18 = vpop.eup %5495  ;;  %v3190_v24 = vsel %vm3183_vm1, %v3186_v58, %v3189_v38  ;;  %v10279_v21 = vld [vmem:[#allocation37_spill] sm:$0xff]  ;;  %v10281_v10 = vld [vmem:[#allocation6_spill] sm:$0xff] }
 0x41f   :  { %v2773_v0 = vsel %vm2771_vm7, %v2772_v42, %v5492_v51  ;;  %v2557_v48 = vadd.s32 3, %v2553_v29  ;;  %5505 = vcosq.f32 %v2448_v28  ;;  %vm2764_vm11 = vweird.f32 %v7785_v13  ;;  %v10278_v51 = vld [vmem:[#allocation9_spill] sm:$0xff]  ;;  %v10285_v42 = vld [vmem:[#allocation14_spill] sm:$0xff] }
 0x420   :  { %v2770_v15 = vsel %vm2768_vm2, %v5490_v34, %v2769_v2  ;;  %5507 = vsinq.f32 %v2448_v28  ;;  %v10268_v63 = vand.u32 2147483647, %v10267_v41  ;;  %v2342_v14 = vsub.s32 4, %v10271_v9  ;;  %v10286_v58 = vld [vmem:[#allocation22_spill] sm:$0xff] }
 0x421   :  { %vm2663_vm8 = vcmp.lt.s32.totalorder %v2662_v22, 2  ;;  %v2668_v30 = vxor.u32 2147483648, %v5494_v39  ;;  %v2449_v54 = vsel %vm8448_vm15, 0, %v2447_v50  ;;  %vm2664_vm4 = vcmp.eq.s32.totalorder %v2662_v22, 0 }
 0x422   :  { %vm8480_vm14 = vcmp.le.f32.partialorder %v10268_v63, 0.7853982  ;;  %v2665_v43 = vxor.u32 2147483648, %v5496_v18  ;;  %vm10273_vm10 = vcmp.lt.s32.totalorder %v10267_v41, 0  ;;  %v8496_v23 = vsel %vm3180_vm3, nan, %v3190_v24 }
 0x423   :  { %v2344_v8 = vsel %vm8480_vm14, %v10267_v41, %v10272_v25  ;;  %v2343_v26 = vsel %vm10273_vm10, %v2342_v14, %v10271_v9  ;;  %v2774_v4 = vsel %vm2767_vm12, %v2770_v15, %v2773_v0  ;;  %vm2667_vm13 = vcmp.eq.s32.totalorder %v2662_v22, 2 }
 0x424   :  { %5509 = vcosq.f32 %v2344_v8  ;;  %v5498_v53 = vpop.eup %5497  ;;  %v2558_v20 = vand.u32 3, %v2557_v48  ;;  %vm3291_vm5 = vcmp.eq.s32.totalorder %v8392_v11, 2  ;;  %v2453_v37 = vadd.s32 3, %v2449_v54 }
 0x425   :  { %v2345_v31 = vsel %vm8480_vm14, 0, %v2343_v26  ;;  %5511 = vsinq.f32 %v2344_v8  ;;  %v10275_v61 = vand.u32 2147483647, %v10274_v47  ;;  %v5500_v60 = vpop.eup %5499  ;;  %vm3288_vm1 = vcmp.eq.s32.totalorder %v8392_v11, 0 }
 0x426   :  { %v2669_v33 = vsel %vm2667_vm13, %v2668_v30, %v5496_v18  ;;  %v2564_v49 = vxor.u32 2147483648, %v5498_v53  ;;  %v2238_v17 = vsub.s32 4, %v10278_v51  ;;  %vm3287_vm6 = vcmp.lt.s32.totalorder %v8392_v11, 2 }
 0x427   :  { %vm8504_vm9 = vcmp.le.f32.partialorder %v10275_v61, 0.7853982  ;;  %vm2660_vm0 = vweird.f32 %v7721_v7  ;;  %v2666_v32 = vsel %vm2664_vm4, %v5494_v39, %v2665_v43  ;;  %v2561_v6 = vxor.u32 2147483648, %v5500_v60 }
 0x428   :  { %v2240_v46 = vsel %vm8504_vm9, %v10274_v47, %v10279_v21  ;;  %v2349_v1 = vadd.s32 3, %v2345_v31  ;;  %vm3284_vm3 = vweird.f32 %v8141_v45  ;;  %vm10280_vm15 = vcmp.lt.s32.totalorder %v10274_v47, 0 }
 0x429   :  { %5513 = vcosq.f32 %v2240_v46  ;;  %v2239_v36 = vsel %vm10280_vm15, %v2238_v17, %v10278_v51  ;;  %v10282_v40 = vand.u32 2147483647, %v10281_v10  ;;  %v2134_v29 = vsub.s32 4, %v10285_v42  ;;  %v5502_v50 = vpop.eup %5501 }
 0x42a   :  { %5515 = vsinq.f32 %v2240_v46  ;;  %vm2556_vm2 = vweird.f32 %v7662_v27  ;;  %vm2559_vm7 = vcmp.lt.s32.totalorder %v2558_v20, 2  ;;  %vm2563_vm14 = vcmp.eq.s32.totalorder %v2558_v20, 2  ;;  %v5504_v48 = vpop.eup %5503 }
 0x42b   :  { %vm8523_vm12 = vcmp.le.f32.partialorder %v10282_v40, 0.7853982  ;;  %v8529_v62 = vand.u32 3, %v2453_v37  ;;  %v8537_v3 = vsel %vm2764_vm11, nan, %v2774_v4  ;;  %v2670_v28 = vsel %vm2663_vm8, %v2666_v32, %v2669_v33  ;;  %v10297_v40 = vld [vmem:[#allocation19_spill] sm:$0xff] }
 0x42c   :  { %v2136_v2 = vsel %vm8523_vm12, %v10281_v10, %v10286_v58  ;;  %vm2560_vm4 = vcmp.eq.s32.totalorder %v2558_v20, 0  ;;  %v2565_v39 = vsel %vm2563_vm14, %v2564_v49, %v5500_v60  ;;  %v2241_v24 = vsel %vm8504_vm9, 0, %v2239_v36  ;;  %v5506_v22 = vpop.eup %5505  ;;  %v10289_v20 = vld [vmem:[#allocation20_spill] sm:$0xff]  ;;  %v10293_v49 = vld [vmem:[#allocation27_spill] sm:$0xff] }
 0x42d   :  { %v2562_v18 = vsel %vm2560_vm4, %v5498_v53, %v2561_v6  ;;  %vm10287_vm10 = vcmp.lt.s32.totalorder %v10281_v10, 0  ;;  %5517 = vcosq.f32 %v2136_v2  ;;  %v3292_v15 = vxor.u32 2147483648, %v5502_v50  ;;  %v5508_v9 = vpop.eup %5507  ;;  %v10288_v53 = vld [vmem:[#allocation15_spill] sm:$0xff] }
 0x42e   :  { %v2135_v0 = vsel %vm10287_vm10, %v2134_v29, %v10285_v42  ;;  %v2350_v63 = vand.u32 3, %v2349_v1  ;;  %5519 = vsinq.f32 %v2136_v2  ;;  %v3289_v12 = vxor.u32 2147483648, %v5504_v48 }
 0x42f   :  { %v2137_v13 = vsel %vm8523_vm12, 0, %v2135_v0  ;;  %vm2455_vm11 = vcmp.lt.s32.totalorder %v8529_v62, 2  ;;  %vm2456_vm8 = vcmp.eq.s32.totalorder %v8529_v62, 0  ;;  %vm2459_vm13 = vcmp.eq.s32.totalorder %v8529_v62, 2 }
 0x430   :  { %v3293_v14 = vsel %vm3291_vm5, %v3292_v15, %v5504_v48  ;;  %v2566_v30 = vsel %vm2559_vm7, %v2562_v18, %v2565_v39  ;;  %v2460_v54 = vxor.u32 2147483648, %v5506_v22  ;;  %v2245_v25 = vadd.s32 3, %v2241_v24  ;;  %v10302_v39 = vld [vmem:[#allocation12_spill] sm:$0xff] }
 0x431   :  { %v3290_v8 = vsel %vm3288_vm1, %v5502_v50, %v3289_v12  ;;  %v2457_v43 = vxor.u32 2147483648, %v5508_v9  ;;  %v2141_v26 = vadd.s32 3, %v2137_v13  ;;  %v2030_v4 = vsub.s32 4, %v10288_v53  ;;  %v5510_v37 = vpop.eup %5509 }
 0x432   :  { %v3294_v31 = vsel %vm3287_vm6, %v3290_v8, %v3293_v14  ;;  %v2671_v61 = vsel %vm2660_vm0, nan, %v2670_v28  ;;  %vm2452_vm5 = vweird.f32 %v7618_v44  ;;  %vm2351_vm9 = vcmp.lt.s32.totalorder %v2350_v63, 2  ;;  %v5512_v51 = vpop.eup %5511 }
 0x433   :  { %v10290_v34 = vand.u32 2147483647, %v10289_v20  ;;  %v3295_v33 = vsel %vm3284_vm3, nan, %v3294_v31  ;;  %vm2348_vm1 = vweird.f32 %v10267_v41  ;;  %vm2352_vm12 = vcmp.eq.s32.totalorder %v2350_v63, 0  ;;  %v5592_v41 = vld [vmem:[%s9935_s1 + $0x98] sm:$0xff] }
 0x434   :  { %v2356_v11 = vxor.u32 2147483648, %v5510_v37  ;;  %vm10294_vm6 = vcmask 1041408   ;;  %v2567_v17 = vsel %vm2556_vm2, nan, %v2566_v30  ;;  %v2461_v21 = vsel %vm2459_vm13, %v2460_v54, %v5508_v9 }
 0x435   :  { %vm8563_vm15 = vcmp.le.f32.partialorder %v10290_v34, 0.7853982  ;;  %5146 = vmatprep.subr.msk.mxu1 %vm10294_vm6, %v3295_v33  ;;  %vm2355_vm0 = vcmp.eq.s32.totalorder %v2350_v63, 2  ;;  %vm2244_vm3 = vweird.f32 %v10274_v47  ;;  %v2246_v45 = vand.u32 3, %v2245_v25  ;;  %vm10295_vm7 = vmmov %vm10294_vm6  ;;  %v5595_v34 = vld [vmem:[%s9935_s1 + $0x88] sm:$0xff] }
 0x436   :  { %v2032_v7 = vsel %vm8563_vm15, %v10289_v20, %v10293_v49  ;;  %5147 = vmatpush1.msk.msra.mxu1 %vm10295_vm7, %v8496_v23  ;;  %v2458_v46 = vsel %vm2456_vm8, %v5506_v22, %v2457_v43  ;;  %v2353_v32 = vxor.u32 2147483648, %v5512_v51  ;;  %v2142_v6 = vand.u32 3, %v2141_v26  ;;  %v5514_v1 = vpop.eup %5513  ;;  %v10301_v23 = vld [vmem:[#allocation11_spill] sm:$0xff]  ;;  %v5593_v26 = vld [vmem:[%s9935_s1 + $0xa0] sm:$0x3] }
 0x437   :  { %vm10296_vm14 = vcmp.lt.s32.totalorder %v10289_v20, 0  ;;  %3371 = vmatprep.subr.mxu1 %v8439_v59  ;;  %v2357_v36 = vsel %vm2355_vm0, %v2356_v11, %v5512_v51  ;;  %5521 = vcosq.f32 %v2032_v7  ;;  %v10298_v38 = vand.u32 2147483647, %v10297_v40  ;;  %v5516_v58 = vpop.eup %5515  ;;  %v5596_v49 = vld [vmem:[%s9935_s1 + $0x80] sm:$0xff] }
 0x438   :  { %v2031_v27 = vsel %vm10296_vm14, %v2030_v4, %v10288_v53  ;;  %v1926_v29 = vsub.s32 4, %v10301_v23  ;;  %3372 = vmatpush1.msra.mxu1 %v8444_v19  ;;  %v2354_v2 = vsel %vm2352_vm12, %v5510_v37, %v2353_v32  ;;  %v2252_v28 = vxor.u32 2147483648, %v5514_v1  ;;  %v5594_v4 = vld [vmem:[%s9935_s1 + $0x90] sm:$0xff] }
 0x439   :  { %vm8590_vm2 = vcmp.le.f32.partialorder %v10298_v38, 0.7853982  ;;  %5523 = vsinq.f32 %v2032_v7  ;;  %3373 = vmatprep.subr.mxu1 %v8470_v5  ;;  %v2462_v50 = vsel %vm2455_vm11, %v2458_v46, %v2461_v21  ;;  %vm2247_vm4 = vcmp.lt.s32.totalorder %v2246_v45, 2 }
 0x43a   :  { %v1928_v59 = vsel %vm8590_vm2, %v10297_v40, %v10302_v39  ;;  %v2249_v18 = vxor.u32 2147483648, %v5516_v58  ;;  %vm2251_vm10 = vcmp.eq.s32.totalorder %v2246_v45, 2  ;;  %3374 = vmatpush1.msra.mxu1 %v8537_v3  ;;  %v2358_v19 = vsel %vm2351_vm9, %v2354_v2, %v2357_v36  ;;  %v5518_v0 = vpop.eup %5517  ;;  %v19_v36 = vld [vmem:[%s9935_s1 + $0x38] sm:$0xff]  ;;  %v24_v2 = vld [vmem:[%s9935_s1 + $0x60] sm:$0xff] }
 0x43b   :  { %vm2248_vm8 = vcmp.eq.s32.totalorder %v2246_v45, 0  ;;  %v2253_v24 = vsel %vm2251_vm10, %v2252_v28, %v5516_v58  ;;  %5525 = vcosq.f32 %v1928_v59  ;;  %3375 = vmatprep.subr.mxu1 %v2671_v61  ;;  %vm2144_vm13 = vcmp.eq.s32.totalorder %v2142_v6, 0  ;;  %v5520_v15 = vpop.eup %5519  ;;  %v5597_v45 = vld [vmem:[%s9935_s1 + $0x78] sm:$0xff]  ;;  %v25_v28 = vld [vmem:[%s9935_s1 + $0x68] sm:$0x3] }
 0x43c   :  { %v2250_v48 = vsel %vm2248_vm8, %v5514_v1, %v2249_v18  ;;  %v2033_v5 = vsel %vm8563_vm15, 0, %v2031_v27  ;;  %vm10303_vm11 = vcmp.lt.s32.totalorder %v10297_v40, 0  ;;  %3376 = vmatpush1.msra.mxu1 %v2567_v17  ;;  %v2463_v3 = vsel %vm2452_vm5, nan, %v2462_v50  ;;  %v5598_v27 = vld [vmem:[%s9935_s1 + $0x70] sm:$0xff]  ;;  %v23_v58 = vld [vmem:[%s9935_s1 + $0x58] sm:$0xff] }
 0x43d   :  { %v1927_v62 = vsel %vm10303_vm11, %v1926_v29, %v10301_v23  ;;  %v2254_v63 = vsel %vm2247_vm4, %v2250_v48, %v2253_v24  ;;  %v2148_v13 = vxor.u32 2147483648, %v5518_v0  ;;  %5527 = vsinq.f32 %v1928_v59  ;;  %3377 = vmatprep.subr.mxu1 %v2463_v3  ;;  %v20_v23 = vld [vmem:[%s9935_s1 + $0x40] sm:$0xff]  ;;  %v22_v29 = vld [vmem:[%s9935_s1 + $0x50] sm:$0xff] }
 0x43e   :  { %v2359_v22 = vsel %vm2348_vm1, nan, %v2358_v19  ;;  %v2145_v12 = vxor.u32 2147483648, %v5520_v15  ;;  %vm2147_vm9 = vcmp.eq.s32.totalorder %v2142_v6, 2  ;;  %v2255_v9 = vsel %vm2244_vm3, nan, %v2254_v63 }
 0x43f   :  { %3378 = vmatpush1.msra.mxu1 %v2359_v22  ;;  %v2149_v14 = vsel %vm2147_vm9, %v2148_v13, %v5520_v15  ;;  %v2037_v30 = vadd.s32 3, %v2033_v5  ;;  %v1929_v44 = vsel %vm8590_vm2, 0, %v1927_v62  ;;  %v5632_v54 = vmov 4  }
 0x440   :  { %5415 = vset.pattern.permute.xlu1 %v5632_v54  ;;  %3379 = vmatprep.subr.mxu1 %v2255_v9  ;;  %vm2143_vm5 = vcmp.lt.s32.totalorder %v2142_v6, 2  ;;  %v2146_v25 = vsel %vm2144_vm13, %v5518_v0, %v2145_v12  ;;  %vm2140_vm15 = vweird.f32 %v10281_v10  ;;  %v1933_v43 = vadd.s32 3, %v1929_v44 }
 0x441   :  { %3317 = vperm.xlu1 %5415, %v5592_v41   ;;  %v2150_v47 = vsel %vm2143_vm5, %v2146_v25, %v2149_v14  ;;  %5414 = vset.pattern.permute.xlu0 %v5632_v54  ;;  %v2038_v53 = vand.u32 3, %v2037_v30  ;;  %vm2036_vm0 = vweird.f32 %v10289_v20  ;;  %vm1932_vm2 = vweird.f32 %v10297_v40  ;;  %v21_v40 = vld [vmem:[%s9935_s1 + $0x48] sm:$0xff] }
 0x442   :  { %v2151_v8 = vsel %vm2140_vm15, nan, %v2150_v47  ;;  %3321 = vperm.xlu0 %5414, %v5593_v26   ;;  %v1934_v10 = vand.u32 3, %v1933_v43  ;;  %vm10304_vm4 = vcmask 408576   ;;  %v10305_v42 = vmov 0.0  }
 0x443   :  { %3380 = vmatpush1.msra.mxu1 %v2151_v8  ;;  %vm2043_vm1 = vcmp.eq.s32.totalorder %v2038_v53, 2  ;;  %vm2040_vm12 = vcmp.eq.s32.totalorder %v2038_v53, 0  ;;  %vm2039_vm6 = vcmp.lt.s32.totalorder %v2038_v53, 2  ;;  %vm10306_vm10 = vmmov %vm10304_vm4 }
 0x444   :  { %v5522_v37 = vpop.eup %5521  ;;  %vm1939_vm3 = vcmp.eq.s32.totalorder %v1934_v10, 2  ;;  %vm1936_vm7 = vcmp.eq.s32.totalorder %v1934_v10, 0  ;;  %vm1935_vm14 = vcmp.lt.s32.totalorder %v1934_v10, 2  ;;  %vm10307_vm8 = vmmov %vm10304_vm4 }
 0x445   :  { %3313 = vperm.xlu1 %5415, %v5594_v4   ;;  %v2044_v61 = vxor.u32 2147483648, %v5522_v37  ;;  %vm10308_vm13 = vmmov %vm10304_vm4 }
 0x446   :  { %v5524_v31 = vpop.eup %5523  ;;  %3309 = vperm.xlu0 %5414, %v5595_v34   ;;  %vm10309_vm11 = vmmov %vm10304_vm4 }
 0x447   :  { %v2041_v60 = vxor.u32 2147483648, %v5524_v31  ;;  %v2045_v11 = vsel %vm2043_vm1, %v2044_v61, %v5524_v31  ;;  %vm10310_vm9 = vmmov %vm10304_vm4 }
 0x448   :  { %v5526_v33 = vpop.eup %5525  ;;  %vm10311_vm5 = vmmov %vm10304_vm4 }
 0x449   :  { %3305 = vperm.xlu1 %5415, %v5596_v49   ;;  %v2042_v7 = vsel %vm2040_vm12, %v5522_v37, %v2041_v60  ;;  %v1940_v51 = vxor.u32 2147483648, %v5526_v33 }
 0x44a   :  { %v5528_v17 = vpop.eup %5527  ;;  %v2046_v21 = vsel %vm2039_vm6, %v2042_v7, %v2045_v11  ;;  %3301 = vperm.xlu0 %5414, %v5597_v45  }
 0x44b   :  { %v2047_v46 = vsel %vm2036_vm0, nan, %v2046_v21  ;;  %v1937_v32 = vxor.u32 2147483648, %v5528_v17  ;;  %v1941_v6 = vsel %vm1939_vm3, %v1940_v51, %v5528_v17 }
 0x44c   :  { %3381 = vmatprep.subr.mxu1 %v2047_v46 }
 0x44d   :  { %3297 = vperm.xlu1 %5415, %v5598_v27   ;;  %v1938_v1 = vsel %vm1936_vm7, %v5526_v33, %v1937_v32 }
 0x44e   :  { %v1942_v20 = vsel %vm1935_vm14, %v1938_v1, %v1941_v6 }
 0x44f   :  { %v1943_v38 = vsel %vm1932_vm2, nan, %v1942_v20 }
 0x450   :  { %3382 = vmatpush1.msra.mxu1 %v1943_v38 }
 0x451   :  { %5148 = vmatmul.mubr.msk.f32.vlgmr.msra.gmra.mxu1 %vm10304_vm4, %v19_v36 }
 0x452   :  { %3421 = vmatprep.mubr.f32.mxu1 %v10305_v42 }
 0x455   :  { %5149 = vmatmul.mubr.msk.f32.gmra.mxu1 %vm10306_vm10, %v20_v23 }
 0x456   :  { %3427 = vmatprep.mubr.f32.mxu1 %v10305_v42 }
 0x459   :  { %5150 = vmatmul.mubr.msk.f32.gmra.mxu1 %vm10307_vm8, %v21_v40 }
 0x45a   :  { %3433 = vmatprep.mubr.f32.mxu1 %v10305_v42 }
 0x45d   :  { %5151 = vmatmul.mubr.msk.f32.gmra.mxu1 %vm10308_vm13, %v22_v29 }
 0x45e   :  { %3439 = vmatprep.mubr.f32.mxu1 %v10305_v42 }
 0x461   :  { %5152 = vmatmul.mubr.msk.f32.gmra.mxu1 %vm10309_vm11, %v23_v58 }
 0x462   :  { %3445 = vmatprep.mubr.f32.mxu1 %v10305_v42 }
 0x465   :  { %5153 = vmatmul.mubr.msk.f32.gmra.mxu1 %vm10310_vm9, %v24_v2 }
 0x466   :  { %3451 = vmatprep.mubr.f32.mxu1 %v10305_v42 }
 0x469   :  { %5154 = vmatmul.mubr.msk.f32.gmra.mxu1 %vm10311_vm5, %v25_v28 }
 0x4bc   :  { %v8679_v39 = vpop.permute.xlu1 %3317 }
 0x4bd   :  { %v8683_v50 = vpop.permute.xlu0 %3321 }
 0x4c0   :  { %v8681_v59 = vpop.permute.xlu1 %3313 }
 0x4c1   :  { %v8687_v19 = vpop.permute.xlu0 %3309 }
 0x4c4   :  { %v8685_v18 = vpop.permute.xlu1 %3305 }
 0x4c5   :  { %v3302_v63 = vpop.permute.xlu0 %3301 }
 0x4c8   :  { %v3298_v24 = vpop.permute.xlu1 %3297 }
 0x511   :  { %v3417_v0 = vpop.f32.mrf.mxu1 }
 0x512   :  { %v8689_v48 = vadd.f32 %v3417_v0, %v3298_v24 }
 0x513   :  { %v3419_v5 = vpop.f32.mrf.mxu1 }
 0x514   :  { %10312 = vst [vmem:[#allocation17_spill] sm:$0xff] %v8689_v48  ;;  %v10051_v62 = vand.u32 2147483647, %v8689_v48  ;;  %v3461_v15 = vand.u32 2139095040, %v8689_v48  ;;  %v8693_v3 = vadd.f32 %v3419_v5, %v3298_v24 }
 0x515   :  { %v3423_v13 = vpop.f32.mrf.mxu1 }
 0x516   :  { %10313 = vst [vmem:[#allocation38_spill] sm:$0xff] %v8693_v3  ;;  %v3462_v22 = vshrl.u32 %v3461_v15, 23  ;;  %v3465_v12 = vand.u32 8388607, %v10051_v62  ;;  %v10046_v9 = vand.u32 2147483647, %v8693_v3  ;;  %v8699_v30 = vadd.f32 %v3423_v13, %v3302_v63 }
 0x517   :  { %v3565_v14 = vand.u32 2139095040, %v8693_v3  ;;  %v3425_v54 = vpop.f32.mrf.mxu1 }
 0x518   :  { %10314 = vst [vmem:[#allocation25_spill] sm:$0xff] %v8699_v30  ;;  %v5155_v44 = vadd.s32 4294967169, %v3462_v22  ;;  %v3569_v41 = vand.u32 8388607, %v10046_v9  ;;  %v3669_v8 = vand.u32 2139095040, %v8699_v30  ;;  %v3466_v43 = vor.u32 8388608, %v3465_v12 }
 0x519   :  { %v3566_v25 = vshrl.u32 %v3565_v14, 23  ;;  %v8704_v4 = vadd.f32 %v3425_v54, %v3302_v63  ;;  %v10050_v60 = vand.u32 2147483647, %v8699_v30 }
 0x51a   :  { %v3468_v47 = vadd.s32 1, %v5155_v44  ;;  %v3570_v53 = vor.u32 8388608, %v3569_v41  ;;  %v3670_v37 = vshrl.u32 %v3669_v8, 23  ;;  %v8707_v33 = vshll.u32 %v3466_v43, 8 }
 0x51b   :  { %v5159_v26 = vadd.s32 4294967169, %v3566_v25  ;;  %10315 = vst [vmem:[#allocation29_spill] sm:$0xff] %v8704_v4  ;;  %v3773_v7 = vand.u32 2139095040, %v8704_v4 }
 0x51c   :  { %vm3469_vm15 = vcmp.gt.s32.totalorder %v3468_v47, 0  ;;  %v8709_v11 = vshll.u32 %v3570_v53, 8  ;;  %v8711_v49 = vadd.s32 4294967169, %v3670_v37 }
 0x51d   :  { %v3470_v31 = vsel %vm3469_vm15, %v3468_v47, 0  ;;  %v3572_v61 = vadd.s32 1, %v5159_v26 }
 0x51e   :  { %v3471_v10 = vshrl.u32 %v3470_v31, 5  ;;  %v3472_v34 = vand.u32 31, %v3470_v31 }
 0x51f   :  { %vm3573_vm1 = vcmp.gt.s32.totalorder %v3572_v61, 0 }
 0x520   :  { %v3473_v51 = vsub.s32 32, %v3472_v34  ;;  %v3475_v17 = vshll.u32 %v10128_v57, %v3472_v34  ;;  %v3478_v21 = vshll.u32 %v10113_v52, %v3472_v34  ;;  %v3481_v45 = vshll.u32 %v10129_v35, %v3472_v34 }
 0x521   :  { %v3484_v46 = vshll.u32 %v10118_v16, %v3472_v34  ;;  %v3487_v32 = vshll.u32 %v10119_v56, %v3472_v34  ;;  %vm3490_vm12 = vcmp.lt.s32.totalorder %v3471_v10, 1  ;;  %vm3491_vm6 = vcmp.lt.s32.totalorder %v3471_v10, 2 }
 0x522   :  { %v3476_v6 = vshrl.u32 %v10113_v52, %v3473_v51  ;;  %v3479_v27 = vshrl.u32 %v10129_v35, %v3473_v51  ;;  %v3482_v1 = vshrl.u32 %v10118_v16, %v3473_v51  ;;  %v3474_v20 = vshrl.u32 %v10128_v57, %v3473_v51 }
 0x523   :  { %v3485_v36 = vshrl.u32 %v10119_v56, %v3473_v51  ;;  %v3488_v38 = vshrl.u32 %v10121_v55, %v3473_v51  ;;  %vm3492_vm0 = vcmp.lt.s32.totalorder %v3471_v10, 3  ;;  %v3574_v29 = vsel %vm3573_vm1, %v3572_v61, 0 }
 0x524   :  { %v3477_v42 = vor.u32 %v3476_v6, %v3475_v17  ;;  %v3480_v23 = vor.u32 %v3479_v27, %v3478_v21  ;;  %v3483_v40 = vor.u32 %v3482_v1, %v3481_v45  ;;  %vm3493_vm3 = vcmp.lt.s32.totalorder %v3471_v10, 4 }
 0x525   :  { %v3486_v58 = vor.u32 %v3485_v36, %v3484_v46  ;;  %v3489_v2 = vor.u32 %v3488_v38, %v3487_v32  ;;  %v3576_v28 = vand.u32 31, %v3574_v29  ;;  %v3575_v25 = vshrl.u32 %v3574_v29, 5 }
 0x526   :  { %v3494_v24 = vsel %vm3490_vm12, %v3474_v20, %v3477_v42  ;;  %v3495_v0 = vsel %vm3493_vm3, %v3483_v40, 2102212464  ;;  %v3498_v5 = vsel %vm3490_vm12, %v3477_v42, %v3480_v23  ;;  %v3502_v15 = vsel %vm3490_vm12, %v3480_v23, %v3483_v40 }
 0x527   :  { %v3496_v63 = vsel %vm3492_vm0, %v3480_v23, %v3495_v0  ;;  %v3499_v13 = vsel %vm3493_vm3, %v3486_v58, 920167782  ;;  %v3503_v22 = vsel %vm3493_vm3, %v3489_v2, 1326507024  ;;  %v3577_v12 = vsub.s32 32, %v3576_v28 }
 0x528   :  { %v3497_v14 = vsel %vm3491_vm6, %v3494_v24, %v3496_v63  ;;  %v3500_v44 = vsel %vm3492_vm0, %v3483_v40, %v3499_v13  ;;  %v3504_v54 = vsel %vm3492_vm0, %v3486_v58, %v3503_v22  ;;  %v3579_v43 = vshll.u32 %v10128_v57, %v3576_v28 }
 0x529   :  { %v3501_v41 = vsel %vm3491_vm6, %v3498_v5, %v3500_v44  ;;  %v3505_v47 = vsel %vm3491_vm6, %v3502_v15, %v3504_v54  ;;  %v3513_v8 = vmul.u32 %v8707_v33, %v3497_v14  ;;  %v3578_v61 = vshrl.u32 %v10128_v57, %v3577_v12 }
 0x52a   :  { %v8738_v26 = vmul.u32.u64.low %v8707_v33, %v3505_v47  ;;  %v8739_v53 = vmul.u32.u64.high %v8707_v33, %v3505_v47, %v8738_v26  ;;  %v8742_v37 = vmul.u32.u64.low %v8707_v33, %v3501_v41  ;;  %v8743_v31 = vmul.u32.u64.high %v8707_v33, %v3501_v41, %v8742_v37 }
 0x52b   :  { %v3580_v34 = vshrl.u32 %v10113_v52, %v3577_v12  ;;  %v3582_v10 = vshll.u32 %v10113_v52, %v3576_v28  ;;  %v3583_v51 = vshrl.u32 %v10129_v35, %v3577_v12  ;;  %v3585_v17 = vshll.u32 %v10129_v35, %v3576_v28 }
 0x52c   :  { %v3586_v21 = vshrl.u32 %v10118_v16, %v3577_v12  ;;  %v3588_v45 = vshll.u32 %v10118_v16, %v3576_v28  ;;  %v3589_v46 = vshrl.u32 %v10119_v56, %v3577_v12  ;;  %v3591_v6 = vshll.u32 %v10119_v56, %v3576_v28 }
 0x52d   :  { %v3581_v32 = vor.u32 %v3580_v34, %v3579_v43  ;;  %v3584_v33 = vor.u32 %v3583_v51, %v3582_v10  ;;  %v3592_v27 = vshrl.u32 %v10121_v55, %v3577_v12  ;;  %vm3515_vm7 = vc.u32 %v8739_v53, %v8742_v37 }
 0x52e   :  { %v3516_v1 = vadd.s32 1, %v8743_v31  ;;  %v3587_v20 = vor.u32 %v3586_v21, %v3585_v17  ;;  %vm3594_vm14 = vcmp.lt.s32.totalorder %v3575_v25, 1  ;;  %v3590_v36 = vor.u32 %v3589_v46, %v3588_v45 }
 0x52f   :  { %v3593_v38 = vor.u32 %v3592_v27, %v3591_v6  ;;  %vm3595_vm2 = vcmp.lt.s32.totalorder %v3575_v25, 2  ;;  %vm3596_vm4 = vcmp.lt.s32.totalorder %v3575_v25, 3  ;;  %vm3597_vm10 = vcmp.lt.s32.totalorder %v3575_v25, 4 }
 0x530   :  { %v3517_v42 = vsel %vm3515_vm7, %v3516_v1, %v8743_v31  ;;  %v3598_v23 = vsel %vm3594_vm14, %v3578_v61, %v3581_v32  ;;  %v3602_v40 = vsel %vm3594_vm14, %v3581_v32, %v3584_v33  ;;  %v3599_v58 = vsel %vm3597_vm10, %v3587_v20, 2102212464 }
 0x531   :  { %v3518_v29 = vadd.s32 %v3517_v42, %v3513_v8  ;;  %v3603_v2 = vsel %vm3597_vm10, %v3590_v36, 920167782  ;;  %v3606_v28 = vsel %vm3594_vm14, %v3584_v33, %v3587_v20  ;;  %v3600_v24 = vsel %vm3596_vm4, %v3584_v33, %v3599_v58 }
 0x532   :  { %v3604_v0 = vsel %vm3596_vm4, %v3587_v20, %v3603_v2  ;;  %v3607_v5 = vsel %vm3597_vm10, %v3593_v38, 1326507024  ;;  %v3676_v15 = vadd.s32 1, %v8711_v49  ;;  %v3774_v12 = vshrl.u32 %v3773_v7, 23 }
 0x533   :  { %v3519_v63 = vadd.s32 536870912, %v3518_v29  ;;  %v3605_v13 = vsel %vm3595_vm2, %v3602_v40, %v3604_v0  ;;  %v3608_v22 = vsel %vm3596_vm4, %v3590_v36, %v3607_v5  ;;  %v3601_v14 = vsel %vm3595_vm2, %v3598_v23, %v3600_v24 }
 0x534   :  { %v3609_v44 = vsel %vm3595_vm2, %v3606_v28, %v3608_v22  ;;  %v8767_v54 = vmul.u32.u64.low %v8709_v11, %v3605_v13  ;;  %v8768_v41 = vmul.u32.u64.high %v8709_v11, %v3605_v13, %v8767_v54  ;;  %vm3677_vm8 = vcmp.gt.s32.totalorder %v3676_v15, 0 }
 0x535   :  { %v8771_v47 = vshrl.u32 %v3519_v63, 30  ;;  %v8774_v49 = vmul.u32.u64.low %v8709_v11, %v3609_v44  ;;  %v8775_v8 = vmul.u32.u64.high %v8709_v11, %v3609_v44, %v8774_v49  ;;  %v3678_v43 = vsel %vm3677_vm8, %v3676_v15, 0 }
 0x536   :  { %v3680_v7 = vand.u32 31, %v3678_v43  ;;  %v3617_v31 = vmul.u32 %v8709_v11, %v3601_v14  ;;  %v3620_v25 = vadd.s32 1, %v8768_v41  ;;  %v3673_v61 = vand.u32 8388607, %v10050_v60 }
 0x537   :  { %10316 = vst [vmem:[#allocation32_spill] sm:$0xff] %v8771_v47  ;;  %v3521_v26 = vshll.u32 %v8771_v47, 30  ;;  %vm3619_vm13 = vc.u32 %v8775_v8, %v8767_v54  ;;  %v5167_v51 = vadd.s32 4294967169, %v3774_v12  ;;  %v3679_v21 = vshrl.u32 %v3678_v43, 5 }
 0x538   :  { %v3681_v10 = vsub.s32 32, %v3680_v7  ;;  %v3621_v17 = vsel %vm3619_vm13, %v3620_v25, %v8768_v41  ;;  %v3683_v45 = vshll.u32 %v10128_v57, %v3680_v7  ;;  %v3686_v46 = vshll.u32 %v10113_v52, %v3680_v7 }
 0x539   :  { %v8782_v34 = vsub.s32 %v3518_v29, %v3521_v26  ;;  %v3622_v32 = vadd.s32 %v3621_v17, %v3617_v31  ;;  %v3689_v6 = vshll.u32 %v10129_v35, %v3680_v7  ;;  %v3692_v20 = vshll.u32 %v10118_v16, %v3680_v7 }
 0x53a   :  { %v3684_v33 = vshrl.u32 %v10113_v52, %v3681_v10  ;;  %v3687_v27 = vshrl.u32 %v10129_v35, %v3681_v10  ;;  %v3690_v1 = vshrl.u32 %v10118_v16, %v3681_v10  ;;  %v3693_v36 = vshrl.u32 %v10119_v56, %v3681_v10 }
 0x53b   :  { %v3524_v11 = vsub.s32 0, %v8782_v34  ;;  %v3695_v23 = vshll.u32 %v10119_v56, %v3680_v7  ;;  %v3696_v2 = vshrl.u32 %v10121_v55, %v3681_v10  ;;  %v3674_v24 = vor.u32 8388608, %v3673_v61 }
 0x53c   :  { %v3685_v42 = vor.u32 %v3684_v33, %v3683_v45  ;;  %v3688_v40 = vor.u32 %v3687_v27, %v3686_v46  ;;  %v3691_v29 = vor.u32 %v3690_v1, %v3689_v6  ;;  %v3694_v58 = vor.u32 %v3693_v36, %v3692_v20 }
 0x53d   :  { %v5156_v38 = vmin.u32 %v3524_v11, %v8782_v34  ;;  %v3623_v0 = vadd.s32 536870912, %v3622_v32  ;;  %v3697_v5 = vor.u32 %v3696_v2, %v3695_v23  ;;  %vm3698_vm11 = vcmp.lt.s32.totalorder %v3679_v21, 1 }
 0x53e   :  { %v3780_v15 = vadd.s32 1, %v5167_v51  ;;  %vm3700_vm9 = vcmp.lt.s32.totalorder %v3679_v21, 3  ;;  %vm3701_vm5 = vcmp.lt.s32.totalorder %v3679_v21, 4  ;;  %v3706_v13 = vsel %vm3698_vm11, %v3685_v42, %v3688_v40 }
 0x53f   :  { %v3526_v28 = vclz %v5156_v38  ;;  %v3703_v22 = vsel %vm3701_vm5, %v3691_v29, 2102212464  ;;  %v3707_v12 = vsel %vm3701_vm5, %v3694_v58, 920167782  ;;  %v3711_v14 = vsel %vm3701_vm5, %v3697_v5, 1326507024 }
 0x540   :  { %v3682_v44 = vshrl.u32 %v10128_v57, %v3681_v10  ;;  %vm3699_vm15 = vcmp.lt.s32.totalorder %v3679_v21, 2  ;;  %v3708_v41 = vsel %vm3700_vm9, %v3691_v29, %v3707_v12  ;;  %v3710_v49 = vsel %vm3698_vm11, %v3688_v40, %v3691_v29 }
 0x541   :  { %v5157_v63 = vadd.s32 4294967294, %v3526_v28  ;;  %v8803_v43 = vshrl.u32 %v3623_v0, 30  ;;  %v3709_v26 = vsel %vm3699_vm15, %v3706_v13, %v3708_v41  ;;  %v3712_v7 = vsel %vm3700_vm9, %v3694_v58, %v3711_v14  ;;  %v3429_v58 = vpop.f32.mrf.mxu1 }
 0x542   :  { %v3714_v31 = vshll.u32 %v3674_v24, 8  ;;  %v3702_v25 = vsel %vm3698_vm11, %v3682_v44, %v3685_v42  ;;  %v3704_v61 = vsel %vm3700_vm9, %v3688_v40, %v3703_v22  ;;  %v3713_v51 = vsel %vm3699_vm15, %v3710_v49, %v3712_v7 }
 0x543   :  { %10317 = vst [vmem:[#allocation36_spill] sm:$0xff] %v8803_v43  ;;  %vm5158_vm1 = vcmp.lt.s32.totalorder %v5157_v63, 0  ;;  %vm3781_vm12 = vcmp.gt.s32.totalorder %v3780_v15, 0  ;;  %v10047_v45 = vand.u32 2147483647, %v8704_v4  ;;  %v3625_v11 = vshll.u32 %v8803_v43, 30 }
 0x544   :  { %v8810_v10 = vmul.u32.u64.low %v3714_v31, %v3709_v26  ;;  %v8811_v17 = vmul.u32.u64.high %v3714_v31, %v3709_v26, %v8810_v10  ;;  %v3782_v46 = vsel %vm3781_vm12, %v3780_v15, 0  ;;  %v8819_v1 = vsel %vm5158_vm1, 0, %v5157_v63 }
 0x545   :  { %v8816_v33 = vmul.u32.u64.low %v3714_v31, %v3713_v51  ;;  %v8817_v6 = vmul.u32.u64.high %v3714_v31, %v3713_v51, %v8816_v33  ;;  %v3784_v27 = vand.u32 31, %v3782_v46  ;;  %v3705_v20 = vsel %vm3699_vm15, %v3702_v25, %v3704_v61 }
 0x546   :  { %v3724_v36 = vadd.s32 1, %v8811_v17  ;;  %v3777_v38 = vand.u32 8388607, %v10047_v45  ;;  %v3534_v23 = vsub.s32 4294967266, %v8819_v1  ;;  %v8826_v40 = vsub.s32 %v3622_v32, %v3625_v11 }
 0x547   :  { %v3785_v42 = vsub.s32 32, %v3784_v27  ;;  %v3721_v29 = vmul.u32 %v3714_v31, %v3705_v20  ;;  %vm3723_vm6 = vc.u32 %v8817_v6, %v8810_v10  ;;  %v8834_v5 = vadd.f32 %v3429_v58, %v8685_v18 }
 0x548   :  { %v3725_v2 = vsel %vm3723_vm6, %v3724_v36, %v8811_v17  ;;  %v3778_v21 = vor.u32 8388608, %v3777_v38  ;;  %v3535_v15 = vadd.s32 127, %v3534_v23  ;;  %v3628_v32 = vsub.s32 0, %v8826_v40 }
 0x549   :  { %v3726_v28 = vadd.s32 %v3725_v2, %v3721_v29  ;;  %v3788_v24 = vshrl.u32 %v10113_v52, %v3785_v42  ;;  %v3791_v0 = vshrl.u32 %v10129_v35, %v3785_v42  ;;  %10318 = vst [vmem:[#allocation30_spill] sm:$0xff] %v8834_v5  ;;  %v3794_v13 = vshrl.u32 %v10118_v16, %v3785_v42 }
 0x54a   :  { %v3787_v22 = vshll.u32 %v10128_v57, %v3784_v27  ;;  %v3790_v12 = vshll.u32 %v10113_v52, %v3784_v27  ;;  %v3796_v14 = vshll.u32 %v10118_v16, %v3784_v27  ;;  %v3797_v44 = vshrl.u32 %v10119_v56, %v3785_v42 }
 0x54b   :  { %v3727_v63 = vadd.s32 536870912, %v3726_v28  ;;  %v3783_v49 = vshrl.u32 %v3782_v46, 5  ;;  %v3793_v26 = vshll.u32 %v10129_v35, %v3784_v27  ;;  %v3800_v7 = vshrl.u32 %v10121_v55, %v3785_v42 }
 0x54c   :  { %v3789_v31 = vor.u32 %v3788_v24, %v3787_v22  ;;  %v3792_v25 = vor.u32 %v3791_v0, %v3790_v12  ;;  %v3798_v61 = vor.u32 %v3797_v44, %v3796_v14  ;;  %v3799_v51 = vshll.u32 %v10119_v56, %v3784_v27 }
 0x54d   :  { %v8842_v41 = vshrl.u32 %v3727_v63, 30  ;;  %v3514_v17 = vadd.s32 %v8742_v37, %v8739_v53  ;;  %v3795_v33 = vor.u32 %v3794_v13, %v3793_v26  ;;  %v3530_v20 = vsub.s32 32, %v8819_v1 }
 0x54e   :  { %v5160_v36 = vmin.u32 %v3628_v32, %v8826_v40  ;;  %v3801_v46 = vor.u32 %v3800_v7, %v3799_v51  ;;  %v3818_v38 = vshll.u32 %v3778_v21, 8  ;;  %v3536_v23 = vshll.u32 %v3535_v15, 23  ;;  %v3431_v7 = vpop.f32.mrf.mxu1 }
 0x54f   :  { %10319 = vst [vmem:[#allocation35_spill] sm:$0xff] %v8842_v41  ;;  %v3729_v11 = vshll.u32 %v8842_v41, 30  ;;  %vm3802_vm0 = vcmp.lt.s32.totalorder %v3783_v49, 1  ;;  %vm3805_vm3 = vcmp.lt.s32.totalorder %v3783_v49, 4  ;;  %vm3804_vm7 = vcmp.lt.s32.totalorder %v3783_v49, 3 }
 0x550   :  { %v3810_v27 = vsel %vm3802_vm0, %v3789_v31, %v3792_v25  ;;  %v3811_v58 = vsel %vm3805_vm3, %v3798_v61, 920167782  ;;  %v3877_v53 = vand.u32 2139095040, %v8834_v5  ;;  %vm3803_vm14 = vcmp.lt.s32.totalorder %v3783_v49, 2 }
 0x551   :  { %v8852_v29 = vsub.s32 %v3726_v28, %v3729_v11  ;;  %v3812_v2 = vsel %vm3804_vm7, %v3795_v33, %v3811_v58  ;;  %v3814_v24 = vsel %vm3802_vm0, %v3792_v25, %v3795_v33  ;;  %v3630_v0 = vclz %v5160_v36 }
 0x552   :  { %v3807_v21 = vsel %vm3805_vm3, %v3795_v33, 2102212464  ;;  %v3813_v28 = vsel %vm3803_vm14, %v3810_v27, %v3812_v2  ;;  %v3815_v15 = vsel %vm3805_vm3, %v3801_v46, 1326507024  ;;  %v3786_v32 = vshrl.u32 %v10128_v57, %v3785_v42 }
 0x553   :  { %v3732_v37 = vsub.s32 0, %v8852_v29  ;;  %v3816_v63 = vsel %vm3804_vm7, %v3798_v61, %v3815_v15  ;;  %v8862_v13 = vmul.u32.u64.low %v3818_v38, %v3813_v28  ;;  %v8863_v22 = vmul.u32.u64.high %v3818_v38, %v3813_v28, %v8862_v13 }
 0x554   :  { %v3532_v12 = vshrl.u32 %v3514_v17, %v3530_v20  ;;  %v3817_v44 = vsel %vm3803_vm14, %v3814_v24, %v3816_v63  ;;  %v3878_v26 = vshrl.u32 %v3877_v53, 23  ;;  %v3806_v51 = vsel %vm3802_vm0, %v3786_v32, %v3789_v31 }
 0x555   :  { %v5164_v14 = vmin.u32 %v3732_v37, %v8852_v29  ;;  %v3808_v11 = vsel %vm3804_vm7, %v3792_v25, %v3807_v21  ;;  %v8870_v33 = vmul.u32.u64.low %v3818_v38, %v3817_v44  ;;  %v8871_v36 = vmul.u32.u64.high %v3818_v38, %v3817_v44, %v8870_v33 }
 0x556   :  { %v5161_v42 = vadd.s32 4294967294, %v3630_v0  ;;  %v5171_v61 = vadd.s32 4294967169, %v3878_v26  ;;  %v3531_v46 = vshll.u32 %v8782_v34, %v8819_v1  ;;  %v3537_v27 = vor.u32 4788187, %v3536_v23 }
 0x557   :  { %v3828_v17 = vadd.s32 1, %v8863_v22  ;;  %v8877_v20 = vadd.f32 %v3431_v7, %v8685_v18  ;;  %v3734_v58 = vclz %v5164_v14  ;;  %v3809_v53 = vsel %vm3803_vm14, %v3806_v51, %v3808_v11 }
 0x558   :  { %v3884_v31 = vadd.s32 1, %v5171_v61  ;;  %v3533_v37 = vor.u32 %v3532_v12, %v3531_v46  ;;  %vm3827_vm2 = vc.u32 %v8871_v36, %v8862_v13  ;;  %vm5162_vm4 = vcmp.lt.s32.totalorder %v5161_v42, 0 }
 0x559   :  { %v3829_v25 = vsel %vm3827_vm2, %v3828_v17, %v8863_v22  ;;  %v3538_v2 = vand.u32 2147483647, %v3537_v27  ;;  %v3825_v34 = vmul.u32 %v3818_v38, %v3809_v53  ;;  %v3981_v1 = vand.u32 2139095040, %v8877_v20 }
 0x55a   :  { %vm3885_vm10 = vcmp.gt.s32.totalorder %v3884_v31, 0  ;;  %v5165_v23 = vadd.s32 4294967294, %v3734_v58  ;;  %v10049_v18 = vand.u32 2147483647, %v8834_v5  ;;  %v3540_v0 = vcvt.s32.f32 %v3533_v37 }
 0x55b   :  { %v3886_v24 = vsel %vm3885_vm10, %v3884_v31, 0  ;;  %v8885_v49 = vsel %vm5162_vm4, 0, %v5161_v42  ;;  %v3830_v21 = vadd.s32 %v3829_v25, %v3825_v34  ;;  %v8891_v32 = vadd.s32 %v8767_v54, %v8775_v8 }
 0x55c   :  { %v3888_v28 = vand.u32 31, %v3886_v24  ;;  %v8887_v15 = vmul.f32 %v3540_v0, %v3538_v2  ;;  %v3982_v63 = vshrl.u32 %v3981_v1, 23  ;;  %v3634_v38 = vsub.s32 32, %v8885_v49 }
 0x55d   :  { %vm5166_vm8 = vcmp.lt.s32.totalorder %v5165_v23, 0  ;;  %v3881_v22 = vand.u32 8388607, %v10049_v18  ;;  %v3831_v14 = vadd.s32 536870912, %v3830_v21  ;;  %v3887_v44 = vshrl.u32 %v3886_v24, 5 }
 0x55e   :  { %v3889_v12 = vsub.s32 32, %v3888_v28  ;;  %v3891_v26 = vshll.u32 %v10128_v57, %v3888_v28  ;;  %v3894_v7 = vshll.u32 %v10113_v52, %v3888_v28  ;;  %v3897_v54 = vshll.u32 %v10129_v35, %v3888_v28 }
 0x55f   :  { %v3900_v33 = vshll.u32 %v10118_v16, %v3888_v28  ;;  %v3903_v61 = vshll.u32 %v10119_v56, %v3888_v28  ;;  %v5175_v46 = vadd.s32 4294967169, %v3982_v63  ;;  %v3638_v31 = vsub.s32 4294967266, %v8885_v49 }
 0x560   :  { %v3892_v51 = vshrl.u32 %v10113_v52, %v3889_v12  ;;  %v3895_v11 = vshrl.u32 %v10129_v35, %v3889_v12  ;;  %v3898_v8 = vshrl.u32 %v10118_v16, %v3889_v12  ;;  %v3901_v42 = vshrl.u32 %v10119_v56, %v3889_v12 }
 0x561   :  { %v3904_v53 = vshrl.u32 %v10121_v55, %v3889_v12  ;;  %v8907_v37 = vshrl.u32 %v3831_v14, 30  ;;  %v3882_v25 = vor.u32 8388608, %v3881_v22  ;;  %v8910_v34 = vsel %vm5166_vm8, 0, %v5165_v23 }
 0x562   :  { %v3893_v27 = vor.u32 %v3892_v51, %v3891_v26  ;;  %v3896_v17 = vor.u32 %v3895_v11, %v3894_v7  ;;  %v3899_v58 = vor.u32 %v3898_v8, %v3897_v54  ;;  %v3902_v2 = vor.u32 %v3901_v42, %v3900_v33 }
 0x563   :  { %10320 = vst [vmem:[#allocation34_spill] sm:$0xff] %v8907_v37  ;;  %v3905_v1 = vor.u32 %v3904_v53, %v3903_v61  ;;  %vm3906_vm13 = vcmp.lt.s32.totalorder %v3887_v44, 1  ;;  %v10048_v24 = vand.u32 2147483647, %v8877_v20  ;;  %vm3908_vm11 = vcmp.lt.s32.totalorder %v3887_v44, 3 }
 0x564   :  { %vm3909_vm9 = vcmp.lt.s32.totalorder %v3887_v44, 4  ;;  %v3914_v0 = vsel %vm3906_vm13, %v3893_v27, %v3896_v17  ;;  %v3988_v28 = vadd.s32 1, %v5175_v46  ;;  %v3918_v7 = vsel %vm3906_vm13, %v3896_v17, %v3899_v58 }
 0x565   :  { %v3911_v63 = vsel %vm3909_vm9, %v3899_v58, 2102212464  ;;  %v3915_v26 = vsel %vm3909_vm9, %v3902_v2, 920167782  ;;  %v3919_v14 = vsel %vm3909_vm9, %v3905_v1, 1326507024  ;;  %v3890_v51 = vshrl.u32 %v10128_v57, %v3889_v12 }
 0x566   :  { %v3833_v22 = vshll.u32 %v8907_v37, 30  ;;  %vm3907_vm5 = vcmp.lt.s32.totalorder %v3887_v44, 2  ;;  %v3916_v23 = vsel %vm3908_vm11, %v3899_v58, %v3915_v26  ;;  %v8918_v11 = vadd.s32 127, %v3638_v31  ;;  %v3435_v31 = vpop.f32.mrf.mxu1 }
 0x567   :  { %v3917_v54 = vsel %vm3907_vm5, %v3914_v0, %v3916_v23  ;;  %v3920_v8 = vsel %vm3908_vm11, %v3902_v2, %v3919_v14  ;;  %v3922_v33 = vshll.u32 %v3882_v25, 8  ;;  %v3910_v42 = vsel %vm3906_vm13, %v3890_v51, %v3893_v27 }
 0x568   :  { %v3912_v61 = vsel %vm3908_vm11, %v3896_v17, %v3911_v63  ;;  %v3921_v46 = vsel %vm3907_vm5, %v3918_v7, %v3920_v8  ;;  %vm3989_vm15 = vcmp.gt.s32.totalorder %v3988_v28, 0  ;;  %v3742_v53 = vsub.s32 4294967266, %v8910_v34 }
 0x569   :  { %v8926_v12 = vmul.u32.u64.low %v3922_v33, %v3921_v46  ;;  %v8927_v1 = vmul.u32.u64.high %v3922_v33, %v3921_v46, %v8926_v12  ;;  %v3990_v58 = vsel %vm3989_vm15, %v3988_v28, 0  ;;  %v8929_v26 = vsub.s32 %v3830_v21, %v3833_v22 }
 0x56a   :  { %v8931_v0 = vmul.u32.u64.low %v3922_v33, %v3917_v54  ;;  %v8932_v23 = vmul.u32.u64.high %v3922_v33, %v3917_v54, %v8931_v0  ;;  %v3985_v27 = vand.u32 8388607, %v10048_v24  ;;  %v3722_v25 = vadd.s32 %v8810_v10, %v8817_v6 }
 0x56b   :  { %v3913_v2 = vsel %vm3907_vm5, %v3910_v42, %v3912_v61  ;;  %v3992_v63 = vand.u32 31, %v3990_v58  ;;  %v3542_v28 = vxor.u32 2147483648, %v8887_v15  ;;  %v8944_v21 = vshrl.u32 %v8891_v32, %v3634_v38 }
 0x56c   :  { %v8948_v14 = vadd.f32 %v3435_v31, %v8687_v19  ;;  %v3738_v22 = vsub.s32 32, %v8910_v34  ;;  %v3743_v51 = vadd.s32 127, %v3742_v53  ;;  %vm3931_vm1 = vc.u32 %v8927_v1, %v8931_v0 }
 0x56d   :  { %v3993_v10 = vsub.s32 32, %v3992_v63  ;;  %v3836_v6 = vsub.s32 0, %v8929_v26  ;;  %v3929_v44 = vmul.u32 %v3922_v33, %v3913_v2  ;;  %v3932_v54 = vadd.s32 1, %v8932_v23 }
 0x56e   :  { %v3986_v8 = vor.u32 8388608, %v3985_v27  ;;  %v3991_v32 = vshrl.u32 %v3990_v58, 5  ;;  %v3995_v38 = vshll.u32 %v10128_v57, %v3992_v63  ;;  %v3998_v53 = vshll.u32 %v10113_v52, %v3992_v63 }
 0x56f   :  { %v3996_v42 = vshrl.u32 %v10113_v52, %v3993_v10  ;;  %v3999_v61 = vshrl.u32 %v10129_v35, %v3993_v10  ;;  %v3933_v46 = vsel %vm3931_vm1, %v3932_v54, %v8932_v23  ;;  %v4001_v12 = vshll.u32 %v10129_v35, %v3992_v63 }
 0x570   :  { %v4002_v31 = vshrl.u32 %v10118_v16, %v3993_v10  ;;  %v3739_v33 = vshll.u32 %v8852_v29, %v8910_v34  ;;  %v3740_v2 = vshrl.u32 %v3722_v25, %v3738_v22  ;;  %v3934_v27 = vadd.s32 %v3933_v46, %v3929_v44 }
 0x571   :  { %v3997_v58 = vor.u32 %v3996_v42, %v3995_v38  ;;  %v4000_v9 = vor.u32 %v3999_v61, %v3998_v53  ;;  %v4004_v24 = vshll.u32 %v10118_v16, %v3992_v63  ;;  %v4005_v18 = vshrl.u32 %v10119_v56, %v3993_v10  ;;  %v3437_v61 = vpop.f32.mrf.mxu1 }
 0x572   :  { %v4003_v45 = vor.u32 %v4002_v31, %v4001_v12  ;;  %v3744_v60 = vshll.u32 %v3743_v51, 23  ;;  %v3935_v23 = vadd.s32 536870912, %v3934_v27  ;;  %v4007_v54 = vshll.u32 %v10119_v56, %v3992_v63 }
 0x573   :  { %v4008_v62 = vshrl.u32 %v10121_v55, %v3993_v10  ;;  %v5168_v7 = vmin.u32 %v3836_v6, %v8929_v26  ;;  %v4006_v17 = vor.u32 %v4005_v18, %v4004_v24  ;;  %vm4013_vm12 = vcmp.lt.s32.totalorder %v3991_v32, 4 }
 0x574   :  { %v4026_v29 = vshll.u32 %v3986_v8, 8  ;;  %v8969_v34 = vshrl.u32 %v3935_v23, 30  ;;  %vm4010_vm6 = vcmp.lt.s32.totalorder %v3991_v32, 1  ;;  %v4015_v22 = vsel %vm4013_vm12, %v4003_v45, 2102212464 }
 0x575   :  { %v4009_v25 = vor.u32 %v4008_v62, %v4007_v54  ;;  %v3994_v44 = vshrl.u32 %v10128_v57, %v3993_v10  ;;  %vm4012_vm0 = vcmp.lt.s32.totalorder %v3991_v32, 3  ;;  %v4018_v51 = vsel %vm4010_vm6, %v3997_v58, %v4000_v9 }
 0x576   :  { %10321 = vst [vmem:[#allocation33_spill] sm:$0xff] %v8969_v34  ;;  %v4019_v38 = vsel %vm4013_vm12, %v4006_v17, 920167782  ;;  %v3937_v63 = vshll.u32 %v8969_v34, 30  ;;  %vm4011_vm3 = vcmp.lt.s32.totalorder %v3991_v32, 2  ;;  %v4022_v6 = vsel %vm4010_vm6, %v4000_v9, %v4003_v45 }
 0x577   :  { %v4020_v42 = vsel %vm4012_vm0, %v4003_v45, %v4019_v38  ;;  %v4014_v18 = vsel %vm4010_vm6, %v3994_v44, %v3997_v58  ;;  %v4016_v24 = vsel %vm4012_vm0, %v4000_v9, %v4015_v22  ;;  %v4023_v62 = vsel %vm4013_vm12, %v4009_v25, 1326507024 }
 0x578   :  { %v4021_v8 = vsel %vm4011_vm3, %v4018_v51, %v4020_v42  ;;  %v8977_v46 = vsub.s32 %v3934_v27, %v3937_v63  ;;  %v4024_v53 = vsel %vm4012_vm0, %v4006_v17, %v4023_v62  ;;  %v3745_v31 = vor.u32 4788187, %v3744_v60 }
 0x579   :  { %v8979_v10 = vmul.u32.u64.low %v4026_v29, %v4021_v8  ;;  %v8980_v12 = vmul.u32.u64.high %v4026_v29, %v4021_v8, %v8979_v10  ;;  %v3838_v23 = vclz %v5168_v7  ;;  %v4025_v54 = vsel %vm4011_vm3, %v4022_v6, %v4024_v53 }
 0x57a   :  { %v4085_v45 = vand.u32 2139095040, %v8948_v14  ;;  %v3940_v9 = vsub.s32 0, %v8977_v46  ;;  %v8986_v58 = vmul.u32.u64.low %v4026_v29, %v4025_v54  ;;  %v8987_v22 = vmul.u32.u64.high %v4026_v29, %v4025_v54, %v8986_v58 }
 0x57b   :  { %v8990_v25 = vadd.f32 %v3437_v61, %v8687_v19  ;;  %vm10088_vm7 = vcmp.lt.s32.totalorder %v8689_v48, 0  ;;  %v3741_v17 = vor.u32 %v3740_v2, %v3739_v33  ;;  %v4017_v27 = vsel %vm4011_vm3, %v4014_v18, %v4016_v24 }
 0x57c   :  { %v4086_v44 = vshrl.u32 %v4085_v45, 23  ;;  %v3543_v60 = vsel %vm10088_vm7, %v3542_v28, %v8887_v15  ;;  %v10322_v7 = vshll.u32 %v8826_v40, %v8885_v49  ;;  %v10323_v19 = vshll.u32 %v8918_v11, 23 }
 0x57d   :  { %v4036_v63 = vadd.s32 1, %v8980_v12  ;;  %v3746_v33 = vand.u32 2147483647, %v3745_v31  ;;  %v5169_v32 = vadd.s32 4294967294, %v3838_v23  ;;  %v10052_v2 = vand.u32 2147483647, %v8948_v14 }
 0x57e   :  { %v3637_v51 = vor.u32 %v8944_v21, %v10322_v7  ;;  %v3641_v38 = vor.u32 4788187, %v10323_v19  ;;  %v5179_v42 = vadd.s32 4294967169, %v4086_v44  ;;  %v5172_v6 = vmin.u32 %v3940_v9, %v8977_v46 }
 0x57f   :  { %v4033_v18 = vmul.u32 %v4026_v29, %v4017_v27  ;;  %vm4035_vm14 = vc.u32 %v8987_v22, %v8979_v10  ;;  %v4189_v40 = vand.u32 2139095040, %v8990_v25  ;;  %v10324_v49 = vand.u32 2147483647, %v8689_v48 }
 0x580   :  { %v10325_v15 = vmov 0  ;;  %v3748_v11 = vcvt.s32.f32 %v3741_v17  ;;  %v4037_v28 = vsel %vm4035_vm14, %v4036_v63, %v8980_v12  ;;  %v4092_v21 = vadd.s32 1, %v5179_v42 }
 0x581   :  { %vm9013_vm2 = vcmp.le.f32.partialorder %v10324_v49, 0.7853982  ;;  %v3642_v29 = vand.u32 2147483647, %v3641_v38  ;;  %v4038_v8 = vadd.s32 %v4037_v28, %v4033_v18  ;;  %v3644_v62 = vcvt.s32.f32 %v3637_v51 }
 0x582   :  { %v10326_v15 = vsel %vm9013_vm2, 4294967295, %v10325_v15  ;;  %v9021_v24 = vsel %vm9013_vm2, %v8689_v48, %v3543_v60  ;;  %v9023_v61 = vmul.f32 %v3748_v11, %v3746_v33  ;;  %v4089_v53 = vand.u32 8388607, %v10052_v2 }
 0x583   :  { %10327 = vst [vmem:[#allocation10_spill] sm:$0xff] %v10326_v15  ;;  %vm4093_vm4 = vcmp.gt.s32.totalorder %v4092_v21, 0  ;;  %vm5170_vm10 = vcmp.lt.s32.totalorder %v5169_v32, 0  ;;  %v3942_v31 = vclz %v5172_v6  ;;  %v4190_v54 = vshrl.u32 %v4189_v40, 23 }
 0x584   :  { %v4094_v23 = vsel %vm4093_vm4, %v4092_v21, 0  ;;  %5529 = vcosq.f32 %v9021_v24  ;;  %v9028_v45 = vmul.f32 %v3644_v62, %v3642_v29  ;;  %v4039_v9 = vadd.s32 536870912, %v4038_v8 }
 0x585   :  { %v4096_v12 = vand.u32 31, %v4094_v23  ;;  %v9031_v17 = vsel %vm5170_vm10, 0, %v5169_v32  ;;  %v4090_v27 = vor.u32 8388608, %v4089_v53  ;;  %v5173_v60 = vadd.s32 4294967294, %v3942_v31 }
 0x586   :  { %v5183_v19 = vadd.s32 4294967169, %v4190_v54  ;;  %v9039_v6 = vshrl.u32 %v4039_v9, 30  ;;  %v4095_v32 = vshrl.u32 %v4094_v23, 5  ;;  %v3842_v49 = vsub.s32 32, %v9031_v17 }
 0x587   :  { %v4097_v44 = vsub.s32 32, %v4096_v12  ;;  %v4099_v7 = vshll.u32 %v10128_v57, %v4096_v12  ;;  %v4102_v51 = vshll.u32 %v10113_v52, %v4096_v12  ;;  %v4105_v33 = vshll.u32 %v10129_v35, %v4096_v12 }
 0x588   :  { %10328 = vst [vmem:[#allocation26_spill] sm:$0xff] %v9039_v6  ;;  %v4108_v18 = vshll.u32 %v10118_v16, %v4096_v12  ;;  %v3846_v29 = vsub.s32 4294967266, %v9031_v17  ;;  %v4196_v31 = vadd.s32 1, %v5183_v19  ;;  %vm10090_vm8 = vcmp.lt.s32.totalorder %v8699_v30, 0 }
 0x589   :  { %v4100_v38 = vshrl.u32 %v10113_v52, %v4097_v44  ;;  %v4103_v63 = vshrl.u32 %v10129_v35, %v4097_v44  ;;  %v4106_v42 = vshrl.u32 %v10118_v16, %v4097_v44  ;;  %v4109_v40 = vshrl.u32 %v10119_v56, %v4097_v44 }
 0x58a   :  { %vm5174_vm13 = vcmp.lt.s32.totalorder %v5173_v60, 0  ;;  %v4111_v23 = vshll.u32 %v10119_v56, %v4096_v12  ;;  %v4112_v54 = vshrl.u32 %v10121_v55, %v4097_v44  ;;  %v4130_v9 = vshll.u32 %v4090_v27, 8 }
 0x58b   :  { %v4101_v11 = vor.u32 %v4100_v38, %v4099_v7  ;;  %v4104_v28 = vor.u32 %v4103_v63, %v4102_v51  ;;  %v4107_v21 = vor.u32 %v4106_v42, %v4105_v33  ;;  %v4110_v62 = vor.u32 %v4109_v40, %v4108_v18 }
 0x58c   :  { %v4041_v2 = vshll.u32 %v9039_v6, 30  ;;  %vm4114_vm11 = vcmp.lt.s32.totalorder %v4095_v32, 1  ;;  %vm4116_vm9 = vcmp.lt.s32.totalorder %v4095_v32, 3  ;;  %vm4117_vm5 = vcmp.lt.s32.totalorder %v4095_v32, 4 }
 0x58d   :  { %v4113_v7 = vor.u32 %v4112_v54, %v4111_v23  ;;  %v4119_v51 = vsel %vm4117_vm5, %v4107_v21, 2102212464  ;;  %v4122_v38 = vsel %vm4114_vm11, %v4101_v11, %v4104_v28  ;;  %v4123_v63 = vsel %vm4117_vm5, %v4110_v62, 920167782 }
 0x58e   :  { %v4098_v19 = vshrl.u32 %v10128_v57, %v4097_v44  ;;  %vm4115_vm15 = vcmp.lt.s32.totalorder %v4095_v32, 2  ;;  %v4124_v33 = vsel %vm4116_vm9, %v4107_v21, %v4123_v63  ;;  %vm4197_vm1 = vcmp.gt.s32.totalorder %v4196_v31, 0 }
 0x58f   :  { %v9054_v12 = vsel %vm5174_vm13, 0, %v5173_v60  ;;  %v4125_v27 = vsel %vm4115_vm15, %v4122_v38, %v4124_v33  ;;  %v4126_v42 = vsel %vm4114_vm11, %v4104_v28, %v4107_v21  ;;  %v4127_v18 = vsel %vm4117_vm5, %v4113_v7, 1326507024  ;;  %v3441_v33 = vpop.f32.mrf.mxu1 }
 0x590   :  { %v9058_v40 = vsub.s32 %v4038_v8, %v4041_v2  ;;  %v4118_v23 = vsel %vm4114_vm11, %v4098_v19, %v4101_v11  ;;  %v4120_v54 = vsel %vm4116_vm9, %v4104_v28, %v4119_v51  ;;  %v4128_v44 = vsel %vm4116_vm9, %v4110_v62, %v4127_v18 }
 0x591   :  { %v9063_v58 = vpop.eup %5529  ;;  %v4129_v63 = vsel %vm4115_vm15, %v4126_v42, %v4128_v44  ;;  %v9066_v53 = vmul.u32.u64.low %v4130_v9, %v4125_v27  ;;  %v9067_v60 = vmul.u32.u64.high %v4130_v9, %v4125_v27, %v9066_v53  ;;  %v4198_v38 = vsel %vm4197_vm1, %v4196_v31, 0 }
 0x592   :  { %10329 = vst [vmem:[#allocation31_spill] sm:$0xff] %v9063_v58  ;;  %v3826_v21 = vadd.s32 %v8862_v13, %v8871_v36  ;;  %v9072_v2 = vadd.s32 127, %v3846_v29  ;;  %v9074_v8 = vmul.u32.u64.low %v4130_v9, %v4129_v63  ;;  %v9075_v11 = vmul.u32.u64.high %v4130_v9, %v4129_v63, %v9074_v8 }
 0x593   :  { %v3950_v28 = vsub.s32 4294967266, %v9054_v12  ;;  %v4121_v62 = vsel %vm4115_vm15, %v4118_v23, %v4120_v54  ;;  %v10330_v7 = vand.u32 2147483647, %v8990_v25  ;;  %v4200_v19 = vand.u32 31, %v4198_v38 }
 0x594   :  { %v10331_v31 = vxor.u32 2147483648, %v9023_v61  ;;  %v3930_v32 = vadd.s32 %v8931_v0, %v8927_v1  ;;  %v9093_v29 = vshrl.u32 %v3826_v21, %v3842_v49  ;;  %v4044_v42 = vsub.s32 0, %v9058_v40 }
 0x595   :  { %v4193_v51 = vand.u32 8388607, %v10330_v7  ;;  %v4140_v18 = vadd.s32 1, %v9067_v60  ;;  %v4201_v23 = vsub.s32 32, %v4200_v19  ;;  %v4137_v44 = vmul.u32 %v4130_v9, %v4121_v62 }
 0x596   :  { %v9087_v13 = vsel %vm10090_vm8, %v10331_v31, %v9023_v61  ;;  %vm4139_vm12 = vc.u32 %v9075_v11, %v9066_v53  ;;  %v9101_v61 = vadd.f32 %v3441_v33, %v8681_v59  ;;  %v3951_v63 = vadd.s32 127, %v3950_v28 }
 0x597   :  { %v4141_v8 = vsel %vm4139_vm12, %v4140_v18, %v9067_v60  ;;  %v4194_v1 = vor.u32 8388608, %v4193_v51  ;;  %v4204_v0 = vshrl.u32 %v10113_v52, %v4201_v23  ;;  %v4203_v21 = vshll.u32 %v10128_v57, %v4200_v19 }
 0x598   :  { %v4142_v49 = vadd.s32 %v4141_v8, %v4137_v44  ;;  %v4206_v7 = vshll.u32 %v10113_v52, %v4200_v19  ;;  %v4207_v31 = vshrl.u32 %v10129_v35, %v4201_v23  ;;  %v5176_v9 = vmin.u32 %v4044_v42, %v9058_v40 }
 0x599   :  { %v4199_v62 = vshrl.u32 %v4198_v38, 5  ;;  %v4209_v27 = vshll.u32 %v10129_v35, %v4200_v19  ;;  %v4210_v33 = vshrl.u32 %v10118_v16, %v4201_v23  ;;  %v4205_v54 = vor.u32 %v4204_v0, %v4203_v21 }
 0x59a   :  { %v4143_v28 = vadd.s32 536870912, %v4142_v49  ;;  %v4208_v60 = vor.u32 %v4207_v31, %v4206_v7  ;;  %v4212_v51 = vshll.u32 %v10118_v16, %v4200_v19  ;;  %v4213_v44 = vshrl.u32 %v10119_v56, %v4201_v23 }
 0x59b   :  { %v4211_v18 = vor.u32 %v4210_v33, %v4209_v27  ;;  %v4215_v8 = vshll.u32 %v10119_v56, %v4200_v19  ;;  %v4216_v36 = vshrl.u32 %v10121_v55, %v4201_v23  ;;  %v4234_v42 = vshll.u32 %v4194_v1, 8 }
 0x59c   :  { %v9115_v58 = vshrl.u32 %v4143_v28, 30  ;;  %v4293_v15 = vand.u32 2139095040, %v9101_v61  ;;  %v10333_v48 = vand.u32 2147483647, %v8699_v30  ;;  %v10334_v0 = vmov 0 }
 0x59d   :  { %v3946_v27 = vsub.s32 32, %v9054_v12  ;;  %v3952_v21 = vshll.u32 %v3951_v63, 23  ;;  %v4214_v7 = vor.u32 %v4213_v44, %v4212_v51  ;;  %v4217_v19 = vor.u32 %v4216_v36, %v4215_v8 }
 0x59e   :  { %10332 = vst [vmem:[#allocation8_spill] sm:$0xff] %v9115_v58  ;;  %vm9121_vm6 = vcmp.le.f32.partialorder %v10333_v48, 0.7853982  ;;  %v4046_v31 = vclz %v5176_v9  ;;  %v4145_v33 = vshll.u32 %v9115_v58, 30  ;;  %vm4218_vm0 = vcmp.lt.s32.totalorder %v4199_v62, 1 }
 0x59f   :  { %v10335_v0 = vsel %vm9121_vm6, 4294967295, %v10334_v0  ;;  %vm4221_vm3 = vcmp.lt.s32.totalorder %v4199_v62, 4  ;;  %vm4220_vm14 = vcmp.lt.s32.totalorder %v4199_v62, 3  ;;  %v4226_v28 = vsel %vm4218_vm0, %v4205_v54, %v4208_v60 }
 0x5a0   :  { %10336 = vst [vmem:[#allocation24_spill] sm:$0xff] %v10335_v0  ;;  %v4223_v1 = vsel %vm4221_vm3, %v4211_v18, 2102212464  ;;  %v4227_v38 = vsel %vm4221_vm3, %v4214_v7, 920167782  ;;  %v4202_v48 = vshrl.u32 %v10128_v57, %v4201_v23  ;;  %vm4219_vm4 = vcmp.lt.s32.totalorder %v4199_v62, 2 }
 0x5a1   :  { %v4228_v47 = vsel %vm4220_vm14, %v4211_v18, %v4227_v38  ;;  %v4230_v43 = vsel %vm4218_vm0, %v4208_v60, %v4211_v18  ;;  %v9131_v63 = vsub.s32 %v4142_v49, %v4145_v33  ;;  %v4231_v9 = vsel %vm4221_vm3, %v4217_v19, 1326507024  ;;  %v3443_v18 = vpop.f32.mrf.mxu1 }
 0x5a2   :  { %v4229_v36 = vsel %vm4219_vm4, %v4226_v28, %v4228_v47  ;;  %v4294_v51 = vshrl.u32 %v4293_v15, 23  ;;  %vm10089_vm10 = vcmp.lt.s32.totalorder %v8693_v3, 0  ;;  %v3948_v44 = vshrl.u32 %v3930_v32, %v3946_v27 }
 0x5a3   :  { %v4222_v8 = vsel %vm4218_vm0, %v4202_v48, %v4205_v54  ;;  %v4224_v41 = vsel %vm4220_vm14, %v4208_v60, %v4223_v1  ;;  %v4232_v23 = vsel %vm4220_vm14, %v4214_v7, %v4231_v9  ;;  %v3947_v47 = vshll.u32 %v8977_v46, %v9054_v12 }
 0x5a4   :  { %v4233_v37 = vsel %vm4219_vm4, %v4230_v43, %v4232_v23  ;;  %v9139_v38 = vmul.u32.u64.low %v4234_v42, %v4229_v36  ;;  %v9140_v34 = vmul.u32.u64.high %v4234_v42, %v4229_v36, %v9139_v38  ;;  %v5187_v49 = vadd.s32 4294967169, %v4294_v51 }
 0x5a5   :  { %v3953_v15 = vor.u32 4788187, %v3952_v21  ;;  %v9145_v19 = vmul.u32.u64.low %v4234_v42, %v4233_v37  ;;  %v9146_v32 = vmul.u32.u64.high %v4234_v42, %v4233_v37, %v9145_v19  ;;  %v5177_v54 = vadd.s32 4294967294, %v4046_v31 }
 0x5a6   :  { %v4148_v60 = vsub.s32 0, %v9131_v63  ;;  %v4225_v27 = vsel %vm4219_vm4, %v4222_v8, %v4224_v41  ;;  %v4300_v7 = vadd.s32 1, %v5187_v49  ;;  %v9154_v43 = vsel %vm9121_vm6, %v8699_v30, %v9087_v13 }
 0x5a7   :  { %v10337_v33 = vshll.u32 %v8929_v26, %v9031_v17  ;;  %v3949_v12 = vor.u32 %v3948_v44, %v3947_v47  ;;  %v9161_v37 = vadd.f32 %v3443_v18, %v8681_v59  ;;  %v10338_v21 = vshll.u32 %v9072_v2, 23 }
 0x5a8   :  { %v4244_v41 = vadd.s32 1, %v9140_v34  ;;  %v10339_v31 = vand.u32 2147483647, %v9101_v61  ;;  %vm4301_vm13 = vcmp.gt.s32.totalorder %v4300_v7, 0  ;;  %v3954_v13 = vand.u32 2147483647, %v3953_v15 }
 0x5a9   :  { %v3845_v46 = vor.u32 %v9093_v29, %v10337_v33  ;;  %v3849_v62 = vor.u32 4788187, %v10338_v21  ;;  %v4241_v28 = vmul.u32 %v4234_v42, %v4225_v27  ;;  %vm4243_vm11 = vc.u32 %v9146_v32, %v9139_v38 }
 0x5aa   :  { %v4297_v1 = vand.u32 8388607, %v10339_v31  ;;  %v4302_v26 = vsel %vm4301_vm13, %v4300_v7, 0  ;;  %vm5178_vm9 = vcmp.lt.s32.totalorder %v5177_v54, 0  ;;  %v5180_v17 = vmin.u32 %v4148_v60, %v9131_v63 }
 0x5ab   :  { %v4245_v59 = vsel %vm4243_vm11, %v4244_v41, %v9140_v34  ;;  %v4304_v29 = vand.u32 31, %v4302_v26  ;;  %5531 = vsinq.f32 %v9021_v24  ;;  %v3956_v2 = vcvt.s32.f32 %v3949_v12 }
 0x5ac   :  { %v4246_v48 = vadd.s32 %v4245_v59, %v4241_v28  ;;  %v4397_v36 = vand.u32 2139095040, %v9161_v37  ;;  %v10340_v9 = vxor.u32 2147483648, %v9028_v45  ;;  %5533 = vcosq.f32 %v9154_v43 }
 0x5ad   :  { %v3852_v51 = vcvt.s32.f32 %v3845_v46  ;;  %v4305_v44 = vsub.s32 32, %v4304_v29  ;;  %v3850_v8 = vand.u32 2147483647, %v3849_v62  ;;  %v3957_v34 = vmul.f32 %v3956_v2, %v3954_v13 }
 0x5ae   :  { %v9179_v42 = vsel %vm10089_vm10, %v10340_v9, %v9028_v45  ;;  %v9182_v23 = vsel %vm5178_vm9, 0, %v5177_v54  ;;  %v4247_v24 = vadd.s32 536870912, %v4246_v48  ;;  %v4150_v49 = vclz %v5180_v17 }
 0x5af   :  { %10341 = vst [vmem:[#allocation28_spill] sm:$0xff] %v9179_v42  ;;  %v4298_v18 = vor.u32 8388608, %v4297_v1  ;;  %v4308_v47 = vshrl.u32 %v10113_v52, %v4305_v44  ;;  %v4311_v15 = vshrl.u32 %v10129_v35, %v4305_v44  ;;  %v4307_v19 = vshll.u32 %v10128_v57, %v4304_v29 }
 0x5b0   :  { %v4310_v45 = vshll.u32 %v10113_v52, %v4304_v29  ;;  %v4314_v60 = vshrl.u32 %v10118_v16, %v4305_v44  ;;  %v4398_v27 = vshrl.u32 %v4397_v36, 23  ;;  %v4303_v7 = vshrl.u32 %v4302_v26, 5 }
 0x5b1   :  { %v4313_v33 = vshll.u32 %v10129_v35, %v4304_v29  ;;  %v4316_v54 = vshll.u32 %v10118_v16, %v4304_v29  ;;  %v4317_v46 = vshrl.u32 %v10119_v56, %v4305_v44  ;;  %v9192_v12 = vmul.f32 %v3852_v51, %v3850_v8 }
 0x5b2   :  { %v9194_v21 = vshrl.u32 %v4247_v24, 30  ;;  %v4309_v62 = vor.u32 %v4308_v47, %v4307_v19  ;;  %v4312_v41 = vor.u32 %v4311_v15, %v4310_v45  ;;  %vm10092_vm5 = vcmp.lt.s32.totalorder %v8834_v5, 0 }
 0x5b3   :  { %v4315_v31 = vor.u32 %v4314_v60, %v4313_v33  ;;  %v4318_v1 = vor.u32 %v4317_v46, %v4316_v54  ;;  %v4319_v13 = vshll.u32 %v10119_v56, %v4304_v29  ;;  %v4320_v28 = vshrl.u32 %v10121_v55, %v4305_v44 }
 0x5b4   :  { %v3958_v26 = vxor.u32 2147483648, %v3957_v34  ;;  %v4050_v17 = vsub.s32 32, %v9182_v23  ;;  %v4054_v59 = vsub.s32 4294967266, %v9182_v23  ;;  %v9201_v2 = vshll.u32 %v4298_v18, 8 }
 0x5b5   :  { %v5181_v36 = vadd.s32 4294967294, %v4150_v49  ;;  %v4321_v9 = vor.u32 %v4320_v28, %v4319_v13  ;;  %vm4322_vm15 = vcmp.lt.s32.totalorder %v4303_v7, 1  ;;  %v5191_v51 = vadd.s32 4294967169, %v4398_v27 }
 0x5b6   :  { %v10342_v8 = vand.u32 2147483647, %v8834_v5  ;;  %v10343_v24 = vmov 0  ;;  %v4249_v29 = vshll.u32 %v9194_v21, 30  ;;  %vm4324_vm12 = vcmp.lt.s32.totalorder %v4303_v7, 3 }
 0x5b7   :  { %vm4325_vm0 = vcmp.lt.s32.totalorder %v4303_v7, 4  ;;  %v4330_v47 = vsel %vm4322_vm15, %v4309_v62, %v4312_v41  ;;  %v4334_v18 = vsel %vm4322_vm15, %v4312_v41, %v4315_v31  ;;  %v4306_v45 = vshrl.u32 %v10128_v57, %v4305_v44 }
 0x5b8   :  { %vm9205_vm1 = vcmp.le.f32.partialorder %v10342_v8, 0.7853982  ;;  %v4327_v15 = vsel %vm4325_vm0, %v4315_v31, 2102212464  ;;  %v4331_v19 = vsel %vm4325_vm0, %v4318_v1, 920167782  ;;  %v9215_v33 = vpop.eup %5531  ;;  %v9221_v8 = vsub.s32 %v4246_v48, %v4249_v29 }
 0x5b9   :  { %v10344_v24 = vsel %vm9205_vm1, 4294967295, %v10343_v24  ;;  %v4335_v49 = vsel %vm4325_vm0, %v4321_v9, 1326507024  ;;  %vm4323_vm3 = vcmp.lt.s32.totalorder %v4303_v7, 2  ;;  %v4332_v60 = vsel %vm4324_vm12, %v4315_v31, %v4331_v19  ;;  %10346 = vst [vmem:[#allocation7_spill] sm:$0xff] %v9215_v33  ;;  %v9219_v28 = vpop.eup %5533 }
 0x5ba   :  { %10345 = vst [vmem:[#allocation23_spill] sm:$0xff] %v10344_v24  ;;  %vm5182_vm14 = vcmp.lt.s32.totalorder %v5181_v36, 0  ;;  %v4333_v54 = vsel %vm4323_vm3, %v4330_v47, %v4332_v60  ;;  %v4336_v46 = vsel %vm4324_vm12, %v4318_v1, %v4335_v49  ;;  %v4404_v13 = vadd.s32 1, %v5191_v51  ;;  %10347 = vst [vmem:[#allocation21_spill] sm:$0xff] %v9219_v28 }
 0x5bb   :  { %v4326_v9 = vsel %vm4322_vm15, %v4306_v45, %v4309_v62  ;;  %v4328_v44 = vsel %vm4324_vm12, %v4312_v41, %v4327_v15  ;;  %v4337_v31 = vsel %vm4323_vm3, %v4334_v18, %v4336_v46  ;;  %5535 = vsinq.f32 %v9154_v43  ;;  %v3447_v18 = vpop.f32.mrf.mxu1 }
 0x5bc   :  { %v9227_v19 = vmul.u32.u64.low %v9201_v2, %v4337_v31  ;;  %v9228_v27 = vmul.u32.u64.high %v9201_v2, %v4337_v31, %v9227_v19  ;;  %v9231_v33 = vmul.u32.u64.low %v9201_v2, %v4333_v54  ;;  %v9232_v47 = vmul.u32.u64.high %v9201_v2, %v4333_v54, %v9231_v33 }
 0x5bd   :  { %v3959_v48 = vsel %vm10092_vm5, %v3958_v26, %v3957_v34  ;;  %v9238_v1 = vadd.s32 127, %v4054_v59  ;;  %vm4405_vm4 = vcmp.gt.s32.totalorder %v4404_v13, 0  ;;  %v4034_v41 = vadd.s32 %v8979_v10, %v8987_v22 }
 0x5be   :  { %v10348_v51 = vand.u32 2147483647, %v9161_v37  ;;  %v4406_v15 = vsel %vm4405_vm4, %v4404_v13, 0  ;;  %v9246_v49 = vsel %vm5182_vm14, 0, %v5181_v36  ;;  %v4252_v43 = vsub.s32 0, %v9221_v8 }
 0x5bf   :  { %v4329_v34 = vsel %vm4323_vm3, %v4326_v9, %v4328_v44  ;;  %v4408_v26 = vand.u32 31, %v4406_v15  ;;  %v9253_v59 = vsel %vm9205_vm1, %v8834_v5, %v3959_v48  ;;  %v9257_v22 = vshrl.u32 %v4034_v41, %v4050_v17  ;;  %v3449_v48 = vpop.f32.mrf.mxu1 }
 0x5c0   :  { %v4401_v29 = vand.u32 8388607, %v10348_v51  ;;  %vm4347_vm13 = vc.u32 %v9228_v27, %v9231_v33  ;;  %v4056_v36 = vshll.u32 %v9238_v1, 23  ;;  %v4138_v7 = vadd.s32 %v9066_v53, %v9075_v11 }
 0x5c1   :  { %v4348_v45 = vadd.s32 1, %v9232_v47  ;;  %v9266_v60 = vadd.f32 %v3447_v18, %v8679_v39  ;;  %v4158_v54 = vsub.s32 4294967266, %v9246_v49  ;;  %v4345_v46 = vmul.u32 %v9201_v2, %v4329_v34 }
 0x5c2   :  { %v4402_v13 = vor.u32 8388608, %v4401_v29  ;;  %v4409_v17 = vsub.s32 32, %v4408_v26  ;;  %v5184_v9 = vmin.u32 %v4252_v43, %v9221_v8  ;;  %v4407_v31 = vshrl.u32 %v4406_v15, 5 }
 0x5c3   :  { %v4349_v44 = vsel %vm4347_vm13, %v4348_v45, %v9232_v47  ;;  %v4411_v19 = vshll.u32 %v10128_v57, %v4408_v26  ;;  %v4414_v1 = vshll.u32 %v10113_v52, %v4408_v26  ;;  %v4417_v51 = vshll.u32 %v10129_v35, %v4408_v26 }
 0x5c4   :  { %v4350_v53 = vadd.s32 %v4349_v44, %v4345_v46  ;;  %v4412_v11 = vshrl.u32 %v10113_v52, %v4409_v17  ;;  %v4415_v41 = vshrl.u32 %v10129_v35, %v4409_v17  ;;  %v4418_v2 = vshrl.u32 %v10118_v16, %v4409_v17 }
 0x5c5   :  { %v4420_v29 = vshll.u32 %v10118_v16, %v4408_v26  ;;  %v4421_v18 = vshrl.u32 %v10119_v56, %v4409_v17  ;;  %v9281_v34 = vadd.f32 %v3449_v48, %v8679_v39  ;;  %v4154_v45 = vsub.s32 32, %v9246_v49 }
 0x5c6   :  { %v4351_v47 = vadd.s32 536870912, %v4350_v53  ;;  %v4413_v15 = vor.u32 %v4412_v11, %v4411_v19  ;;  %v4416_v43 = vor.u32 %v4415_v41, %v4414_v1  ;;  %v4159_v46 = vadd.s32 127, %v4158_v54 }
 0x5c7   :  { %v4419_v44 = vor.u32 %v4418_v2, %v4417_v51  ;;  %v4422_v62 = vor.u32 %v4421_v18, %v4420_v29  ;;  %v4254_v10 = vclz %v5184_v9  ;;  %v4423_v0 = vshll.u32 %v10119_v56, %v4408_v26 }
 0x5c8   :  { %v9284_v28 = vshrl.u32 %v4351_v47, 30  ;;  %v4424_v42 = vshrl.u32 %v10121_v55, %v4409_v17  ;;  %vm4426_vm11 = vcmp.lt.s32.totalorder %v4407_v31, 1  ;;  %vm4429_vm9 = vcmp.lt.s32.totalorder %v4407_v31, 4  ;;  %v9289_v11 = vpop.eup %5535 }
 0x5c9   :  { %v4442_v30 = vshll.u32 %v4402_v13, 8  ;;  %v4501_v19 = vand.u32 2139095040, %v9266_v60  ;;  %10349 = vst [vmem:[#allocation5_spill] sm:$0xff] %v9289_v11  ;;  %v4431_v54 = vsel %vm4429_vm9, %v4419_v44, 2102212464  ;;  %v4434_v1 = vsel %vm4426_vm11, %v4413_v15, %v4416_v43 }
 0x5ca   :  { %v4353_v39 = vshll.u32 %v9284_v28, 30  ;;  %v4425_v48 = vor.u32 %v4424_v42, %v4423_v0  ;;  %v4410_v9 = vshrl.u32 %v10128_v57, %v4409_v17  ;;  %vm4428_vm15 = vcmp.lt.s32.totalorder %v4407_v31, 3 }
 0x5cb   :  { %v4435_v41 = vsel %vm4429_vm9, %v4422_v62, 920167782  ;;  %v4438_v26 = vsel %vm4426_vm11, %v4416_v43, %v4419_v44  ;;  %vm4427_vm12 = vcmp.lt.s32.totalorder %v4407_v31, 2  ;;  %vm10091_vm0 = vcmp.lt.s32.totalorder %v8704_v4, 0 }
 0x5cc   :  { %v9295_v51 = vsub.s32 %v4350_v53, %v4353_v39  ;;  %v4436_v13 = vsel %vm4428_vm15, %v4419_v44, %v4435_v41  ;;  %v4439_v2 = vsel %vm4429_vm9, %v4425_v48, 1326507024  ;;  %v4430_v29 = vsel %vm4426_vm11, %v4410_v9, %v4413_v15 }
 0x5cd   :  { %v4432_v18 = vsel %vm4428_vm15, %v4416_v43, %v4431_v54  ;;  %v4437_v0 = vsel %vm4427_vm12, %v4434_v1, %v4436_v13  ;;  %v4440_v42 = vsel %vm4428_vm15, %v4422_v62, %v4439_v2  ;;  %v4057_v53 = vor.u32 4788187, %v4056_v36 }
 0x5ce   :  { %v4356_v47 = vsub.s32 0, %v9295_v51  ;;  %v4441_v17 = vsel %vm4427_vm12, %v4438_v26, %v4440_v42  ;;  %v9302_v11 = vmul.u32.u64.low %v4442_v30, %v4437_v0  ;;  %v9303_v3 = vmul.u32.u64.high %v4442_v30, %v4437_v0, %v9302_v11 }
 0x5cf   :  { %v9306_v39 = vmul.u32.u64.low %v4442_v30, %v4441_v17  ;;  %v9307_v44 = vmul.u32.u64.high %v4442_v30, %v4441_v17, %v9306_v39  ;;  %v4502_v48 = vshrl.u32 %v4501_v19, 23  ;;  %v4156_v41 = vshrl.u32 %v4138_v7, %v4154_v45 }
 0x5d0   :  { %v4160_v24 = vshll.u32 %v4159_v46, 23  ;;  %v5188_v15 = vmin.u32 %v4356_v47, %v9295_v51  ;;  %v4433_v43 = vsel %vm4427_vm12, %v4430_v29, %v4432_v18  ;;  %v10350_v62 = vshll.u32 %v9058_v40, %v9182_v23 }
 0x5d1   :  { %v5185_v1 = vadd.s32 4294967294, %v4254_v10  ;;  %v10076_v9 = vand.u32 2147483647, %v9266_v60  ;;  %v5195_v26 = vadd.s32 4294967169, %v4502_v48  ;;  %v4155_v36 = vshll.u32 %v9131_v63, %v9246_v49 }
 0x5d2   :  { %v4053_v54 = vor.u32 %v9257_v22, %v10350_v62  ;;  %v4358_v13 = vclz %v5188_v15  ;;  %v4452_v7 = vadd.s32 1, %v9303_v3  ;;  %v4605_v45 = vand.u32 2139095040, %v9281_v34 }
 0x5d3   :  { %v4058_v46 = vand.u32 2147483647, %v4057_v53  ;;  %v4449_v31 = vmul.u32 %v4442_v30, %v4433_v43  ;;  %vm4451_vm3 = vc.u32 %v9307_v44, %v9302_v11  ;;  %v4508_v40 = vadd.s32 1, %v5195_v26  ;;  %v3453_v26 = vpop.f32.mrf.mxu1 }
 0x5d4   :  { %v4157_v23 = vor.u32 %v4156_v41, %v4155_v36  ;;  %v4161_v22 = vor.u32 4788187, %v4160_v24  ;;  %v5189_v10 = vadd.s32 4294967294, %v4358_v13  ;;  %v4453_v19 = vsel %vm4451_vm3, %v4452_v7, %v9303_v3 }
 0x5d5   :  { %vm5186_vm14 = vcmp.lt.s32.totalorder %v5185_v1, 0  ;;  %v4454_v2 = vadd.s32 %v4453_v19, %v4449_v31  ;;  %v4505_v63 = vand.u32 8388607, %v10076_v9  ;;  %vm4509_vm4 = vcmp.gt.s32.totalorder %v4508_v40, 0 }
 0x5d6   :  { %v10351_v49 = vxor.u32 2147483648, %v9192_v12  ;;  %v4060_v29 = vcvt.s32.f32 %v4053_v54  ;;  %v4510_v18 = vsel %vm4509_vm4, %v4508_v40, 0  ;;  %v4606_v0 = vshrl.u32 %v4605_v45, 23 }
 0x5d7   :  { %5537 = vcosq.f32 %v9253_v59  ;;  %vm5190_vm13 = vcmp.lt.s32.totalorder %v5189_v10, 0  ;;  %v4455_v3 = vadd.s32 536870912, %v4454_v2  ;;  %v4512_v24 = vand.u32 31, %v4510_v18 }
 0x5d8   :  { %v9330_v30 = vsel %vm10091_vm0, %v10351_v49, %v9192_v12  ;;  %v9333_v42 = vmul.f32 %v4060_v29, %v4058_v46  ;;  %v4162_v47 = vand.u32 2147483647, %v4161_v22  ;;  %v4164_v17 = vcvt.s32.f32 %v4157_v23 }
 0x5d9   :  { %10352 = vst [vmem:[#allocation13_spill] sm:$0xff] %v9330_v30  ;;  %v9335_v53 = vsel %vm5186_vm14, 0, %v5185_v1  ;;  %v9337_v39 = vshrl.u32 %v4455_v3, 30  ;;  %v4506_v48 = vor.u32 8388608, %v4505_v63  ;;  %v4513_v41 = vsub.s32 32, %v4512_v24 }
 0x5da   :  { %v10077_v12 = vand.u32 2147483647, %v9281_v34  ;;  %v9340_v15 = vsel %vm5190_vm13, 0, %v5189_v10  ;;  %v4511_v43 = vshrl.u32 %v4510_v18, 5  ;;  %v4515_v62 = vshll.u32 %v10128_v57, %v4512_v24 }
 0x5db   :  { %v5199_v54 = vadd.s32 4294967169, %v4606_v0  ;;  %v4516_v36 = vshrl.u32 %v10113_v52, %v4513_v41  ;;  %v4518_v13 = vshll.u32 %v10113_v52, %v4512_v24  ;;  %v4519_v1 = vshrl.u32 %v10129_v35, %v4513_v41 }
 0x5dc   :  { %v4521_v7 = vshll.u32 %v10129_v35, %v4512_v24  ;;  %v4457_v45 = vshll.u32 %v9337_v39, 30  ;;  %v4522_v46 = vshrl.u32 %v10118_v16, %v4513_v41  ;;  %v4524_v31 = vshll.u32 %v10118_v16, %v4512_v24 }
 0x5dd   :  { %v4525_v40 = vshrl.u32 %v10119_v56, %v4513_v41  ;;  %v4517_v22 = vor.u32 %v4516_v36, %v4515_v62  ;;  %v4520_v10 = vor.u32 %v4519_v1, %v4518_v13  ;;  %v9353_v19 = vadd.f32 %v3453_v26, %v8683_v50 }
 0x5de   :  { %v9355_v63 = vmul.f32 %v4164_v17, %v4162_v47  ;;  %v4258_v49 = vsub.s32 32, %v9335_v53  ;;  %v4523_v29 = vor.u32 %v4522_v46, %v4521_v7  ;;  %v4366_v0 = vsub.s32 4294967266, %v9340_v15 }
 0x5df   :  { %v4526_v18 = vor.u32 %v4525_v40, %v4524_v31  ;;  %v4527_v3 = vshll.u32 %v10119_v56, %v4512_v24  ;;  %v4528_v9 = vshrl.u32 %v10121_v55, %v4513_v41  ;;  %v4609_v23 = vand.u32 8388607, %v10077_v12 }
 0x5e0   :  { %v9363_v62 = vsub.s32 %v4454_v2, %v4457_v45  ;;  %vm4530_vm11 = vcmp.lt.s32.totalorder %v4511_v43, 1  ;;  %v4546_v26 = vshll.u32 %v4506_v48, 8  ;;  %v4612_v36 = vadd.s32 1, %v5199_v54 }
 0x5e1   :  { %v4514_v47 = vshrl.u32 %v10128_v57, %v4513_v41  ;;  %v4529_v17 = vor.u32 %v4528_v9, %v4527_v3  ;;  %vm4533_vm9 = vcmp.lt.s32.totalorder %v4511_v43, 4  ;;  %v4538_v13 = vsel %vm4530_vm11, %v4517_v22, %v4520_v10 }
 0x5e2   :  { %vm4532_vm15 = vcmp.lt.s32.totalorder %v4511_v43, 3  ;;  %v4535_v1 = vsel %vm4533_vm9, %v4523_v29, 2102212464  ;;  %v4539_v7 = vsel %vm4533_vm9, %v4526_v18, 920167782  ;;  %v4542_v24 = vsel %vm4530_vm11, %v4520_v10, %v4523_v29 }
 0x5e3   :  { %v4367_v46 = vadd.s32 127, %v4366_v0  ;;  %vm4531_vm12 = vcmp.lt.s32.totalorder %v4511_v43, 2  ;;  %v4540_v31 = vsel %vm4532_vm15, %v4523_v29, %v4539_v7  ;;  %v4543_v40 = vsel %vm4533_vm9, %v4529_v17, 1326507024 }
 0x5e4   :  { %v9368_v2 = vpop.eup %5537  ;;  %v4460_v48 = vsub.s32 0, %v9363_v62  ;;  %v4534_v54 = vsel %vm4530_vm11, %v4514_v47, %v4517_v22  ;;  %v4541_v9 = vsel %vm4531_vm12, %v4538_v13, %v4540_v31  ;;  %v4544_v41 = vsel %vm4532_vm15, %v4526_v18, %v4543_v40 }
 0x5e5   :  { %10353 = vst [vmem:[#allocation18_spill] sm:$0xff] %v9368_v2  ;;  %v4536_v45 = vsel %vm4532_vm15, %v4520_v10, %v4535_v1  ;;  %v4545_v3 = vsel %vm4531_vm12, %v4542_v24, %v4544_v41  ;;  %v9374_v12 = vmul.u32.u64.low %v4546_v26, %v4541_v9  ;;  %v9375_v30 = vmul.u32.u64.high %v4546_v26, %v4541_v9, %v9374_v12 }
 0x5e6   :  { %v9378_v0 = vmul.u32.u64.low %v4546_v26, %v4545_v3  ;;  %v9379_v4 = vmul.u32.u64.high %v4546_v26, %v4545_v3, %v9378_v0  ;;  %v4610_v29 = vor.u32 8388608, %v4609_v23  ;;  %vm4613_vm3 = vcmp.gt.s32.totalorder %v4612_v36, 0 }
 0x5e7   :  { %v4166_v17 = vxor.u32 2147483648, %v9355_v63  ;;  %v4242_v22 = vadd.s32 %v9139_v38, %v9146_v32  ;;  %v4362_v47 = vsub.s32 32, %v9340_v15  ;;  %v4614_v18 = vsel %vm4613_vm3, %v4612_v36, 0 }
 0x5e8   :  { %v4346_v13 = vadd.s32 %v9231_v33, %v9228_v27  ;;  %v4537_v1 = vsel %vm4531_vm12, %v4534_v54, %v4536_v45  ;;  %v4616_v7 = vand.u32 31, %v4614_v18  ;;  %v4368_v23 = vshll.u32 %v4367_v46, 23 }
 0x5e9   :  { %v9389_v24 = vshrl.u32 %v4242_v22, %v4258_v49  ;;  %v5192_v31 = vmin.u32 %v4460_v48, %v9363_v62  ;;  %v10080_v40 = vand.u32 2147483647, %v9353_v19  ;;  %vm4555_vm14 = vc.u32 %v9379_v4, %v9374_v12 }
 0x5ea   :  { %v4556_v38 = vadd.s32 1, %v9375_v30  ;;  %v4617_v32 = vsub.s32 32, %v4616_v7  ;;  %v9396_v36 = vshll.u32 %v4610_v29, 8  ;;  %v4363_v27 = vshll.u32 %v9295_v51, %v9340_v15 }
 0x5eb   :  { %v4364_v33 = vshrl.u32 %v4346_v13, %v4362_v47  ;;  %v4553_v43 = vmul.u32 %v4546_v26, %v4537_v1  ;;  %v4709_v49 = vand.u32 2139095040, %v9353_v19  ;;  %v4619_v48 = vshll.u32 %v10128_v57, %v4616_v7 }
 0x5ec   :  { %v4557_v46 = vsel %vm4555_vm14, %v4556_v38, %v9375_v30  ;;  %v4620_v54 = vshrl.u32 %v10113_v52, %v4617_v32  ;;  %v4623_v9 = vshrl.u32 %v10129_v35, %v4617_v32  ;;  %v9405_v41 = vor.u32 4788187, %v4368_v23 }
 0x5ed   :  { %v4462_v45 = vclz %v5192_v31  ;;  %v4558_v3 = vadd.s32 %v4557_v46, %v4553_v43  ;;  %v4622_v0 = vshll.u32 %v10113_v52, %v4616_v7  ;;  %v4615_v29 = vshrl.u32 %v4614_v18, 5 }
 0x5ee   :  { %v4621_v51 = vor.u32 %v4620_v54, %v4619_v48  ;;  %v4625_v15 = vshll.u32 %v10129_v35, %v4616_v7  ;;  %v4626_v26 = vshrl.u32 %v10118_v16, %v4617_v32  ;;  %v4628_v47 = vshll.u32 %v10118_v16, %v4616_v7 }
 0x5ef   :  { %v4559_v22 = vadd.s32 536870912, %v4558_v3  ;;  %v4624_v30 = vor.u32 %v4623_v9, %v4622_v0  ;;  %v4629_v13 = vshrl.u32 %v10119_v56, %v4617_v32  ;;  %vm4084_vm4 = vcmp.lt.s32.totalorder %v8948_v14, 0 }
 0x5f0   :  { %v4365_v1 = vor.u32 %v4364_v33, %v4363_v27  ;;  %v4627_v23 = vor.u32 %v4626_v26, %v4625_v15  ;;  %v4631_v31 = vshll.u32 %v10119_v56, %v4616_v7  ;;  %v4632_v38 = vshrl.u32 %v10121_v55, %v4617_v32 }
 0x5f1   :  { %v4370_v18 = vand.u32 2147483647, %v9405_v41  ;;  %v5193_v43 = vadd.s32 4294967294, %v4462_v45  ;;  %v9416_v46 = vshrl.u32 %v4559_v22, 30  ;;  %v4630_v48 = vor.u32 %v4629_v13, %v4628_v47 }
 0x5f2   :  { %v4618_v54 = vshrl.u32 %v10128_v57, %v4617_v32  ;;  %v4633_v9 = vor.u32 %v4632_v38, %v4631_v31  ;;  %vm4634_vm13 = vcmp.lt.s32.totalorder %v4615_v29, 1  ;;  %v4710_v0 = vshrl.u32 %v4709_v49, 23 }
 0x5f3   :  { %v4561_v10 = vshll.u32 %v9416_v46, 30  ;;  %vm4636_vm11 = vcmp.lt.s32.totalorder %v4615_v29, 3  ;;  %vm4637_vm9 = vcmp.lt.s32.totalorder %v4615_v29, 4  ;;  %v4642_v27 = vsel %vm4634_vm13, %v4621_v51, %v4624_v30 }
 0x5f4   :  { %v4639_v33 = vsel %vm4637_vm9, %v4627_v23, 2102212464  ;;  %v4643_v7 = vsel %vm4637_vm9, %v4630_v48, 920167782  ;;  %v4646_v15 = vsel %vm4634_vm13, %v4624_v30, %v4627_v23  ;;  %v4647_v26 = vsel %vm4637_vm9, %v4633_v9, 1326507024 }
 0x5f5   :  { %vm5194_vm15 = vcmp.lt.s32.totalorder %v5193_v43, 0  ;;  %v9420_v41 = vsub.s32 %v4558_v3, %v4561_v10  ;;  %vm4635_vm12 = vcmp.lt.s32.totalorder %v4615_v29, 2  ;;  %v4644_v45 = vsel %vm4636_vm11, %v4627_v23, %v4643_v7 }
 0x5f6   :  { %v4638_v22 = vsel %vm4634_vm13, %v4618_v54, %v4621_v51  ;;  %v4645_v32 = vsel %vm4635_vm12, %v4642_v27, %v4644_v45  ;;  %v4648_v49 = vsel %vm4636_vm11, %v4630_v48, %v4647_v26  ;;  %v5203_v47 = vadd.s32 4294967169, %v4710_v0 }
 0x5f7   :  { %v4564_v13 = vsub.s32 0, %v9420_v41  ;;  %v4640_v31 = vsel %vm4636_vm11, %v4624_v30, %v4639_v33  ;;  %v4649_v38 = vsel %vm4635_vm12, %v4646_v15, %v4648_v49  ;;  %v4713_v9 = vand.u32 8388607, %v10080_v40 }
 0x5f8   :  { %v9431_v10 = vmul.u32.u64.low %v9396_v36, %v4649_v38  ;;  %v9432_v3 = vmul.u32.u64.high %v9396_v36, %v4649_v38, %v9431_v10  ;;  %v9435_v51 = vmul.u32.u64.low %v9396_v36, %v4645_v32  ;;  %v9436_v23 = vmul.u32.u64.high %v9396_v36, %v4645_v32, %v9435_v51 }
 0x5f9   :  { %v9444_v30 = vsel %vm4084_vm4, %v4166_v17, %v9355_v63  ;;  %v4259_v48 = vshll.u32 %v9221_v8, %v9335_v53  ;;  %v5196_v54 = vmin.u32 %v4564_v13, %v9420_v41  ;;  %v4716_v0 = vadd.s32 1, %v5203_v47  ;;  %v3455_v8 = vpop.f32.mrf.mxu1 }
 0x5fa   :  { %v10354_v27 = vsub.s32 4294967266, %v9335_v53  ;;  %v4372_v7 = vcvt.s32.f32 %v4365_v1  ;;  %v9454_v15 = vsel %vm5194_vm15, 0, %v5193_v43  ;;  %v4641_v26 = vsel %vm4635_vm12, %v4638_v22, %v4640_v31 }
 0x5fb   :  { %v9458_v45 = vor.u32 %v9389_v24, %v4259_v48  ;;  %v4566_v63 = vclz %v5196_v54  ;;  %v4714_v17 = vor.u32 8388608, %v4713_v9  ;;  %vm4717_vm3 = vcmp.gt.s32.totalorder %v4716_v0, 0 }
 0x5fc   :  { %v9451_v33 = vadd.s32 127, %v10354_v27  ;;  %v9460_v32 = vmul.f32 %v4372_v7, %v4370_v18  ;;  %vm4659_vm14 = vc.u32 %v9432_v3, %v9435_v51  ;;  %v4660_v53 = vadd.s32 1, %v9436_v23 }
 0x5fd   :  { %v4718_v1 = vsel %vm4717_vm3, %v4716_v0, 0  ;;  %v5197_v49 = vadd.s32 4294967294, %v4566_v63  ;;  %v4657_v29 = vmul.u32 %v9396_v36, %v4641_v26  ;;  %v4470_v24 = vsub.s32 4294967266, %v9454_v15 }
 0x5fe   :  { %v4720_v22 = vand.u32 31, %v4718_v1  ;;  %v4554_v47 = vadd.s32 %v9374_v12, %v9379_v4  ;;  %v4661_v18 = vsel %vm4659_vm14, %v4660_v53, %v9436_v23  ;;  %v9472_v13 = vadd.f32 %v3455_v8, %v8683_v50 }
 0x5ff   :  { %vm5198_vm13 = vcmp.lt.s32.totalorder %v5197_v49, 0  ;;  %v4662_v31 = vadd.s32 %v4661_v18, %v4657_v29  ;;  %v9474_v9 = vshll.u32 %v4714_v17, 8  ;;  %v4719_v48 = vshrl.u32 %v4718_v1, 5 }
 0x600   :  { %v4721_v38 = vsub.s32 32, %v4720_v22  ;;  %v4569_v10 = vsel %vm5198_vm13, 0, %v5197_v49  ;;  %v4723_v36 = vshll.u32 %v10128_v57, %v4720_v22  ;;  %v4726_v54 = vshll.u32 %v10113_v52, %v4720_v22 }
 0x601   :  { %v4570_v0 = vsub.s32 32, %v4569_v10  ;;  %v4574_v27 = vsub.s32 4294967266, %v4569_v10  ;;  %v4663_v7 = vadd.s32 536870912, %v4662_v31  ;;  %v4729_v4 = vshll.u32 %v10129_v35, %v4720_v22 }
 0x602   :  { %v4724_v12 = vshrl.u32 %v10113_v52, %v4721_v38  ;;  %v4727_v50 = vshrl.u32 %v10129_v35, %v4721_v38  ;;  %v4730_v23 = vshrl.u32 %v10118_v16, %v4721_v38  ;;  %v4732_v26 = vshll.u32 %v10118_v16, %v4720_v22 }
 0x603   :  { %v4572_v63 = vshrl.u32 %v4554_v47, %v4570_v0  ;;  %v4575_v17 = vadd.s32 127, %v4574_v27  ;;  %v9483_v8 = vshrl.u32 %v4663_v7, 30  ;;  %v4733_v53 = vshrl.u32 %v10119_v56, %v4721_v38 }
 0x604   :  { %v4571_v1 = vshll.u32 %v9420_v41, %v4569_v10  ;;  %v4725_v49 = vor.u32 %v4724_v12, %v4723_v36  ;;  %v4728_v29 = vor.u32 %v4727_v50, %v4726_v54  ;;  %v4731_v18 = vor.u32 %v4730_v23, %v4729_v4 }
 0x605   :  { %v4576_v40 = vshll.u32 %v4575_v17, 23  ;;  %v4665_v43 = vshll.u32 %v9483_v8, 30  ;;  %v4734_v2 = vor.u32 %v4733_v53, %v4732_v26  ;;  %v4813_v5 = vand.u32 2139095040, %v9472_v13 }
 0x606   :  { %v4573_v6 = vor.u32 %v4572_v63, %v4571_v1  ;;  %v4722_v58 = vshrl.u32 %v10128_v57, %v4721_v38  ;;  %v4735_v47 = vshll.u32 %v10119_v56, %v4720_v22  ;;  %v4736_v0 = vshrl.u32 %v10121_v55, %v4721_v38 }
 0x607   :  { %v4577_v27 = vor.u32 4788187, %v4576_v40  ;;  %v9492_v7 = vsub.s32 %v4662_v31, %v4665_v43  ;;  %vm4738_vm11 = vcmp.lt.s32.totalorder %v4719_v48, 1  ;;  %vm4741_vm9 = vcmp.lt.s32.totalorder %v4719_v48, 4 }
 0x608   :  { %v4737_v41 = vor.u32 %v4736_v0, %v4735_v47  ;;  %vm4739_vm15 = vcmp.lt.s32.totalorder %v4719_v48, 2  ;;  %v4743_v10 = vsel %vm4741_vm9, %v4731_v18, 2102212464  ;;  %v4746_v36 = vsel %vm4738_vm11, %v4725_v49, %v4728_v29 }
 0x609   :  { %v4668_v54 = vsub.s32 0, %v9492_v7  ;;  %vm4740_vm12 = vcmp.lt.s32.totalorder %v4719_v48, 3  ;;  %v4742_v4 = vsel %vm4738_vm11, %v4722_v58, %v4725_v49  ;;  %v4747_v12 = vsel %vm4741_vm9, %v4734_v2, 920167782 }
 0x60a   :  { %v4578_v50 = vand.u32 2147483647, %v4577_v27  ;;  %v4748_v23 = vsel %vm4740_vm12, %v4731_v18, %v4747_v12  ;;  %v4750_v26 = vsel %vm4738_vm11, %v4728_v29, %v4731_v18  ;;  %v4751_v22 = vsel %vm4741_vm9, %v4737_v41, 1326507024 }
 0x60b   :  { %vm4292_vm3 = vcmp.lt.s32.totalorder %v9101_v61, 0  ;;  %v5200_v40 = vmin.u32 %v4668_v54, %v9492_v7  ;;  %v4744_v43 = vsel %vm4740_vm12, %v4728_v29, %v4743_v10  ;;  %v4749_v31 = vsel %vm4739_vm15, %v4746_v36, %v4748_v23 }
 0x60c   :  { %v4752_v38 = vsel %vm4740_vm12, %v4734_v2, %v4751_v22  ;;  %v4471_v63 = vadd.s32 127, %v4470_v24  ;;  %v9500_v53 = vmul.u32.u64.low %v9474_v9, %v4749_v31  ;;  %v9501_v1 = vmul.u32.u64.high %v9474_v9, %v4749_v31, %v9500_v53 }
 0x60d   :  { %v4753_v17 = vsel %vm4739_vm15, %v4750_v26, %v4752_v38  ;;  %v4580_v58 = vcvt.s32.f32 %v4573_v6  ;;  %v4670_v49 = vclz %v5200_v40  ;;  %v4450_v29 = vadd.s32 %v9302_v11, %v9307_v44 }
 0x60e   :  { %v9505_v18 = vmul.u32.u64.low %v9474_v9, %v4753_v17  ;;  %v9506_v47 = vmul.u32.u64.high %v9474_v9, %v4753_v17, %v9505_v18  ;;  %vm4500_vm14 = vcmp.lt.s32.totalorder %v9266_v60, 0  ;;  %v4745_v2 = vsel %vm4739_vm15, %v4742_v4, %v4744_v43 }
 0x60f   :  { %v4810_v24 = vand.u32 2147483647, %v9472_v13  ;;  %v4814_v0 = vshrl.u32 %v4813_v5, 23  ;;  %v4264_v27 = vshll.u32 %v9451_v33, 23  ;;  %v4374_v41 = vxor.u32 2147483648, %v9460_v32 }
 0x610   :  { %v4581_v6 = vmul.f32 %v4580_v58, %v4578_v50  ;;  %v5201_v10 = vadd.s32 4294967294, %v4670_v49  ;;  %v10355_v36 = vsub.s32 32, %v9454_v15  ;;  %v4472_v12 = vshll.u32 %v4471_v63, 23 }
 0x611   :  { %v4764_v23 = vadd.s32 1, %v9501_v1  ;;  %v5207_v11 = vadd.s32 4294967169, %v4814_v0  ;;  %v4658_v44 = vadd.s32 %v9435_v51, %v9432_v3  ;;  %v4761_v48 = vmul.u32 %v9474_v9, %v4745_v2 }
 0x612   :  { %v4468_v54 = vshrl.u32 %v4450_v29, %v10355_v36  ;;  %vm5202_vm13 = vcmp.lt.s32.totalorder %v5201_v10, 0  ;;  %vm4763_vm11 = vc.u32 %v9506_v47, %v9500_v53  ;;  %v4817_v4 = vand.u32 8388607, %v4810_v24 }
 0x613   :  { %v4673_v5 = vsel %vm5202_vm13, 0, %v5201_v10  ;;  %v4765_v33 = vsel %vm4763_vm11, %v4764_v23, %v9501_v1  ;;  %v4820_v50 = vadd.s32 1, %v5207_v11  ;;  %v4582_v26 = vxor.u32 2147483648, %v4581_v6 }
 0x614   :  { %v4674_v22 = vsub.s32 32, %v4673_v5  ;;  %v4678_v40 = vsub.s32 4294967266, %v4673_v5  ;;  %v4766_v43 = vadd.s32 %v4765_v33, %v4761_v48  ;;  %v9526_v31 = vor.u32 4788187, %v4264_v27 }
 0x615   :  { %v9531_v3 = vsel %vm4292_vm3, %v4374_v41, %v9460_v32  ;;  %v4467_v51 = vshll.u32 %v9363_v62, %v9454_v15  ;;  %v10356_v9 = vand.u32 2147483647, %v9266_v60  ;;  %vm4821_vm15 = vcmp.gt.s32.totalorder %v4820_v50, 0 }
 0x616   :  { %v4676_v63 = vshrl.u32 %v4658_v44, %v4674_v22  ;;  %v4679_v17 = vadd.s32 127, %v4678_v40  ;;  %v4767_v1 = vadd.s32 536870912, %v4766_v43  ;;  %v4822_v58 = vsel %vm4821_vm15, %v4820_v50, 0 }
 0x617   :  { %vm9537_vm9 = vcmp.le.f32.partialorder %v10356_v9, 0.7853982  ;;  %v9541_v49 = vor.u32 %v4468_v54, %v4467_v51  ;;  %v9543_v18 = vor.u32 4788187, %v4472_v12  ;;  %v4675_v32 = vshll.u32 %v9492_v7, %v4673_v5 }
 0x618   :  { %v4824_v29 = vand.u32 31, %v4822_v58  ;;  %v4583_v62 = vsel %vm4500_vm14, %v4582_v26, %v4581_v6  ;;  %v4680_v15 = vshll.u32 %v4679_v17, 23  ;;  %v9548_v2 = vshrl.u32 %v4767_v1, 30 }
 0x619   :  { %v4818_v0 = vor.u32 8388608, %v4817_v4  ;;  %v4677_v27 = vor.u32 %v4676_v63, %v4675_v32  ;;  %v4823_v41 = vshrl.u32 %v4822_v58, 5  ;;  %vm4604_vm11 = vcmp.lt.s32.totalorder %v9281_v34, 0 }
 0x61a   :  { %v4825_v10 = vsub.s32 32, %v4824_v29  ;;  %v4827_v36 = vshll.u32 %v10128_v57, %v4824_v29  ;;  %v4681_v23 = vor.u32 4788187, %v4680_v15  ;;  %v4769_v54 = vshll.u32 %v9548_v2, 30 }
 0x61b   :  { %v4830_v12 = vshll.u32 %v10113_v52, %v4824_v29  ;;  %v4833_v7 = vshll.u32 %v10129_v35, %v4824_v29  ;;  %v4836_v48 = vshll.u32 %v10118_v16, %v4824_v29  ;;  %v4839_v50 = vshll.u32 %v10119_v56, %v4824_v29 }
 0x61c   :  { %v4828_v11 = vshrl.u32 %v10113_v52, %v4825_v10  ;;  %v4831_v6 = vshrl.u32 %v10129_v35, %v4825_v10  ;;  %v4834_v44 = vshrl.u32 %v10118_v16, %v4825_v10  ;;  %v4682_v5 = vand.u32 2147483647, %v4681_v23 }
 0x61d   :  { %v9558_v33 = vsub.s32 %v4766_v43, %v4769_v54  ;;  %v4837_v4 = vshrl.u32 %v10119_v56, %v4825_v10  ;;  %v4840_v51 = vshrl.u32 %v10121_v55, %v4825_v10  ;;  %v4476_v52 = vcvt.s32.f32 %v9541_v49 }
 0x61e   :  { %v4829_v26 = vor.u32 %v4828_v11, %v4827_v36  ;;  %v4832_v22 = vor.u32 %v4831_v6, %v4830_v12  ;;  %v4835_v40 = vor.u32 %v4834_v44, %v4833_v7  ;;  %v4586_v35 = vsel %vm9537_vm9, %v9266_v60, %v4583_v62 }
 0x61f   :  { %v4772_v16 = vsub.s32 0, %v9558_v33  ;;  %v4838_v9 = vor.u32 %v4837_v4, %v4836_v48  ;;  %v4684_v43 = vcvt.s32.f32 %v4677_v27  ;;  %v4841_v63 = vor.u32 %v4840_v51, %v4839_v50 }
 0x620   :  { %vm4845_vm12 = vcmp.lt.s32.totalorder %v4823_v41, 4  ;;  %v4858_v17 = vshll.u32 %v4818_v0, 8  ;;  %v10359_v56 = vand.u32 2147483647, %v9101_v61  ;;  %v4826_v58 = vshrl.u32 %v10128_v57, %v4825_v10 }
 0x621   :  { %v5204_v55 = vmin.u32 %v4772_v16, %v9558_v33  ;;  %vm4842_vm15 = vcmp.lt.s32.totalorder %v4823_v41, 1  ;;  %v4847_v49 = vsel %vm4845_vm12, %v4835_v40, 2102212464  ;;  %v4685_v32 = vmul.f32 %v4684_v43, %v4682_v5 }
 0x622   :  { %vm9570_vm13 = vcmp.le.f32.partialorder %v10359_v56, 0.7853982  ;;  %vm4844_vm7 = vcmp.lt.s32.totalorder %v4823_v41, 3  ;;  %v4850_v29 = vsel %vm4842_vm15, %v4829_v26, %v4832_v22  ;;  %v4851_v62 = vsel %vm4845_vm12, %v4838_v9, 920167782 }
 0x623   :  { %v4774_v15 = vclz %v5204_v55  ;;  %vm4843_vm10 = vcmp.lt.s32.totalorder %v4823_v41, 2  ;;  %v4852_v0 = vsel %vm4844_vm7, %v4835_v40, %v4851_v62  ;;  %v4854_v27 = vsel %vm4842_vm15, %v4832_v22, %v4835_v40 }
 0x624   :  { %v4846_v36 = vsel %vm4842_vm15, %v4826_v58, %v4829_v26  ;;  %v4848_v23 = vsel %vm4844_vm7, %v4832_v22, %v4847_v49  ;;  %v4853_v54 = vsel %vm4843_vm10, %v4850_v29, %v4852_v0  ;;  %v4855_v12 = vsel %vm4845_vm12, %v4841_v63, 1326507024 }
 0x625   :  { %v10362_v57 = vand.u32 2147483647, %v8948_v14  ;;  %v5205_v7 = vadd.s32 4294967294, %v4774_v15  ;;  %v4856_v11 = vsel %vm4844_vm7, %v4838_v9, %v4855_v12  ;;  %v4474_v48 = vand.u32 2147483647, %v9543_v18 }
 0x626   :  { %v9587_v6 = vmul.u32.u64.low %v4858_v17, %v4853_v54  ;;  %v9588_v44 = vmul.u32.u64.high %v4858_v17, %v4853_v54, %v9587_v6  ;;  %v4686_v5 = vxor.u32 2147483648, %v4685_v32  ;;  %v4857_v4 = vsel %vm4843_vm10, %v4854_v27, %v4856_v11 }
 0x627   :  { %vm9583_vm8 = vcmp.le.f32.partialorder %v10362_v57, 0.7853982  ;;  %v4584_v50 = vsub.s32 4, %v9416_v46  ;;  %vm5206_vm12 = vcmp.lt.s32.totalorder %v5205_v7, 0  ;;  %v4849_v26 = vsel %vm4843_vm10, %v4846_v36, %v4848_v23 }
 0x628   :  { %v9595_v22 = vmul.u32.u64.low %v4858_v17, %v4857_v4  ;;  %v9596_v40 = vmul.u32.u64.high %v4858_v17, %v4857_v4, %v9595_v22  ;;  %5539 = vcosq.f32 %v4586_v35  ;;  %v4762_v51 = vadd.s32 %v9500_v53, %v9506_v47 }
 0x629   :  { %v4777_v16 = vsel %vm5206_vm12, 0, %v5205_v7  ;;  %v4688_v9 = vsub.s32 4, %v9483_v8  ;;  %vm4396_vm7 = vcmp.lt.s32.totalorder %v9161_v37, 0  ;;  %5541 = vsinq.f32 %v4586_v35 }
 0x62a   :  { %v4778_v18 = vsub.s32 32, %v4777_v16  ;;  %v4782_v43 = vsub.s32 4294967266, %v4777_v16  ;;  %v4868_v63 = vadd.s32 1, %v9588_v44  ;;  %v4378_v41 = vsel %vm9570_vm13, %v9101_v61, %v9531_v3 }
 0x62b   :  { %v4477_v56 = vmul.f32 %v4476_v52, %v4474_v48  ;;  %v4687_v55 = vsel %vm4604_vm11, %v4686_v5, %v4685_v32  ;;  %v4865_v53 = vmul.u32 %v4858_v17, %v4849_v26  ;;  %v4779_v47 = vshll.u32 %v9558_v33, %v4777_v16 }
 0x62c   :  { %v4780_v58 = vshrl.u32 %v4762_v51, %v4778_v18  ;;  %v4783_v49 = vadd.s32 127, %v4782_v43  ;;  %vm4867_vm10 = vc.u32 %v9596_v40, %v9587_v6  ;;  %v4792_v29 = vsub.s32 4, %v9548_v2 }
 0x62d   :  { %v4869_v35 = vsel %vm4867_vm10, %v4868_v63, %v9588_v44  ;;  %v10365_v62 = vand.u32 2147483647, %v9281_v34  ;;  %v4585_v52 = vsel %vm4500_vm14, %v4584_v50, %v9416_v46  ;;  %vm10093_vm12 = vcmp.lt.s32.totalorder %v8877_v20, 0 }
 0x62e   :  { %v4781_v33 = vor.u32 %v4780_v58, %v4779_v47  ;;  %v4784_v17 = vshll.u32 %v4783_v49, 23  ;;  %v4870_v32 = vadd.s32 %v4869_v35, %v4865_v53  ;;  %v4689_v15 = vsel %vm4604_vm11, %v4688_v9, %v9483_v8 }
 0x62f   :  { %vm9616_vm15 = vcmp.le.f32.partialorder %v10365_v62, 0.7853982  ;;  %v4170_v0 = vsel %vm9583_vm8, %v8948_v14, %v9444_v30  ;;  %v4266_v27 = vand.u32 2147483647, %v9526_v31  ;;  %v4478_v36 = vxor.u32 2147483648, %v4477_v56 }
 0x630   :  { %v4690_v46 = vsel %vm9616_vm15, %v9281_v34, %v4687_v55  ;;  %v4268_v23 = vcvt.s32.f32 %v9458_v45  ;;  %vm4708_vm14 = vcmp.lt.s32.totalorder %v9353_v19, 0  ;;  %v4785_v54 = vor.u32 4788187, %v4784_v17 }
 0x631   :  { %v4871_v12 = vadd.s32 536870912, %v4870_v32  ;;  %5543 = vcosq.f32 %v4378_v41  ;;  %v4793_v8 = vsel %vm4708_vm14, %v4792_v29, %v9548_v2  ;;  %v4691_v30 = vsel %vm9616_vm15, 0, %v4689_v15 }
 0x632   :  { %v4587_v31 = vsel %vm9537_vm9, 0, %v4585_v52  ;;  %vm4188_vm11 = vcmp.lt.s32.totalorder %v8990_v25, 0  ;;  %v4786_v57 = vand.u32 2147483647, %v4785_v54  ;;  %v4788_v7 = vcvt.s32.f32 %v4781_v33 }
 0x633   :  { %v4872_v45 = vshrl.u32 %v4871_v12, 30  ;;  %5545 = vcosq.f32 %v4690_v46  ;;  %v4269_v11 = vmul.f32 %v4268_v23, %v4266_v27  ;;  %v4479_v44 = vsel %vm4396_vm7, %v4478_v36, %v4477_v56 }
 0x634   :  { %v10368_v48 = vand.u32 2147483647, %v9353_v19  ;;  %5547 = vsinq.f32 %v4690_v46  ;;  %v4789_v38 = vmul.f32 %v4788_v7, %v4786_v57  ;;  %v4695_v4 = vadd.s32 3, %v4691_v30 }
 0x635   :  { %5549 = vsinq.f32 %v4378_v41  ;;  %v4873_v5 = vshll.u32 %v4872_v45, 30  ;;  %v4591_v26 = vadd.s32 3, %v4587_v31  ;;  %v10371_v22 = vand.u32 2147483647, %v9161_v37  ;;  %v5540_v9 = vpop.eup %5539 }
 0x636   :  { %vm9649_vm10 = vcmp.le.f32.partialorder %v10368_v48, 0.7853982  ;;  %v4376_v16 = vsub.s32 4, %v9284_v28  ;;  %5551 = vsinq.f32 %v9253_v59  ;;  %v4790_v18 = vxor.u32 2147483648, %v4789_v38  ;;  %v5542_v41 = vpop.eup %5541 }
 0x637   :  { %v4795_v50 = vsel %vm9649_vm10, 0, %v4793_v8  ;;  %vm9657_vm9 = vcmp.le.f32.partialorder %v10371_v22, 0.7853982  ;;  %v9663_v43 = vsub.s32 %v4870_v32, %v4873_v5  ;;  %v10374_v56 = vxor.u32 2147483648, %v9333_v42 }
 0x638   :  { %v4482_v63 = vsel %vm9657_vm9, %v9161_v37, %v4479_v44  ;;  %5553 = vcosq.f32 %v4170_v0  ;;  %v4270_v53 = vxor.u32 2147483648, %v4269_v11  ;;  %v4480_v47 = vsub.s32 4, %v9337_v39 }
 0x639   :  { %v9673_v55 = vsel %vm10093_vm12, %v10374_v56, %v9333_v42  ;;  %5555 = vsinq.f32 %v4170_v0  ;;  %v4876_v59 = vsub.s32 0, %v9663_v43  ;;  %v4799_v58 = vadd.s32 3, %v4795_v50 }
 0x63a   :  { %v9677_v49 = vand.u32 3, %v4695_v4  ;;  %v4791_v35 = vsel %vm4708_vm14, %v4790_v18, %v4789_v38  ;;  %v4592_v29 = vand.u32 3, %v4591_v26  ;;  %5557 = vcosq.f32 %v4482_v63 }
 0x63b   :  { %v4377_v42 = vsel %vm4292_vm3, %v4376_v16, %v9284_v28  ;;  %v5208_v62 = vmin.u32 %v4876_v59, %v9663_v43  ;;  %v4595_v3 = vxor.u32 2147483648, %v5542_v41  ;;  %v4598_v52 = vxor.u32 2147483648, %v5540_v9 }
 0x63c   :  { %5559 = vsinq.f32 %v4482_v63  ;;  %v4271_v33 = vsel %vm4188_vm11, %v4270_v53, %v4269_v11  ;;  %vm9689_vm15 = vcmp.le.f32.partialorder %v4810_v24, 0.7853982  ;;  %v4896_v32 = vsub.s32 4, %v4872_v45  ;;  %v10380_v63 = vld [vmem:[#allocation8_spill] sm:$0xff] }
 0x63d   :  { %v4481_v15 = vsel %vm4396_vm7, %v4480_v47, %v9337_v39  ;;  %v4794_v28 = vsel %vm9649_vm10, %v9353_v19, %v4791_v35  ;;  %vm10094_vm3 = vcmp.lt.s32.totalorder %v9472_v13, 0  ;;  %v4878_v0 = vclz %v5208_v62 }
 0x63e   :  { %v4379_v27 = vsel %vm9570_vm13, 0, %v4377_v42  ;;  %v9702_v36 = vand.u32 3, %v4799_v58  ;;  %vm4590_vm14 = vweird.f32 %v9266_v60  ;;  %vm4594_vm0 = vcmp.eq.s32.totalorder %v4592_v29, 0  ;;  %v5544_v24 = vpop.eup %5543 }
 0x63f   :  { %vm4597_vm5 = vcmp.eq.s32.totalorder %v4592_v29, 2  ;;  %v5209_v46 = vadd.s32 4294967294, %v4878_v0  ;;  %vm4698_vm7 = vcmp.eq.s32.totalorder %v9677_v49, 0  ;;  %vm4701_vm12 = vcmp.eq.s32.totalorder %v9677_v49, 2 }
 0x640   :  { %v4596_v39 = vsel %vm4594_vm0, %v5540_v9, %v4595_v3  ;;  %v4599_v23 = vsel %vm4597_vm5, %v4598_v52, %v5542_v41  ;;  %v4483_v54 = vsel %vm9657_vm9, 0, %v4481_v15  ;;  %v5546_v12 = vpop.eup %5545  ;;  %5561 = vcosq.f32 %v4794_v28 }
 0x641   :  { %v4866_v1 = vadd.s32 %v9587_v6, %v9596_v40  ;;  %v4897_v8 = vsel %vm10094_vm3, %v4896_v32, %v4872_v45  ;;  %v4383_v30 = vadd.s32 3, %v4379_v27  ;;  %v5548_v31 = vpop.eup %5547  ;;  %5563 = vsinq.f32 %v4794_v28 }
 0x642   :  { %vm5210_vm13 = vcmp.lt.s32.totalorder %v5209_v46, 0  ;;  %vm4593_vm10 = vcmp.lt.s32.totalorder %v4592_v29, 2  ;;  %v10377_v57 = vand.u32 2147483647, %v8990_v25  ;;  %v5550_v11 = vpop.eup %5549  ;;  %v4487_v2 = vadd.s32 3, %v4483_v54 }
 0x643   :  { %v4881_v44 = vsel %vm5210_vm13, 0, %v5209_v46  ;;  %v4600_v48 = vsel %vm4593_vm10, %v4596_v39, %v4599_v23  ;;  %v4899_v38 = vsel %vm9689_vm15, 0, %v4897_v8  ;;  %vm4697_vm5 = vcmp.lt.s32.totalorder %v9677_v49, 2  ;;  %v9725_v4 = vpop.eup %5551 }
 0x644   :  { %vm9715_vm0 = vcmp.le.f32.partialorder %v10377_v57, 0.7853982  ;;  %v4882_v40 = vsub.s32 32, %v4881_v44  ;;  %v4886_v45 = vsub.s32 4294967266, %v4881_v44  ;;  %v4702_v5 = vxor.u32 2147483648, %v5546_v12 }
 0x645   :  { %v4274_v6 = vsel %vm9715_vm0, %v8990_v25, %v4271_v33  ;;  %v4883_v50 = vshll.u32 %v9663_v43, %v4881_v44  ;;  %v4699_v26 = vxor.u32 2147483648, %v5548_v31  ;;  %v4384_v22 = vand.u32 3, %v4383_v30  ;;  %v9729_v16 = vpop.eup %5553  ;;  %v10400_v30 = vld [vmem:[#allocation38_spill] sm:$0xff] }
 0x646   :  { %v4272_v51 = vsub.s32 4, %v9194_v21  ;;  %v4884_v9 = vshrl.u32 %v4866_v1, %v4882_v40  ;;  %v4887_v18 = vadd.s32 127, %v4886_v45  ;;  %5565 = vcosq.f32 %v4274_v6  ;;  %v9732_v56 = vpop.eup %5555 }
 0x647   :  { %v4168_v41 = vsub.s32 4, %v10380_v63  ;;  %v4488_v53 = vand.u32 3, %v4487_v2  ;;  %v4387_v47 = vxor.u32 2147483648, %v5550_v11  ;;  %v4390_v59 = vxor.u32 2147483648, %v5544_v24  ;;  %v5558_v58 = vpop.eup %5557 }
 0x648   :  { %5567 = vsinq.f32 %v4274_v6  ;;  %v4885_v35 = vor.u32 %v4884_v9, %v4883_v50  ;;  %v4888_v43 = vshll.u32 %v4887_v18, 23  ;;  %vm4694_vm9 = vweird.f32 %v9281_v34 }
 0x649   :  { %v9737_v29 = vsel %vm4590_vm14, nan, %v4600_v48  ;;  %v5560_v42 = vpop.eup %5559  ;;  %v4903_v62 = vadd.s32 3, %v4899_v38  ;;  %v4700_v3 = vsel %vm4698_vm7, %v5546_v12, %v4699_v26  ;;  %v4703_v52 = vsel %vm4701_vm12, %v4702_v5, %v5548_v31  ;;  %v10384_v31 = vld [vmem:[#allocation26_spill] sm:$0xff]  ;;  %v10386_v5 = vld [vmem:[#allocation33_spill] sm:$0xff] }
 0x64a   :  { %vm4386_vm10 = vcmp.eq.s32.totalorder %v4384_v22, 0  ;;  %v4889_v33 = vor.u32 4788187, %v4888_v43  ;;  %vm4389_vm3 = vcmp.eq.s32.totalorder %v4384_v22, 2  ;;  %v4273_v32 = vsel %vm4188_vm11, %v4272_v51, %v9194_v21 }
 0x64b   :  { %v4169_v60 = vsel %vm4084_vm4, %v4168_v41, %v10380_v63  ;;  %vm4489_vm14 = vcmp.lt.s32.totalorder %v4488_v53, 2  ;;  %v4494_v15 = vxor.u32 2147483648, %v5558_v58  ;;  %v4388_v28 = vsel %vm4386_vm10, %v5544_v24, %v4387_v47  ;;  %v10389_v47 = vld [vmem:[#allocation30_spill] sm:$0xff] }
 0x64c   :  { %v4391_v0 = vsel %vm4389_vm3, %v4390_v59, %v5550_v11  ;;  %v4890_v27 = vand.u32 2147483647, %v4889_v33  ;;  %v4892_v46 = vcvt.s32.f32 %v4885_v35  ;;  %v4491_v39 = vxor.u32 2147483648, %v5560_v42  ;;  %v10396_v33 = vld [vmem:[#allocation13_spill] sm:$0xff] }
 0x64d   :  { %vm4493_vm7 = vcmp.eq.s32.totalorder %v4488_v53, 2  ;;  %vm4802_vm12 = vcmp.eq.s32.totalorder %v9702_v36, 0  ;;  %vm4805_vm13 = vcmp.eq.s32.totalorder %v9702_v36, 2  ;;  %v4704_v23 = vsel %vm4697_vm5, %v4700_v3, %v4703_v52  ;;  %v5562_v24 = vpop.eup %5561  ;;  %v10395_v3 = vld [vmem:[#allocation34_spill] sm:$0xff] }
 0x64e   :  { %vm4385_vm11 = vcmp.lt.s32.totalorder %v4384_v22, 2  ;;  %v4275_v21 = vsel %vm9715_vm0, 0, %v4273_v32  ;;  %v4171_v54 = vsel %vm9583_vm8, 0, %v4169_v60  ;;  %v4893_v12 = vmul.f32 %v4892_v46, %v4890_v27  ;;  %v5564_v49 = vpop.eup %5563 }
 0x64f   :  { %v4392_v1 = vsel %vm4385_vm11, %v4388_v28, %v4391_v0  ;;  %v10381_v8 = vand.u32 2147483647, %v8877_v20  ;;  %v4064_v57 = vsub.s32 4, %v10384_v31  ;;  %v9765_v11 = vand.u32 3, %v4903_v62 }
 0x650   :  { %vm4490_vm3 = vcmp.eq.s32.totalorder %v4488_v53, 0  ;;  %v4495_v7 = vsel %vm4493_vm7, %v4494_v15, %v5560_v42  ;;  %v4894_v44 = vxor.u32 2147483648, %v4893_v12  ;;  %vm4486_vm8 = vweird.f32 %v9161_v37  ;;  %v10391_v53 = vld [vmem:[#allocation29_spill] sm:$0xff] }
 0x651   :  { %vm9760_vm4 = vcmp.le.f32.partialorder %v10381_v8, 0.7853982  ;;  %v4492_v48 = vsel %vm4490_vm3, %v5558_v58, %v4491_v39  ;;  %v4279_v2 = vadd.s32 3, %v4275_v21  ;;  %v4175_v6 = vadd.s32 3, %v4171_v54  ;;  %v10398_v21 = vld [vmem:[#allocation35_spill] sm:$0xff] }
 0x652   :  { %v4066_v10 = vsel %vm9760_vm4, %v8877_v20, %v9673_v55  ;;  %v4806_v40 = vxor.u32 2147483648, %v5562_v24  ;;  %v9774_v45 = vsel %vm4694_vm9, nan, %v4704_v23  ;;  %vm10385_vm0 = vweird.f32 %v9101_v61 }
 0x653   :  { %v9778_v38 = vsel %vm10385_vm0, nan, %v4392_v1  ;;  %v3960_v50 = vsub.s32 4, %v10386_v5  ;;  %vm10387_vm5 = vcmp.lt.s32.totalorder %v9472_v13, 0  ;;  %vm4801_vm10 = vcmp.lt.s32.totalorder %v9702_v36, 2  ;;  %v5566_v34 = vpop.eup %5565 }
 0x654   :  { %v4895_v55 = vsel %vm10387_vm5, %v4894_v44, %v4893_v12  ;;  %v4803_v26 = vxor.u32 2147483648, %v5564_v49  ;;  %vm10388_vm7 = vcmp.lt.s32.totalorder %v8877_v20, 0  ;;  %5569 = vcosq.f32 %v4066_v10 }
 0x655   :  { %v4065_v22 = vsel %vm10388_vm7, %v4064_v57, %v10384_v31  ;;  %v4898_v61 = vsel %vm9689_vm15, %v9472_v13, %v4895_v55  ;;  %v4496_v51 = vsel %vm4489_vm14, %v4492_v48, %v4495_v7  ;;  %v4179_v9 = vxor.u32 2147483648, %v9732_v56  ;;  %v5568_v18 = vpop.eup %5567  ;;  %v10407_v48 = vld [vmem:[#allocation28_spill] sm:$0xff] }
 0x656   :  { %5571 = vsinq.f32 %v4066_v10  ;;  %v4280_v63 = vand.u32 3, %v4279_v2  ;;  %v4176_v41 = vand.u32 3, %v4175_v6  ;;  %vm10390_vm9 = vcmp.lt.s32.totalorder %v10389_v47, 0  ;;  %v10406_v10 = vld [vmem:[#allocation36_spill] sm:$0xff] }
 0x657   :  { %5573 = vcosq.f32 %v4898_v61  ;;  %v3961_v59 = vsel %vm10390_vm9, %v3960_v50, %v10386_v5  ;;  %vm4798_vm11 = vweird.f32 %v9353_v19  ;;  %v4182_v58 = vxor.u32 2147483648, %v9729_v16 }
 0x658   :  { %5575 = vsinq.f32 %v4898_v61  ;;  %v4067_v17 = vsel %vm9760_vm4, 0, %v4065_v22  ;;  %v10392_v35 = vand.u32 2147483647, %v10391_v53  ;;  %v4804_v42 = vsel %vm4802_vm12, %v5562_v24, %v4803_v26  ;;  %v10409_v61 = vld [vmem:[#allocation18_spill] sm:$0xff] }
 0x659   :  { %v4807_v62 = vsel %vm4805_vm13, %v4806_v40, %v5564_v49  ;;  %v3856_v52 = vsub.s32 4, %v10395_v3  ;;  %v4283_v60 = vxor.u32 2147483648, %v5568_v18  ;;  %v4286_v15 = vxor.u32 2147483648, %v5566_v34  ;;  %v10404_v49 = vld [vmem:[#allocation25_spill] sm:$0xff] }
 0x65a   :  { %vm9801_vm15 = vcmp.le.f32.partialorder %v10392_v35, 0.7853982  ;;  %v3963_v0 = vsel %vm9205_vm1, 0, %v3961_v59  ;;  %vm4278_vm14 = vweird.f32 %v8990_v25  ;;  %vm4178_vm4 = vcmp.eq.s32.totalorder %v4176_v41, 0 }
 0x65b   :  { %v3858_v32 = vsel %vm9801_vm15, %v10391_v53, %v10396_v33  ;;  %vm4181_vm12 = vcmp.eq.s32.totalorder %v4176_v41, 2  ;;  %v4071_v27 = vadd.s32 3, %v4067_v17  ;;  %v9819_v46 = vsel %vm4486_vm8, nan, %v4496_v51 }
 0x65c   :  { %5577 = vcosq.f32 %v3858_v32  ;;  %v4180_v39 = vsel %vm4178_vm4, %v9729_v16, %v4179_v9  ;;  %v4183_v23 = vsel %vm4181_vm12, %v4182_v58, %v9732_v56  ;;  %v3752_v54 = vsub.s32 4, %v10398_v21 }
 0x65d   :  { %5579 = vsinq.f32 %v3858_v32  ;;  %vm4282_vm13 = vcmp.eq.s32.totalorder %v4280_v63, 0  ;;  %vm4285_vm3 = vcmp.eq.s32.totalorder %v4280_v63, 2  ;;  %v3967_v24 = vadd.s32 3, %v3963_v0 }
 0x65e   :  { %vm10399_vm1 = vcmp.lt.s32.totalorder %v10391_v53, 0  ;;  %vm4909_vm0 = vcmp.eq.s32.totalorder %v9765_v11, 2  ;;  %v4808_v37 = vsel %vm4801_vm10, %v4804_v42, %v4807_v62  ;;  %v4284_v1 = vsel %vm4282_vm13, %v5566_v34, %v4283_v60  ;;  %v10412_v62 = vld [vmem:[#allocation32_spill] sm:$0xff] }
 0x65f   :  { %v3857_v12 = vsel %vm10399_vm1, %v3856_v52, %v10395_v3  ;;  %v4287_v8 = vsel %vm4285_vm3, %v4286_v15, %v5568_v18  ;;  %vm4177_vm8 = vcmp.lt.s32.totalorder %v4176_v41, 2  ;;  %vm4906_vm5 = vcmp.eq.s32.totalorder %v9765_v11, 0  ;;  %v10411_v41 = vld [vmem:[#allocation5_spill] sm:$0xff] }
 0x660   :  { %vm4281_vm7 = vcmp.lt.s32.totalorder %v4280_v63, 2  ;;  %v4184_v16 = vsel %vm4177_vm8, %v4180_v39, %v4183_v23  ;;  %v9831_v56 = vand.u32 3, %v4071_v27  ;;  %v10401_v31 = vand.u32 2147483647, %v10400_v30  ;;  %v10413_v23 = vld [vmem:[#allocation17_spill] sm:$0xff] }
 0x661   :  { %vm4905_vm4 = vcmp.lt.s32.totalorder %v9765_v11, 2  ;;  %v3859_v36 = vsel %vm9801_vm15, 0, %v3857_v12  ;;  %vm10405_vm10 = vcmp.lt.s32.totalorder %v10404_v49, 0  ;;  %v3648_v44 = vsub.s32 4, %v10406_v10  ;;  %v5570_v50 = vpop.eup %5569  ;;  %v34_v11 = vld [vmem:[%s9935_s1 + $0x70] sm:$0x3] }
 0x662   :  { %vm9835_vm9 = vcmp.le.f32.partialorder %v10401_v31, 0.7853982  ;;  %v3753_v7 = vsel %vm10405_vm10, %v3752_v54, %v10398_v21  ;;  %vm4902_vm12 = vweird.f32 %v9472_v13  ;;  %v4809_v6 = vsel %vm4798_vm11, nan, %v4808_v37 }
 0x663   :  { %v3650_v2 = vsel %vm9835_vm9, %v10400_v30, %v10407_v48  ;;  %v4288_v40 = vsel %vm4281_vm7, %v4284_v1, %v4287_v8  ;;  %vm4174_vm13 = vweird.f32 %v8948_v14  ;;  %v3968_v5 = vand.u32 3, %v3967_v24  ;;  %v5572_v34 = vpop.eup %5571  ;;  %v10415_v24 = vld [vmem:[#allocation21_spill] sm:$0xff] }
 0x664   :  { %v9854_v55 = vsel %vm4174_vm13, nan, %v4184_v16  ;;  %v3971_v26 = vxor.u32 2147483648, %v9725_v4  ;;  %vm10408_vm15 = vcmp.lt.s32.totalorder %v10400_v30, 0  ;;  %5581 = vcosq.f32 %v3650_v2  ;;  %v5574_v14 = vpop.eup %5573 }
 0x665   :  { %v3649_v22 = vsel %vm10408_vm15, %v3648_v44, %v10406_v10  ;;  %v3974_v51 = vxor.u32 2147483648, %v10409_v61  ;;  %v3863_v9 = vadd.s32 3, %v3859_v36  ;;  %v3755_v18 = vsel %vm9121_vm6, 0, %v3753_v7  ;;  %v5576_v58 = vpop.eup %5575 }
 0x666   :  { %5583 = vsinq.f32 %v3650_v2  ;;  %v9865_v63 = vsel %vm4278_vm14, nan, %v4288_v40  ;;  %vm4074_vm11 = vcmp.eq.s32.totalorder %v9831_v56, 0  ;;  %vm4077_vm3 = vcmp.eq.s32.totalorder %v9831_v56, 2  ;;  %v10419_v2 = vld [vmem:[#allocation7_spill] sm:$0xff] }
 0x667   :  { %v3763_v59 = vxor.u32 2147483648, %v10411_v41  ;;  %v4910_v17 = vxor.u32 2147483648, %v5574_v14  ;;  %vm3970_vm1 = vcmp.eq.s32.totalorder %v3968_v5, 0  ;;  %vm3973_vm8 = vcmp.eq.s32.totalorder %v3968_v5, 2 }
 0x668   :  { %v3651_v35 = vsel %vm9835_vm9, 0, %v3649_v22  ;;  %v4907_v43 = vxor.u32 2147483648, %v5576_v58  ;;  %vm4073_vm6 = vcmp.lt.s32.totalorder %v9831_v56, 2  ;;  %v3972_v25 = vsel %vm3970_vm1, %v10409_v61, %v3971_v26 }
 0x669   :  { %v3759_v42 = vadd.s32 3, %v3755_v18  ;;  %v3544_v3 = vsub.s32 4, %v10412_v62  ;;  %v5578_v52 = vpop.eup %5577  ;;  %v4911_v33 = vsel %vm4909_vm0, %v4910_v17, %v5576_v58  ;;  %v4078_v32 = vxor.u32 2147483648, %v5570_v50 }
 0x66a   :  { %v3975_v60 = vsel %vm3973_vm8, %v3974_v51, %v9725_v4  ;;  %v3864_v15 = vand.u32 3, %v3863_v9  ;;  %v5580_v28 = vpop.eup %5579  ;;  %v4908_v0 = vsel %vm4906_vm5, %v5574_v14, %v4907_v43  ;;  %v4075_v27 = vxor.u32 2147483648, %v5572_v34 }
 0x66b   :  { %v3655_v39 = vadd.s32 3, %v3651_v35  ;;  %vm10414_vm14 = vcmp.lt.s32.totalorder %v10413_v23, 0  ;;  %v4912_v54 = vsel %vm4905_vm4, %v4908_v0, %v4911_v33  ;;  %vm4070_vm7 = vweird.f32 %v8877_v20 }
 0x66c   :  { %v3545_v21 = vsel %vm10414_vm14, %v3544_v3, %v10412_v62  ;;  %vm3969_vm0 = vcmp.lt.s32.totalorder %v3968_v5, 2  ;;  %v3766_v12 = vxor.u32 2147483648, %v10415_v24  ;;  %v4913_v1 = vsel %vm4902_vm12, nan, %v4912_v54  ;;  %v10420_v5 = vld [vmem:[#allocation31_spill] sm:$0xff] }
 0x66d   :  { %v3547_v37 = vsel %vm9013_vm2, 0, %v3545_v21  ;;  %vm3966_vm5 = vweird.f32 %v10389_v47  ;;  %v3867_v8 = vxor.u32 2147483648, %v5580_v28  ;;  %v3870_v16 = vxor.u32 2147483648, %v5578_v52  ;;  %v26_v47 = vld [vmem:[%s9935_s1 + $0xa8] sm:$0x3] }
 0x66e   :  { %v3760_v31 = vand.u32 3, %v3759_v42  ;;  %vm10417_vm9 = vcmask 1041408   ;;  %v3976_v57 = vsel %vm3969_vm0, %v3972_v25, %v3975_v60  ;;  %vm3862_vm4 = vweird.f32 %v10391_v53 }
 0x66f   :  { %5211 = vmatprep.subr.msk.mxu0 %vm10417_vm9, %v4913_v1  ;;  %vm3865_vm10 = vcmp.lt.s32.totalorder %v3864_v15, 2  ;;  %v3551_v36 = vadd.s32 3, %v3547_v37  ;;  %vm10418_vm2 = vmmov %vm10417_vm9  ;;  %v4076_v13 = vsel %vm4074_vm11, %v5570_v50, %v4075_v27  ;;  %v4079_v7 = vsel %vm4077_vm3, %v4078_v32, %v5572_v34 }
 0x670   :  { %5212 = vmatpush1.msk.msra.mxu0 %vm10418_vm2, %v4809_v6  ;;  %vm3866_vm12 = vcmp.eq.s32.totalorder %v3864_v15, 0  ;;  %v3656_v10 = vand.u32 3, %v3655_v39  ;;  %v5633_v44 = vmov 5   ;;  %vm3869_vm13 = vcmp.eq.s32.totalorder %v3864_v15, 2 }
 0x671   :  { %5416 = vset.pattern.permute.xlu0 %v5633_v44  ;;  %4948 = vmatprep.subr.mxu0 %v9774_v45  ;;  %v3552_v48 = vand.u32 3, %v3551_v36  ;;  %v3555_v40 = vxor.u32 2147483648, %v10419_v2  ;;  %v3558_v26 = vxor.u32 2147483648, %v10420_v5  ;;  %v3868_v6 = vsel %vm3866_vm12, %v5578_v52, %v3867_v8  ;;  %v5582_v22 = vpop.eup %5581 }
 0x672   :  { %4916 = vperm.xlu0 %5416, %v34_v11   ;;  %4949 = vmatpush1.msra.mxu0 %v9737_v29  ;;  %v3871_v50 = vsel %vm3869_vm13, %v3870_v16, %v5580_v28  ;;  %vm3762_vm15 = vcmp.eq.s32.totalorder %v3760_v31, 0  ;;  %vm3765_vm11 = vcmp.eq.s32.totalorder %v3760_v31, 2  ;;  %v4080_v34 = vsel %vm4073_vm6, %v4076_v13, %v4079_v7 }
 0x673   :  { %4950 = vmatprep.subr.mxu0 %v9819_v46  ;;  %vm3761_vm3 = vcmp.lt.s32.totalorder %v3760_v31, 2  ;;  %v3764_v45 = vsel %vm3762_vm15, %v10415_v24, %v3763_v59  ;;  %v3767_v61 = vsel %vm3765_vm11, %v3766_v12, %v10411_v41  ;;  %v5584_v51 = vpop.eup %5583  ;;  %vm3661_vm1 = vcmp.eq.s32.totalorder %v3656_v10, 2 }
 0x674   :  { %4951 = vmatpush1.msra.mxu0 %v9778_v38  ;;  %v3662_v29 = vxor.u32 2147483648, %v5582_v22  ;;  %vm3554_vm8 = vcmp.eq.s32.totalorder %v3552_v48, 0  ;;  %vm3557_vm14 = vcmp.eq.s32.totalorder %v3552_v48, 2  ;;  %v3872_v9 = vsel %vm3865_vm10, %v3868_v6, %v3871_v50 }
 0x675   :  { %4952 = vmatprep.subr.mxu0 %v9865_v63  ;;  %v3659_v46 = vxor.u32 2147483648, %v5584_v51  ;;  %v3556_v56 = vsel %vm3554_vm8, %v10420_v5, %v3555_v40  ;;  %v3559_v19 = vsel %vm3557_vm14, %v3558_v26, %v10419_v2  ;;  %v4081_v18 = vsel %vm4070_vm7, nan, %v4080_v34 }
 0x676   :  { %4953 = vmatpush1.msra.mxu0 %v9854_v55  ;;  %v3768_v38 = vsel %vm3761_vm3, %v3764_v45, %v3767_v61  ;;  %vm3658_vm6 = vcmp.eq.s32.totalorder %v3656_v10, 0  ;;  %v3663_v14 = vsel %vm3661_vm1, %v3662_v29, %v5584_v51  ;;  %v3977_v63 = vsel %vm3966_vm5, nan, %v3976_v57 }
 0x677   :  { %4954 = vmatprep.subr.mxu0 %v4081_v18  ;;  %vm3657_vm0 = vcmp.lt.s32.totalorder %v3656_v10, 2  ;;  %v3660_v41 = vsel %vm3658_vm6, %v5582_v22, %v3659_v46  ;;  %vm3553_vm9 = vcmp.lt.s32.totalorder %v3552_v48, 2  ;;  %v3873_v59 = vsel %vm3862_vm4, nan, %v3872_v9 }
 0x678   :  { %4955 = vmatpush1.msra.mxu0 %v3977_v63  ;;  %vm3758_vm10 = vweird.f32 %v10404_v49  ;;  %v3664_v55 = vsel %vm3657_vm0, %v3660_v41, %v3663_v14  ;;  %v3560_v20 = vsel %vm3553_vm9, %v3556_v56, %v3559_v19  ;;  %vm3654_vm7 = vweird.f32 %v10400_v30 }
 0x679   :  { %4956 = vmatprep.subr.mxu0 %v3873_v59  ;;  %v3769_v58 = vsel %vm3758_vm10, nan, %v3768_v38  ;;  %v3665_v17 = vsel %vm3654_vm7, nan, %v3664_v55  ;;  %vm3550_vm2 = vweird.f32 %v10413_v23  ;;  %vm10421_vm5 = vcmask 408576  }
 0x67a   :  { %4957 = vmatpush1.msra.mxu0 %v3769_v58  ;;  %v3561_v35 = vsel %vm3550_vm2, nan, %v3560_v20 }
 0x67b   :  { %4958 = vmatprep.subr.mxu0 %v3665_v17 }
 0x67c   :  { %4959 = vmatpush1.msra.mxu0 %v3561_v35 }
 0x67d   :  { %5213 = vmatmul.mubr.msk.f32.vlgmr.msra.gmra.mxu0 %vm10421_vm5, %v26_v47 }
 0x6ed   :  { %v4917_v49 = vpop.permute.xlu0 %4916 }
 0x73d   :  { %v4994_v53 = vpop.f32.mrf.mxu0 }
 0x73e   :  { %v4995_v25 = vadd.f32 %v4994_v53, %v4917_v49 }
 0x73f   :  { %v4996_v43 = vpop.f32.mrf.mxu0 }
 0x740   :  { %v4997_v30 = vadd.f32 %v4996_v43, %v4917_v49 }
 0x742   :  { %v5001_v42 = vcombine.low %v4995_v25, %v4997_v30 }
 0x744   :  { %5214 = vst.sshfl [vmem:[#allocation2] sm:$0x33 pattern:$0x76325410] %v5001_v42 }
 0x745   :  { %5610 = shalt.err (!%p5607_p4)
}
 0x746   :  { %5020 = dma.vmem_to_hbm [thread:$0]  %s5018_s27, 64, %s9936_s2, [#allocation3]  }
 0x747   :  { %5619 = dma.done.wait [#allocation3], 64  }
 0x748   :  { %5620 = vsyncadd [#allocation3], 4294967232 }
 0x749   :  { %5024 = vsyncpa [#allocation3], 1 }

</bundles_post_ra>
